<compile_context>
chip_gen: v6e
topology: v6e:2x2x1
jax: 0.10.0
libtpu: 0.0.40
codegen_flags: <defaults>
</compile_context>

<pallas_src>
import functools

import numpy as np
import jax
import jax.numpy as jnp
from jax.experimental import pallas as pl
from jax.experimental.pallas import tpu as pltpu


# ----------------------------------------------------------------------------
# chip-aware budgets
# ----------------------------------------------------------------------------
try:
    _VMEM_CAP = int(pltpu.get_tpu_info().vmem_capacity_bytes)
except Exception:  # pragma: no cover - conservative fallback (v7x-sized)
    _VMEM_CAP = 64 * 1024 * 1024
_VMEM_LIMIT = min(_VMEM_CAP * 3 // 4, 96 * 1024 * 1024)
_ROW_CAP = 512 if _VMEM_CAP >= (100 << 20) else 256   # v5e/v6e: bigger tiles


def _round_up(x, m):
    return (x + m - 1) // m * m


def _pick_tile(m, cap=_ROW_CAP):
    """Row-tile size (multiple of 16) and padded row count.

    Single grid step whenever everything fits in one tile: on single-TC chips
    splitting is pure per-step overhead and shrinks matmul M; on v7x a split
    only happens once there are > cap rows (so each core still gets big M).
    """
    mp = _round_up(max(m, 1), 16)
    tm = min(cap, mp)
    return tm, _round_up(mp, tm)


def _const_spec(shape):
    """BlockSpec for a grid-invariant input: single-buffered (no pipelining)."""
    return pl.BlockSpec(shape, lambda i: (0,) * len(shape),
                        pipeline_mode=pl.Buffered(1))


# ----------------------------------------------------------------------------
# In-kernel Fourier-feature matmul: per-harmonic accumulating dots.
# ----------------------------------------------------------------------------
def _fourier_matmul(x, w_ref, gridsize):
    """sum_g [cos(g*x) | sin(g*x)] @ w_g   (f32 accumulation on the MXU).

    x     : (M, P_pad) f32
    w_ref : (2*G*P_pad, OUT_pad) bf16 ref, rows packed as G blocks of [cos|sin]
    Higher harmonics come from a VPU angle-addition recurrence (only one
    cos/sin EUP pass); each harmonic's (M, 2*P_pad) bf16 slab feeds its own
    accumulating dot so the full 2*G feature slab is never materialized.
    """
    p_pad = x.shape[-1]
    c1 = jnp.cos(x)                                   # EUP, once
    s1 = jnp.sin(x)                                   # EUP, once

    def slab(c, s):                                   # lane-aligned (mult of 128)
        return jnp.concatenate(
            [c.astype(jnp.bfloat16), s.astype(jnp.bfloat16)], axis=-1)

    acc = jnp.dot(slab(c1, s1), w_ref[pl.ds(0, 2 * p_pad), :],
                  preferred_element_type=jnp.float32)
    c, s = c1, s1
    for g in range(1, gridsize):
        c, s = c * c1 - s * s1, s * c1 + c * s1       # VPU only
        acc = acc + jnp.dot(
            slab(c, s), w_ref[pl.ds(2 * g * p_pad, 2 * p_pad), :],
            preferred_element_type=jnp.float32)
    return acc


# ----------------------------------------------------------------------------
# Pallas kernels
# ----------------------------------------------------------------------------
def _stft_kan_kernel(xw_ref, win_ref, w_ref, b_ref, o_ref, *, gridsize,
                     apply_window):
    # xw_ref : (tm, P_pad) f32   unfolded windows (zero padded to lane multiple)
    # win_ref: (1, P_pad)  f32   window function tiled per window
    # w_ref  : (2*G*P_pad, OUT_pad) bf16
    # b_ref  : (1, OUT_pad) f32
    # o_ref  : (tm, OUT_pad) f32
    xw = xw_ref[...]
    if apply_window:
        xw = xw * win_ref[...]
    o_ref[...] = _fourier_matmul(xw, w_ref, gridsize) + b_ref[...]


def _edge_conv_kernel(e_ref, win1_ref, w1_ref, b1_ref, w2_ref, b2_ref, o_ref,
                      *, k, g1, g2, apply_win1):
    # Fused DynamicEdgeConv MLP (two STFT-KAN layers) + max over k neighbors.
    # The k neighbors are batched into the matmul M dimension (M = k*tm) so
    # every weight matrix is pushed through the MXU exactly once per tile.
    # e_ref  : (k, tm, P1_pad) f32  per-neighbor edge features [x_i, x_j - x_i]
    # w1_ref : (2*g1*P1_pad, P2_pad) bf16  layer-1 weights @ (layer-2 unfold*win)
    # b1_ref : (1, P2_pad) f32
    # w2_ref : (2*g2*P2_pad, OUT_pad) bf16
    # b2_ref : (1, OUT_pad) f32
    # o_ref  : (tm, OUT_pad) f32
    e = e_ref[...]
    tm = e.shape[1]
    x = e.reshape(k * tm, e.shape[2])                  # collapse leading dims
    if apply_win1:                                     # skipped for boxcar
        x = x * win1_ref[...]
    h1 = _fourier_matmul(x, w1_ref, g1) + b1_ref[...]  # (k*tm, P2_pad)
    # h1 is already layer-2's unfolded+windowed input (fold done in weights)
    h2 = _fourier_matmul(h1, w2_ref, g2) + b2_ref[...] # (k*tm, OUT_pad)
    best = h2[0:tm]
    for j in range(1, k):                              # max over neighbor groups
        best = jnp.maximum(best, h2[j * tm:(j + 1) * tm])
    o_ref[...] = best


# ----------------------------------------------------------------------------
# Parameter construction
# ----------------------------------------------------------------------------
def _make_window(window_type, m):
    n = np.arange(m, dtype=np.float64)
    if window_type == "boxcar":
        w = np.ones(m)
    elif window_type == "hann":
        w = 0.5 - 0.5 * np.cos(2.0 * np.pi * n / m)
    elif window_type == "blackman":
        w = (0.42 - 0.5 * np.cos(2.0 * np.pi * n / m)
             + 0.08 * np.cos(4.0 * np.pi * n / m))
    elif window_type == "bartlett":
        w = 1.0 - np.abs(2.0 * n / m - 1.0)
    else:
        raise ValueError(window_type)
    return w.astype(np.float32)


def init_stft_kan(key, in_dim, out_dim, gridsize, window_size, stride,
                  smooth_initialization, window_type):
    nw = (in_dim - window_size) // stride + 1
    p = nw * window_size
    p_pad = _round_up(p, 128)
    out_pad = _round_up(out_dim, 128)
    if smooth_initialization:
        norm = (np.arange(gridsize) + 1.0) ** 2
    else:
        norm = np.full((gridsize,), np.sqrt(gridsize))
    denom = jnp.asarray(np.sqrt(window_size) * norm, jnp.float32)      # (G,)
    coeffs = jax.random.normal(
        key, (2, out_dim, nw, window_size, gridsize), jnp.float32) / denom
    # -> (2, G, nw*window_size, out_dim); window-major along the unfolded axis
    cw = jnp.transpose(coeffs, (0, 4, 2, 3, 1)).reshape(2, gridsize, p, out_dim)
    # NOTE: correctness relies on these padded rows/cols being exactly zero
    # (padded lanes of xw produce cos(0)=1 features).
    cw = jnp.pad(cw, ((0, 0), (0, 0), (0, p_pad - p), (0, out_pad - out_dim)))
    # pack as (G, [cos, sin], P_pad, OUT_pad) -> (2*G*P_pad, OUT_pad)
    w_f32 = jnp.transpose(cw, (1, 0, 2, 3)).reshape(2 * gridsize * p_pad, out_pad)
    bias = jnp.zeros((1, out_pad), jnp.float32)
    win_np = np.tile(_make_window(window_type, window_size), nw)       # (P,)
    window_tiled = jnp.asarray(
        np.pad(win_np, (0, p_pad - p)), jnp.float32).reshape(1, p_pad)
    gather_idx = (np.arange(nw)[:, None] * stride
                  + np.arange(window_size)[None, :]).reshape(-1)
    return dict(w=w_f32.astype(jnp.bfloat16), w_f32=w_f32, bias=bias,
                window_tiled=window_tiled, win_np=win_np,
                gather_idx=gather_idx, p=p, p_pad=p_pad,
                out_dim=out_dim, out_pad=out_pad, gridsize=gridsize,
                in_dim=in_dim, is_boxcar=(window_type == "boxcar"))


def make_fused_conv(p1, p2):
    """Fold layer-2's unfold + window (a linear map U) into layer-1's packed
    weights so the DynamicEdgeConv MLP + max aggregation runs as one kernel."""
    u = np.zeros((p1["out_pad"], p2["p_pad"]), np.float32)
    u[p2["gather_idx"], np.arange(p2["p"])] = p2["win_np"]
    u = jnp.asarray(u)
    w1 = p1["w_f32"] @ u                              # (2*G1*P1_pad, P2_pad)
    b1 = p1["bias"] @ u                               # (1, P2_pad)
    return dict(g1=p1["gridsize"], g2=p2["gridsize"],
                gidx1=p1["gather_idx"], p1_pad=p1["p_pad"],
                win1=p1["window_tiled"], win1_is_boxcar=p1["is_boxcar"],
                w1=w1.astype(jnp.bfloat16), b1=b1,
                w2=p2["w"], b2=p2["bias"],
                out_dim=p2["out_dim"], out_pad=p2["out_pad"])


# ----------------------------------------------------------------------------
# Layer wrappers (pallas_call plumbing)
# ----------------------------------------------------------------------------
def stft_kan_apply(x, p):
    """One STFT-KAN layer.  x: (M, in_dim) f32 -> (M, out_dim) f32."""
    m = x.shape[0]
    # TODO(synk): for large N, move the unfold into the kernel as strided
    # slices of the raw (tm, in_dim) block to avoid the ~window/stride HBM blowup.
    xw = x[:, p["gather_idx"]]                        # unfold (indexing glue)
    if p["p_pad"] != p["p"]:
        xw = jnp.pad(xw, ((0, 0), (0, p["p_pad"] - p["p"])))
    tm, mp = _pick_tile(m)
    if mp != m:
        xw = jnp.pad(xw, ((0, mp - m), (0, 0)))
    out = pl.pallas_call(
        functools.partial(_stft_kan_kernel, gridsize=p["gridsize"],
                          apply_window=not p["is_boxcar"]),
        out_shape=jax.ShapeDtypeStruct((mp, p["out_pad"]), jnp.float32),
        grid=(mp // tm,),
        in_specs=[
            pl.BlockSpec((tm, p["p_pad"]), lambda i: (i, 0)),
            _const_spec((1, p["p_pad"])),
            _const_spec(p["w"].shape),
            _const_spec((1, p["out_pad"])),
        ],
        out_specs=pl.BlockSpec((tm, p["out_pad"]), lambda i: (i, 0)),
        compiler_params=pltpu.CompilerParams(
            dimension_semantics=("parallel",),
            vmem_limit_bytes=_VMEM_LIMIT),
    )(xw, p["window_tiled"], p["w"], p["bias"])
    return out[:m, :p["out_dim"]]


def knn_idx(pos, batch, k):
    # TODO(synk): top-k neighbor selection (sort) has no clean Pallas TPU
    # equivalent at this size; pairwise distances + top_k stay in plain JAX.
    d2 = jnp.sum((pos[:, None, :] - pos[None, :, :]) ** 2, axis=-1)
    same = batch[:, None] == batch[None, :]
    d2 = jnp.where(same, d2, jnp.inf)
    _, idx = jax.lax.top_k(-d2, k)      # includes self, as torch_cluster.knn(x, x)
    return idx


def dynamic_edge_conv(pos, batch, k, fp):
    n, d = pos.shape
    idx = knn_idx(pos, batch, k)                      # (n, k)
    x_i = jnp.broadcast_to(pos[:, None, :], (n, k, d))
    x_j = pos[idx]                                    # (n, k, d)
    e = jnp.concatenate([x_i, x_j - x_i], axis=-1)    # (n, k, 2d)
    e = e[..., fp["gidx1"]]                           # layer-1 unfold (identity here)
    p1, p1p = e.shape[-1], fp["p1_pad"]
    if p1p != p1:
        e = jnp.pad(e, ((0, 0), (0, 0), (0, p1p - p1)))
    e = jnp.transpose(e, (1, 0, 2))                   # (k, n, P1_pad)
    tm, np_ = _pick_tile(n)
    if np_ != n:
        e = jnp.pad(e, ((0, 0), (0, np_ - n), (0, 0)))
    out = pl.pallas_call(
        functools.partial(_edge_conv_kernel, k=k, g1=fp["g1"], g2=fp["g2"],
                          apply_win1=not fp["win1_is_boxcar"]),
        out_shape=jax.ShapeDtypeStruct((np_, fp["out_pad"]), jnp.float32),
        grid=(np_ // tm,),
        in_specs=[
            pl.BlockSpec((k, tm, p1p), lambda i: (0, i, 0)),
            _const_spec((1, p1p)),
            _const_spec(fp["w1"].shape),
            _const_spec(fp["b1"].shape),
            _const_spec(fp["w2"].shape),
            _const_spec(fp["b2"].shape),
        ],
        out_specs=pl.BlockSpec((tm, fp["out_pad"]), lambda i: (i, 0)),
        compiler_params=pltpu.CompilerParams(
            dimension_semantics=("parallel",),
            vmem_limit_bytes=_VMEM_LIMIT),
    )(e, fp["win1"], fp["w1"], fp["b1"], fp["w2"], fp["b2"])
    return out[:n, :fp["out_dim"]]


def forward(pos, batch, params, num_graphs, k):
    x1 = dynamic_edge_conv(pos, batch, k, params["conv_fused"])   # (N, 128)
    x = stft_kan_apply(x1, params["linear1"])                     # (N, emb)
    gmax = jax.ops.segment_max(x, batch, num_segments=num_graphs)
    gsum = jax.ops.segment_sum(x, batch, num_segments=num_graphs)
    cnt = jax.ops.segment_sum(jnp.ones((x.shape[0], 1), x.dtype), batch,
                              num_segments=num_graphs)
    xcat = jnp.concatenate([gmax, gsum / cnt], axis=1)            # (B, 2*emb)
    # linear2 has only num_graphs rows; kept as a Pallas call for uniformity —
    # it is weight-DMA bound either way.
    return stft_kan_apply(xcat, params["linear2"])                # (B, out)


# ----------------------------------------------------------------------------
# Main
# ----------------------------------------------------------------------------
if __name__ == "__main__":
    key = jax.random.PRNGKey(0)
    k_pts, k1, k2, k3, k4 = jax.random.split(key, 5)

    K = 4                      # args.k
    EMB = 128                  # args.emb_dims (>= 99 so linear2's 197-window fits)
    OUT_CH = 7
    points_per_graph = 16
    num_graphs = 2
    N = points_per_graph * num_graphs

    pos = jax.random.normal(k_pts, (N, 3), jnp.float32)
    batch = jnp.repeat(jnp.arange(num_graphs, dtype=jnp.int32), points_per_graph)

    conv1 = init_stft_kan(k1, 6, 64, gridsize=3, window_size=2, stride=2,
                          smooth_initialization=True, window_type="boxcar")
    conv2 = init_stft_kan(k2, 64, 128, gridsize=1, window_size=28, stride=5,
                          smooth_initialization=False, window_type="blackman")
    params = {
        "conv_fused": make_fused_conv(conv1, conv2),
        "linear1": init_stft_kan(k3, 128, EMB, gridsize=7, window_size=52,
                                 stride=20, smooth_initialization=True,
                                 window_type="bartlett"),
        "linear2": init_stft_kan(k4, 2 * EMB, OUT_CH, gridsize=6,
                                 window_size=197, stride=10,
                                 smooth_initialization=False,
                                 window_type="hann"),
    }

    out = forward(pos, batch, params, num_graphs=num_graphs, k=K)
    out = jax.block_until_ready(out)
    assert out.shape == (num_graphs, OUT_CH)
    assert bool(jnp.all(jnp.isfinite(out)))
    print("KERNEL_OK")
</pallas_src>

<mosaic_0001>
module attributes {stable_mosaic.version = 11 : i64} {
  func.func @_edge_conv_kernel(%arg0: i32, %arg1: memref<4x32x128xf32, #tpu.memory_space<vmem>>, %arg2: memref<1x128xf32, #tpu.memory_space<vmem>>, %arg3: memref<768x256xbf16, #tpu.memory_space<vmem>>, %arg4: memref<1x256xf32, #tpu.memory_space<vmem>>, %arg5: memref<512x128xbf16, #tpu.memory_space<vmem>>, %arg6: memref<1x128xf32, #tpu.memory_space<vmem>>, %arg7: memref<32x128xf32, #tpu.memory_space<vmem>>) attributes {dimension_semantics = [#tpu.dimension_semantics<parallel>], iteration_bounds = array<i64: 1>, scalar_prefetch = 0 : i64, scratch_operands = 0 : i64, tpu.core_type = #tpu.core_type<tc>, window_params = [{transform_indices = @transform_0, window_bounds = array<i64: 4, 32, 128>}, {pipeline_mode = #tpu.pipeline_mode<synchronous>, transform_indices = @transform_1, window_bounds = array<i64: 1, 128>}, {pipeline_mode = #tpu.pipeline_mode<synchronous>, transform_indices = @transform_2, window_bounds = array<i64: 768, 256>}, {pipeline_mode = #tpu.pipeline_mode<synchronous>, transform_indices = @transform_3, window_bounds = array<i64: 1, 256>}, {pipeline_mode = #tpu.pipeline_mode<synchronous>, transform_indices = @transform_4, window_bounds = array<i64: 512, 128>}, {pipeline_mode = #tpu.pipeline_mode<synchronous>, transform_indices = @transform_5, window_bounds = array<i64: 1, 128>}, {transform_indices = @transform_6, window_bounds = array<i64: 32, 128>}]} {
    %c0 = arith.constant 0 : index
    %c0_0 = arith.constant 0 : index
    %c0_1 = arith.constant 0 : index
    %0 = vector.load %arg1[%c0, %c0_0, %c0_1] : memref<4x32x128xf32, #tpu.memory_space<vmem>>, vector<4x32x128xf32>
    %1 = vector.shape_cast %0 : vector<4x32x128xf32> to vector<128x128xf32>
    %2 = math.cos %1 : vector<128x128xf32>
    %3 = math.sin %1 : vector<128x128xf32>
    %4 = arith.truncf %2 : vector<128x128xf32> to vector<128x128xbf16>
    %5 = arith.truncf %3 : vector<128x128xf32> to vector<128x128xbf16>
    %6 = tpu.concatenate %4, %5 in 1 : vector<128x128xbf16>, vector<128x128xbf16> -> vector<128x256xbf16>
    %c0_2 = arith.constant 0 : index
    %c0_3 = arith.constant 0 : index
    %7 = vector.load %arg3[%c0_2, %c0_3] : memref<768x256xbf16, #tpu.memory_space<vmem>>, vector<256x256xbf16>
    %cst = arith.constant dense<0.000000e+00> : vector<128x256xf32>
    %8 = tpu.matmul %6, %7, %cst {dimension_numbers = #tpu.dot_dimension_numbers<[1], [0], [0], [1], [0, 0, 1, 1], [], []>} : vector<128x256xbf16>, vector<256x256xbf16>, vector<128x256xf32> -> vector<128x256xf32>
    %9 = arith.mulf %2, %2 : vector<128x128xf32>
    %10 = arith.mulf %3, %3 : vector<128x128xf32>
    %11 = arith.subf %9, %10 : vector<128x128xf32>
    %12 = arith.mulf %3, %2 : vector<128x128xf32>
    %13 = arith.mulf %2, %3 : vector<128x128xf32>
    %14 = arith.addf %12, %13 : vector<128x128xf32>
    %15 = arith.truncf %11 : vector<128x128xf32> to vector<128x128xbf16>
    %16 = arith.truncf %14 : vector<128x128xf32> to vector<128x128xbf16>
    %17 = tpu.concatenate %15, %16 in 1 : vector<128x128xbf16>, vector<128x128xbf16> -> vector<128x256xbf16>
    %c256 = arith.constant 256 : index
    %c0_4 = arith.constant 0 : index
    %18 = vector.load %arg3[%c256, %c0_4] : memref<768x256xbf16, #tpu.memory_space<vmem>>, vector<256x256xbf16>
    %cst_5 = arith.constant dense<0.000000e+00> : vector<128x256xf32>
    %19 = tpu.matmul %17, %18, %cst_5 {dimension_numbers = #tpu.dot_dimension_numbers<[1], [0], [0], [1], [0, 0, 1, 1], [], []>} : vector<128x256xbf16>, vector<256x256xbf16>, vector<128x256xf32> -> vector<128x256xf32>
    %20 = arith.addf %8, %19 : vector<128x256xf32>
    %21 = arith.mulf %11, %2 : vector<128x128xf32>
    %22 = arith.mulf %14, %3 : vector<128x128xf32>
    %23 = arith.subf %21, %22 : vector<128x128xf32>
    %24 = arith.mulf %14, %2 : vector<128x128xf32>
    %25 = arith.mulf %11, %3 : vector<128x128xf32>
    %26 = arith.addf %24, %25 : vector<128x128xf32>
    %27 = arith.truncf %23 : vector<128x128xf32> to vector<128x128xbf16>
    %28 = arith.truncf %26 : vector<128x128xf32> to vector<128x128xbf16>
    %29 = tpu.concatenate %27, %28 in 1 : vector<128x128xbf16>, vector<128x128xbf16> -> vector<128x256xbf16>
    %c512 = arith.constant 512 : index
    %c0_6 = arith.constant 0 : index
    %30 = vector.load %arg3[%c512, %c0_6] : memref<768x256xbf16, #tpu.memory_space<vmem>>, vector<256x256xbf16>
    %cst_7 = arith.constant dense<0.000000e+00> : vector<128x256xf32>
    %31 = tpu.matmul %29, %30, %cst_7 {dimension_numbers = #tpu.dot_dimension_numbers<[1], [0], [0], [1], [0, 0, 1, 1], [], []>} : vector<128x256xbf16>, vector<256x256xbf16>, vector<128x256xf32> -> vector<128x256xf32>
    %32 = arith.addf %20, %31 : vector<128x256xf32>
    %c0_8 = arith.constant 0 : index
    %c0_9 = arith.constant 0 : index
    %33 = vector.load %arg4[%c0_8, %c0_9] : memref<1x256xf32, #tpu.memory_space<vmem>>, vector<1x256xf32>
    %34 = vector.broadcast %33 : vector<1x256xf32> to vector<128x256xf32>
    %35 = arith.addf %32, %34 : vector<128x256xf32>
    %36 = math.cos %35 : vector<128x256xf32>
    %37 = math.sin %35 : vector<128x256xf32>
    %38 = arith.truncf %36 : vector<128x256xf32> to vector<128x256xbf16>
    %39 = arith.truncf %37 : vector<128x256xf32> to vector<128x256xbf16>
    %40 = tpu.concatenate %38, %39 in 1 : vector<128x256xbf16>, vector<128x256xbf16> -> vector<128x512xbf16>
    %c0_10 = arith.constant 0 : index
    %c0_11 = arith.constant 0 : index
    %41 = vector.load %arg5[%c0_10, %c0_11] : memref<512x128xbf16, #tpu.memory_space<vmem>>, vector<512x128xbf16>
    %cst_12 = arith.constant dense<0.000000e+00> : vector<128x128xf32>
    %42 = tpu.matmul %40, %41, %cst_12 {dimension_numbers = #tpu.dot_dimension_numbers<[1], [0], [0], [1], [0, 0, 1, 1], [], []>} : vector<128x512xbf16>, vector<512x128xbf16>, vector<128x128xf32> -> vector<128x128xf32>
    %c0_13 = arith.constant 0 : index
    %c0_14 = arith.constant 0 : index
    %43 = vector.load %arg6[%c0_13, %c0_14] : memref<1x128xf32, #tpu.memory_space<vmem>>, vector<1x128xf32>
    %44 = vector.broadcast %43 : vector<1x128xf32> to vector<128x128xf32>
    %45 = arith.addf %42, %44 : vector<128x128xf32>
    %46 = vector.extract_strided_slice %45 {offsets = [0, 0], sizes = [32, 128], strides = [1, 1]} : vector<128x128xf32> to vector<32x128xf32>
    %47 = vector.extract_strided_slice %45 {offsets = [32, 0], sizes = [32, 128], strides = [1, 1]} : vector<128x128xf32> to vector<32x128xf32>
    %48 = arith.maximumf %46, %47 : vector<32x128xf32>
    %49 = vector.extract_strided_slice %45 {offsets = [64, 0], sizes = [32, 128], strides = [1, 1]} : vector<128x128xf32> to vector<32x128xf32>
    %50 = arith.maximumf %48, %49 : vector<32x128xf32>
    %51 = vector.extract_strided_slice %45 {offsets = [96, 0], sizes = [32, 128], strides = [1, 1]} : vector<128x128xf32> to vector<32x128xf32>
    %52 = arith.maximumf %50, %51 : vector<32x128xf32>
    %c0_15 = arith.constant 0 : index
    %c0_16 = arith.constant 0 : index
    %53 = vector.load %arg7[%c0_15, %c0_16] : memref<32x128xf32, #tpu.memory_space<vmem>>, vector<32x128xf32>
    tpu.vector_store %arg7[%c0_15, %c0_16], %52 {strides = array<i32>} : memref<32x128xf32, #tpu.memory_space<vmem>>, vector<32x128xf32>,
    return
  }
  func.func @transform_0(%arg0: i32) -> (i32, i32, i32) {
    %c0_i32 = arith.constant 0 : i32
    %c0_i32_0 = arith.constant 0 : i32
    %c0_i32_1 = arith.constant 0 : i32
    return %c0_i32, %arg0, %c0_i32_0 : i32, i32, i32
  }
  func.func @transform_1(%arg0: i32) -> (i32, i32) {
    %c0_i32 = arith.constant 0 : i32
    %c0_i32_0 = arith.constant 0 : i32
    %c0_i32_1 = arith.constant 0 : i32
    return %c0_i32, %c0_i32_0 : i32, i32
  }
  func.func @transform_2(%arg0: i32) -> (i32, i32) {
    %c0_i32 = arith.constant 0 : i32
    %c0_i32_0 = arith.constant 0 : i32
    %c0_i32_1 = arith.constant 0 : i32
    return %c0_i32, %c0_i32_0 : i32, i32
  }
  func.func @transform_3(%arg0: i32) -> (i32, i32) {
    %c0_i32 = arith.constant 0 : i32
    %c0_i32_0 = arith.constant 0 : i32
    %c0_i32_1 = arith.constant 0 : i32
    return %c0_i32, %c0_i32_0 : i32, i32
  }
  func.func @transform_4(%arg0: i32) -> (i32, i32) {
    %c0_i32 = arith.constant 0 : i32
    %c0_i32_0 = arith.constant 0 : i32
    %c0_i32_1 = arith.constant 0 : i32
    return %c0_i32, %c0_i32_0 : i32, i32
  }
  func.func @transform_5(%arg0: i32) -> (i32, i32) {
    %c0_i32 = arith.constant 0 : i32
    %c0_i32_0 = arith.constant 0 : i32
    %c0_i32_1 = arith.constant 0 : i32
    return %c0_i32, %c0_i32_0 : i32, i32
  }
  func.func @transform_6(%arg0: i32) -> (i32, i32) {
    %c0_i32 = arith.constant 0 : i32
    %c0_i32_0 = arith.constant 0 : i32
    return %arg0, %c0_i32 : i32, i32
  }
}

</mosaic_0001>

<bundles_post_ra>
// kernel: tpu_custom_call.1
= control target key start
LH: loop header
LB: loop body
LE: loop exit
PB: predicated region body
PF: predicated region fallthrough
CT: control target
= control target key end

     0   :  { %11 = vsyncpa [#allocation3], 0  ;;  %s18988_s0 = inlined_call_operand.hbm [shape: f32[4,32,128], index: 0, kind: input, shape index: {}]   ;;  %s18989_s1 = inlined_call_operand.vmem [shape: f32[1,128], index: 1, kind: input, shape index: {}]   ;;  %s18990_s2 = inlined_call_operand.hbm [shape: bf16[768,256], index: 2, kind: input, shape index: {}]   ;;  %s18991_s3 = inlined_call_operand.vmem [shape: f32[1,256], index: 3, kind: input, shape index: {}]   ;;  %s18992_s4 = inlined_call_operand.hbm [shape: bf16[512,128], index: 4, kind: input, shape index: {}]   ;;  %s18993_s5 = inlined_call_operand.vmem [shape: f32[1,128], index: 5, kind: input, shape index: {}]   ;;  %s18994_s6 = inlined_call_operand.hbm [shape: f32[32,128], index: 6, kind: output, shape index: {}]  }
   0x1   :  { %12 = vsyncpa [#allocation6], 0 }
   0x2   :  { %13 = vsyncpa [#allocation4], 0  ;;  %s13092_s21 = smov [#allocation5]   ;;  %s13093_s22 = smov [#allocation2]  }
   0x3   :  { %s33_s1 = sshll.u32 %s13092_s21, 4  ;;  %s19_s23 = sshll.u32 %s13093_s22, 4  ;;  %s34_s1 = int_to_ptr.vmem [resolvable:$true] %s33_s1  ;;  %s20_s23 = int_to_ptr.vmem [resolvable:$true] %s19_s23 }
   0x4   :  { %s13014_s24 = scalar_lea.vmem %s34_s1, 12288  ;;  %p13019_p1 = scmp.lt.s32.totalorder %s34_s1, %s34_s1 }
   0x5   :  { %p13015_p0 = scmp.ne.s32.totalorder %s34_s1, %s13014_s24  ;;  %p13020_p2 = scmp.lt.s32.totalorder %s13014_s24, %s13014_s24 }
   0x7   :  { %p13021_p3 = por %p13020_p2, %p13019_p1 }
   0x9   :  { %p13022_p4 = pnand %p13021_p3, %p13015_p0 }
   0xb   :  { %13025 = shalt.err (!%p13022_p4)
}
   0xc   :  { %s13094_s25 = smov 128   ;;  %s13095_s26 = smov 8  }
   0xd   :  { %39 = dma.hbm_to_vmem [thread:$0]  %s18990_s2, 12288, %s34_s1, [#allocation6], %s13094_s25, %s13094_s25, %s13095_s26  }
   0xe   :  { %s13034_s29 = scalar_lea.vmem %s20_s23, 2048  ;;  %p13039_p6 = scmp.lt.s32.totalorder %s20_s23, %s20_s23 }
   0xf   :  { %p13035_p5 = scmp.ne.s32.totalorder %s20_s23, %s13034_s29  ;;  %p13040_p7 = scmp.lt.s32.totalorder %s13034_s29, %s13034_s29 }
  0x11   :  { %p13041_p8 = por %p13040_p7, %p13039_p6 }
  0x13   :  { %p13042_p9 = pnand %p13041_p8, %p13035_p5 }
  0x15   :  { %13045 = shalt.err (!%p13042_p9)
}
  0x16   :  { %25 = dma.hbm_to_vmem [thread:$0]  %s18988_s0, 2048, %s20_s23, [#allocation3], %s13094_s25, %s13094_s25, %s13095_s26  }
  0x17   :  { %s13096_s8 = smov [#allocation7]  }
  0x18   :  { %s47_s9 = sshll.u32 %s13096_s8, 4  ;;  %s48_s9 = int_to_ptr.vmem [resolvable:$true] %s47_s9 }
  0x19   :  { %s13054_s10 = scalar_lea.vmem %s48_s9, 4096  ;;  %p13059_p11 = scmp.lt.s32.totalorder %s48_s9, %s48_s9 }
  0x1a   :  { %p13055_p10 = scmp.ne.s32.totalorder %s48_s9, %s13054_s10  ;;  %p13060_p12 = scmp.lt.s32.totalorder %s13054_s10, %s13054_s10 }
  0x1c   :  { %p13061_p13 = por %p13060_p12, %p13059_p11 }
  0x1e   :  { %p13062_p0 = pnand %p13061_p13, %p13055_p10 }
  0x20   :  { %13065 = shalt.err (!%p13062_p0)
}
  0x21   :  { %s13097_s2 = smov 64   ;;  %s13098_s11 = smov 4  }
  0x22   :  { %53 = dma.hbm_to_vmem [thread:$0]  %s18992_s4, 4096, %s48_s9, [#allocation6], %s13097_s2, %s13097_s2, %s13098_s11  }
  0x23   :  { %13086 = dma.done.wait [#allocation3], 2048  }
  0x24   :  { %13087 = vsyncadd [#allocation3], 4294965248 }
  0x25   :  { %13088 = dma.done.wait [#allocation6], 16384  }
  0x26   :  { %13089 = vsyncadd [#allocation6], 4294950912  ;;  %v12635_v0 = vld [vmem:[#allocation5 + $0x74] ss:$8 sps:$4 sm:$0xff]   ;;  %v12637_v1 = vld [vmem:[#allocation5 + $0x70] ss:$8 sps:$4 sm:$0xff]  }
  0x27   :  { %4003 = vmatprep.subr.bf16.mxu1 %v12635_v0  ;;  %v12638_v2 = vld [vmem:[#allocation5 + $0x174] ss:$8 sps:$4 sm:$0xff]   ;;  %v12640_v3 = vld [vmem:[#allocation5 + $0x170] ss:$8 sps:$4 sm:$0xff]   ;;  %v12641_v4 = vld [vmem:[#allocation5 + $0x64] ss:$8 sps:$4 sm:$0xff]  }
  0x28   :  { %4004 = vmatpush1.bf16.msra.mxu1 %v12637_v1  ;;  %v12643_v5 = vld [vmem:[#allocation5 + $0x60] ss:$8 sps:$4 sm:$0xff]   ;;  %3730 = vmatprep.subr.bf16.mxu0 %v12638_v2  ;;  %v12644_v6 = vld [vmem:[#allocation5 + $0x164] ss:$8 sps:$4 sm:$0xff]   ;;  %v12647_v8 = vld [vmem:[#allocation5 + $0x54] ss:$8 sps:$4 sm:$0xff]  }
  0x29   :  { %3731 = vmatpush1.bf16.msra.mxu0 %v12640_v3  ;;  %4005 = vmatprep.subr.bf16.mxu1 %v12641_v4  ;;  %v12646_v7 = vld [vmem:[#allocation5 + $0x160] ss:$8 sps:$4 sm:$0xff]   ;;  %v12649_v9 = vld [vmem:[#allocation5 + $0x50] ss:$8 sps:$4 sm:$0xff]   ;;  %v12650_v10 = vld [vmem:[#allocation5 + $0x154] ss:$8 sps:$4 sm:$0xff]  }
  0x2a   :  { %3732 = vmatprep.subr.bf16.mxu0 %v12644_v6  ;;  %v12653_v11 = vld [vmem:[#allocation5 + $0x44] ss:$8 sps:$4 sm:$0xff]   ;;  %v12652_v12 = vld [vmem:[#allocation5 + $0x150] ss:$8 sps:$4 sm:$0xff]   ;;  %v12655_v14 = vld [vmem:[#allocation5 + $0x40] ss:$8 sps:$4 sm:$0xff]  }
  0x2b   :  { %v12656_v13 = vld [vmem:[#allocation5 + $0x144] ss:$8 sps:$4 sm:$0xff]   ;;  %v12659_v15 = vld [vmem:[#allocation5 + $0x34] ss:$8 sps:$4 sm:$0xff]   ;;  %v12658_v16 = vld [vmem:[#allocation5 + $0x140] ss:$8 sps:$4 sm:$0xff]  }
  0x2c   :  { %4006 = vmatpush1.bf16.msra.mxu1 %v12643_v5  ;;  %v12662_v17 = vld [vmem:[#allocation5 + $0x134] ss:$8 sps:$4 sm:$0xff]   ;;  %v12661_v18 = vld [vmem:[#allocation5 + $0x30] ss:$8 sps:$4 sm:$0xff]   ;;  %v12665_v19 = vld [vmem:[#allocation5 + $0x24] ss:$8 sps:$4 sm:$0xff]  }
  0x2d   :  { %4007 = vmatprep.subr.bf16.mxu1 %v12647_v8  ;;  %3733 = vmatpush1.bf16.msra.mxu0 %v12646_v7  ;;  %v12664_v20 = vld [vmem:[#allocation5 + $0x130] ss:$8 sps:$4 sm:$0xff]   ;;  %v12668_v21 = vld [vmem:[#allocation5 + $0x124] ss:$8 sps:$4 sm:$0xff]   ;;  %v12667_v22 = vld [vmem:[#allocation5 + $0x20] ss:$8 sps:$4 sm:$0xff]  }
  0x2e   :  { %3734 = vmatprep.subr.bf16.mxu0 %v12650_v10  ;;  %v12671_v23 = vld [vmem:[#allocation5 + $0x14] ss:$8 sps:$4 sm:$0xff]   ;;  %v12670_v24 = vld [vmem:[#allocation5 + $0x120] ss:$8 sps:$4 sm:$0xff]   ;;  %v12673_v26 = vld [vmem:[#allocation5 + $0x10] ss:$8 sps:$4 sm:$0xff]  }
  0x2f   :  { %v12674_v25 = vld [vmem:[#allocation5 + $0x114] ss:$8 sps:$4 sm:$0xff]   ;;  %v12677_v27 = vld [vmem:[#allocation5 + $0x4] ss:$8 sps:$4 sm:$0xff]   ;;  %v12676_v28 = vld [vmem:[#allocation5 + $0x110] ss:$8 sps:$4 sm:$0xff]  }
  0x30   :  { %4008 = vmatpush1.bf16.msra.mxu1 %v12649_v9  ;;  %v12680_v29 = vld [vmem:[#allocation5 + $0x104] ss:$8 sps:$4 sm:$0xff]   ;;  %v12679_v30 = vld [vmem:[#allocation5] ss:$8 sps:$4 sm:$0xff]   ;;  %v12683_v31 = vld [vmem:[#allocation5 + $0xf4] ss:$8 sps:$4 sm:$0xff]  }
  0x31   :  { %4009 = vmatprep.subr.bf16.mxu1 %v12653_v11  ;;  %3735 = vmatpush1.bf16.msra.mxu0 %v12652_v12  ;;  %v12682_v32 = vld [vmem:[#allocation5 + $0x100] ss:$8 sps:$4 sm:$0xff]   ;;  %v12686_v33 = vld [vmem:[#allocation5 + $0x1f4] ss:$8 sps:$4 sm:$0xff]   ;;  %v12685_v34 = vld [vmem:[#allocation5 + $0xf0] ss:$8 sps:$4 sm:$0xff]  }
  0x32   :  { %3736 = vmatprep.subr.bf16.mxu0 %v12656_v13  ;;  %v12689_v35 = vld [vmem:[#allocation5 + $0xe4] ss:$8 sps:$4 sm:$0xff]   ;;  %v12688_v36 = vld [vmem:[#allocation5 + $0x1f0] ss:$8 sps:$4 sm:$0xff]   ;;  %v12691_v38 = vld [vmem:[#allocation5 + $0xe0] ss:$8 sps:$4 sm:$0xff]  }
  0x33   :  { %v12692_v37 = vld [vmem:[#allocation5 + $0x1e4] ss:$8 sps:$4 sm:$0xff]   ;;  %v12695_v39 = vld [vmem:[#allocation5 + $0xd4] ss:$8 sps:$4 sm:$0xff]   ;;  %v12694_v40 = vld [vmem:[#allocation5 + $0x1e0] ss:$8 sps:$4 sm:$0xff]  }
  0x34   :  { %4010 = vmatpush1.bf16.msra.mxu1 %v12655_v14  ;;  %v12698_v41 = vld [vmem:[#allocation5 + $0x1d4] ss:$8 sps:$4 sm:$0xff]   ;;  %v12697_v42 = vld [vmem:[#allocation5 + $0xd0] ss:$8 sps:$4 sm:$0xff]   ;;  %v12701_v44 = vld [vmem:[#allocation5 + $0xc4] ss:$8 sps:$4 sm:$0xff]  }
  0x35   :  { %4011 = vmatprep.subr.bf16.mxu1 %v12659_v15  ;;  %3737 = vmatpush1.bf16.msra.mxu0 %v12658_v16  ;;  %v12700_v43 = vld [vmem:[#allocation5 + $0x1d0] ss:$8 sps:$4 sm:$0xff]   ;;  %v12703_v45 = vld [vmem:[#allocation5 + $0xc0] ss:$8 sps:$4 sm:$0xff]   ;;  %v12704_v46 = vld [vmem:[#allocation5 + $0x1c4] ss:$8 sps:$4 sm:$0xff]  }
  0x36   :  { %3738 = vmatprep.subr.bf16.mxu0 %v12662_v17  ;;  %v13156_v47 = vld [vmem:[#allocation2] sm:$0xff]  ;;  %v13158_v48 = vld [vmem:[#allocation2 + $0x8] sm:$0xff]  ;;  %v12707_v49 = vld [vmem:[#allocation5 + $0xb4] ss:$8 sps:$4 sm:$0xff]  }
  0x37   :  { %v82_v50 = vand.u32 2147483647, %v13156_v47  ;;  %v85_v51 = vand.u32 2139095040, %v13156_v47  ;;  %v185_v52 = vand.u32 2147483647, %v13158_v48  ;;  %v188_v53 = vand.u32 2139095040, %v13158_v48 }
  0x38   :  { %4012 = vmatpush1.bf16.msra.mxu1 %v12661_v18  ;;  %v12706_v54 = vld [vmem:[#allocation5 + $0x1c0] ss:$8 sps:$4 sm:$0xff]   ;;  %v12710_v57 = vld [vmem:[#allocation5 + $0x1b4] ss:$8 sps:$4 sm:$0xff]   ;;  %v12709_v60 = vld [vmem:[#allocation5 + $0xb0] ss:$8 sps:$4 sm:$0xff]  }
  0x39   :  { %4013 = vmatprep.subr.bf16.mxu1 %v12665_v19  ;;  %3739 = vmatpush1.bf16.msra.mxu0 %v12664_v20  ;;  %v86_v55 = vshrl.u32 %v85_v51, 23  ;;  %v89_v56 = vand.u32 8388607, %v82_v50  ;;  %v189_v58 = vshrl.u32 %v188_v53, 23  ;;  %v192_v59 = vand.u32 8388607, %v185_v52 }
  0x3a   :  { %3740 = vmatprep.subr.bf16.mxu0 %v12668_v21  ;;  %v12713_v62 = vld [vmem:[#allocation5 + $0xa4] ss:$8 sps:$4 sm:$0xff]   ;;  %v12712_v0 = vld [vmem:[#allocation5 + $0x1b0] ss:$8 sps:$4 sm:$0xff]   ;;  %v12715_v7 = vld [vmem:[#allocation5 + $0xa0] ss:$8 sps:$4 sm:$0xff]  }
  0x3b   :  { %v11756_v61 = vadd.s32 4294967169, %v86_v55  ;;  %v11760_v63 = vadd.s32 4294967169, %v189_v58  ;;  %v90_v1 = vor.u32 8388608, %v89_v56  ;;  %v13168_v3 = vld [vmem:[#allocation2 + $0x10] sm:$0xff]  ;;  %v12716_v4 = vld [vmem:[#allocation5 + $0x1a4] ss:$8 sps:$4 sm:$0xff]  }
  0x3c   :  { %4014 = vmatpush1.bf16.msra.mxu1 %v12667_v22  ;;  %v193_v5 = vor.u32 8388608, %v192_v59  ;;  %v291_v8 = vand.u32 2139095040, %v13168_v3  ;;  %v12718_v9 = vld [vmem:[#allocation5 + $0x1a0] ss:$8 sps:$4 sm:$0xff]   ;;  %v12719_v10 = vld [vmem:[#allocation5 + $0x94] ss:$8 sps:$4 sm:$0xff]  }
  0x3d   :  { %4015 = vmatprep.subr.bf16.mxu1 %v12671_v23  ;;  %3741 = vmatpush1.bf16.msra.mxu0 %v12670_v24  ;;  %v92_v2 = vadd.s32 1, %v11756_v61  ;;  %v195_v6 = vadd.s32 1, %v11760_v63  ;;  %v12721_v12 = vld [vmem:[#allocation5 + $0x90] ss:$8 sps:$4 sm:$0xff]   ;;  %v12722_v13 = vld [vmem:[#allocation5 + $0x194] ss:$8 sps:$4 sm:$0xff]  }
  0x3e   :  { %3742 = vmatprep.subr.bf16.mxu0 %v12674_v25  ;;  %v13173_v16 = vshll.u32 %v90_v1, 8  ;;  %v12725_v18 = vld [vmem:[#allocation5 + $0x84] ss:$8 sps:$4 sm:$0xff]   ;;  %v13177_v20 = vshll.u32 %v193_v5, 8  ;;  %v288_v21 = vand.u32 2147483647, %v13168_v3 }
  0x3f   :  { %vm93_vm0 = vcmp.gt.s32.totalorder %v92_v2, 0  ;;  %vm196_vm1 = vcmp.gt.s32.totalorder %v195_v6, 0  ;;  %v13180_v22 = vshrl.u32 %v291_v8, 23  ;;  %v12724_v23 = vld [vmem:[#allocation5 + $0x190] ss:$8 sps:$4 sm:$0xff]   ;;  %vm84_vm12 = vcmp.lt.s32.totalorder %v13156_v47, 0 }
  0x40   :  { %4016 = vmatpush1.bf16.msra.mxu1 %v12673_v26  ;;  %v94_v11 = vsel %vm93_vm0, %v92_v2, 0  ;;  %v197_v17 = vsel %vm196_vm1, %v195_v6, 0  ;;  %v19003_v25 = vmov 683565275   ;;  %vm13280_vm14 = vcmp.le.f32.partialorder %v82_v50, 0.7853982 }
  0x41   :  { %4017 = vmatprep.subr.bf16.mxu1 %v12677_v27  ;;  %3743 = vmatpush1.bf16.msra.mxu0 %v12676_v28  ;;  %v13171_v14 = vshrl.u32 %v94_v11, 5  ;;  %v96_v15 = vand.u32 31, %v94_v11  ;;  %v13175_v19 = vand.u32 31, %v197_v17  ;;  %v19001_v27 = vmov 2475754826  }
  0x42   :  { %3744 = vmatprep.subr.bf16.mxu0 %v12680_v29  ;;  %v18998_v29 = vmov 2131351028  }
  0x43   :  { %v97_v24 = vsub.s32 32, %v96_v15  ;;  %v99_v26 = vshll.u32 %v19003_v25, %v96_v15  ;;  %v102_v28 = vshll.u32 %v19001_v27, %v96_v15  ;;  %vm114_vm2 = vcmp.lt.s32.totalorder %v13171_v14, 1 }
  0x44   :  { %4018 = vmatpush1.bf16.msra.mxu1 %v12679_v30  ;;  %v105_v30 = vshll.u32 %v18998_v29, %v96_v15  ;;  %vm115_vm3 = vcmp.lt.s32.totalorder %v13171_v14, 2  ;;  %vm117_vm4 = vcmp.lt.s32.totalorder %v13171_v14, 4  ;;  %v200_v53 = vsub.s32 32, %v13175_v19 }
  0x45   :  { %4019 = vmatprep.subr.bf16.mxu1 %v12683_v31  ;;  %3745 = vmatpush1.bf16.msra.mxu0 %v12682_v32  ;;  %v12728_v31 = vld [vmem:[#allocation5 + $0x184] ss:$8 sps:$4 sm:$0xff]   ;;  %v18996_v32 = vmov 2102212464   ;;  %vm116_vm5 = vcmp.lt.s32.totalorder %v13171_v14, 3  ;;  %v205_v1 = vshll.u32 %v19001_v27, %v13175_v19 }
  0x46   :  { %3746 = vmatprep.subr.bf16.mxu0 %v12686_v33  ;;  %v108_v33 = vshll.u32 %v18996_v32, %v96_v15  ;;  %v201_v5 = vshrl.u32 %v19003_v25, %v200_v53  ;;  %v203_v6 = vshrl.u32 %v19001_v27, %v200_v53  ;;  %v209_v14 = vshrl.u32 %v18996_v32, %v200_v53 }
  0x48   :  { %4020 = vmatpush2.bf16.msra.mxu1 %v12685_v34  ;;  %v19035_v34 = vmov 920167782  }
  0x49   :  { %4021 = vmatprep.subr.bf16.mxu1 %v12689_v35  ;;  %3747 = vmatpush2.bf16.msra.mxu0 %v12688_v36  ;;  %v111_v35 = vshll.u32 %v19035_v34, %v96_v15  ;;  %v13188_v36 = vshrl.u32 %v197_v17, 5 }
  0x4a   :  { %3748 = vmatprep.subr.bf16.mxu0 %v12692_v37  ;;  %v12727_v37 = vld [vmem:[#allocation5 + $0x80] ss:$8 sps:$4 sm:$0xff]  }
  0x4b   :  { %vm217_vm6 = vcmp.lt.s32.totalorder %v13188_v36, 1  ;;  %vm218_vm7 = vcmp.lt.s32.totalorder %v13188_v36, 2  ;;  %vm219_vm9 = vcmp.lt.s32.totalorder %v13188_v36, 3  ;;  %vm220_vm10 = vcmp.lt.s32.totalorder %v13188_v36, 4 }
  0x4c   :  { %4022 = vmatpush2.bf16.msra.mxu1 %v12691_v38  ;;  %v98_v38 = vshrl.u32 %v19003_v25, %v97_v24 }
  0x4d   :  { %4023 = vmatprep.subr.bf16.mxu1 %v12695_v39  ;;  %3749 = vmatpush2.bf16.msra.mxu0 %v12694_v40  ;;  %v100_v39 = vshrl.u32 %v19001_v27, %v97_v24  ;;  %v103_v40 = vshrl.u32 %v18998_v29, %v97_v24 }
  0x4e   :  { %3750 = vmatprep.subr.bf16.mxu0 %v12698_v41  ;;  %v106_v41 = vshrl.u32 %v18996_v32, %v97_v24 }
  0x50   :  { %4024 = vmatpush2.bf16.msra.mxu1 %v12697_v42  ;;  %v109_v42 = vshrl.u32 %v19035_v34, %v97_v24  ;;  %v107_v51 = vor.u32 %v106_v41, %v105_v30 }
  0x51   :  { %4025 = vmatprep.subr.bf16.mxu1 %v12701_v44  ;;  %3751 = vmatpush2.bf16.msra.mxu0 %v12700_v43  ;;  %v19012_v43 = vmov 1326507024  }
  0x52   :  { %3752 = vmatprep.subr.bf16.mxu0 %v12704_v46  ;;  %v112_v44 = vshrl.u32 %v19012_v43, %v97_v24  ;;  %v101_v46 = vor.u32 %v100_v39, %v99_v26  ;;  %v110_v55 = vor.u32 %v109_v42, %v108_v33  ;;  %v119_v59 = vsel %vm117_vm4, %v107_v51, 2102212464 }
  0x53   :  { %v211_v24 = vshll.u32 %v18996_v32, %v13175_v19  ;;  %v212_v26 = vshrl.u32 %v19035_v34, %v200_v53  ;;  %v215_v30 = vshrl.u32 %v19012_v43, %v200_v53 }
  0x54   :  { %4026 = vmatpush2.bf16.msra.mxu1 %v12703_v45  ;;  %v12733_v45 = vld [vmem:[#allocation5 + $0x274] ss:$8 sps:$4 sm:$0xff]   ;;  %v113_v56 = vor.u32 %v112_v44, %v111_v35  ;;  %v118_v58 = vsel %vm114_vm2, %v98_v38, %v101_v46  ;;  %v123_v63 = vsel %vm117_vm4, %v110_v55, 920167782 }
  0x55   :  { %4027 = vmatprep.subr.bf16.mxu1 %v12707_v49  ;;  %3753 = vmatpush2.bf16.msra.mxu0 %v12706_v54  ;;  %v104_v49 = vor.u32 %v103_v40, %v102_v28  ;;  %v12730_v54 = vld [vmem:[#allocation5 + $0x180] ss:$8 sps:$4 sm:$0xff]   ;;  %v124_v2 = vsel %vm116_vm5, %v107_v51, %v123_v63  ;;  %v214_v28 = vshll.u32 %v19035_v34, %v13175_v19 }
  0x56   :  { %3754 = vmatprep.subr.bf16.mxu0 %v12710_v57  ;;  %v202_v57 = vshll.u32 %v19003_v25, %v13175_v19 }
  0x57   :  { %v126_v61 = vsel %vm114_vm2, %v104_v49, %v107_v51  ;;  %v216_v38 = vor.u32 %v215_v30, %v214_v28 }
  0x58   :  { %4028 = vmatpush2.bf16.msra.mxu1 %v12709_v60  ;;  %v122_v60 = vsel %vm114_vm2, %v101_v46, %v104_v49  ;;  %v204_v17 = vor.u32 %v203_v6, %v202_v57  ;;  %vm187_vm2 = vcmp.lt.s32.totalorder %v13158_v48, 0 }
  0x59   :  { %4029 = vmatprep.subr.bf16.mxu1 %v12713_v62  ;;  %3755 = vmatpush2.bf16.msra.mxu0 %v12712_v0  ;;  %v120_v62 = vsel %vm116_vm5, %v104_v49, %v119_v59  ;;  %v127_v0 = vsel %vm117_vm4, %v113_v56, 1326507024  ;;  %v125_v8 = vsel %vm115_vm3, %v122_v60, %v124_v2  ;;  %v230_v49 = vsel %vm220_vm10, %v216_v38, 1326507024 }
  0x5a   :  { %3756 = vmatprep.subr.bf16.mxu0 %v12716_v4  ;;  %v128_v4 = vsel %vm116_vm5, %v110_v55, %v127_v0  ;;  %v11764_v55 = vadd.s32 4294967169, %v13180_v22  ;;  %v295_v0 = vand.u32 8388607, %v288_v21 }
  0x5c   :  { %4030 = vmatpush2.bf16.msra.mxu1 %v12715_v7  ;;  %v121_v7 = vsel %vm115_vm3, %v118_v58, %v120_v62  ;;  %v298_v62 = vadd.s32 1, %v11764_v55 }
  0x5d   :  { %4031 = vmatprep.subr.bf16.mxu1 %v12719_v10  ;;  %3757 = vmatpush2.bf16.msra.mxu0 %v12718_v9  ;;  %v129_v9 = vsel %vm115_vm3, %v126_v61, %v128_v4  ;;  %v206_v10 = vshrl.u32 %v18998_v29, %v200_v53 }
  0x5e   :  { %3758 = vmatprep.subr.bf16.mxu0 %v12722_v13  ;;  %v13230_v13 = vmul.u32.u64.low %v13173_v16, %v125_v8  ;;  %v13231_v15 = vmul.u32.u64.high %v13173_v16, %v125_v8, %v13230_v13  ;;  %vm299_vm11 = vcmp.gt.s32.totalorder %v298_v62, 0  ;;  %v296_v8 = vor.u32 8388608, %v295_v0 }
  0x5f   :  { %v300_v4 = vsel %vm299_vm11, %v298_v62, 0 }
  0x60   :  { %4032 = vmatpush2.bf16.msra.mxu1 %v12721_v12  ;;  %v13226_v11 = vmul.u32.u64.low %v13173_v16, %v129_v9  ;;  %v13227_v12 = vmul.u32.u64.high %v13173_v16, %v129_v9, %v13226_v11  ;;  %v140_v35 = vadd.s32 1, %v13231_v15 }
  0x61   :  { %4033 = vmatprep.subr.bf16.mxu1 %v12725_v18  ;;  %3759 = vmatpush2.bf16.msra.mxu0 %v12724_v23  ;;  %v207_v18 = vor.u32 %v206_v10, %v205_v1  ;;  %v208_v23 = vshll.u32 %v18998_v29, %v13175_v19  ;;  %v221_v19 = vsel %vm217_vm6, %v201_v5, %v204_v17  ;;  %v302_v10 = vand.u32 31, %v300_v4  ;;  %v13377_v11 = vld [vmem:[#allocation2 + $0x20] sm:$0xff] }
  0x62   :  { %3760 = vmatprep.subr.bf16.mxu0 %v12728_v31  ;;  %v137_v31 = vmul.u32 %v13173_v16, %v121_v7  ;;  %vm139_vm8 = vc.u32 %v13227_v12, %v13230_v13  ;;  %v13274_v7 = vld [vmem:[#allocation2 + $0x18] sm:$0xff]  ;;  %v138_v50 = vadd.s32 %v13230_v13, %v13227_v12 }
  0x63   :  { %v210_v33 = vor.u32 %v209_v14, %v208_v23  ;;  %v225_v39 = vsel %vm217_vm6, %v204_v17, %v207_v18  ;;  %v141_v16 = vsel %vm139_vm8, %v140_v35, %v13231_v15  ;;  %v303_v30 = vsub.s32 32, %v302_v10 }
  0x64   :  { %4034 = vmatpush2.bf16.msra.mxu1 %v12727_v37  ;;  %v213_v37 = vor.u32 %v212_v26, %v211_v24  ;;  %v142_v44 = vadd.s32 %v141_v16, %v137_v31  ;;  %v13289_v24 = vshll.u32 %v296_v8, 8  ;;  %v391_v26 = vand.u32 2147483647, %v13274_v7 }
  0x65   :  { %12397 = vmatprep.subr.bf16.mxu1 %v12733_v45  ;;  %3761 = vmatpush2.bf16.msra.mxu0 %v12730_v54  ;;  %v222_v40 = vsel %vm220_vm10, %v210_v33, 2102212464  ;;  %v229_v42 = vsel %vm217_vm6, %v207_v18, %v210_v33  ;;  %v305_v16 = vshll.u32 %v19003_v25, %v302_v10  ;;  %v306_v12 = vshrl.u32 %v19001_v27, %v303_v30 }
  0x66   :  { %4420 = vmatprep.subr.bf16.mxu0 %v12733_v45  ;;  %v226_v41 = vsel %vm220_vm10, %v213_v37, 920167782  ;;  %v223_v45 = vsel %vm219_vm9, %v207_v18, %v222_v40  ;;  %v231_v54 = vsel %vm219_vm9, %v213_v37, %v230_v49  ;;  %v143_v56 = vadd.s32 536870912, %v142_v44 }
  0x67   :  { %v227_v46 = vsel %vm219_vm9, %v210_v33, %v226_v41  ;;  %v224_v51 = vsel %vm218_vm7, %v221_v19, %v223_v45  ;;  %v232_v57 = vsel %vm218_vm7, %v229_v42, %v231_v54  ;;  %v394_v18 = vand.u32 2139095040, %v13274_v7 }
  0x68   :  { %v228_v53 = vsel %vm218_vm7, %v225_v39, %v227_v46  ;;  %v13264_v60 = vmul.u32.u64.low %v13177_v20, %v232_v57  ;;  %v13265_v61 = vmul.u32.u64.high %v13177_v20, %v232_v57, %v13264_v60  ;;  %v144_v63 = vshrl.u32 %v143_v56, 30 }
  0x69   :  { %v13260_v58 = vmul.u32.u64.low %v13177_v20, %v228_v53  ;;  %v13261_v59 = vmul.u32.u64.high %v13177_v20, %v228_v53, %v13260_v58  ;;  %v240_v1 = vmul.u32 %v13177_v20, %v224_v51  ;;  %v301_v37 = vshrl.u32 %v300_v4, 5 }
  0x6a   :  { %v145_v22 = vshll.u32 %v144_v63, 30  ;;  %v168_v2 = vsub.s32 4, %v144_v63  ;;  %v13300_v38 = vshrl.u32 %v394_v18, 23  ;;  %v308_v40 = vshll.u32 %v19001_v27, %v302_v10 }
  0x6b   :  { %v243_v36 = vadd.s32 1, %v13261_v59  ;;  %vm242_vm13 = vc.u32 %v13265_v61, %v13260_v58  ;;  %v13297_v33 = vadd.s32 %v13260_v58, %v13265_v61  ;;  %v309_v13 = vshrl.u32 %v18998_v29, %v303_v30 }
  0x6c   :  { %v146_v5 = vsub.s32 %v142_v44, %v145_v22  ;;  %v169_v9 = vsel %vm84_vm12, %v168_v2, %v144_v63  ;;  %v311_v42 = vshll.u32 %v18998_v29, %v302_v10  ;;  %v312_v44 = vshrl.u32 %v18996_v32, %v303_v30 }
  0x6d   :  { %v244_v6 = vsel %vm242_vm13, %v243_v36, %v13261_v59  ;;  %v13287_v14 = vsel %vm13280_vm14, 0, %v169_v9  ;;  %v314_v45 = vshll.u32 %v18996_v32, %v302_v10  ;;  %v315_v46 = vshrl.u32 %v19035_v34, %v303_v30 }
  0x6e   :  { %v245_v20 = vadd.s32 %v244_v6, %v240_v1  ;;  %v148_v15 = vsub.s32 0, %v146_v5  ;;  %v13303_v39 = vadd.s32 3, %v13287_v14  ;;  %v317_v53 = vshll.u32 %v19035_v34, %v302_v10 }
  0x6f   :  { %v318_v54 = vshrl.u32 %v19012_v43, %v303_v30  ;;  %v304_v58 = vshrl.u32 %v19003_v25, %v303_v30  ;;  %v307_v61 = vor.u32 %v306_v12, %v305_v16  ;;  %v310_v62 = vor.u32 %v309_v13, %v308_v40 }
  0x70   :  { %v246_v17 = vadd.s32 536870912, %v245_v20  ;;  %v11757_v23 = vmin.u32 %v148_v15, %v146_v5  ;;  %v316_v1 = vor.u32 %v315_v46, %v314_v45  ;;  %vm320_vm0 = vcmp.lt.s32.totalorder %v301_v37, 1 }
  0x71   :  { %v313_v2 = vor.u32 %v312_v44, %v311_v42  ;;  %v319_v36 = vor.u32 %v318_v54, %v317_v53  ;;  %vm323_vm1 = vcmp.lt.s32.totalorder %v301_v37, 4  ;;  %vm322_vm3 = vcmp.lt.s32.totalorder %v301_v37, 3 }
  0x72   :  { %v13292_v28 = vshrl.u32 %v246_v17, 30  ;;  %v150_v31 = vclz %v11757_v23  ;;  %vm321_vm4 = vcmp.lt.s32.totalorder %v301_v37, 2  ;;  %v329_v18 = vsel %vm323_vm1, %v316_v1, 920167782 }
  0x73   :  { %v325_v9 = vsel %vm323_vm1, %v313_v2, 2102212464  ;;  %v330_v30 = vsel %vm322_vm3, %v313_v2, %v329_v18  ;;  %v333_v16 = vsel %vm323_vm1, %v319_v36, 1326507024  ;;  %vm13347_vm6 = vcmp.le.f32.partialorder %v185_v52, 0.7853982 }
  0x74   :  { %v248_v35 = vshll.u32 %v13292_v28, 30  ;;  %v11758_v19 = vadd.s32 4294967294, %v150_v31  ;;  %v271_v60 = vsub.s32 4, %v13292_v28  ;;  %v326_v17 = vsel %vm322_vm3, %v310_v62, %v325_v9 }
  0x75   :  { %v334_v42 = vsel %vm322_vm3, %v316_v1, %v333_v16  ;;  %v11768_v37 = vadd.s32 4294967169, %v13300_v38 }
  0x76   :  { %v13307_v41 = vsub.s32 %v245_v20, %v248_v35  ;;  %vm11759_vm15 = vcmp.lt.s32.totalorder %v11758_v19, 0  ;;  %v328_v20 = vsel %vm320_vm0, %v307_v61, %v310_v62 }
  0x77   :  { %v153_v49 = vsel %vm11759_vm15, 0, %v11758_v19  ;;  %v331_v19 = vsel %vm321_vm4, %v328_v20, %v330_v30  ;;  %vm174_vm15 = vweird.f32 %v13156_v47 }
  0x78   :  { %v251_v51 = vsub.s32 0, %v13307_v41  ;;  %v154_v55 = vsub.s32 32, %v153_v49  ;;  %v155_v56 = vshll.u32 %v146_v5, %v153_v49  ;;  %v158_v57 = vsub.s32 4294967266, %v153_v49 }
  0x79   :  { %v324_v5 = vsel %vm320_vm0, %v304_v58, %v307_v61  ;;  %v13336_v46 = vmul.u32.u64.low %v13289_v24, %v331_v19  ;;  %v13337_v49 = vmul.u32.u64.high %v13289_v24, %v331_v19, %v13336_v46  ;;  %v272_v61 = vsel %vm187_vm2, %v271_v60, %v13292_v28 }
  0x7a   :  { %v11761_v59 = vmin.u32 %v251_v51, %v13307_v41  ;;  %v156_v63 = vshrl.u32 %v138_v50, %v154_v55  ;;  %v159_v0 = vadd.s32 127, %v158_v57  ;;  %v327_v23 = vsel %vm321_vm4, %v324_v5, %v326_v17 }
  0x7b   :  { %v332_v50 = vsel %vm320_vm0, %v310_v62, %v313_v2  ;;  %v13354_v57 = vand.u32 8388607, %v391_v26  ;;  %v343_v62 = vmul.u32 %v13289_v24, %v327_v23  ;;  %v346_v38 = vadd.s32 1, %v13337_v49 }
  0x7c   :  { %v253_v22 = vclz %v11761_v59  ;;  %v157_v4 = vor.u32 %v156_v63, %v155_v56  ;;  %v160_v6 = vshll.u32 %v159_v0, 23  ;;  %v335_v45 = vsel %vm321_vm4, %v332_v50, %v334_v42 }
  0x7d   :  { %v13342_v54 = vmul.u32.u64.low %v13289_v24, %v335_v45  ;;  %v13343_v55 = vmul.u32.u64.high %v13289_v24, %v335_v45, %v13342_v54  ;;  %v401_v63 = vadd.s32 1, %v11768_v37  ;;  %v274_v28 = vsel %vm13347_vm6, 0, %v272_v61 }
  0x7e   :  { %v11762_v8 = vadd.s32 4294967294, %v253_v22  ;;  %v161_v10 = vor.u32 4788187, %v160_v6  ;;  %v164_v15 = vcvt.s32.f32 %v157_v4  ;;  %v13370_v22 = vand.u32 3, %v13303_v39 }
  0x7f   :  { %vm345_vm7 = vc.u32 %v13343_v55, %v13336_v46  ;;  %vm402_vm8 = vcmp.gt.s32.totalorder %v401_v63, 0  ;;  %v494_v39 = vand.u32 2147483647, %v13377_v11  ;;  %v13380_v5 = vand.u32 3, %v274_v28 }
  0x80   :  { %vm11763_vm5 = vcmp.lt.s32.totalorder %v11762_v8, 0  ;;  %v162_v31 = vand.u32 2147483647, %v161_v10  ;;  %v347_v60 = vsel %vm345_vm7, %v346_v38, %v13337_v49  ;;  %v403_v2 = vsel %vm402_vm8, %v401_v63, 0 }
  0x81   :  { %v256_v35 = vsel %vm11763_vm5, 0, %v11762_v8  ;;  %v348_v36 = vadd.s32 %v347_v60, %v343_v62  ;;  %v405_v4 = vand.u32 31, %v403_v2  ;;  %v1927_v8 = vadd.s32 3, %v274_v28 }
  0x82   :  { %v257_v40 = vsub.s32 32, %v256_v35  ;;  %v258_v12 = vshll.u32 %v13307_v41, %v256_v35  ;;  %v261_v13 = vsub.s32 4294967266, %v256_v35  ;;  %v165_v44 = vmul.f32 %v164_v15, %v162_v31 }
  0x83   :  { %v399_v9 = vor.u32 8388608, %v13354_v57  ;;  %v349_v20 = vadd.s32 536870912, %v348_v36  ;;  %v13383_v10 = vshrl.u32 %v403_v2, 5  ;;  %v406_v15 = vsub.s32 32, %v405_v4 }
  0x84   :  { %v259_v51 = vshrl.u32 %v13297_v33, %v257_v40  ;;  %v262_v53 = vadd.s32 127, %v261_v13  ;;  %v166_v56 = vxor.u32 2147483648, %v165_v44  ;;  %v13357_v33 = vand.u32 3, %v13287_v14 }
  0x85   :  { %v408_v17 = vshll.u32 %v19003_v25, %v405_v4  ;;  %vm1829_vm10 = vcmp.eq.s32.totalorder %v13370_v22, 2  ;;  %v411_v23 = vshll.u32 %v19001_v27, %v405_v4  ;;  %v414_v30 = vshll.u32 %v18998_v29, %v405_v4 }
  0x86   :  { %v260_v58 = vor.u32 %v259_v51, %v258_v12  ;;  %v263_v59 = vshll.u32 %v262_v53, 23  ;;  %v167_v52 = vsel %vm84_vm12, %v166_v56, %v165_v44  ;;  %vm180_vm9 = vcmp.eq.s32.totalorder %v13357_v33, 2 }
  0x87   :  { %v170_v0 = vsel %vm13280_vm14, %v13156_v47, %v167_v52  ;;  %v417_v50 = vshll.u32 %v18996_v32, %v405_v4  ;;  %vm177_vm11 = vcmp.eq.s32.totalorder %v13357_v33, 0  ;;  %vm1826_vm12 = vcmp.eq.s32.totalorder %v13370_v22, 0 }
  0x88   :  { %v264_v14 = vor.u32 4788187, %v263_v59  ;;  %v267_v1 = vcvt.s32.f32 %v260_v58  ;;  %12811 = vcosq.f32 %v170_v0  ;;  %v13393_v31 = vshrl.u32 %v349_v20, 30 }
  0x89   :  { %12813 = vsinq.f32 %v170_v0  ;;  %v409_v35 = vshrl.u32 %v19001_v27, %v406_v15  ;;  %v412_v19 = vshrl.u32 %v18998_v29, %v406_v15  ;;  %v420_v16 = vshll.u32 %v19035_v34, %v405_v4 }
  0x8a   :  { %v265_v24 = vand.u32 2147483647, %v264_v14  ;;  %vm176_vm13 = vcmp.lt.s32.totalorder %v13357_v33, 2  ;;  %vm1825_vm14 = vcmp.lt.s32.totalorder %v13370_v22, 2  ;;  %v415_v12 = vshrl.u32 %v18996_v32, %v406_v15 }
  0x8b   :  { %v418_v13 = vshrl.u32 %v19035_v34, %v406_v15  ;;  %v421_v42 = vshrl.u32 %v19012_v43, %v406_v15  ;;  %v13408_v45 = vand.u32 3, %v1927_v8  ;;  %v351_v49 = vshll.u32 %v13393_v31, 30 }
  0x8c   :  { %v268_v6 = vmul.f32 %v267_v1, %v265_v24  ;;  %v410_v51 = vor.u32 %v409_v35, %v408_v17  ;;  %v413_v53 = vor.u32 %v412_v19, %v411_v23  ;;  %v416_v54 = vor.u32 %v415_v12, %v414_v30 }
  0x8d   :  { %v419_v56 = vor.u32 %v418_v13, %v417_v50  ;;  %v13412_v37 = vsub.s32 %v348_v36, %v351_v49  ;;  %v407_v57 = vshrl.u32 %v19003_v25, %v406_v15  ;;  %v422_v58 = vor.u32 %v421_v42, %v420_v16 }
  0x8e   :  { %v269_v18 = vxor.u32 2147483648, %v268_v6  ;;  %vm423_vm0 = vcmp.lt.s32.totalorder %v13383_v10, 1  ;;  %vm425_vm1 = vcmp.lt.s32.totalorder %v13383_v10, 3  ;;  %v13417_v41 = vshll.u32 %v399_v9, 8 }
  0x8f   :  { %v497_v59 = vand.u32 2139095040, %v13377_v11  ;;  %v354_v61 = vsub.s32 0, %v13412_v37  ;;  %vm426_vm3 = vcmp.lt.s32.totalorder %v13383_v10, 4  ;;  %v431_v52 = vsel %vm423_vm0, %v410_v51, %v413_v53 }
  0x90   :  { %v270_v40 = vsel %vm187_vm2, %v269_v18, %v268_v6  ;;  %vm424_vm2 = vcmp.lt.s32.totalorder %v13383_v10, 2  ;;  %v428_v38 = vsel %vm426_vm3, %v416_v54, 2102212464  ;;  %v432_v63 = vsel %vm426_vm3, %v419_v56, 920167782 }
  0x91   :  { %v273_v44 = vsel %vm13347_vm6, %v13158_v48, %v270_v40  ;;  %v435_v0 = vsel %vm423_vm0, %v413_v53, %v416_v54  ;;  %v436_v14 = vsel %vm426_vm3, %v422_v58, 1326507024  ;;  %vm283_vm4 = vcmp.eq.s32.totalorder %v13380_v5, 2 }
  0x92   :  { %12815 = vcosq.f32 %v273_v44  ;;  %v11765_v24 = vmin.u32 %v354_v61, %v13412_v37  ;;  %v427_v60 = vsel %vm423_vm0, %v407_v57, %v410_v51  ;;  %v433_v2 = vsel %vm425_vm1, %v416_v54, %v432_v63 }
  0x93   :  { %12817 = vsinq.f32 %v273_v44  ;;  %vm280_vm5 = vcmp.eq.s32.totalorder %v13380_v5, 0  ;;  %v429_v4 = vsel %vm425_vm1, %v413_v53, %v428_v38  ;;  %v434_v6 = vsel %vm424_vm2, %v431_v52, %v433_v2 }
  0x94   :  { %v437_v8 = vsel %vm425_vm1, %v419_v56, %v436_v14  ;;  %vm279_vm6 = vcmp.lt.s32.totalorder %v13380_v5, 2  ;;  %v356_v15 = vclz %v11765_v24  ;;  %vm277_vm7 = vweird.f32 %v13158_v48 }
  0x95   :  { %v12812_v62 = vpop.eup %12811  ;;  %v438_v17 = vsel %vm424_vm2, %v435_v0, %v437_v8  ;;  %vm1929_vm8 = vcmp.lt.s32.totalorder %v13408_v45, 2  ;;  %v430_v40 = vsel %vm424_vm2, %v427_v60, %v429_v4  ;;  %v344_v42 = vadd.s32 %v13336_v46, %v13343_v55 }
  0x96   :  { %v12814_v1 = vpop.eup %12813  ;;  %v181_v28 = vxor.u32 2147483648, %v12812_v62  ;;  %v13453_v30 = vmul.u32.u64.low %v13417_v41, %v438_v17  ;;  %v13454_v50 = vmul.u32.u64.high %v13417_v41, %v438_v17, %v13453_v30  ;;  %v11766_v16 = vadd.s32 4294967294, %v356_v15 }
  0x97   :  { %v178_v36 = vxor.u32 2147483648, %v12814_v1  ;;  %v13465_v12 = vmul.u32.u64.low %v13417_v41, %v434_v6  ;;  %v13466_v13 = vmul.u32.u64.high %v13417_v41, %v434_v6, %v13465_v12  ;;  %v374_v44 = vsub.s32 4, %v13393_v31 }
  0x98   :  { %v182_v9 = vsel %vm180_vm9, %v181_v28, %v12814_v1  ;;  %v1831_v20 = vsel %vm1829_vm10, %v181_v28, %v12814_v1  ;;  %vm1930_vm9 = vcmp.eq.s32.totalorder %v13408_v45, 0  ;;  %vm11767_vm10 = vcmp.lt.s32.totalorder %v11766_v16, 0 }
  0x99   :  { %v179_v18 = vsel %vm177_vm11, %v12812_v62, %v178_v36  ;;  %v1828_v23 = vsel %vm1826_vm12, %v12812_v62, %v178_v36  ;;  %vm1933_vm11 = vcmp.eq.s32.totalorder %v13408_v45, 2  ;;  %v359_v10 = vsel %vm11767_vm10, 0, %v11766_v16 }
  0x9a   :  { %v183_v35 = vsel %vm176_vm13, %v179_v18, %v182_v9  ;;  %v1832_v19 = vsel %vm1825_vm14, %v1828_v23, %v1831_v20  ;;  %v498_v49 = vshrl.u32 %v497_v59, 23  ;;  %vm290_vm12 = vcmp.lt.s32.totalorder %v13168_v3, 0  ;;  %v12731_v20 = vld [vmem:[#allocation5 + $0x270] ss:$8 sps:$4 sm:$0xff]   ;;  %v12736_v18 = vld [vmem:[#allocation5 + $0x264] ss:$8 sps:$4 sm:$0xff]  }
  0x9b   :  { %v13471_v33 = vsel %vm174_vm15, nan, %v183_v35  ;;  %v13475_v22 = vsel %vm174_vm15, nan, %v1832_v19  ;;  %v360_v53 = vsub.s32 32, %v359_v10  ;;  %v361_v54 = vshll.u32 %v13412_v37, %v359_v10 }
  0x9c   :  { %v446_v47 = vmul.u32 %v13417_v41, %v430_v40  ;;  %vm448_vm13 = vc.u32 %v13454_v50, %v13465_v12  ;;  %v3490_v55 = vmul.f32 %v13475_v22, %v13471_v33  ;;  %v364_v57 = vsub.s32 4294967266, %v359_v10 }
  0x9d   :  { %v449_v58 = vadd.s32 1, %v13466_v13  ;;  %v3442_v61 = vmul.f32 %v13471_v33, %v13471_v33  ;;  %v3458_v37 = vmul.f32 %v13475_v22, %v13475_v22  ;;  %v362_v52 = vshrl.u32 %v344_v42, %v360_v53  ;;  %v12734_v53 = vld [vmem:[#allocation5 + $0x260] ss:$8 sps:$4 sm:$0xff]  }
  0x9e   :  { %v365_v38 = vadd.s32 127, %v364_v57  ;;  %v13506_v2 = vadd.f32 %v3490_v55, %v3490_v55  ;;  %v375_v16 = vsel %vm290_vm12, %v374_v44, %v13393_v31  ;;  %v11772_v40 = vadd.s32 4294967169, %v498_v49 }
  0x9f   :  { %v12816_v51 = vpop.eup %12815  ;;  %v450_v63 = vsel %vm448_vm13, %v449_v58, %v13466_v13  ;;  %v363_v1 = vor.u32 %v362_v52, %v361_v54  ;;  %v13516_v8 = vsub.f32 %v3442_v61, %v3458_v37  ;;  %vm13539_vm14 = vcmp.le.f32.partialorder %v288_v21, 0.7853982  ;;  %v12737_v61 = vld [vmem:[#allocation5 + $0x250] ss:$8 sps:$4 sm:$0xff]  }
  0xa0   :  { %v12818_v56 = vpop.eup %12817  ;;  %v284_v46 = vxor.u32 2147483648, %v12816_v51  ;;  %v451_v28 = vadd.s32 %v450_v63, %v446_v47  ;;  %v366_v36 = vshll.u32 %v365_v38, 23  ;;  %v501_v31 = vand.u32 8388607, %v494_v39  ;;  %v13556_v38 = vld [vmem:[#allocation2 + $0x10] sm:$0xff] }
  0xa1   :  { %v281_v59 = vxor.u32 2147483648, %v12818_v56  ;;  %v370_v30 = vcvt.s32.f32 %v363_v1  ;;  %v377_v47 = vsel %vm13539_vm14, 0, %v375_v16  ;;  %v504_v21 = vadd.s32 1, %v11772_v40  ;;  %v12743_v54 = vld [vmem:[#allocation5 + $0x230] ss:$8 sps:$4 sm:$0xff]  }
  0xa2   :  { %v285_v41 = vsel %vm283_vm4, %v284_v46, %v12818_v56  ;;  %v1935_v62 = vsel %vm1933_vm11, %v284_v46, %v12818_v56  ;;  %v452_v9 = vadd.s32 536870912, %v451_v28  ;;  %v367_v23 = vor.u32 4788187, %v366_v36  ;;  %v12739_v46 = vld [vmem:[#allocation5 + $0x254] ss:$8 sps:$4 sm:$0xff]  }
  0xa3   :  { %v282_v0 = vsel %vm280_vm5, %v12816_v51, %v281_v59  ;;  %v1932_v14 = vsel %vm1930_vm9, %v12816_v51, %v281_v59  ;;  %v2031_v59 = vadd.s32 3, %v377_v47  ;;  %vm505_vm15 = vcmp.gt.s32.totalorder %v504_v21, 0 }
  0xa4   :  { %v286_v24 = vsel %vm279_vm6, %v282_v0, %v285_v41  ;;  %v1936_v60 = vsel %vm1929_vm8, %v1932_v14, %v1935_v62  ;;  %v453_v35 = vshrl.u32 %v452_v9, 30  ;;  %v368_v42 = vand.u32 2147483647, %v367_v23  ;;  %v12742_v41 = vld [vmem:[#allocation5 + $0x244] ss:$8 sps:$4 sm:$0xff]  }
  0xa5   :  { %v13510_v4 = vsel %vm277_vm7, nan, %v286_v24  ;;  %v13514_v6 = vsel %vm277_vm7, nan, %v1936_v60  ;;  %vm393_vm0 = vcmp.lt.s32.totalorder %v13274_v7, 0  ;;  %v502_v62 = vor.u32 8388608, %v501_v31  ;;  %v13569_v14 = vld [vmem:[#allocation2 + $0x28] sm:$0xff] }
  0xa6   :  { %v3402_v5 = vpack.c.bf16 %v13514_v6, %v13475_v22  ;;  %v3394_v45 = vpack.c.bf16 %v13510_v4, %v13471_v33  ;;  %v3491_v15 = vmul.f32 %v13514_v6, %v13510_v4  ;;  %v3443_v17 = vmul.f32 %v13510_v4, %v13510_v4 }
  0xa7   :  { %v3459_v48 = vmul.f32 %v13514_v6, %v13514_v6  ;;  %v454_v10 = vshll.u32 %v453_v35, 30  ;;  %v371_v49 = vmul.f32 %v370_v30, %v368_v42  ;;  %v477_v55 = vsub.s32 4, %v453_v35 }
  0xa8   :  { %4035 = vmatprep.mubr.bf16.mxu1 %v3402_v5  ;;  %v13528_v19 = vadd.f32 %v3491_v15, %v3491_v15  ;;  %vm13563_vm1 = vcmp.le.f32.partialorder %v391_v26, 0.7853982  ;;  %v506_v1 = vsel %vm505_vm15, %v504_v21, 0  ;;  %v597_v60 = vand.u32 2147483647, %v13569_v14 }
  0xa9   :  { %4036 = vmatmul.mubr.bf16.vlgmr.msra.gmra.mxu1 %v3394_v45  ;;  %v13533_v13 = vsub.f32 %v3443_v17, %v3459_v48  ;;  %v13549_v56 = vsub.s32 %v451_v28, %v454_v10  ;;  %v372_v57 = vxor.u32 2147483648, %v371_v49  ;;  %v478_v3 = vsel %vm393_vm0, %v477_v55, %v453_v35  ;;  %v12740_v5 = vld [vmem:[#allocation5 + $0x240] ss:$8 sps:$4 sm:$0xff]   ;;  %v12745_v48 = vld [vmem:[#allocation5 + $0x234] ss:$8 sps:$4 sm:$0xff]  }
  0xaa   :  { %12413 = vmatpush1.bf16.msra.mxu1 %v12731_v20  ;;  %v3530_v51 = vpack.c.bf16 %v13528_v19, %v13506_v2  ;;  %v13571_v24 = vshrl.u32 %v506_v1, 5  ;;  %v447_v36 = vadd.s32 %v13465_v12, %v13454_v50  ;;  %v13576_v26 = vand.u32 3, %v2031_v59 }
  0xab   :  { %v3522_v44 = vpack.c.bf16 %v13533_v13, %v13516_v8  ;;  %12398 = vmatprep.subr.bf16.mxu1 %v12736_v18  ;;  %v457_v58 = vsub.s32 0, %v13549_v56  ;;  %v373_v37 = vsel %vm290_vm12, %v372_v57, %v371_v49  ;;  %v13578_v9 = vand.u32 3, %v377_v47 }
  0xac   :  { %3762 = vmatprep.mubr.bf16.mxu0 %v3530_v51  ;;  %v376_v63 = vsel %vm13539_vm14, %v13556_v38, %v373_v37  ;;  %v508_v15 = vand.u32 31, %v506_v1  ;;  %v13584_v17 = vshll.u32 %v502_v62, 8  ;;  %vm526_vm2 = vcmp.lt.s32.totalorder %v13571_v24, 1 }
  0xad   :  { %3763 = vmatmul.mubr.bf16.vlgmr.msra.gmra.mxu0 %v3522_v44  ;;  %v11769_v52 = vmin.u32 %v457_v58, %v13549_v56  ;;  %12819 = vcosq.f32 %v376_v63  ;;  %vm528_vm3 = vcmp.lt.s32.totalorder %v13571_v24, 3  ;;  %vm529_vm4 = vcmp.lt.s32.totalorder %v13571_v24, 4 }
  0xae   :  { %4421 = vmatpush1.bf16.msra.mxu0 %v12731_v20  ;;  %12414 = vmatpush1.bf16.msra.mxu1 %v12734_v53  ;;  %12821 = vsinq.f32 %v376_v63  ;;  %v13582_v20 = vsel %vm13563_vm1, 0, %v478_v3  ;;  %v600_v50 = vand.u32 2139095040, %v13569_v14  ;;  %v509_v12 = vsub.s32 32, %v508_v15  ;;  %v12746_v63 = vld [vmem:[#allocation5 + $0x220] ss:$8 sps:$4 sm:$0xff]  }
  0xaf   :  { %4422 = vmatprep.subr.bf16.mxu0 %v12736_v18  ;;  %12399 = vmatprep.subr.bf16.mxu1 %v12739_v46  ;;  %v459_v28 = vclz %v11769_v52  ;;  %v511_v18 = vshll.u32 %v19003_v25, %v508_v15  ;;  %v514_v23 = vshll.u32 %v19001_v27, %v508_v15  ;;  %v517_v35 = vshll.u32 %v18998_v29, %v508_v15 }
  0xb0   :  { %v520_v16 = vshll.u32 %v18996_v32, %v508_v15  ;;  %v523_v40 = vshll.u32 %v19035_v34, %v508_v15  ;;  %vm2037_vm6 = vcmp.eq.s32.totalorder %v13576_v26, 2  ;;  %v512_v31 = vshrl.u32 %v19001_v27, %v509_v12 }
  0xb1   :  { %v11770_v45 = vadd.s32 4294967294, %v459_v28  ;;  %v515_v44 = vshrl.u32 %v18998_v29, %v509_v12  ;;  %v518_v49 = vshrl.u32 %v18996_v32, %v509_v12  ;;  %v521_v47 = vshrl.u32 %v19035_v34, %v509_v12 }
  0xb2   :  { %4423 = vmatpush1.bf16.msra.mxu0 %v12734_v53  ;;  %12415 = vmatpush1.bf16.msra.mxu1 %v12737_v61  ;;  %v510_v53 = vshrl.u32 %v19003_v25, %v509_v12  ;;  %vm2034_vm7 = vcmp.eq.s32.totalorder %v13576_v26, 0  ;;  %v601_v57 = vshrl.u32 %v600_v50, 23  ;;  %v513_v58 = vor.u32 %v512_v31, %v511_v18 }
  0xb3   :  { %4424 = vmatprep.subr.bf16.mxu0 %v12739_v46  ;;  %12400 = vmatprep.subr.bf16.mxu1 %v12742_v41  ;;  %vm11771_vm5 = vcmp.lt.s32.totalorder %v11770_v45, 0  ;;  %v12748_v46 = vld [vmem:[#allocation5 + $0x224] ss:$8 sps:$4 sm:$0xff]   ;;  %v516_v59 = vor.u32 %v515_v44, %v514_v23  ;;  %v522_v37 = vor.u32 %v521_v47, %v520_v16  ;;  %vm527_vm8 = vcmp.lt.s32.totalorder %v13571_v24, 2 }
  0xb4   :  { %v462_v30 = vsel %vm11771_vm5, 0, %v11770_v45  ;;  %vm2033_vm9 = vcmp.lt.s32.totalorder %v13576_v26, 2  ;;  %v530_v3 = vsel %vm526_vm2, %v510_v53, %v513_v58  ;;  %vm382_vm10 = vcmp.lt.s32.totalorder %v13578_v9, 2 }
  0xb5   :  { %v463_v42 = vsub.s32 32, %v462_v30  ;;  %v464_v10 = vshll.u32 %v13549_v56, %v462_v30  ;;  %v467_v51 = vsub.s32 4294967266, %v462_v30  ;;  %v524_v56 = vshrl.u32 %v19012_v43, %v509_v12 }
  0xb6   :  { %4425 = vmatpush1.bf16.msra.mxu0 %v12737_v61  ;;  %12416 = vmatpush1.bf16.msra.mxu1 %v12740_v5  ;;  %v519_v61 = vor.u32 %v518_v49, %v517_v35  ;;  %v534_v28 = vsel %vm526_vm2, %v513_v58, %v516_v59  ;;  %v11776_v30 = vadd.s32 4294967169, %v601_v57  ;;  %vm383_vm11 = vcmp.eq.s32.totalorder %v13578_v9, 0 }
  0xb7   :  { %4426 = vmatprep.subr.bf16.mxu0 %v12742_v41  ;;  %12401 = vmatprep.subr.bf16.mxu1 %v12745_v48  ;;  %v465_v55 = vshrl.u32 %v447_v36, %v463_v42  ;;  %v468_v21 = vadd.s32 127, %v467_v51  ;;  %v525_v62 = vor.u32 %v524_v56, %v523_v40  ;;  %v535_v36 = vsel %vm529_vm4, %v522_v37, 920167782 }
  0xb8   :  { %v531_v1 = vsel %vm529_vm4, %v519_v61, 2102212464  ;;  %v538_v18 = vsel %vm526_vm2, %v516_v59, %v519_v61  ;;  %vm386_vm12 = vcmp.eq.s32.totalorder %v13578_v9, 2  ;;  %v2135_v49 = vadd.s32 3, %v13582_v20 }
  0xb9   :  { %v466_v52 = vor.u32 %v465_v55, %v464_v10  ;;  %v469_v41 = vshll.u32 %v468_v21, 23  ;;  %v532_v15 = vsel %vm528_vm3, %v516_v59, %v531_v1  ;;  %v539_v23 = vsel %vm529_vm4, %v525_v62, 1326507024 }
  0xba   :  { %4427 = vmatpush1.bf16.msra.mxu0 %v12740_v5  ;;  %12417 = vmatpush1.bf16.msra.mxu1 %v12743_v54  ;;  %v12820_v50 = vpop.eup %12819  ;;  %v533_v42 = vsel %vm527_vm8, %v530_v3, %v532_v15  ;;  %v540_v10 = vsel %vm528_vm3, %v522_v37, %v539_v23  ;;  %v604_v24 = vand.u32 8388607, %v597_v60  ;;  %v607_v57 = vadd.s32 1, %v11776_v30 }
  0xbb   :  { %4428 = vmatprep.subr.bf16.mxu0 %v12745_v48  ;;  %12402 = vmatprep.subr.bf16.mxu1 %v12748_v46  ;;  %v470_v5 = vor.u32 4788187, %v469_v41  ;;  %v473_v45 = vcvt.s32.f32 %v466_v52  ;;  %v536_v48 = vsel %vm528_vm3, %v519_v61, %v535_v36  ;;  %v12822_v35 = vpop.eup %12821  ;;  %v387_v16 = vxor.u32 2147483648, %v12820_v50 }
  0xbc   :  { %v537_v12 = vsel %vm527_vm8, %v534_v28, %v536_v48  ;;  %v384_v51 = vxor.u32 2147483648, %v12822_v35  ;;  %v541_v53 = vsel %vm527_vm8, %v538_v18, %v540_v10  ;;  %v549_v56 = vmul.u32 %v13584_v17, %v533_v42 }
  0xbd   :  { %v471_v40 = vand.u32 2147483647, %v470_v5  ;;  %v13631_v31 = vmul.u32.u64.low %v13584_v17, %v537_v12  ;;  %v13632_v44 = vmul.u32.u64.high %v13584_v17, %v537_v12, %v13631_v31  ;;  %v2039_v21 = vsel %vm2037_vm6, %v387_v16, %v12822_v35 }
  0xbe   :  { %4429 = vmatpush1.bf16.msra.mxu0 %v12743_v54  ;;  %12418 = vmatpush1.bf16.msra.mxu1 %v12746_v63  ;;  %v2036_v58 = vsel %vm2034_vm7, %v12820_v50, %v384_v51  ;;  %v385_v59 = vsel %vm383_vm11, %v12820_v50, %v384_v51  ;;  %v388_v61 = vsel %vm386_vm12, %v387_v16, %v12822_v35  ;;  %vm380_vm13 = vweird.f32 %v13556_v38 }
  0xbf   :  { %4430 = vmatprep.subr.bf16.mxu0 %v12748_v46  ;;  %v474_v54 = vmul.f32 %v473_v45, %v471_v40  ;;  %v13640_v47 = vmul.u32.u64.low %v13584_v17, %v541_v53  ;;  %v13641_v46 = vmul.u32.u64.high %v13584_v17, %v541_v53, %v13640_v47  ;;  %v552_v37 = vadd.s32 1, %v13632_v44 }
  0xc0   :  { %v13655_v41 = vand.u32 3, %v13582_v20  ;;  %v13660_v62 = vand.u32 3, %v2135_v49  ;;  %vm608_vm15 = vcmp.gt.s32.totalorder %v607_v57, 0  ;;  %v389_v3 = vsel %vm382_vm10, %v385_v59, %v388_v61 }
  0xc1   :  { %v475_v55 = vxor.u32 2147483648, %v474_v54  ;;  %vm551_vm14 = vc.u32 %v13641_v46, %v13631_v31  ;;  %v605_v28 = vor.u32 8388608, %v604_v24  ;;  %v609_v0 = vsel %vm608_vm15, %v607_v57, 0 }
  0xc2   :  { %4431 = vmatpush1.bf16.msra.mxu0 %v12746_v63  ;;  %v2040_v63 = vsel %vm2033_vm9, %v2036_v58, %v2039_v21  ;;  %v553_v20 = vsel %vm551_vm14, %v552_v37, %v13632_v44  ;;  %v13675_v5 = vsel %vm380_vm13, nan, %v389_v3  ;;  %v610_v45 = vshrl.u32 %v609_v0, 5  ;;  %v12749_v58 = vld [vmem:[#allocation5 + $0x210] ss:$8 sps:$4 sm:$0xff]  }
  0xc3   :  { %v476_v52 = vsel %vm393_vm0, %v475_v55, %v474_v54  ;;  %v554_v1 = vadd.s32 %v553_v20, %v549_v56  ;;  %v13671_v36 = vsel %vm380_vm13, nan, %v2040_v63  ;;  %19239 = vst [vmem:[#allocation13_spill] sm:$0xff] %v13675_v5  ;;  %vm2141_vm0 = vcmp.eq.s32.totalorder %v13660_v62, 2  ;;  %v12751_v56 = vld [vmem:[#allocation5 + $0x214] ss:$8 sps:$4 sm:$0xff]  }
  0xc4   :  { %v479_v17 = vsel %vm13563_vm1, %v13274_v7, %v476_v52  ;;  %v611_v7 = vand.u32 31, %v609_v0  ;;  %19238 = vst [vmem:[#allocation12_spill] sm:$0xff] %v13671_v36  ;;  %vm489_vm1 = vcmp.eq.s32.totalorder %v13655_v41, 2  ;;  %v13686_v23 = vshll.u32 %v605_v28, 8  ;;  %12403 = vmatprep.subr.bf16.mxu1 %v12751_v56  ;;  %4432 = vmatprep.subr.bf16.mxu0 %v12751_v56 }
  0xc5   :  { %12823 = vcosq.f32 %v479_v17  ;;  %v555_v26 = vadd.s32 536870912, %v554_v1  ;;  %vm2138_vm2 = vcmp.eq.s32.totalorder %v13660_v62, 0  ;;  %vm486_vm3 = vcmp.eq.s32.totalorder %v13655_v41, 0  ;;  %12419 = vmatpush1.bf16.msra.mxu1 %v12749_v58 }
  0xc6   :  { %12825 = vsinq.f32 %v479_v17  ;;  %v612_v15 = vsub.s32 32, %v611_v7  ;;  %v614_v9 = vshll.u32 %v19003_v25, %v611_v7  ;;  %v617_v48 = vshll.u32 %v19001_v27, %v611_v7  ;;  %4433 = vmatpush1.bf16.msra.mxu0 %v12749_v58 }
  0xc7   :  { %v620_v50 = vshll.u32 %v18998_v29, %v611_v7  ;;  %v13682_v12 = vshrl.u32 %v555_v26, 30  ;;  %v623_v18 = vshll.u32 %v18996_v32, %v611_v7  ;;  %v626_v38 = vshll.u32 %v19035_v34, %v611_v7 }
  0xc8   :  { %v613_v30 = vshrl.u32 %v19003_v25, %v612_v15  ;;  %v615_v35 = vshrl.u32 %v19001_v27, %v612_v15  ;;  %v618_v16 = vshrl.u32 %v18998_v29, %v612_v15  ;;  %v621_v40 = vshrl.u32 %v18996_v32, %v612_v15 }
  0xc9   :  { %vm2137_vm4 = vcmp.lt.s32.totalorder %v13660_v62, 2  ;;  %vm485_vm5 = vcmp.lt.s32.totalorder %v13655_v41, 2  ;;  %v3492_v42 = vmul.f32 %v13671_v36, %v13675_v5  ;;  %v557_v10 = vshll.u32 %v13682_v12, 30 }
  0xca   :  { %v624_v51 = vshrl.u32 %v19035_v34, %v612_v15  ;;  %v627_v53 = vshrl.u32 %v19012_v43, %v612_v15  ;;  %v616_v44 = vor.u32 %v615_v35, %v614_v9  ;;  %v619_v54 = vor.u32 %v618_v16, %v617_v48  ;;  %v12754_v15 = vld [vmem:[#allocation5 + $0x204] ss:$8 sps:$4 sm:$0xff]  }
  0xcb   :  { %v622_v49 = vor.u32 %v621_v40, %v620_v50  ;;  %vm629_vm6 = vcmp.lt.s32.totalorder %v610_v45, 1  ;;  %v13703_v47 = vmul.f32 %v13675_v5, %v13675_v5  ;;  %v13705_v24 = vsub.s32 %v554_v1, %v557_v10  ;;  %12404 = vmatprep.subr.bf16.mxu1 %v12754_v15  ;;  %4434 = vmatprep.subr.bf16.mxu0 %v12754_v15 }
  0xcc   :  { %v625_v55 = vor.u32 %v624_v51, %v623_v18  ;;  %v628_v21 = vor.u32 %v627_v53, %v626_v38  ;;  %vm630_vm7 = vcmp.lt.s32.totalorder %v610_v45, 2  ;;  %vm631_vm8 = vcmp.lt.s32.totalorder %v610_v45, 3  ;;  %v13004_v51 = vld [vmem:[#allocation2 + $0x18] sm:$0xff] }
  0xcd   :  { %vm632_vm9 = vcmp.lt.s32.totalorder %v610_v45, 4  ;;  %v633_v57 = vsel %vm629_vm6, %v613_v30, %v616_v44  ;;  %v560_v59 = vsub.s32 0, %v13705_v24  ;;  %v637_v37 = vsel %vm629_vm6, %v616_v44, %v619_v54  ;;  %v12752_v30 = vld [vmem:[#allocation5 + $0x200] ss:$8 sps:$4 sm:$0xff]  }
  0xce   :  { %v634_v61 = vsel %vm632_vm9, %v622_v49, 2102212464  ;;  %v638_v52 = vsel %vm632_vm9, %v625_v55, 920167782  ;;  %v641_v3 = vsel %vm629_vm6, %v619_v54, %v622_v49  ;;  %v642_v20 = vsel %vm632_vm9, %v628_v21, 1326507024  ;;  %12420 = vmatpush1.bf16.msra.mxu1 %v12752_v30  ;;  %4435 = vmatpush1.bf16.msra.mxu0 %v12752_v30 }
  0xcf   :  { %v635_v17 = vsel %vm631_vm8, %v619_v54, %v634_v61  ;;  %v639_v63 = vsel %vm631_vm8, %v622_v49, %v638_v52  ;;  %v11773_v28 = vmin.u32 %v560_v59, %v13705_v24  ;;  %v643_v26 = vsel %vm631_vm8, %v625_v55, %v642_v20 }
  0xd0   :  { %v636_v0 = vsel %vm630_vm7, %v633_v57, %v635_v17  ;;  %v640_v7 = vsel %vm630_vm7, %v637_v37, %v639_v63  ;;  %v644_v50 = vsel %vm630_vm7, %v641_v3, %v643_v26  ;;  %vm483_vm10 = vweird.f32 %v13004_v51 }
  0xd1   :  { %v13719_v18 = vmul.u32.u64.low %v13686_v23, %v640_v7  ;;  %v13720_v38 = vmul.u32.u64.high %v13686_v23, %v640_v7, %v13719_v18  ;;  %v562_v16 = vclz %v11773_v28  ;;  %v3460_v44 = vmul.f32 %v13671_v36, %v13671_v36 }
  0xd2   :  { %v12824_v1 = vpop.eup %12823  ;;  %v13724_v40 = vmul.u32.u64.low %v13686_v23, %v644_v50  ;;  %v13725_v10 = vmul.u32.u64.high %v13686_v23, %v644_v50, %v13724_v40  ;;  %v550_v55 = vadd.s32 %v13631_v31, %v13641_v46  ;;  %v13743_v58 = vadd.f32 %v3492_v42, %v3492_v42  ;;  %v13761_v42 = vld [vmem:[#allocation2 + $0x30] sm:$0xff] }
  0xd3   :  { %v12826_v9 = vpop.eup %12825  ;;  %v490_v48 = vxor.u32 2147483648, %v12824_v1  ;;  %v11774_v21 = vadd.s32 4294967294, %v562_v16  ;;  %v652_v59 = vmul.u32 %v13686_v23, %v636_v0  ;;  %v655_v31 = vadd.s32 1, %v13720_v38 }
  0xd4   :  { %v487_v35 = vxor.u32 2147483648, %v12826_v9  ;;  %19240 = vst [vmem:[#allocation14_spill] sm:$0xff] %v13743_v58  ;;  %v13766_v17 = vsub.f32 %v13703_v47, %v3460_v44  ;;  %vm654_vm12 = vc.u32 %v13725_v10, %v13719_v18  ;;  %v580_v7 = vsub.s32 4, %v13682_v12 }
  0xd5   :  { %v2143_v45 = vsel %vm2141_vm0, %v490_v48, %v12826_v9  ;;  %v491_v53 = vsel %vm489_vm1, %v490_v48, %v12826_v9  ;;  %vm11775_vm11 = vcmp.lt.s32.totalorder %v11774_v21, 0  ;;  %v656_v26 = vsel %vm654_vm12, %v655_v31, %v13720_v38 }
  0xd6   :  { %v2140_v54 = vsel %vm2138_vm2, %v12824_v1, %v487_v35  ;;  %v488_v49 = vsel %vm486_vm3, %v12824_v1, %v487_v35  ;;  %19243 = vst [vmem:[#allocation17_spill] sm:$0xff] %v13766_v17  ;;  %v565_v63 = vsel %vm11775_vm11, 0, %v11774_v21  ;;  %v703_v47 = vand.u32 2139095040, %v13761_v42 }
  0xd7   :  { %v2144_v56 = vsel %vm2137_vm4, %v2140_v54, %v2143_v45  ;;  %v492_v57 = vsel %vm485_vm5, %v488_v49, %v491_v53  ;;  %v566_v20 = vsub.s32 32, %v565_v63  ;;  %v567_v1 = vshll.u32 %v13705_v24, %v565_v63  ;;  %v13782_v24 = vld [vmem:[#allocation2 + $0x38] sm:$0xff] }
  0xd8   :  { %v13747_v61 = vsel %vm483_vm10, nan, %v2144_v56  ;;  %v13750_v37 = vsel %vm483_vm10, nan, %v492_v57  ;;  %v570_v28 = vsub.s32 4294967266, %v565_v63  ;;  %v657_v50 = vadd.s32 %v656_v26, %v652_v59 }
  0xd9   :  { %19241 = vst [vmem:[#allocation15_spill] sm:$0xff] %v13747_v61  ;;  %19242 = vst [vmem:[#allocation16_spill] sm:$0xff] %v13750_v37  ;;  %v3403_v46 = vpack.c.bf16 %v13747_v61, %v13671_v36  ;;  %v3395_v41 = vpack.c.bf16 %v13750_v37, %v13675_v5  ;;  %v3493_v62 = vmul.f32 %v13747_v61, %v13750_v37  ;;  %vm496_vm13 = vcmp.lt.s32.totalorder %v13377_v11, 0 }
  0xda   :  { %v3445_v23 = vmul.f32 %v13750_v37, %v13750_v37  ;;  %v3461_v52 = vmul.f32 %v13747_v61, %v13747_v61  ;;  %v568_v9 = vshrl.u32 %v550_v55, %v566_v20  ;;  %v571_v48 = vadd.s32 127, %v570_v28 }
  0xdb   :  { %4045 = vmatprep.mubr.bf16.mxu1 %v3403_v46  ;;  %v13770_v3 = vadd.f32 %v3493_v62, %v3493_v62  ;;  %v658_v40 = vadd.s32 536870912, %v657_v50  ;;  %v581_v38 = vsel %vm496_vm13, %v580_v7, %v13682_v12  ;;  %v700_v51 = vand.u32 2147483647, %v13761_v42 }
  0xdc   :  { %4046 = vmatmul.mubr.bf16.gmra.mxu1 %v3395_v41  ;;  %v13773_v0 = vsub.f32 %v3445_v23, %v3461_v52  ;;  %v569_v35 = vor.u32 %v568_v9, %v567_v1  ;;  %v572_v16 = vshll.u32 %v571_v48, 23  ;;  %v704_v45 = vshrl.u32 %v703_v47, 23 }
  0xdd   :  { %19244 = vst [vmem:[#allocation18_spill] sm:$0xff] %v13770_v3  ;;  %v3531_v15 = vpack.c.bf16 %v13770_v3, %v13743_v58  ;;  %v659_v54 = vshrl.u32 %v658_v40, 30  ;;  %v806_v49 = vand.u32 2139095040, %v13782_v24  ;;  %vm13792_vm14 = vcmp.le.f32.partialorder %v494_v39, 0.7853982 }
  0xde   :  { %19245 = vst [vmem:[#allocation19_spill] sm:$0xff] %v13773_v0  ;;  %v3523_v30 = vpack.c.bf16 %v13773_v0, %v13766_v17  ;;  %v573_v53 = vor.u32 4788187, %v572_v16  ;;  %v576_v44 = vcvt.s32.f32 %v569_v35  ;;  %v11780_v55 = vadd.s32 4294967169, %v704_v45  ;;  %v12773_v17 = vld [vmem:[#allocation5 + $0x290] ss:$8 sps:$4 sm:$0xff]  }
  0xdf   :  { %3772 = vmatprep.mubr.bf16.mxu0 %v3531_v15  ;;  %v660_v57 = vshll.u32 %v659_v54, 30  ;;  %v583_v12 = vsel %vm13792_vm14, 0, %v581_v38  ;;  %v807_v31 = vshrl.u32 %v806_v49, 23  ;;  %v707_v62 = vand.u32 8388607, %v700_v51 }
  0xe0   :  { %3773 = vmatmul.mubr.bf16.gmra.mxu0 %v3523_v30  ;;  %v574_v56 = vand.u32 2147483647, %v573_v53  ;;  %v710_v59 = vadd.s32 1, %v11780_v55  ;;  %v683_v23 = vsub.s32 4, %v659_v54  ;;  %v2239_v63 = vadd.s32 3, %v583_v12 }
  0xe1   :  { %v13798_v41 = vsub.s32 %v657_v50, %v660_v57  ;;  %vm13805_vm0 = vcmp.le.f32.partialorder %v597_v60, 0.7853982  ;;  %vm599_vm1 = vcmp.lt.s32.totalorder %v13569_v14, 0  ;;  %v803_v1 = vand.u32 2147483647, %v13782_v24 }
  0xe2   :  { %v577_v46 = vmul.f32 %v576_v44, %v574_v56  ;;  %vm711_vm15 = vcmp.gt.s32.totalorder %v710_v59, 0  ;;  %v11784_v28 = vadd.s32 4294967169, %v807_v31  ;;  %v708_v47 = vor.u32 8388608, %v707_v62 }
  0xe3   :  { %v663_v39 = vsub.s32 0, %v13798_v41  ;;  %v712_v15 = vsel %vm711_vm15, %v710_v59, 0  ;;  %v684_v60 = vsel %vm599_vm1, %v683_v23, %v659_v54  ;;  %v13819_v48 = vand.u32 3, %v583_v12 }
  0xe4   :  { %v578_v52 = vxor.u32 2147483648, %v577_v46  ;;  %v13821_v50 = vshrl.u32 %v712_v15, 5  ;;  %v653_v30 = vadd.s32 %v13719_v18, %v13725_v10  ;;  %v13825_v16 = vand.u32 3, %v2239_v63 }
  0xe5   :  { %v11777_v26 = vmin.u32 %v663_v39, %v13798_v41  ;;  %v714_v40 = vand.u32 31, %v712_v15  ;;  %v13829_v38 = vand.u32 8388607, %v803_v1  ;;  %v13833_v53 = vsel %vm13805_vm0, 0, %v684_v60 }
  0xe6   :  { %v579_v7 = vsel %vm496_vm13, %v578_v52, %v577_v46  ;;  %vm732_vm2 = vcmp.lt.s32.totalorder %v13821_v50, 1  ;;  %v13836_v44 = vshll.u32 %v708_v47, 8  ;;  %vm733_vm3 = vcmp.lt.s32.totalorder %v13821_v50, 2 }
  0xe7   :  { %v582_v9 = vsel %vm13792_vm14, %v13377_v11, %v579_v7  ;;  %v665_v35 = vclz %v11777_v26  ;;  %v813_v11 = vadd.s32 1, %v11784_v28  ;;  %v715_v18 = vsub.s32 32, %v714_v40 }
  0xe8   :  { %12827 = vcosq.f32 %v582_v9  ;;  %v717_v10 = vshll.u32 %v19003_v25, %v714_v40  ;;  %v720_v54 = vshll.u32 %v19001_v27, %v714_v40  ;;  %v723_v49 = vshll.u32 %v18998_v29, %v714_v40 }
  0xe9   :  { %12829 = vsinq.f32 %v582_v9  ;;  %v11778_v45 = vadd.s32 4294967294, %v665_v35  ;;  %v726_v55 = vshll.u32 %v18996_v32, %v714_v40  ;;  %v729_v21 = vshll.u32 %v19035_v34, %v714_v40 }
  0xea   :  { %v718_v57 = vshrl.u32 %v19001_v27, %v715_v18  ;;  %v721_v12 = vshrl.u32 %v18998_v29, %v715_v18  ;;  %vm814_vm5 = vcmp.gt.s32.totalorder %v813_v11, 0  ;;  %v724_v62 = vshrl.u32 %v18996_v32, %v715_v18 }
  0xeb   :  { %vm11779_vm4 = vcmp.lt.s32.totalorder %v11778_v45, 0  ;;  %v727_v39 = vshrl.u32 %v19035_v34, %v715_v18  ;;  %v730_v63 = vshrl.u32 %v19012_v43, %v715_v18  ;;  %vm2242_vm6 = vcmp.eq.s32.totalorder %v13825_v16, 0 }
  0xec   :  { %v668_v56 = vsel %vm11779_vm4, 0, %v11778_v45  ;;  %v719_v23 = vor.u32 %v718_v57, %v717_v10  ;;  %v722_v52 = vor.u32 %v721_v12, %v720_v54  ;;  %vm2245_vm7 = vcmp.eq.s32.totalorder %v13825_v16, 2 }
  0xed   :  { %v669_v59 = vsub.s32 32, %v668_v56  ;;  %v670_v31 = vshll.u32 %v13798_v41, %v668_v56  ;;  %v673_v46 = vsub.s32 4294967266, %v668_v56  ;;  %v725_v26 = vor.u32 %v724_v62, %v723_v49 }
  0xee   :  { %vm735_vm8 = vcmp.lt.s32.totalorder %v13821_v50, 4  ;;  %vm592_vm9 = vcmp.eq.s32.totalorder %v13819_v48, 2  ;;  %v716_v41 = vshrl.u32 %v19003_v25, %v715_v18  ;;  %v728_v47 = vor.u32 %v727_v39, %v726_v55 }
  0xef   :  { %v671_v28 = vshrl.u32 %v653_v30, %v669_v59  ;;  %v674_v7 = vadd.s32 127, %v673_v46  ;;  %v731_v15 = vor.u32 %v730_v63, %v729_v21  ;;  %vm734_vm10 = vcmp.lt.s32.totalorder %v13821_v50, 3 }
  0xf0   :  { %v737_v35 = vsel %vm735_vm8, %v725_v26, 2102212464  ;;  %v815_v30 = vsel %vm814_vm5, %v813_v11, 0  ;;  %vm2241_vm11 = vcmp.lt.s32.totalorder %v13825_v16, 2  ;;  %vm589_vm12 = vcmp.eq.s32.totalorder %v13819_v48, 0 }
  0xf1   :  { %v672_v9 = vor.u32 %v671_v28, %v670_v31  ;;  %v675_v60 = vshll.u32 %v674_v7, 23  ;;  %v740_v40 = vsel %vm732_vm2, %v719_v23, %v722_v52  ;;  %v741_v45 = vsel %vm735_vm8, %v728_v47, 920167782  ;;  %v13882_v7 = vld [vmem:[#allocation2 + $0x40] sm:$0xff] }
  0xf2   :  { %v744_v18 = vsel %vm732_vm2, %v722_v52, %v725_v26  ;;  %v745_v10 = vsel %vm735_vm8, %v731_v15, 1326507024  ;;  %v742_v55 = vsel %vm734_vm10, %v725_v26, %v741_v45  ;;  %v811_v21 = vor.u32 8388608, %v13829_v38  ;;  %v13005_v45 = vld [vmem:[#allocation2 + $0x20] sm:$0xff] }
  0xf3   :  { %v676_v54 = vor.u32 4788187, %v675_v60  ;;  %v679_v49 = vcvt.s32.f32 %v672_v9  ;;  %v736_v56 = vsel %vm732_vm2, %v716_v41, %v719_v23  ;;  %v738_v57 = vsel %vm734_vm10, %v722_v52, %v737_v35 }
  0xf4   :  { %v746_v12 = vsel %vm734_vm10, %v728_v47, %v745_v10  ;;  %v817_v59 = vand.u32 31, %v815_v30  ;;  %v2343_v62 = vadd.s32 3, %v13833_v53  ;;  %vm588_vm13 = vcmp.lt.s32.totalorder %v13819_v48, 2 }
  0xf5   :  { %v12828_v11 = vpop.eup %12827  ;;  %v677_v46 = vand.u32 2147483647, %v676_v54  ;;  %v743_v38 = vsel %vm733_vm3, %v740_v40, %v742_v55  ;;  %v747_v39 = vsel %vm733_vm3, %v744_v18, %v746_v12  ;;  %v739_v41 = vsel %vm733_vm3, %v736_v56, %v738_v57 }
  0xf6   :  { %v12830_v31 = vpop.eup %12829  ;;  %v593_v63 = vxor.u32 2147483648, %v12828_v11  ;;  %v13879_v52 = vmul.u32.u64.low %v13836_v44, %v747_v39  ;;  %v13880_v28 = vmul.u32.u64.high %v13836_v44, %v747_v39, %v13879_v52  ;;  %v13886_v47 = vshrl.u32 %v815_v30, 5 }
  0xf7   :  { %v590_v23 = vxor.u32 2147483648, %v12830_v31  ;;  %v680_v26 = vmul.f32 %v679_v49, %v677_v46  ;;  %v18995_v15 = vand.u32 2147483647, %v13882_v7  ;;  %v818_v35 = vsub.s32 32, %v817_v59 }
  0xf8   :  { %v13890_v9 = vmul.u32.u64.low %v13836_v44, %v743_v38  ;;  %v13891_v60 = vmul.u32.u64.high %v13836_v44, %v743_v38, %v13890_v9  ;;  %v13894_v40 = vshll.u32 %v811_v21, 8  ;;  %vm586_vm14 = vweird.f32 %v13005_v45 }
  0xf9   :  { %v681_v18 = vxor.u32 2147483648, %v680_v26  ;;  %v13896_v10 = vand.u32 3, %v2343_v62  ;;  %v13899_v50 = vand.u32 3, %v13833_v53  ;;  %v909_v30 = vand.u32 2139095040, %v13882_v7 }
  0xfa   :  { %v2244_v54 = vsel %vm2242_vm6, %v12828_v11, %v590_v23  ;;  %v2247_v49 = vsel %vm2245_vm7, %v593_v63, %v12830_v31  ;;  %v755_v55 = vmul.u32 %v13836_v44, %v739_v41  ;;  %v820_v21 = vshll.u32 %v19003_v25, %v817_v59 }
  0xfb   :  { %v682_v56 = vsel %vm599_vm1, %v681_v18, %v680_v26  ;;  %v594_v57 = vsel %vm592_vm9, %v593_v63, %v12830_v31  ;;  %vm757_vm15 = vc.u32 %v13880_v28, %v13890_v9  ;;  %vm835_vm2 = vcmp.lt.s32.totalorder %v13886_v47, 1 }
  0xfc   :  { %v685_v53 = vsel %vm13805_vm0, %v13569_v14, %v682_v56  ;;  %v758_v12 = vadd.s32 1, %v13891_v60  ;;  %v821_v44 = vshrl.u32 %v19001_v27, %v818_v35  ;;  %v823_v46 = vshll.u32 %v19001_v27, %v817_v59 }
  0xfd   :  { %12831 = vcosq.f32 %v685_v53  ;;  %v2248_v62 = vsel %vm2241_vm11, %v2244_v54, %v2247_v49  ;;  %v591_v31 = vsel %vm589_vm12, %v12828_v11, %v590_v23  ;;  %v824_v38 = vshrl.u32 %v18998_v29, %v818_v35 }
  0xfe   :  { %12833 = vsinq.f32 %v685_v53  ;;  %v759_v39 = vsel %vm757_vm15, %v758_v12, %v13891_v60  ;;  %v822_v20 = vor.u32 %v821_v44, %v820_v21  ;;  %v826_v63 = vshll.u32 %v18998_v29, %v817_v59 }
  0xff   :  { %v760_v52 = vadd.s32 %v759_v39, %v755_v55  ;;  %v825_v26 = vor.u32 %v824_v38, %v823_v46  ;;  %v827_v41 = vshrl.u32 %v18996_v32, %v818_v35  ;;  %v829_v18 = vshll.u32 %v18996_v32, %v817_v59 }
 0x100   :  { %v595_v16 = vsel %vm588_vm13, %v591_v31, %v594_v57  ;;  %v830_v54 = vshrl.u32 %v19035_v34, %v818_v35  ;;  %v832_v11 = vshll.u32 %v19035_v34, %v817_v59  ;;  %v833_v23 = vshrl.u32 %v19012_v43, %v818_v35 }
 0x101   :  { %v761_v49 = vadd.s32 536870912, %v760_v52  ;;  %v819_v60 = vshrl.u32 %v19003_v25, %v818_v35  ;;  %v828_v21 = vor.u32 %v827_v41, %v826_v63  ;;  %vm838_vm0 = vcmp.lt.s32.totalorder %v13886_v47, 4 }
 0x102   :  { %v831_v55 = vor.u32 %v830_v54, %v829_v18  ;;  %v834_v56 = vor.u32 %v833_v23, %v832_v11  ;;  %vm836_vm1 = vcmp.lt.s32.totalorder %v13886_v47, 2  ;;  %vm837_vm3 = vcmp.lt.s32.totalorder %v13886_v47, 3  ;;  %v12755_v23 = vld [vmem:[#allocation5 + $0x2f0] ss:$8 sps:$4 sm:$0xff]  }
 0x103   :  { %v13939_v48 = vshrl.u32 %v761_v49, 30  ;;  %v840_v57 = vsel %vm838_vm0, %v828_v21, 2102212464  ;;  %v843_v59 = vsel %vm835_vm2, %v822_v20, %v825_v26  ;;  %v910_v53 = vshrl.u32 %v909_v30, 23 }
 0x104   :  { %v13944_v12 = vsel %vm586_vm14, nan, %v2248_v62  ;;  %vm691_vm4 = vcmp.lt.s32.totalorder %v13899_v50, 2  ;;  %v844_v35 = vsel %vm838_vm0, %v831_v55, 920167782  ;;  %v847_v44 = vsel %vm835_vm2, %v825_v26, %v828_v21 }
 0x105   :  { %19250 = vst [vmem:[#allocation20_spill] sm:$0xff] %v13944_v12  ;;  %v848_v46 = vsel %vm838_vm0, %v834_v56, 1326507024  ;;  %vm689_vm5 = vweird.f32 %v13569_v14  ;;  %v13951_v31 = vsel %vm586_vm14, nan, %v595_v16  ;;  %v763_v38 = vshll.u32 %v13939_v48, 30 }
 0x106   :  { %19251 = vst [vmem:[#allocation21_spill] sm:$0xff] %v13951_v31  ;;  %v839_v30 = vsel %vm835_vm2, %v819_v60, %v822_v20  ;;  %v845_v62 = vsel %vm837_vm3, %v828_v21, %v844_v35  ;;  %v841_v39 = vsel %vm837_vm3, %v825_v26, %v840_v57  ;;  %v849_v41 = vsel %vm837_vm3, %v831_v55, %v848_v46  ;;  %v12757_v16 = vld [vmem:[#allocation5 + $0x2f4] ss:$8 sps:$4 sm:$0xff]   ;;  %v12760_v46 = vld [vmem:[#allocation5 + $0x2e4] ss:$8 sps:$4 sm:$0xff]  }
 0x107   :  { %v846_v63 = vsel %vm836_vm1, %v843_v59, %v845_v62  ;;  %v11788_v45 = vadd.s32 4294967169, %v910_v53  ;;  %vm692_vm6 = vcmp.eq.s32.totalorder %v13899_v50, 0  ;;  %vm695_vm7 = vcmp.eq.s32.totalorder %v13899_v50, 2  ;;  %12405 = vmatprep.subr.bf16.mxu1 %v12757_v16  ;;  %4436 = vmatprep.subr.bf16.mxu0 %v12757_v16 }
 0x108   :  { %v13966_v18 = vsub.s32 %v760_v52, %v763_v38  ;;  %v850_v20 = vsel %vm836_vm1, %v847_v44, %v849_v41  ;;  %vm2345_vm8 = vcmp.lt.s32.totalorder %v13896_v10, 2  ;;  %v3494_v26 = vmul.f32 %v13944_v12, %v13951_v31  ;;  %12421 = vmatpush2.bf16.msra.mxu1 %v12755_v23  ;;  %4437 = vmatpush2.bf16.msra.mxu0 %v12755_v23 }
 0x109   :  { %v13974_v54 = vmul.u32.u64.low %v13894_v40, %v850_v20  ;;  %v13975_v11 = vmul.u32.u64.high %v13894_v40, %v850_v20, %v13974_v54  ;;  %v842_v52 = vsel %vm836_vm1, %v839_v30, %v841_v39  ;;  %vm2349_vm9 = vcmp.eq.s32.totalorder %v13896_v10, 2  ;;  %v12758_v39 = vld [vmem:[#allocation5 + $0x2e0] ss:$8 sps:$4 sm:$0xff]   ;;  %12406 = vmatprep.subr.bf16.mxu1 %v12760_v46  ;;  %4438 = vmatprep.subr.bf16.mxu0 %v12760_v46 }
 0x10a   :  { %v766_v49 = vsub.s32 0, %v13966_v18  ;;  %v13981_v60 = vmul.u32.u64.low %v13894_v40, %v846_v63  ;;  %v13982_v21 = vmul.u32.u64.high %v13894_v40, %v846_v63, %v13981_v60  ;;  %v12832_v55 = vpop.eup %12831  ;;  %v3446_v56 = vmul.f32 %v13951_v31, %v13951_v31 }
 0x10b   :  { %v3462_v57 = vmul.f32 %v13944_v12, %v13944_v12  ;;  %v916_v59 = vadd.s32 1, %v11788_v45  ;;  %v12834_v47 = vpop.eup %12833  ;;  %v696_v53 = vxor.u32 2147483648, %v12832_v55  ;;  %vm2346_vm10 = vcmp.eq.s32.totalorder %v13896_v10, 0 }
 0x10c   :  { %v756_v35 = vadd.s32 %v13890_v9, %v13880_v28  ;;  %v11781_v44 = vmin.u32 %v766_v49, %v13966_v18  ;;  %v693_v38 = vxor.u32 2147483648, %v12834_v47  ;;  %v13994_v30 = vadd.f32 %v3494_v26, %v3494_v26  ;;  %12422 = vmatpush2.bf16.msra.mxu1 %v12758_v39  ;;  %4439 = vmatpush2.bf16.msra.mxu0 %v12758_v39 }
 0x10d   :  { %v858_v62 = vmul.u32 %v13894_v40, %v842_v52  ;;  %vm860_vm11 = vc.u32 %v13975_v11, %v13981_v60  ;;  %v2351_v63 = vsel %vm2349_vm9, %v696_v53, %v12834_v47  ;;  %v697_v41 = vsel %vm695_vm7, %v696_v53, %v12834_v47 }
 0x10e   :  { %19252 = vst [vmem:[#allocation22_spill] sm:$0xff] %v13994_v30  ;;  %v768_v45 = vclz %v11781_v44  ;;  %v861_v28 = vadd.s32 1, %v13982_v21  ;;  %v2348_v9 = vsel %vm2346_vm10, %v12832_v55, %v693_v38  ;;  %v694_v40 = vsel %vm692_vm6, %v12832_v55, %v693_v38 }
 0x10f   :  { %v14008_v20 = vsub.f32 %v3446_v56, %v3462_v57  ;;  %vm917_vm12 = vcmp.gt.s32.totalorder %v916_v59, 0  ;;  %v2352_v16 = vsel %vm2345_vm8, %v2348_v9, %v2351_v63  ;;  %v698_v26 = vsel %vm691_vm4, %v694_v40, %v697_v41 }
 0x110   :  { %v11782_v54 = vadd.s32 4294967294, %v768_v45  ;;  %v862_v23 = vsel %vm860_vm11, %v861_v28, %v13982_v21  ;;  %v14020_v49 = vsel %vm689_vm5, nan, %v2352_v16  ;;  %v14024_v52 = vsel %vm689_vm5, nan, %v698_v26 }
 0x111   :  { %19253 = vst [vmem:[#allocation23_spill] sm:$0xff] %v14008_v20  ;;  %19254 = vst [vmem:[#allocation24_spill] sm:$0xff] %v14020_v49  ;;  %v786_v10 = vsub.s32 4, %v13939_v48  ;;  %v863_v55 = vadd.s32 %v862_v23, %v858_v62  ;;  %v3404_v50 = vpack.c.bf16 %v14020_v49, %v13944_v12  ;;  %v3396_v56 = vpack.c.bf16 %v14024_v52, %v13951_v31 }
 0x112   :  { %19255 = vst [vmem:[#allocation25_spill] sm:$0xff] %v14024_v52  ;;  %v3495_v21 = vmul.f32 %v14020_v49, %v14024_v52  ;;  %v3447_v57 = vmul.f32 %v14024_v52, %v14024_v52  ;;  %v3463_v14 = vmul.f32 %v14020_v49, %v14020_v49  ;;  %vm11783_vm13 = vcmp.lt.s32.totalorder %v11782_v54, 0  ;;  %v12766_v49 = vld [vmem:[#allocation5 + $0x2c4] ss:$8 sps:$4 sm:$0xff]  }
 0x113   :  { %v864_v47 = vadd.s32 536870912, %v863_v55  ;;  %v918_v53 = vsel %vm917_vm12, %v916_v59, 0  ;;  %4055 = vmatprep.mubr.bf16.mxu1 %v3404_v50  ;;  %vm702_vm14 = vcmp.lt.s32.totalorder %v13761_v42, 0  ;;  %v771_v46 = vsel %vm11783_vm13, 0, %v11782_v54 }
 0x114   :  { %v14038_v44 = vadd.f32 %v3495_v21, %v3495_v21  ;;  %4056 = vmatmul.mubr.bf16.gmra.mxu1 %v3396_v56  ;;  %v14041_v38 = vsub.f32 %v3447_v57, %v3463_v14  ;;  %v772_v62 = vsub.s32 32, %v771_v46  ;;  %v773_v39 = vshll.u32 %v13966_v18, %v771_v46 }
 0x115   :  { %v776_v63 = vsub.s32 4294967266, %v771_v46  ;;  %v14046_v45 = vshrl.u32 %v864_v47, 30  ;;  %v913_v59 = vand.u32 8388607, %v18995_v15  ;;  %v920_v28 = vand.u32 31, %v918_v53 }
 0x116   :  { %19256 = vst [vmem:[#allocation26_spill] sm:$0xff] %v14038_v44  ;;  %19257 = vst [vmem:[#allocation27_spill] sm:$0xff] %v14041_v38  ;;  %v3532_v41 = vpack.c.bf16 %v14038_v44, %v13994_v30  ;;  %v3524_v9 = vpack.c.bf16 %v14041_v38, %v14008_v20  ;;  %v774_v40 = vshrl.u32 %v756_v35, %v772_v62  ;;  %vm14058_vm15 = vcmp.le.f32.partialorder %v700_v51, 0.7853982  ;;  %v12775_v30 = vld [vmem:[#allocation5 + $0x294] ss:$8 sps:$4 sm:$0xff]  }
 0x117   :  { %v777_v16 = vadd.s32 127, %v776_v63  ;;  %v787_v26 = vsel %vm702_vm14, %v786_v10, %v13939_v48  ;;  %v866_v18 = vshll.u32 %v14046_v45, 30  ;;  %v921_v54 = vsub.s32 32, %v920_v28 }
 0x118   :  { %3782 = vmatprep.mubr.bf16.mxu0 %v3532_v41  ;;  %v775_v50 = vor.u32 %v774_v40, %v773_v39  ;;  %v789_v35 = vsel %vm14058_vm15, 0, %v787_v26  ;;  %v914_v57 = vor.u32 8388608, %v913_v59  ;;  %v14066_v48 = vshrl.u32 %v918_v53, 5 }
 0x119   :  { %3783 = vmatmul.mubr.bf16.gmra.mxu0 %v3524_v9  ;;  %v778_v56 = vshll.u32 %v777_v16, 23  ;;  %v14064_v21 = vsub.s32 %v863_v55, %v866_v18  ;;  %v923_v47 = vshll.u32 %v19003_v25, %v920_v28  ;;  %v926_v46 = vshll.u32 %v19001_v27, %v920_v28 }
 0x11a   :  { %v782_v14 = vcvt.s32.f32 %v775_v50  ;;  %v924_v62 = vshrl.u32 %v19001_v27, %v921_v54  ;;  %v927_v39 = vshrl.u32 %v18998_v29, %v921_v54  ;;  %v929_v63 = vshll.u32 %v18998_v29, %v920_v28 }
 0x11b   :  { %v779_v10 = vor.u32 4788187, %v778_v56  ;;  %v869_v51 = vsub.s32 0, %v14064_v21  ;;  %v2447_v55 = vadd.s32 3, %v789_v35  ;;  %v930_v59 = vshrl.u32 %v18996_v32, %v921_v54 }
 0x11c   :  { %v932_v53 = vshll.u32 %v18996_v32, %v920_v28  ;;  %v859_v9 = vadd.s32 %v13981_v60, %v13975_v11  ;;  %vm938_vm2 = vcmp.lt.s32.totalorder %v14066_v48, 1  ;;  %v14080_v16 = vshll.u32 %v914_v57, 8 }
 0x11d   :  { %v780_v41 = vand.u32 2147483647, %v779_v10  ;;  %v11785_v40 = vmin.u32 %v869_v51, %v14064_v21  ;;  %vm805_vm0 = vcmp.lt.s32.totalorder %v13782_v24, 0  ;;  %v922_v18 = vshrl.u32 %v19003_v25, %v921_v54 }
 0x11e   :  { %v933_v50 = vshrl.u32 %v19035_v34, %v921_v54  ;;  %vm939_vm1 = vcmp.lt.s32.totalorder %v14066_v48, 2  ;;  %v925_v10 = vor.u32 %v924_v62, %v923_v47  ;;  %v928_v15 = vor.u32 %v927_v39, %v926_v46 }
 0x11f   :  { %v783_v26 = vmul.f32 %v782_v14, %v780_v41  ;;  %v871_v56 = vclz %v11785_v40  ;;  %v931_v32 = vor.u32 %v930_v59, %v929_v63  ;;  %v935_v51 = vshll.u32 %v19035_v34, %v920_v28 }
 0x120   :  { %v934_v60 = vor.u32 %v933_v50, %v932_v53  ;;  %v936_v57 = vshrl.u32 %v19012_v43, %v921_v54  ;;  %vm14090_vm3 = vcmp.le.f32.partialorder %v803_v1, 0.7853982  ;;  %v889_v29 = vsub.s32 4, %v14046_v45 }
 0x121   :  { %v784_v11 = vxor.u32 2147483648, %v783_v26  ;;  %v11786_v41 = vadd.s32 4294967294, %v871_v56  ;;  %vm940_vm4 = vcmp.lt.s32.totalorder %v14066_v48, 3  ;;  %vm941_vm5 = vcmp.lt.s32.totalorder %v14066_v48, 4 }
 0x122   :  { %v937_v46 = vor.u32 %v936_v57, %v935_v51  ;;  %v942_v28 = vsel %vm938_vm2, %v922_v18, %v925_v10  ;;  %v943_v1 = vsel %vm941_vm5, %v931_v32, 2102212464  ;;  %v946_v62 = vsel %vm938_vm2, %v925_v10, %v928_v15 }
 0x123   :  { %v785_v47 = vsel %vm702_vm14, %v784_v11, %v783_v26  ;;  %vm11787_vm6 = vcmp.lt.s32.totalorder %v11786_v41, 0  ;;  %v947_v39 = vsel %vm941_vm5, %v934_v60, 920167782  ;;  %v944_v59 = vsel %vm940_vm4, %v928_v15, %v943_v1 }
 0x124   :  { %v788_v54 = vsel %vm14058_vm15, %v13761_v42, %v785_v47  ;;  %v874_v63 = vsel %vm11787_vm6, 0, %v11786_v41  ;;  %v948_v53 = vsel %vm940_vm4, %v931_v32, %v947_v39  ;;  %v14115_v18 = vand.u32 3, %v789_v35  ;;  %v14126_v41 = vld [vmem:[#allocation2 + $0x48] sm:$0xff] }
 0x125   :  { %12835 = vcosq.f32 %v788_v54  ;;  %v875_v40 = vsub.s32 32, %v874_v63  ;;  %v876_v23 = vshll.u32 %v14064_v21, %v874_v63  ;;  %v879_v26 = vsub.s32 4294967266, %v874_v63 }
 0x126   :  { %12837 = vsinq.f32 %v788_v54  ;;  %v949_v50 = vsel %vm939_vm1, %v946_v62, %v948_v53  ;;  %v950_v56 = vsel %vm938_vm2, %v928_v15, %v931_v32  ;;  %v951_v10 = vsel %vm941_vm5, %v937_v46, 1326507024 }
 0x127   :  { %v877_v11 = vshrl.u32 %v859_v9, %v875_v40  ;;  %v880_v51 = vadd.s32 127, %v879_v26  ;;  %v890_v57 = vsel %vm805_vm0, %v889_v29, %v14046_v45  ;;  %v952_v35 = vsel %vm940_vm4, %v934_v60, %v951_v10  ;;  %v14142_v45 = vld [vmem:[#allocation2 + $0x50] sm:$0xff] }
 0x128   :  { %v945_v21 = vsel %vm939_vm1, %v942_v28, %v944_v59  ;;  %v953_v32 = vsel %vm939_vm1, %v950_v56, %v952_v35  ;;  %v14135_v15 = vmul.u32.u64.low %v14080_v16, %v949_v50  ;;  %v14136_v47 = vmul.u32.u64.high %v14080_v16, %v949_v50, %v14135_v15 }
 0x129   :  { %v878_v9 = vor.u32 %v877_v11, %v876_v23  ;;  %v881_v46 = vshll.u32 %v880_v51, 23  ;;  %v14139_v1 = vmul.u32.u64.low %v14080_v16, %v953_v32  ;;  %v14140_v29 = vmul.u32.u64.high %v14080_v16, %v953_v32, %v14139_v1 }
 0x12a   :  { %v892_v60 = vsel %vm14090_vm3, 0, %v890_v57  ;;  %v2448_v54 = vand.u32 3, %v2447_v55  ;;  %v19000_v28 = vand.u32 2147483647, %v14126_v41  ;;  %v1012_v48 = vand.u32 2139095040, %v14126_v41 }
 0x12b   :  { %v882_v62 = vor.u32 4788187, %v881_v46  ;;  %v885_v39 = vcvt.s32.f32 %v878_v9  ;;  %v961_v63 = vmul.u32 %v14080_v16, %v945_v21  ;;  %vm792_vm7 = vweird.f32 %v13761_v42 }
 0x12c   :  { %v964_v59 = vadd.s32 1, %v14136_v47  ;;  %v1013_v53 = vshrl.u32 %v1012_v48, 23  ;;  %v1115_v40 = vand.u32 2139095040, %v14142_v45  ;;  %v2551_v26 = vadd.s32 3, %v892_v60 }
 0x12d   :  { %v883_v23 = vand.u32 2147483647, %v882_v62  ;;  %vm794_vm8 = vcmp.lt.s32.totalorder %v14115_v18, 2  ;;  %vm963_vm9 = vc.u32 %v14140_v29, %v14135_v15  ;;  %vm2449_vm10 = vcmp.lt.s32.totalorder %v2448_v54, 2 }
 0x12e   :  { %v965_v55 = vsel %vm963_vm9, %v964_v59, %v14136_v47  ;;  %v11792_v50 = vadd.s32 4294967169, %v1013_v53  ;;  %v1016_v16 = vand.u32 8388607, %v19000_v28  ;;  %vm2450_vm11 = vcmp.eq.s32.totalorder %v2448_v54, 0 }
 0x12f   :  { %v886_v56 = vmul.f32 %v885_v39, %v883_v23  ;;  %v966_v10 = vadd.s32 %v965_v55, %v961_v63  ;;  %v1116_v11 = vshrl.u32 %v1115_v40, 23  ;;  %vm2453_vm12 = vcmp.eq.s32.totalorder %v2448_v54, 2 }
 0x130   :  { %vm795_vm13 = vcmp.eq.s32.totalorder %v14115_v18, 0  ;;  %vm798_vm14 = vcmp.eq.s32.totalorder %v14115_v18, 2  ;;  %v1019_v51 = vadd.s32 1, %v11792_v50  ;;  %v14159_v21 = vand.u32 3, %v2551_v26 }
 0x131   :  { %v887_v35 = vxor.u32 2147483648, %v886_v56  ;;  %v14161_v32 = vand.u32 3, %v892_v60  ;;  %v967_v47 = vadd.s32 536870912, %v966_v10  ;;  %v14164_v1 = vadd.s32 %v14135_v15, %v14140_v29 }
 0x132   :  { %v12836_v57 = vpop.eup %12835  ;;  %v1017_v48 = vor.u32 8388608, %v1016_v16  ;;  %vm1020_vm15 = vcmp.gt.s32.totalorder %v1019_v51, 0  ;;  %v11796_v59 = vadd.s32 4294967169, %v1116_v11  ;;  %vm2557_vm2 = vcmp.eq.s32.totalorder %v14159_v21, 2 }
 0x133   :  { %v12838_v9 = vpop.eup %12837  ;;  %v799_v46 = vxor.u32 2147483648, %v12836_v57  ;;  %v888_v39 = vsel %vm805_vm0, %v887_v35, %v886_v56  ;;  %v14168_v63 = vshrl.u32 %v967_v47, 30  ;;  %v1021_v15 = vsel %vm1020_vm15, %v1019_v51, 0 }
 0x134   :  { %v796_v62 = vxor.u32 2147483648, %v12838_v9  ;;  %v891_v60 = vsel %vm14090_vm3, %v13782_v24, %v888_v39  ;;  %v14183_v50 = vshll.u32 %v1017_v48, 8  ;;  %v1023_v51 = vand.u32 31, %v1021_v15 }
 0x135   :  { %v2455_v53 = vsel %vm2453_vm12, %v799_v46, %v12838_v9  ;;  %v800_v40 = vsel %vm798_vm14, %v799_v46, %v12838_v9  ;;  %12839 = vcosq.f32 %v891_v60  ;;  %v969_v26 = vshll.u32 %v14168_v63, 30 }
 0x136   :  { %v2452_v29 = vsel %vm2450_vm11, %v12836_v57, %v796_v62  ;;  %v797_v23 = vsel %vm795_vm13, %v12836_v57, %v796_v62  ;;  %12841 = vsinq.f32 %v891_v60  ;;  %v14201_v35 = vadd.s32 1, %v11796_v59  ;;  %v12763_v60 = vld [vmem:[#allocation5 + $0x2d4] ss:$8 sps:$4 sm:$0xff]  }
 0x137   :  { %v2456_v55 = vsel %vm2449_vm10, %v2452_v29, %v2455_v53  ;;  %v801_v14 = vsel %vm794_vm8, %v797_v23, %v800_v40  ;;  %v14193_v11 = vsub.s32 %v966_v10, %v969_v26  ;;  %v14204_v9 = vshrl.u32 %v1021_v15, 5  ;;  %v12761_v23 = vld [vmem:[#allocation5 + $0x2d0] ss:$8 sps:$4 sm:$0xff]   ;;  %12407 = vmatprep.subr.bf16.mxu1 %v12763_v60  ;;  %4440 = vmatprep.subr.bf16.mxu0 %v12763_v60 }
 0x138   :  { %v14187_v16 = vsel %vm792_vm7, nan, %v2456_v55  ;;  %v14191_v56 = vsel %vm792_vm7, nan, %v801_v14  ;;  %v1024_v42 = vsub.s32 32, %v1023_v51  ;;  %v1026_v10 = vshll.u32 %v19003_v25, %v1023_v51  ;;  %12423 = vmatpush2.bf16.msra.mxu1 %v12761_v23  ;;  %4441 = vmatpush2.bf16.msra.mxu0 %v12761_v23 }
 0x139   :  { %19262 = vst [vmem:[#allocation28_spill] sm:$0xff] %v14187_v16  ;;  %19263 = vst [vmem:[#allocation29_spill] sm:$0xff] %v14191_v56  ;;  %v3496_v54 = vmul.f32 %v14187_v16, %v14191_v56  ;;  %v3448_v18 = vmul.f32 %v14191_v56, %v14191_v56  ;;  %v3464_v57 = vmul.f32 %v14187_v16, %v14187_v16  ;;  %v972_v47 = vsub.s32 0, %v14193_v11 }
 0x13a   :  { %vm901_vm0 = vcmp.eq.s32.totalorder %v14161_v32, 2  ;;  %v1029_v62 = vshll.u32 %v19001_v27, %v1023_v51  ;;  %v19266_v39 = vmov 2131351028   ;;  %vm2554_vm1 = vcmp.eq.s32.totalorder %v14159_v21, 0  ;;  %12408 = vmatprep.subr.bf16.mxu1 %v12766_v49  ;;  %4442 = vmatprep.subr.bf16.mxu0 %v12766_v49 }
 0x13b   :  { %v14209_v46 = vadd.f32 %v3496_v54, %v3496_v54  ;;  %v14211_v48 = vsub.f32 %v3448_v18, %v3464_v57  ;;  %v1032_v59 = vshll.u32 %v19266_v39, %v1023_v51  ;;  %vm898_vm3 = vcmp.eq.s32.totalorder %v14161_v32, 0 }
 0x13c   :  { %v11789_v53 = vmin.u32 %v972_v47, %v14193_v11  ;;  %v1025_v40 = vshrl.u32 %v19003_v25, %v1024_v42  ;;  %v1027_v15 = vshrl.u32 %v19001_v27, %v1024_v42  ;;  %v1030_v29 = vshrl.u32 %v19266_v39, %v1024_v42 }
 0x13d   :  { %19264 = vst [vmem:[#allocation30_spill] sm:$0xff] %v14209_v46  ;;  %19265 = vst [vmem:[#allocation31_spill] sm:$0xff] %v14211_v48  ;;  %vm2553_vm4 = vcmp.lt.s32.totalorder %v14159_v21, 2  ;;  %vm897_vm5 = vcmp.lt.s32.totalorder %v14161_v32, 2  ;;  %v19267_v26 = vmov 2102212464   ;;  %v1036_v54 = vshrl.u32 %v19035_v34, %v1024_v42 }
 0x13e   :  { %v1033_v55 = vshrl.u32 %v19267_v26, %v1024_v42  ;;  %v1035_v14 = vshll.u32 %v19267_v26, %v1023_v51  ;;  %v1038_v18 = vshll.u32 %v19035_v34, %v1023_v51  ;;  %vm895_vm6 = vweird.f32 %v13782_v24 }
 0x13f   :  { %v974_v57 = vclz %v11789_v53  ;;  %v1028_v47 = vor.u32 %v1027_v15, %v1026_v10  ;;  %v1031_v28 = vor.u32 %v1030_v29, %v1029_v62  ;;  %v1039_v27 = vshrl.u32 %v19012_v43, %v1024_v42  ;;  %v12764_v10 = vld [vmem:[#allocation5 + $0x2c0] ss:$8 sps:$4 sm:$0xff]  }
 0x140   :  { %v1034_v25 = vor.u32 %v1033_v55, %v1032_v59  ;;  %v1037_v38 = vor.u32 %v1036_v54, %v1035_v14  ;;  %vm1041_vm7 = vcmp.lt.s32.totalorder %v14204_v9, 1  ;;  %vm1042_vm8 = vcmp.lt.s32.totalorder %v14204_v9, 2  ;;  %12424 = vmatpush2.bf16.msra.mxu1 %v12764_v10  ;;  %4443 = vmatpush2.bf16.msra.mxu0 %v12764_v10 }
 0x141   :  { %v11790_v20 = vadd.s32 4294967294, %v974_v57  ;;  %v1040_v51 = vor.u32 %v1039_v27, %v1038_v18  ;;  %vm1043_vm9 = vcmp.lt.s32.totalorder %v14204_v9, 3  ;;  %vm1044_vm10 = vcmp.lt.s32.totalorder %v14204_v9, 4 }
 0x142   :  { %v1045_v42 = vsel %vm1041_vm7, %v1025_v40, %v1028_v47  ;;  %v1046_v62 = vsel %vm1044_vm10, %v1034_v25, 2102212464  ;;  %v1049_v59 = vsel %vm1041_vm7, %v1028_v47, %v1031_v28  ;;  %v1050_v60 = vsel %vm1044_vm10, %v1037_v38, 920167782  ;;  %v12840_v15 = vpop.eup %12839 }
 0x143   :  { %vm11791_vm11 = vcmp.lt.s32.totalorder %v11790_v20, 0  ;;  %v1047_v27 = vsel %vm1043_vm9, %v1031_v28, %v1046_v62  ;;  %v1051_v53 = vsel %vm1043_vm9, %v1034_v25, %v1050_v60  ;;  %v1053_v40 = vsel %vm1041_vm7, %v1031_v28, %v1034_v25  ;;  %v12842_v14 = vpop.eup %12841 }
 0x144   :  { %v977_v29 = vsel %vm11791_vm11, 0, %v11790_v20  ;;  %v1048_v23 = vsel %vm1042_vm8, %v1045_v42, %v1047_v27  ;;  %v1052_v55 = vsel %vm1042_vm8, %v1049_v59, %v1051_v53  ;;  %v1054_v49 = vsel %vm1044_vm10, %v1040_v51, 1326507024 }
 0x145   :  { %v902_v54 = vxor.u32 2147483648, %v12840_v15  ;;  %v978_v18 = vsub.s32 32, %v977_v29  ;;  %v979_v57 = vshll.u32 %v14193_v11, %v977_v29  ;;  %v982_v47 = vsub.s32 4294967266, %v977_v29 }
 0x146   :  { %v899_v25 = vxor.u32 2147483648, %v12842_v14  ;;  %v1055_v20 = vsel %vm1043_vm9, %v1037_v38, %v1054_v49  ;;  %v14257_v28 = vmul.u32.u64.low %v14183_v50, %v1052_v55  ;;  %v14258_v42 = vmul.u32.u64.high %v14183_v50, %v1052_v55, %v14257_v28 }
 0x147   :  { %v2559_v62 = vsel %vm2557_vm2, %v902_v54, %v12842_v14  ;;  %v903_v51 = vsel %vm901_vm0, %v902_v54, %v12842_v14  ;;  %v980_v10 = vshrl.u32 %v14164_v1, %v978_v18  ;;  %v983_v59 = vadd.s32 127, %v982_v47 }
 0x148   :  { %v2556_v11 = vsel %vm2554_vm1, %v12840_v15, %v899_v25  ;;  %v900_v38 = vsel %vm898_vm3, %v12840_v15, %v899_v25  ;;  %v1056_v60 = vsel %vm1042_vm8, %v1053_v40, %v1055_v20  ;;  %v1064_v27 = vmul.u32 %v14183_v50, %v1048_v23 }
 0x149   :  { %v2560_v53 = vsel %vm2553_vm4, %v2556_v11, %v2559_v62  ;;  %v904_v29 = vsel %vm897_vm5, %v900_v38, %v903_v51  ;;  %v981_v55 = vor.u32 %v980_v10, %v979_v57  ;;  %v984_v1 = vshll.u32 %v983_v59, 23 }
 0x14a   :  { %v14279_v49 = vsel %vm895_vm6, nan, %v2560_v53  ;;  %v14283_v15 = vsel %vm895_vm6, nan, %v904_v29  ;;  %v14286_v9 = vmul.u32.u64.low %v14183_v50, %v1056_v60  ;;  %v14287_v40 = vmul.u32.u64.high %v14183_v50, %v1056_v60, %v14286_v9 }
 0x14b   :  { %19268 = vst [vmem:[#allocation32_spill] sm:$0xff] %v14279_v49  ;;  %19269 = vst [vmem:[#allocation33_spill] sm:$0xff] %v14283_v15  ;;  %v3405_v21 = vpack.c.bf16 %v14279_v49, %v14187_v16  ;;  %v3397_v32 = vpack.c.bf16 %v14283_v15, %v14191_v56  ;;  %v3497_v23 = vmul.f32 %v14279_v49, %v14283_v15  ;;  %v985_v54 = vor.u32 4788187, %v984_v1 }
 0x14c   :  { %v3449_v14 = vmul.f32 %v14283_v15, %v14283_v15  ;;  %v3465_v24 = vmul.f32 %v14279_v49, %v14279_v49  ;;  %v988_v18 = vcvt.s32.f32 %v981_v55  ;;  %v1067_v50 = vadd.s32 1, %v14258_v42 }
 0x14d   :  { %4065 = vmatprep.mubr.bf16.mxu1 %v3405_v21  ;;  %v14300_v57 = vadd.f32 %v3497_v23, %v3497_v23  ;;  %v986_v25 = vand.u32 2147483647, %v985_v54  ;;  %v992_v20 = vsub.s32 4, %v14168_v63  ;;  %vm1066_vm12 = vc.u32 %v14287_v40, %v14257_v28  ;;  %v14322_v54 = vld [vmem:[#allocation2 + $0x58] sm:$0xff] }
 0x14e   :  { %4066 = vmatmul.mubr.bf16.gmra.mxu1 %v3397_v32  ;;  %v14302_v47 = vsub.f32 %v3449_v14, %v3465_v24  ;;  %v1068_v51 = vsel %vm1066_vm12, %v1067_v50, %v14258_v42  ;;  %vm1123_vm13 = vcmp.gt.s32.totalorder %v14201_v35, 0  ;;  %v19272_v38 = vand.u32 2147483647, %v13882_v7 }
 0x14f   :  { %19270 = vst [vmem:[#allocation34_spill] sm:$0xff] %v14300_v57  ;;  %v3533_v62 = vpack.c.bf16 %v14300_v57, %v14209_v46  ;;  %v989_v59 = vmul.f32 %v988_v18, %v986_v25  ;;  %v1069_v11 = vadd.s32 %v1068_v51, %v1064_v27  ;;  %vm908_vm15 = vcmp.lt.s32.totalorder %v13882_v7, 0 }
 0x150   :  { %19271 = vst [vmem:[#allocation35_spill] sm:$0xff] %v14302_v47  ;;  %v3525_v10 = vpack.c.bf16 %v14302_v47, %v14211_v48  ;;  %vm907_vm14 = vcmp.le.f32.partialorder %v19272_v38, 0.7853982  ;;  %v19011_v60 = vand.u32 2147483647, %v14142_v45  ;;  %v993_v29 = vsel %vm908_vm15, %v992_v20, %v14168_v63 }
 0x151   :  { %3792 = vmatprep.mubr.bf16.mxu0 %v3533_v62  ;;  %v990_v53 = vxor.u32 2147483648, %v989_v59  ;;  %v1070_v42 = vadd.s32 536870912, %v1069_v11  ;;  %v1124_v55 = vsel %vm1123_vm13, %v14201_v35, 0  ;;  %v995_v32 = vsel %vm907_vm14, 0, %v993_v29 }
 0x152   :  { %3793 = vmatmul.mubr.bf16.gmra.mxu0 %v3525_v10  ;;  %v1126_v1 = vand.u32 31, %v1124_v55  ;;  %v1119_v23 = vand.u32 8388607, %v19011_v60  ;;  %v1125_v18 = vshrl.u32 %v1124_v55, 5  ;;  %v19273_v50 = vmov 683565275  }
 0x153   :  { %v991_v9 = vsel %vm908_vm15, %v990_v53, %v989_v59  ;;  %v1071_v21 = vshrl.u32 %v1070_v42, 30  ;;  %v19274_v63 = vmov 2475754826   ;;  %vm1011_vm2 = vcmp.lt.s32.totalorder %v14126_v41, 0 }
 0x154   :  { %v994_v27 = vsel %vm907_vm14, %v13882_v7, %v991_v9  ;;  %v1127_v14 = vsub.s32 32, %v1126_v1  ;;  %v1129_v25 = vshll.u32 %v19273_v50, %v1126_v1  ;;  %v1132_v20 = vshll.u32 %v19274_v63, %v1126_v1 }
 0x155   :  { %v1072_v24 = vshll.u32 %v1071_v21, 30  ;;  %12843 = vcosq.f32 %v994_v27  ;;  %v1135_v51 = vshll.u32 %v19266_v39, %v1126_v1  ;;  %v1138_v38 = vshll.u32 %v19267_v26, %v1126_v1 }
 0x156   :  { %v1130_v35 = vshrl.u32 %v19274_v63, %v1127_v14  ;;  %v1133_v62 = vshrl.u32 %v19266_v39, %v1127_v14  ;;  %12845 = vsinq.f32 %v994_v27  ;;  %v1136_v59 = vshrl.u32 %v19267_v26, %v1127_v14 }
 0x157   :  { %v14329_v10 = vsub.s32 %v1069_v11, %v1072_v24  ;;  %v1120_v53 = vor.u32 8388608, %v1119_v23  ;;  %v1139_v29 = vshrl.u32 %v19035_v34, %v1127_v14  ;;  %v1218_v42 = vand.u32 2139095040, %v14322_v54 }
 0x158   :  { %v1095_v9 = vsub.s32 4, %v1071_v21  ;;  %v2655_v60 = vadd.s32 3, %v995_v32  ;;  %v14337_v43 = vand.u32 3, %v995_v32  ;;  %v1131_v27 = vor.u32 %v1130_v35, %v1129_v25 }
 0x159   :  { %v1075_v55 = vsub.s32 0, %v14329_v10  ;;  %v1134_v11 = vor.u32 %v1133_v62, %v1132_v20  ;;  %v1141_v24 = vshll.u32 %v19035_v34, %v1126_v1  ;;  %v19275_v47 = vmov 1326507024  }
 0x15a   :  { %v1142_v49 = vshrl.u32 %v19275_v47, %v1127_v14  ;;  %v1137_v16 = vor.u32 %v1136_v59, %v1135_v51  ;;  %v1140_v23 = vor.u32 %v1139_v29, %v1138_v38  ;;  %vm1144_vm0 = vcmp.lt.s32.totalorder %v1125_v18, 1 }
 0x15b   :  { %v11793_v48 = vmin.u32 %v1075_v55, %v14329_v10  ;;  %v1065_v57 = vadd.s32 %v14257_v28, %v14287_v40  ;;  %v1128_v15 = vshrl.u32 %v19273_v50, %v1127_v14  ;;  %v1219_v56 = vshrl.u32 %v1218_v42, 23 }
 0x15c   :  { %v1143_v46 = vor.u32 %v1142_v49, %v1141_v24  ;;  %v14345_v12 = vand.u32 3, %v2655_v60  ;;  %vm1146_vm1 = vcmp.lt.s32.totalorder %v1125_v18, 3  ;;  %v1160_v25 = vshll.u32 %v1120_v53, 8 }
 0x15d   :  { %v1077_v32 = vclz %v11793_v48  ;;  %v1096_v1 = vsel %vm1011_vm2, %v1095_v9, %v1071_v21  ;;  %vm1145_vm3 = vcmp.lt.s32.totalorder %v1125_v18, 2  ;;  %vm1147_vm4 = vcmp.lt.s32.totalorder %v1125_v18, 4 }
 0x15e   :  { %v1152_v20 = vsel %vm1144_vm0, %v1131_v27, %v1134_v11  ;;  %v1149_v62 = vsel %vm1147_vm4, %v1137_v16, 2102212464  ;;  %v1153_v51 = vsel %vm1147_vm4, %v1140_v23, 920167782  ;;  %v1156_v28 = vsel %vm1144_vm0, %v1134_v11, %v1137_v16 }
 0x15f   :  { %v11794_v35 = vadd.s32 4294967294, %v1077_v32  ;;  %v1148_v49 = vsel %vm1144_vm0, %v1128_v15, %v1131_v27  ;;  %v1154_v48 = vsel %vm1146_vm1, %v1137_v16, %v1153_v51  ;;  %v1157_v40 = vsel %vm1147_vm4, %v1143_v46, 1326507024 }
 0x160   :  { %v11800_v60 = vadd.s32 4294967169, %v1219_v56  ;;  %v1150_v14 = vsel %vm1146_vm1, %v1134_v11, %v1149_v62  ;;  %v1155_v21 = vsel %vm1145_vm3, %v1152_v20, %v1154_v48  ;;  %v1158_v59 = vsel %vm1146_vm1, %v1140_v23, %v1157_v40 }
 0x161   :  { %vm11795_vm5 = vcmp.lt.s32.totalorder %v11794_v35, 0  ;;  %v1159_v53 = vsel %vm1145_vm3, %v1156_v28, %v1158_v59  ;;  %v14357_v29 = vmul.u32.u64.low %v1160_v25, %v1155_v21  ;;  %v14358_v42 = vmul.u32.u64.high %v1160_v25, %v1155_v21, %v14357_v29 }
 0x162   :  { %v1080_v38 = vsel %vm11795_vm5, 0, %v11794_v35  ;;  %v12844_v55 = vpop.eup %12843  ;;  %v19276_v15 = vand.u32 2147483647, %v14126_v41  ;;  %v1151_v11 = vsel %vm1145_vm3, %v1148_v49, %v1150_v14  ;;  %v19032_v32 = vand.u32 2147483647, %v14322_v54 }
 0x163   :  { %v1081_v56 = vsub.s32 32, %v1080_v38  ;;  %v1082_v46 = vshll.u32 %v14329_v10, %v1080_v38  ;;  %v1085_v9 = vsub.s32 4294967266, %v1080_v38  ;;  %v12846_v27 = vpop.eup %12845  ;;  %vm1000_vm7 = vcmp.lt.s32.totalorder %v14337_v43, 2 }
 0x164   :  { %vm14363_vm6 = vcmp.le.f32.partialorder %v19276_v15, 0.7853982  ;;  %v14369_v24 = vmul.u32.u64.low %v1160_v25, %v1159_v53  ;;  %v14370_v23 = vmul.u32.u64.high %v1160_v25, %v1159_v53, %v14369_v24  ;;  %vm1001_vm8 = vcmp.eq.s32.totalorder %v14337_v43, 0 }
 0x165   :  { %v1083_v20 = vshrl.u32 %v1065_v57, %v1081_v56  ;;  %v1086_v35 = vadd.s32 127, %v1085_v9  ;;  %v1098_v62 = vsel %vm14363_vm6, 0, %v1096_v1  ;;  %v1005_v51 = vxor.u32 2147483648, %v12844_v55 }
 0x166   :  { %vm2661_vm9 = vcmp.eq.s32.totalorder %v14345_v12, 2  ;;  %v1170_v18 = vadd.s32 1, %v14358_v42  ;;  %v1225_v10 = vadd.s32 1, %v11800_v60  ;;  %vm998_vm10 = vweird.f32 %v13882_v7  ;;  %v14387_v60 = vld [vmem:[#allocation2 + $0x60] sm:$0xff] }
 0x167   :  { %v1002_v28 = vxor.u32 2147483648, %v12846_v27  ;;  %v1084_v49 = vor.u32 %v1083_v20, %v1082_v46  ;;  %v1087_v48 = vshll.u32 %v1086_v35, 23  ;;  %v1167_v57 = vmul.u32 %v1160_v25, %v1151_v11 }
 0x168   :  { %vm2658_vm11 = vcmp.eq.s32.totalorder %v14345_v12, 0  ;;  %v2759_v40 = vadd.s32 3, %v1098_v62  ;;  %vm1169_vm12 = vc.u32 %v14370_v23, %v14357_v29  ;;  %v1222_v1 = vand.u32 8388607, %v19032_v32 }
 0x169   :  { %v1088_v14 = vor.u32 4788187, %v1087_v48  ;;  %v1091_v21 = vcvt.s32.f32 %v1084_v49  ;;  %vm2657_vm13 = vcmp.lt.s32.totalorder %v14345_v12, 2  ;;  %vm1004_vm14 = vcmp.eq.s32.totalorder %v14337_v43, 2 }
 0x16a   :  { %v2663_v25 = vsel %vm2661_vm9, %v1005_v51, %v12846_v27  ;;  %v1171_v59 = vsel %vm1169_vm12, %v1170_v18, %v14358_v42  ;;  %vm1226_vm15 = vcmp.gt.s32.totalorder %v1225_v10, 0  ;;  %v2660_v15 = vsel %vm2658_vm11, %v12844_v55, %v1002_v28 }
 0x16b   :  { %v1089_v53 = vand.u32 2147483647, %v1088_v14  ;;  %v1172_v56 = vadd.s32 %v1171_v59, %v1167_v57  ;;  %v1227_v46 = vsel %vm1226_vm15, %v1225_v10, 0  ;;  %v14393_v9 = vand.u32 3, %v2759_v40 }
 0x16c   :  { %v14395_v11 = vand.u32 3, %v1098_v62  ;;  %v1223_v24 = vor.u32 8388608, %v1222_v1  ;;  %v1229_v20 = vand.u32 31, %v1227_v46  ;;  %v1003_v49 = vsel %vm1001_vm8, %v12844_v55, %v1002_v28 }
 0x16d   :  { %v1092_v35 = vmul.f32 %v1091_v21, %v1089_v53  ;;  %v1006_v42 = vsel %vm1004_vm14, %v1005_v51, %v12846_v27  ;;  %v1173_v18 = vadd.s32 536870912, %v1172_v56  ;;  %v2664_v48 = vsel %vm2657_vm13, %v2660_v15, %v2663_v25 }
 0x16e   :  { %v1230_v14 = vsub.s32 32, %v1229_v20  ;;  %v1232_v10 = vshll.u32 %v19273_v50, %v1229_v20  ;;  %v1235_v57 = vshll.u32 %v19274_v63, %v1229_v20  ;;  %v1238_v1 = vshll.u32 %v19266_v39, %v1229_v20 }
 0x16f   :  { %v1093_v62 = vxor.u32 2147483648, %v1092_v35  ;;  %v14405_v40 = vshrl.u32 %v1173_v18, 30  ;;  %v1241_v21 = vshll.u32 %v19267_v26, %v1229_v20  ;;  %v1007_v55 = vsel %vm1000_vm7, %v1003_v49, %v1006_v42 }
 0x170   :  { %v1233_v27 = vshrl.u32 %v19274_v63, %v1230_v14  ;;  %v1236_v12 = vshrl.u32 %v19266_v39, %v1230_v14  ;;  %v1239_v51 = vshrl.u32 %v19267_v26, %v1230_v14  ;;  %v1228_v59 = vshrl.u32 %v1227_v46, 5 }
 0x171   :  { %v1094_v28 = vsel %vm1011_vm2, %v1093_v62, %v1092_v35  ;;  %v1175_v25 = vshll.u32 %v14405_v40, 30  ;;  %v1242_v53 = vshrl.u32 %v19035_v34, %v1230_v14  ;;  %v14423_v43 = vsel %vm998_vm10, nan, %v2664_v48 }
 0x172   :  { %v1097_v15 = vsel %vm14363_vm6, %v14126_v41, %v1094_v28  ;;  %v1234_v49 = vor.u32 %v1233_v27, %v1232_v10  ;;  %v1237_v42 = vor.u32 %v1236_v12, %v1235_v57  ;;  %v1240_v32 = vor.u32 %v1239_v51, %v1238_v1  ;;  %v12767_v28 = vld [vmem:[#allocation5 + $0x2b0] ss:$8 sps:$4 sm:$0xff]  }
 0x173   :  { %12847 = vcosq.f32 %v1097_v15  ;;  %v14425_v18 = vsub.s32 %v1172_v56, %v1175_v25  ;;  %v1243_v35 = vor.u32 %v1242_v53, %v1241_v21  ;;  %v1231_v46 = vshrl.u32 %v19273_v50, %v1230_v14 }
 0x174   :  { %12849 = vsinq.f32 %v1097_v15  ;;  %v1244_v62 = vshll.u32 %v19035_v34, %v1229_v20  ;;  %v1245_v38 = vshrl.u32 %v19275_v47, %v1230_v14  ;;  %vm1247_vm2 = vcmp.lt.s32.totalorder %v1228_v59, 1  ;;  %v12769_v20 = vld [vmem:[#allocation5 + $0x2b4] ss:$8 sps:$4 sm:$0xff]  }
 0x175   :  { %v1178_v16 = vsub.s32 0, %v14425_v18  ;;  %vm1249_vm0 = vcmp.lt.s32.totalorder %v1228_v59, 3  ;;  %v14431_v48 = vshll.u32 %v1223_v24, 8  ;;  %vm1114_vm1 = vcmp.lt.s32.totalorder %v14142_v45, 0  ;;  %12409 = vmatprep.subr.bf16.mxu1 %v12769_v20  ;;  %4444 = vmatprep.subr.bf16.mxu0 %v12769_v20  ;;  %v12770_v20 = vld [vmem:[#allocation5 + $0x2a0] ss:$8 sps:$4 sm:$0xff]  }
 0x176   :  { %v1246_v10 = vor.u32 %v1245_v38, %v1244_v62  ;;  %vm1248_vm3 = vcmp.lt.s32.totalorder %v1228_v59, 2  ;;  %vm1250_vm4 = vcmp.lt.s32.totalorder %v1228_v59, 4  ;;  %v1255_v56 = vsel %vm1247_vm2, %v1234_v49, %v1237_v42  ;;  %12425 = vmatpush2.bf16.msra.mxu1 %v12767_v28  ;;  %4445 = vmatpush2.bf16.msra.mxu0 %v12767_v28 }
 0x177   :  { %v11797_v57 = vmin.u32 %v1178_v16, %v14425_v18  ;;  %v1252_v1 = vsel %vm1250_vm4, %v1240_v32, 2102212464  ;;  %v1256_v21 = vsel %vm1250_vm4, %v1243_v35, 920167782  ;;  %v1259_v27 = vsel %vm1247_vm2, %v1237_v42, %v1240_v32 }
 0x178   :  { %vm1107_vm5 = vcmp.eq.s32.totalorder %v14395_v11, 2  ;;  %v1251_v14 = vsel %vm1247_vm2, %v1231_v46, %v1234_v49  ;;  %v1253_v12 = vsel %vm1249_vm0, %v1237_v42, %v1252_v1  ;;  %v1257_v24 = vsel %vm1249_vm0, %v1240_v32, %v1256_v21 }
 0x179   :  { %v1260_v51 = vsel %vm1250_vm4, %v1246_v10, 1326507024  ;;  %v14440_v38 = vsel %vm998_vm10, nan, %v1007_v55  ;;  %vm1104_vm6 = vcmp.eq.s32.totalorder %v14395_v11, 0  ;;  %v19279_v25 = vand.u32 2147483647, %v14142_v45 }
 0x17a   :  { %v1180_v15 = vclz %v11797_v57  ;;  %v1258_v49 = vsel %vm1248_vm3, %v1255_v56, %v1257_v24  ;;  %v1261_v42 = vsel %vm1249_vm0, %v1243_v35, %v1260_v51  ;;  %vm1103_vm8 = vcmp.lt.s32.totalorder %v14395_v11, 2  ;;  %v12772_v56 = vld [vmem:[#allocation5 + $0x2a4] ss:$8 sps:$4 sm:$0xff]  }
 0x17b   :  { %vm14445_vm7 = vcmp.le.f32.partialorder %v19279_v25, 0.7853982  ;;  %v1198_v7 = vsub.s32 4, %v14405_v40  ;;  %v1262_v32 = vsel %vm1248_vm3, %v1259_v27, %v1261_v42  ;;  %vm1101_vm9 = vweird.f32 %v14126_v41  ;;  %12410 = vmatprep.subr.bf16.mxu1 %v12772_v56  ;;  %4446 = vmatprep.subr.bf16.mxu0 %v12772_v56 }
 0x17c   :  { %v14455_v55 = vmul.u32.u64.low %v14431_v48, %v1258_v49  ;;  %v14456_v46 = vmul.u32.u64.high %v14431_v48, %v1258_v49, %v14455_v55  ;;  %v11798_v62 = vadd.s32 4294967294, %v1180_v15  ;;  %v1254_v35 = vsel %vm1248_vm3, %v1251_v14, %v1253_v12  ;;  %12426 = vmatpush2.bf16.msra.mxu1 %v12770_v20  ;;  %4447 = vmatpush2.bf16.msra.mxu0 %v12770_v20 }
 0x17d   :  { %v14462_v16 = vmul.u32.u64.low %v14431_v48, %v1262_v32  ;;  %v14463_v10 = vmul.u32.u64.high %v14431_v48, %v1262_v32, %v14462_v16  ;;  %v3498_v57 = vmul.f32 %v14423_v43, %v14440_v38  ;;  %v3450_v1 = vmul.f32 %v14440_v38, %v14440_v38  ;;  %12411 = vmatprep.subr.bf16.mxu1 %v12775_v30  ;;  %4448 = vmatprep.subr.bf16.mxu0 %v12775_v30 }
 0x17e   :  { %v3466_v21 = vmul.f32 %v14423_v43, %v14423_v43  ;;  %v1321_v27 = vand.u32 2139095040, %v14387_v60  ;;  %vm2761_vm10 = vcmp.lt.s32.totalorder %v14393_v9, 2  ;;  %vm2762_vm11 = vcmp.eq.s32.totalorder %v14393_v9, 0 }
 0x17f   :  { %v1168_v59 = vadd.s32 %v14357_v29, %v14370_v23  ;;  %vm11799_vm12 = vcmp.lt.s32.totalorder %v11798_v62, 0  ;;  %vm2765_vm13 = vcmp.eq.s32.totalorder %v14393_v9, 2  ;;  %v1270_v12 = vmul.u32 %v14431_v48, %v1254_v35 }
 0x180   :  { %v1183_v14 = vsel %vm11799_vm12, 0, %v11798_v62  ;;  %v1273_v24 = vadd.s32 1, %v14456_v46  ;;  %v1199_v29 = vsel %vm1114_vm1, %v1198_v7, %v14405_v40  ;;  %v12848_v23 = vpop.eup %12847  ;;  %v14483_v15 = vadd.f32 %v3498_v57, %v3498_v57  ;;  %12427 = vmatpush2.bf16.msra.mxu1 %v12773_v17  ;;  %4449 = vmatpush2.bf16.msra.mxu0 %v12773_v17 }
 0x181   :  { %v1184_v51 = vsub.s32 32, %v1183_v14  ;;  %v1185_v28 = vshll.u32 %v14425_v18, %v1183_v14  ;;  %v1188_v25 = vsub.s32 4294967266, %v1183_v14  ;;  %v14485_v49 = vsub.f32 %v3450_v1, %v3466_v21  ;;  %v12850_v42 = vpop.eup %12849 }
 0x182   :  { %vm1272_vm14 = vc.u32 %v14463_v10, %v14455_v55  ;;  %v1322_v48 = vshrl.u32 %v1321_v27, 23  ;;  %v1108_v32 = vxor.u32 2147483648, %v12848_v23  ;;  %v1105_v16 = vxor.u32 2147483648, %v12850_v42 }
 0x183   :  { %v1186_v62 = vshrl.u32 %v1168_v59, %v1184_v51  ;;  %v1189_v35 = vadd.s32 127, %v1188_v25  ;;  %v1274_v18 = vsel %vm1272_vm14, %v1273_v24, %v14456_v46  ;;  %v1201_v56 = vsel %vm14445_vm7, 0, %v1199_v29 }
 0x184   :  { %v1275_v40 = vadd.s32 %v1274_v18, %v1270_v12  ;;  %v11804_v7 = vadd.s32 4294967169, %v1322_v48  ;;  %v2767_v57 = vsel %vm2765_vm13, %v1108_v32, %v12850_v42  ;;  %v1109_v1 = vsel %vm1107_vm5, %v1108_v32, %v12850_v42 }
 0x185   :  { %v1187_v21 = vor.u32 %v1186_v62, %v1185_v28  ;;  %v1190_v27 = vshll.u32 %v1189_v35, 23  ;;  %v2764_v20 = vsel %vm2762_vm11, %v12848_v23, %v1105_v16  ;;  %v1106_v46 = vsel %vm1104_vm6, %v12848_v23, %v1105_v16 }
 0x186   :  { %v1276_v59 = vadd.s32 536870912, %v1275_v40  ;;  %v1328_v14 = vadd.s32 1, %v11804_v7  ;;  %v2768_v12 = vsel %vm2761_vm10, %v2764_v20, %v2767_v57  ;;  %v1110_v24 = vsel %vm1103_vm8, %v1106_v46, %v1109_v1 }
 0x187   :  { %v1191_v51 = vor.u32 4788187, %v1190_v27  ;;  %v1194_v25 = vcvt.s32.f32 %v1187_v21  ;;  %v14506_v28 = vsel %vm1101_vm9, nan, %v2768_v12  ;;  %v14510_v29 = vsel %vm1101_vm9, nan, %v1110_v24 }
 0x188   :  { %v14512_v48 = vshrl.u32 %v1276_v59, 30  ;;  %vm1329_vm15 = vcmp.gt.s32.totalorder %v1328_v14, 0  ;;  %v3406_v9 = vpack.c.bf16 %v14506_v28, %v14423_v43  ;;  %v3398_v11 = vpack.c.bf16 %v14510_v29, %v14440_v38 }
 0x189   :  { %v3499_v23 = vmul.f32 %v14506_v28, %v14510_v29  ;;  %v3451_v42 = vmul.f32 %v14510_v29, %v14510_v29  ;;  %v3467_v41 = vmul.f32 %v14506_v28, %v14506_v28  ;;  %v1192_v32 = vand.u32 2147483647, %v1191_v51 }
 0x18a   :  { %v1278_v62 = vshll.u32 %v14512_v48, 30  ;;  %v19282_v35 = vand.u32 2147483647, %v14387_v60  ;;  %4075 = vmatprep.mubr.bf16.mxu1 %v3406_v9  ;;  %v1330_v21 = vsel %vm1329_vm15, %v1328_v14, 0  ;;  %v2863_v20 = vadd.s32 3, %v1201_v56 }
 0x18b   :  { %v14527_v16 = vadd.f32 %v3499_v23, %v3499_v23  ;;  %4076 = vmatmul.mubr.bf16.gmra.mxu1 %v3398_v11  ;;  %v14529_v7 = vsub.f32 %v3451_v42, %v3467_v41  ;;  %v1195_v57 = vmul.f32 %v1194_v25, %v1192_v32  ;;  %v14538_v51 = vshrl.u32 %v1330_v21, 5 }
 0x18c   :  { %v1325_v18 = vand.u32 8388607, %v19282_v35  ;;  %v14531_v1 = vsub.s32 %v1275_v40, %v1278_v62  ;;  %v1332_v9 = vand.u32 31, %v1330_v21  ;;  %v1271_v11 = vadd.s32 %v14455_v55, %v14463_v10 }
 0x18d   :  { %v3534_v27 = vpack.c.bf16 %v14527_v16, %v14483_v15  ;;  %v3526_v46 = vpack.c.bf16 %v14529_v7, %v14485_v49  ;;  %v1196_v59 = vxor.u32 2147483648, %v1195_v57  ;;  %v14548_v23 = vand.u32 3, %v2863_v20 }
 0x18e   :  { %v1281_v12 = vsub.s32 0, %v14531_v1  ;;  %v1326_v24 = vor.u32 8388608, %v1325_v18  ;;  %v14550_v42 = vand.u32 3, %v1201_v56  ;;  %vm1217_vm2 = vcmp.lt.s32.totalorder %v14322_v54, 0 }
 0x18f   :  { %3802 = vmatprep.mubr.bf16.mxu0 %v3534_v27  ;;  %v1197_v40 = vsel %vm1114_vm1, %v1196_v59, %v1195_v57  ;;  %v1333_v32 = vsub.s32 32, %v1332_v9  ;;  %v1301_v35 = vsub.s32 4, %v14512_v48  ;;  %vm1350_vm0 = vcmp.lt.s32.totalorder %v14538_v51, 1 }
 0x190   :  { %3803 = vmatmul.mubr.bf16.gmra.mxu0 %v3526_v46  ;;  %v11801_v14 = vmin.u32 %v1281_v12, %v14531_v1  ;;  %v1200_v25 = vsel %vm14445_vm7, %v14142_v45, %v1197_v40  ;;  %v14553_v62 = vshll.u32 %v1326_v24, 8  ;;  %vm1351_vm1 = vcmp.lt.s32.totalorder %v14538_v51, 2 }
 0x191   :  { %12851 = vcosq.f32 %v1200_v25  ;;  %v1335_v55 = vshll.u32 %v19273_v50, %v1332_v9  ;;  %v1336_v10 = vshrl.u32 %v19274_v63, %v1333_v32  ;;  %vm1352_vm3 = vcmp.lt.s32.totalorder %v14538_v51, 3 }
 0x192   :  { %v1283_v41 = vclz %v11801_v14  ;;  %12853 = vsinq.f32 %v1200_v25  ;;  %v1338_v56 = vshll.u32 %v19274_v63, %v1332_v9  ;;  %v1339_v18 = vshrl.u32 %v19266_v39, %v1333_v32 }
 0x193   :  { %v1341_v57 = vshll.u32 %v19266_v39, %v1332_v9  ;;  %v1342_v21 = vshrl.u32 %v19267_v26, %v1333_v32  ;;  %v1337_v27 = vor.u32 %v1336_v10, %v1335_v55  ;;  %v1344_v20 = vshll.u32 %v19267_v26, %v1332_v9 }
 0x194   :  { %v11802_v53 = vadd.s32 4294967294, %v1283_v41  ;;  %v1345_v46 = vshrl.u32 %v19035_v34, %v1333_v32  ;;  %vm2869_vm5 = vcmp.eq.s32.totalorder %v14548_v23, 2  ;;  %v1340_v12 = vor.u32 %v1339_v18, %v1338_v56 }
 0x195   :  { %v1343_v24 = vor.u32 %v1342_v21, %v1341_v57  ;;  %v1347_v40 = vshll.u32 %v19035_v34, %v1332_v9  ;;  %v19283_v14 = vand.u32 2147483647, %v14322_v54  ;;  %vm2866_vm7 = vcmp.eq.s32.totalorder %v14548_v23, 0 }
 0x196   :  { %vm11803_vm4 = vcmp.lt.s32.totalorder %v11802_v53, 0  ;;  %v1346_v44 = vor.u32 %v1345_v46, %v1344_v20  ;;  %vm2865_vm8 = vcmp.lt.s32.totalorder %v14548_v23, 2  ;;  %vm1206_vm9 = vcmp.lt.s32.totalorder %v14550_v42, 2 }
 0x197   :  { %v1286_v59 = vsel %vm11803_vm4, 0, %v11802_v53  ;;  %vm14571_vm6 = vcmp.le.f32.partialorder %v19283_v14, 0.7853982  ;;  %v14579_v53 = vld [vmem:[#allocation2 + $0x68] sm:$0xff]  ;;  %v1334_v9 = vshrl.u32 %v19273_v50, %v1333_v32  ;;  %v1348_v56 = vshrl.u32 %v19275_v47, %v1333_v32 }
 0x198   :  { %v1287_v41 = vsub.s32 32, %v1286_v59  ;;  %v1288_v55 = vshll.u32 %v14531_v1, %v1286_v59  ;;  %v1291_v10 = vsub.s32 4294967266, %v1286_v59  ;;  %vm1353_vm10 = vcmp.lt.s32.totalorder %v14538_v51, 4 }
 0x199   :  { %v1358_v18 = vsel %vm1350_vm0, %v1337_v27, %v1340_v12  ;;  %v1359_v21 = vsel %vm1353_vm10, %v1346_v44, 920167782  ;;  %vm1204_vm11 = vweird.f32 %v14142_v45  ;;  %v1302_v46 = vsel %vm1217_vm2, %v1301_v35, %v14512_v48 }
 0x19a   :  { %v1289_v1 = vshrl.u32 %v1271_v11, %v1287_v41  ;;  %v1292_v57 = vadd.s32 127, %v1291_v10  ;;  %v1349_v59 = vor.u32 %v1348_v56, %v1347_v40  ;;  %v1355_v32 = vsel %vm1353_vm10, %v1343_v24, 2102212464 }
 0x19b   :  { %v1360_v14 = vsel %vm1352_vm3, %v1343_v24, %v1359_v21  ;;  %v1362_v34 = vsel %vm1350_vm0, %v1340_v12, %v1343_v24  ;;  %v1354_v20 = vsel %vm1350_vm0, %v1334_v9, %v1337_v27  ;;  %vm1207_vm12 = vcmp.eq.s32.totalorder %v14550_v42, 0 }
 0x19c   :  { %v1290_v11 = vor.u32 %v1289_v1, %v1288_v55  ;;  %v1293_v41 = vshll.u32 %v1292_v57, 23  ;;  %v1361_v10 = vsel %vm1351_vm1, %v1358_v18, %v1360_v14  ;;  %v1363_v48 = vsel %vm1353_vm10, %v1349_v59, 1326507024 }
 0x19d   :  { %v14606_v35 = vmul.u32.u64.low %v14553_v62, %v1361_v10  ;;  %v14607_v40 = vmul.u32.u64.high %v14553_v62, %v1361_v10, %v14606_v35  ;;  %v1356_v55 = vsel %vm1352_vm3, %v1340_v12, %v1355_v32  ;;  %v1364_v18 = vsel %vm1352_vm3, %v1346_v44, %v1363_v48 }
 0x19e   :  { %v1294_v56 = vor.u32 4788187, %v1293_v41  ;;  %v1297_v21 = vcvt.s32.f32 %v1290_v11  ;;  %v12852_v1 = vpop.eup %12851  ;;  %vm1210_vm13 = vcmp.eq.s32.totalorder %v14550_v42, 2  ;;  %v1365_v27 = vsel %vm1351_vm1, %v1362_v34, %v1364_v18 }
 0x19f   :  { %v1424_v24 = vand.u32 2139095040, %v14579_v53  ;;  %v12854_v9 = vpop.eup %12853  ;;  %v1211_v57 = vxor.u32 2147483648, %v12852_v1  ;;  %v14619_v14 = vmul.u32.u64.low %v14553_v62, %v1365_v27  ;;  %v14620_v11 = vmul.u32.u64.high %v14553_v62, %v1365_v27, %v14619_v14 }
 0x1a0   :  { %v1295_v59 = vand.u32 2147483647, %v1294_v56  ;;  %v1208_v12 = vxor.u32 2147483648, %v12854_v9  ;;  %v1304_v44 = vsel %vm14571_vm6, 0, %v1302_v46  ;;  %v1357_v32 = vsel %vm1351_vm1, %v1354_v20, %v1356_v55 }
 0x1a1   :  { %v1425_v41 = vshrl.u32 %v1424_v24, 23  ;;  %v2871_v34 = vsel %vm2869_vm5, %v1211_v57, %v12854_v9  ;;  %v1212_v48 = vsel %vm1210_vm13, %v1211_v57, %v12854_v9  ;;  %v19286_v18 = vand.u32 2147483647, %v14579_v53 }
 0x1a2   :  { %v1298_v10 = vmul.f32 %v1297_v21, %v1295_v59  ;;  %v2868_v27 = vsel %vm2866_vm7, %v12852_v1, %v1208_v12  ;;  %v1209_v14 = vsel %vm1207_vm12, %v12852_v1, %v1208_v12  ;;  %v1376_v46 = vadd.s32 1, %v14607_v40 }
 0x1a3   :  { %v1428_v56 = vand.u32 8388607, %v19286_v18  ;;  %v11808_v52 = vadd.s32 4294967169, %v1425_v41  ;;  %v2872_v20 = vsel %vm2865_vm8, %v2868_v27, %v2871_v34  ;;  %v1213_v21 = vsel %vm1206_vm9, %v1209_v14, %v1212_v48 }
 0x1a4   :  { %v1299_v51 = vxor.u32 2147483648, %v1298_v10  ;;  %v1373_v55 = vmul.u32 %v14553_v62, %v1357_v32  ;;  %v2967_v24 = vadd.s32 3, %v1304_v44  ;;  %vm1375_vm14 = vc.u32 %v14620_v11, %v14606_v35 }
 0x1a5   :  { %v1431_v9 = vadd.s32 1, %v11808_v52  ;;  %v14645_v1 = vsel %vm1204_vm11, nan, %v2872_v20  ;;  %v14649_v23 = vsel %vm1204_vm11, nan, %v1213_v21  ;;  %v1377_v62 = vsel %vm1375_vm14, %v1376_v46, %v14607_v40  ;;  %v14682_v20 = vld [vmem:[#allocation2 + $0x70] sm:$0xff] }
 0x1a6   :  { %v1300_v57 = vsel %vm1217_vm2, %v1299_v51, %v1298_v10  ;;  %19287 = vst [vmem:[#allocation36_spill] sm:$0xff] %v14645_v1  ;;  %v1429_v59 = vor.u32 8388608, %v1428_v56  ;;  %v14655_v52 = vand.u32 3, %v1304_v44  ;;  %v1378_v12 = vadd.s32 %v1377_v62, %v1373_v55 }
 0x1a7   :  { %v1303_v42 = vsel %vm14571_vm6, %v14322_v54, %v1300_v57  ;;  %vm1432_vm15 = vcmp.gt.s32.totalorder %v1431_v9, 0  ;;  %v14657_v32 = vand.u32 3, %v2967_v24  ;;  %v3500_v45 = vmul.f32 %v14645_v1, %v14649_v23 }
 0x1a8   :  { %12855 = vcosq.f32 %v1303_v42  ;;  %v1433_v41 = vsel %vm1432_vm15, %v1431_v9, 0  ;;  %v1379_v10 = vadd.s32 536870912, %v1378_v12  ;;  %v3452_v25 = vmul.f32 %v14649_v23, %v14649_v23 }
 0x1a9   :  { %12857 = vsinq.f32 %v1303_v42  ;;  %v1435_v34 = vand.u32 31, %v1433_v41  ;;  %v3468_v40 = vmul.f32 %v14645_v1, %v14645_v1  ;;  %v14666_v48 = vadd.s32 %v14606_v35, %v14620_v11 }
 0x1aa   :  { %v14668_v44 = vshll.u32 %v1429_v59, 8  ;;  %v14670_v18 = vshrl.u32 %v1379_v10, 30  ;;  %v14672_v56 = vshrl.u32 %v1433_v41, 5  ;;  %vm2973_vm2 = vcmp.eq.s32.totalorder %v14657_v32, 2 }
 0x1ab   :  { %v1436_v27 = vsub.s32 32, %v1435_v34  ;;  %v1438_v14 = vshll.u32 %v19273_v50, %v1435_v34  ;;  %vm1313_vm0 = vcmp.eq.s32.totalorder %v14655_v52, 2  ;;  %v14677_v46 = vadd.f32 %v3500_v45, %v3500_v45 }
 0x1ac   :  { %v1441_v51 = vshll.u32 %v19274_v63, %v1435_v34  ;;  %v1444_v35 = vshll.u32 %v19266_v39, %v1435_v34  ;;  %v1447_v11 = vshll.u32 %v19267_v26, %v1435_v34  ;;  %vm2970_vm1 = vcmp.eq.s32.totalorder %v14657_v32, 0 }
 0x1ad   :  { %vm1310_vm3 = vcmp.eq.s32.totalorder %v14655_v52, 0  ;;  %v1381_v21 = vshll.u32 %v14670_v18, 30  ;;  %v1437_v55 = vshrl.u32 %v19273_v50, %v1436_v27  ;;  %v1439_v24 = vshrl.u32 %v19274_v63, %v1436_v27 }
 0x1ae   :  { %v19288_v9 = vmov 920167782   ;;  %vm2969_vm4 = vcmp.lt.s32.totalorder %v14657_v32, 2  ;;  %vm1309_vm5 = vcmp.lt.s32.totalorder %v14655_v52, 2  ;;  %v1442_v42 = vshrl.u32 %v19266_v39, %v1436_v27 }
 0x1af   :  { %v1450_v57 = vshll.u32 %v19288_v9, %v1435_v34  ;;  %v1445_v62 = vshrl.u32 %v19267_v26, %v1436_v27  ;;  %v1448_v59 = vshrl.u32 %v19288_v9, %v1436_v27  ;;  %v1451_v45 = vshrl.u32 %v19275_v47, %v1436_v27 }
 0x1b0   :  { %vm1307_vm6 = vweird.f32 %v14322_v54  ;;  %v14697_v41 = vsub.s32 %v1378_v12, %v1381_v21  ;;  %v1440_v10 = vor.u32 %v1439_v24, %v1438_v14  ;;  %vm1453_vm7 = vcmp.lt.s32.totalorder %v14672_v56, 1 }
 0x1b1   :  { %v1527_v34 = vand.u32 2139095040, %v14682_v20  ;;  %v1443_v31 = vor.u32 %v1442_v42, %v1441_v51  ;;  %v1446_v0 = vor.u32 %v1445_v62, %v1444_v35  ;;  %v1449_v61 = vor.u32 %v1448_v59, %v1447_v11  ;;  %v12776_v62 = vld [vmem:[#allocation5 + $0x280] ss:$8 sps:$4 sm:$0xff]  }
 0x1b2   :  { %vm1454_vm8 = vcmp.lt.s32.totalorder %v14672_v56, 2  ;;  %v1384_v36 = vsub.s32 0, %v14697_v41  ;;  %v1452_v3 = vor.u32 %v1451_v45, %v1450_v57  ;;  %vm1455_vm9 = vcmp.lt.s32.totalorder %v14672_v56, 3 }
 0x1b3   :  { %vm1456_vm10 = vcmp.lt.s32.totalorder %v14672_v56, 4  ;;  %v1457_v12 = vsel %vm1453_vm7, %v1437_v55, %v1440_v10  ;;  %v1461_v14 = vsel %vm1453_vm7, %v1440_v10, %v1443_v31  ;;  %v1465_v21 = vsel %vm1453_vm7, %v1443_v31, %v1446_v0  ;;  %v12778_v55 = vld [vmem:[#allocation5 + $0x284] ss:$8 sps:$4 sm:$0xff]  }
 0x1b4   :  { %v1458_v27 = vsel %vm1456_vm10, %v1446_v0, 2102212464  ;;  %v1462_v51 = vsel %vm1456_vm10, %v1449_v61, 920167782  ;;  %v11805_v35 = vmin.u32 %v1384_v36, %v14697_v41  ;;  %v14720_v57 = vsub.f32 %v3452_v25, %v3468_v40  ;;  %12412 = vmatprep.subr.bf16.mxu1 %v12778_v55  ;;  %4450 = vmatprep.subr.bf16.mxu0 %v12778_v55 }
 0x1b5   :  { %v1459_v11 = vsel %vm1455_vm9, %v1443_v31, %v1458_v27  ;;  %v1463_v30 = vsel %vm1455_vm9, %v1446_v0, %v1462_v51  ;;  %v12856_v24 = vpop.eup %12855  ;;  %v1466_v17 = vsel %vm1456_vm10, %v1452_v3, 1326507024  ;;  %v1528_v36 = vshrl.u32 %v1527_v34, 23  ;;  %12428 = vmatpush2.bf16.msra.mxu1 %v12776_v62  ;;  %4451 = vmatpush2.bf16.msra.mxu0 %v12776_v62 }
 0x1b6   :  { %19289 = vst [vmem:[#allocation37_spill] sm:$0xff] %v14720_v57  ;;  %v1464_v42 = vsel %vm1454_vm8, %v1461_v14, %v1463_v30  ;;  %v12858_v59 = vpop.eup %12857  ;;  %v1314_v45 = vxor.u32 2147483648, %v12856_v24  ;;  %v1386_v10 = vclz %v11805_v35  ;;  %v1460_v27 = vsel %vm1454_vm8, %v1457_v12, %v1459_v11 }
 0x1b7   :  { %v1467_v0 = vsel %vm1455_vm9, %v1449_v61, %v1466_v17  ;;  %v1311_v31 = vxor.u32 2147483648, %v12858_v59  ;;  %v14733_v40 = vmul.u32.u64.low %v14668_v44, %v1464_v42  ;;  %v14734_v3 = vmul.u32.u64.high %v14668_v44, %v1464_v42, %v14733_v40 }
 0x1b8   :  { %v1468_v25 = vsel %vm1454_vm8, %v1465_v21, %v1467_v0  ;;  %v2975_v34 = vsel %vm2973_vm2, %v1314_v45, %v12858_v59  ;;  %v1315_v12 = vsel %vm1313_vm0, %v1314_v45, %v12858_v59  ;;  %v11806_v61 = vadd.s32 4294967294, %v1386_v10 }
 0x1b9   :  { %v1404_v14 = vsub.s32 4, %v14670_v18  ;;  %v2972_v56 = vsel %vm2970_vm1, %v12856_v24, %v1311_v31  ;;  %v1312_v51 = vsel %vm1310_vm3, %v12856_v24, %v1311_v31  ;;  %v1476_v55 = vmul.u32 %v14668_v44, %v1460_v27 }
 0x1ba   :  { %v14747_v35 = vmul.u32.u64.low %v14668_v44, %v1468_v25  ;;  %v14748_v11 = vmul.u32.u64.high %v14668_v44, %v1468_v25, %v14747_v35  ;;  %v2976_v30 = vsel %vm2969_vm4, %v2972_v56, %v2975_v34  ;;  %v1316_v21 = vsel %vm1309_vm5, %v1312_v51, %v1315_v12 }
 0x1bb   :  { %vm11807_vm11 = vcmp.lt.s32.totalorder %v11806_v61, 0  ;;  %v14757_v42 = vsel %vm1307_vm6, nan, %v2976_v30  ;;  %v14761_v24 = vsel %vm1307_vm6, nan, %v1316_v21  ;;  %v1479_v62 = vadd.s32 1, %v14734_v3 }
 0x1bc   :  { %19290 = vst [vmem:[#allocation38_spill] sm:$0xff] %v14757_v42  ;;  %v1389_v17 = vsel %vm11807_vm11, 0, %v11806_v61  ;;  %v3407_v32 = vpack.c.bf16 %v14757_v42, %v14645_v1  ;;  %v3399_v52 = vpack.c.bf16 %v14761_v24, %v14649_v23  ;;  %v3501_v44 = vmul.f32 %v14757_v42, %v14761_v24 }
 0x1bd   :  { %v3453_v59 = vmul.f32 %v14761_v24, %v14761_v24  ;;  %v3469_v54 = vmul.f32 %v14757_v42, %v14757_v42  ;;  %v1390_v45 = vsub.s32 32, %v1389_v17  ;;  %v1391_v10 = vshll.u32 %v14697_v41, %v1389_v17 }
 0x1be   :  { %v1394_v27 = vsub.s32 4294967266, %v1389_v17  ;;  %4085 = vmatprep.mubr.bf16.mxu1 %v3407_v32  ;;  %v14775_v0 = vadd.f32 %v3501_v44, %v3501_v44  ;;  %vm1320_vm12 = vcmp.lt.s32.totalorder %v14387_v60, 0  ;;  %vm1478_vm13 = vc.u32 %v14748_v11, %v14733_v40  ;;  %v14800_v44 = vld [vmem:[#allocation2 + $0x78] sm:$0xff] }
 0x1bf   :  { %4086 = vmatmul.mubr.bf16.gmra.mxu1 %v3399_v52  ;;  %v14780_v31 = vsub.f32 %v3453_v59, %v3469_v54  ;;  %v1392_v25 = vshrl.u32 %v14666_v48, %v1390_v45  ;;  %v1480_v12 = vsel %vm1478_vm13, %v1479_v62, %v14734_v3  ;;  %v1405_v61 = vsel %vm1320_vm12, %v1404_v14, %v14670_v18 }
 0x1c0   :  { %v1395_v34 = vadd.s32 127, %v1394_v27  ;;  %v3535_v41 = vpack.c.bf16 %v14775_v0, %v14677_v46  ;;  %v1481_v56 = vadd.s32 %v1480_v12, %v1476_v55  ;;  %v19053_v51 = vand.u32 2147483647, %v14682_v20 }
 0x1c1   :  { %19291 = vst [vmem:[#allocation39_spill] sm:$0xff] %v14780_v31  ;;  %v3527_v35 = vpack.c.bf16 %v14780_v31, %v14720_v57  ;;  %v1393_v30 = vor.u32 %v1392_v25, %v1391_v10  ;;  %v11812_v17 = vadd.s32 4294967169, %v1528_v36  ;;  %v19292_v48 = vand.u32 2147483647, %v14387_v60 }
 0x1c2   :  { %v1396_v21 = vshll.u32 %v1395_v34, 23  ;;  %3812 = vmatprep.mubr.bf16.mxu0 %v3535_v41  ;;  %v1482_v62 = vadd.s32 536870912, %v1481_v56  ;;  %v1531_v36 = vand.u32 8388607, %v19053_v51  ;;  %v1630_v34 = vand.u32 2139095040, %v14800_v44 }
 0x1c3   :  { %vm14794_vm14 = vcmp.le.f32.partialorder %v19292_v48, 0.7853982  ;;  %3813 = vmatmul.mubr.bf16.gmra.mxu0 %v3527_v35  ;;  %v1400_v18 = vcvt.s32.f32 %v1393_v30  ;;  %v1534_v55 = vadd.s32 1, %v11812_v17  ;;  %vm1423_vm2 = vcmp.lt.s32.totalorder %v14579_v53, 0 }
 0x1c4   :  { %v1397_v32 = vor.u32 4788187, %v1396_v21  ;;  %v1407_v14 = vsel %vm14794_vm14, 0, %v1405_v61  ;;  %v1483_v52 = vshrl.u32 %v1482_v62, 30  ;;  %v1532_v41 = vor.u32 8388608, %v1531_v36 }
 0x1c5   :  { %vm1535_vm15 = vcmp.gt.s32.totalorder %v1534_v55, 0  ;;  %v3071_v45 = vadd.s32 3, %v1407_v14 }
 0x1c6   :  { %v1398_v59 = vand.u32 2147483647, %v1397_v32  ;;  %v1484_v54 = vshll.u32 %v1483_v52, 30  ;;  %v1536_v10 = vsel %vm1535_vm15, %v1534_v55, 0  ;;  %v1507_v21 = vsub.s32 4, %v1483_v52 }
 0x1c7   :  { %v1538_v25 = vand.u32 31, %v1536_v10  ;;  %v14809_v17 = vand.u32 3, %v3071_v45  ;;  %v1477_v32 = vadd.s32 %v14733_v40, %v14748_v11  ;;  %v1537_v3 = vshrl.u32 %v1536_v10, 5 }
 0x1c8   :  { %v1401_v27 = vmul.f32 %v1400_v18, %v1398_v59  ;;  %v14805_v12 = vsub.s32 %v1481_v56, %v1484_v54  ;;  %v14816_v56 = vand.u32 3, %v1407_v14  ;;  %v1631_v18 = vshrl.u32 %v1630_v34, 23 }
 0x1c9   :  { %v1539_v35 = vsub.s32 32, %v1538_v25  ;;  %v1541_v59 = vshll.u32 %v19273_v50, %v1538_v25  ;;  %v14823_v54 = vshll.u32 %v1532_v41, 8  ;;  %v1508_v14 = vsel %vm1423_vm2, %v1507_v21, %v1483_v52 }
 0x1ca   :  { %v1402_v61 = vxor.u32 2147483648, %v1401_v27  ;;  %v1487_v30 = vsub.s32 0, %v14805_v12  ;;  %v19295_v34 = vand.u32 2147483647, %v14579_v53  ;;  %v11816_v51 = vadd.s32 4294967169, %v1631_v18 }
 0x1cb   :  { %v1542_v45 = vshrl.u32 %v19274_v63, %v1539_v35  ;;  %v1545_v40 = vshrl.u32 %v19266_v39, %v1539_v35  ;;  %v1540_v41 = vshrl.u32 %v19273_v50, %v1539_v35  ;;  %v1553_v52 = vshll.u32 %v19288_v9, %v1538_v25 }
 0x1cc   :  { %v1403_v62 = vsel %vm1320_vm12, %v1402_v61, %v1401_v27  ;;  %v11809_v36 = vmin.u32 %v1487_v30, %v14805_v12  ;;  %v1544_v27 = vshll.u32 %v19274_v63, %v1538_v25  ;;  %vm14832_vm0 = vcmp.le.f32.partialorder %v19295_v34, 0.7853982 }
 0x1cd   :  { %v1406_v55 = vsel %vm14794_vm14, %v14387_v60, %v1403_v62  ;;  %v1547_v30 = vshll.u32 %v19266_v39, %v1538_v25  ;;  %v1548_v62 = vshrl.u32 %v19267_v26, %v1539_v35  ;;  %v1543_v10 = vor.u32 %v1542_v45, %v1541_v59 }
 0x1ce   :  { %12859 = vcosq.f32 %v1406_v55  ;;  %v1489_v11 = vclz %v11809_v36  ;;  %v1551_v36 = vshrl.u32 %v19288_v9, %v1539_v35  ;;  %v1546_v21 = vor.u32 %v1545_v40, %v1544_v27 }
 0x1cf   :  { %12861 = vsinq.f32 %v1406_v55  ;;  %v1550_v55 = vshll.u32 %v19267_v26, %v1538_v25  ;;  %v1549_v34 = vor.u32 %v1548_v62, %v1547_v30  ;;  %v1554_v37 = vshrl.u32 %v19275_v47, %v1539_v35 }
 0x1d0   :  { %v11810_v48 = vadd.s32 4294967294, %v1489_v11  ;;  %vm1556_vm3 = vcmp.lt.s32.totalorder %v1537_v3, 1  ;;  %vm1559_vm4 = vcmp.lt.s32.totalorder %v1537_v3, 4  ;;  %vm1557_vm5 = vcmp.lt.s32.totalorder %v1537_v3, 2 }
 0x1d1   :  { %v1552_v58 = vor.u32 %v1551_v36, %v1550_v55  ;;  %v1555_v31 = vor.u32 %v1554_v37, %v1553_v52  ;;  %vm1558_vm6 = vcmp.lt.s32.totalorder %v1537_v3, 3  ;;  %v1561_v57 = vsel %vm1559_vm4, %v1549_v34, 2102212464 }
 0x1d2   :  { %vm11811_vm1 = vcmp.lt.s32.totalorder %v11810_v48, 0  ;;  %v1560_v25 = vsel %vm1556_vm3, %v1540_v41, %v1543_v10  ;;  %v1564_v59 = vsel %vm1556_vm3, %v1543_v10, %v1546_v21  ;;  %v1568_v27 = vsel %vm1556_vm3, %v1546_v21, %v1549_v34 }
 0x1d3   :  { %v1492_v5 = vsel %vm11811_vm1, 0, %v11810_v48  ;;  %v1565_v45 = vsel %vm1559_vm4, %v1552_v58, 920167782  ;;  %v1569_v62 = vsel %vm1559_vm4, %v1555_v31, 1326507024  ;;  %v1562_v48 = vsel %vm1558_vm6, %v1546_v21, %v1561_v57 }
 0x1d4   :  { %v1493_v18 = vsub.s32 32, %v1492_v5  ;;  %v1494_v11 = vshll.u32 %v14805_v12, %v1492_v5  ;;  %v1497_v42 = vsub.s32 4294967266, %v1492_v5  ;;  %v1566_v30 = vsel %vm1558_vm6, %v1549_v34, %v1565_v45 }
 0x1d5   :  { %v1567_v37 = vsel %vm1557_vm5, %v1564_v59, %v1566_v30  ;;  %v1570_v55 = vsel %vm1558_vm6, %v1552_v58, %v1569_v62  ;;  %v1637_v36 = vadd.s32 1, %v11816_v51  ;;  %v1510_v5 = vsel %vm14832_vm0, 0, %v1508_v14 }
 0x1d6   :  { %v1495_v35 = vshrl.u32 %v1477_v32, %v1493_v18  ;;  %v1498_v40 = vadd.s32 127, %v1497_v42  ;;  %v1571_v41 = vsel %vm1557_vm5, %v1568_v27, %v1570_v55  ;;  %v1563_v51 = vsel %vm1557_vm5, %v1560_v25, %v1562_v48 }
 0x1d7   :  { %v14852_v10 = vmul.u32.u64.low %v14823_v54, %v1571_v41  ;;  %v14853_v1 = vmul.u32.u64.high %v14823_v54, %v1571_v41, %v14852_v10  ;;  %v14856_v42 = vmul.u32.u64.low %v14823_v54, %v1567_v37  ;;  %v14857_v32 = vmul.u32.u64.high %v14823_v54, %v1567_v37, %v14856_v42 }
 0x1d8   :  { %v1496_v52 = vor.u32 %v1495_v35, %v1494_v11  ;;  %v1499_v12 = vshll.u32 %v1498_v40, 23  ;;  %vm1638_vm7 = vcmp.gt.s32.totalorder %v1637_v36, 0  ;;  %vm3073_vm8 = vcmp.lt.s32.totalorder %v14809_v17, 2 }
 0x1d9   :  { %v19298_v14 = vand.u32 2147483647, %v14800_v44  ;;  %v1639_v11 = vsel %vm1638_vm7, %v1637_v36, 0  ;;  %vm3077_vm9 = vcmp.eq.s32.totalorder %v14809_v17, 2  ;;  %vm3074_vm10 = vcmp.eq.s32.totalorder %v14809_v17, 0 }
 0x1da   :  { %v1500_v31 = vor.u32 4788187, %v1499_v12  ;;  %v1503_v58 = vcvt.s32.f32 %v1496_v52  ;;  %v1641_v27 = vand.u32 31, %v1639_v11  ;;  %v3175_v35 = vadd.s32 3, %v1510_v5 }
 0x1db   :  { %v12860_v57 = vpop.eup %12859  ;;  %v1634_v18 = vand.u32 8388607, %v19298_v14  ;;  %v1579_v3 = vmul.u32 %v14823_v54, %v1563_v51  ;;  %vm1581_vm11 = vc.u32 %v14853_v1, %v14856_v42  ;;  %vm1412_vm12 = vcmp.lt.s32.totalorder %v14816_v56, 2 }
 0x1dc   :  { %v12862_v21 = vpop.eup %12861  ;;  %v1417_v34 = vxor.u32 2147483648, %v12860_v57  ;;  %v1501_v45 = vand.u32 2147483647, %v1500_v31  ;;  %vm1413_vm13 = vcmp.eq.s32.totalorder %v14816_v56, 0  ;;  %v1582_v40 = vadd.s32 1, %v14857_v32 }
 0x1dd   :  { %v1414_v59 = vxor.u32 2147483648, %v12862_v21  ;;  %vm1410_vm14 = vweird.f32 %v14387_v60  ;;  %vm1416_vm15 = vcmp.eq.s32.totalorder %v14816_v56, 2  ;;  %v1635_v62 = vor.u32 8388608, %v1634_v18 }
 0x1de   :  { %v1504_v25 = vmul.f32 %v1503_v58, %v1501_v45  ;;  %v3079_v30 = vsel %vm3077_vm9, %v1417_v34, %v12862_v21  ;;  %v1642_v48 = vsub.s32 32, %v1641_v27  ;;  %v1583_v54 = vsel %vm1581_vm11, %v1582_v40, %v14857_v32 }
 0x1df   :  { %v3076_v55 = vsel %vm3074_vm10, %v12860_v57, %v1414_v59  ;;  %v1644_v36 = vshll.u32 %v19273_v50, %v1641_v27  ;;  %v14876_v52 = vand.u32 3, %v3175_v35  ;;  %v14878_v12 = vand.u32 3, %v1510_v5 }
 0x1e0   :  { %v1505_v37 = vxor.u32 2147483648, %v1504_v25  ;;  %v1584_v41 = vadd.s32 %v1583_v54, %v1579_v3  ;;  %v1640_v10 = vshrl.u32 %v1639_v11, 5  ;;  %v1418_v58 = vsel %vm1416_vm15, %v1417_v34, %v12862_v21 }
 0x1e1   :  { %v1645_v51 = vshrl.u32 %v19274_v63, %v1642_v48  ;;  %v1647_v14 = vshll.u32 %v19274_v63, %v1641_v27  ;;  %v3080_v18 = vsel %vm3073_vm8, %v3076_v55, %v3079_v30  ;;  %v1415_v5 = vsel %vm1413_vm13, %v12860_v57, %v1414_v59 }
 0x1e2   :  { %v1506_v31 = vsel %vm1423_vm2, %v1505_v37, %v1504_v25  ;;  %v1585_v45 = vadd.s32 536870912, %v1584_v41  ;;  %v1648_v35 = vshrl.u32 %v19266_v39, %v1642_v48  ;;  %v1650_v21 = vshll.u32 %v19266_v39, %v1641_v27 }
 0x1e3   :  { %v1509_v32 = vsel %vm14832_vm0, %v14579_v53, %v1506_v31  ;;  %v1646_v11 = vor.u32 %v1645_v51, %v1644_v36  ;;  %v1651_v3 = vshrl.u32 %v19267_v26, %v1642_v48  ;;  %v1653_v61 = vshll.u32 %v19267_v26, %v1641_v27 }
 0x1e4   :  { %12863 = vcosq.f32 %v1509_v32  ;;  %v14893_v34 = vshrl.u32 %v1585_v45, 30  ;;  %v1649_v25 = vor.u32 %v1648_v35, %v1647_v14  ;;  %v1654_v17 = vshrl.u32 %v19288_v9, %v1642_v48 }
 0x1e5   :  { %12865 = vsinq.f32 %v1509_v32  ;;  %v1656_v40 = vshll.u32 %v19288_v9, %v1641_v27  ;;  %v1657_v57 = vshrl.u32 %v19275_v47, %v1642_v48  ;;  %v1419_v59 = vsel %vm1412_vm12, %v1415_v5, %v1418_v58 }
 0x1e6   :  { %v1587_v30 = vshll.u32 %v14893_v34, 30  ;;  %v1652_v37 = vor.u32 %v1651_v3, %v1650_v21  ;;  %vm1659_vm2 = vcmp.lt.s32.totalorder %v1640_v10, 1  ;;  %v1643_v55 = vshrl.u32 %v19273_v50, %v1642_v48 }
 0x1e7   :  { %v1655_v54 = vor.u32 %v1654_v17, %v1653_v61  ;;  %v1658_v36 = vor.u32 %v1657_v57, %v1656_v40  ;;  %vm1661_vm0 = vcmp.lt.s32.totalorder %v1640_v10, 3  ;;  %vm1660_vm1 = vcmp.lt.s32.totalorder %v1640_v10, 2 }
 0x1e8   :  { %v14904_v31 = vsub.s32 %v1584_v41, %v1587_v30  ;;  %vm1662_vm3 = vcmp.lt.s32.totalorder %v1640_v10, 4  ;;  %v1675_v51 = vshll.u32 %v1635_v62, 8  ;;  %v14908_v27 = vsel %vm1410_vm14, nan, %v3080_v18 }
 0x1e9   :  { %v1664_v56 = vsel %vm1662_vm3, %v1652_v37, 2102212464  ;;  %v1667_v58 = vsel %vm1659_vm2, %v1646_v11, %v1649_v25  ;;  %v1668_v14 = vsel %vm1662_vm3, %v1655_v54, 920167782  ;;  %v14913_v32 = vsel %vm1410_vm14, nan, %v1419_v59 }
 0x1ea   :  { %v1590_v48 = vsub.s32 0, %v14904_v31  ;;  %v1669_v41 = vsel %vm1661_vm0, %v1652_v37, %v1668_v14  ;;  %v1671_v5 = vsel %vm1659_vm2, %v1649_v25, %v1652_v37  ;;  %v1663_v62 = vsel %vm1659_vm2, %v1643_v55, %v1646_v11 }
 0x1eb   :  { %v1665_v45 = vsel %vm1661_vm0, %v1649_v25, %v1664_v56  ;;  %v1670_v18 = vsel %vm1660_vm1, %v1667_v58, %v1669_v41  ;;  %v1672_v35 = vsel %vm1662_vm3, %v1658_v36, 1326507024  ;;  %vm1513_vm4 = vweird.f32 %v14579_v53 }
 0x1ec   :  { %v11813_v21 = vmin.u32 %v1590_v48, %v14904_v31  ;;  %v1673_v3 = vsel %vm1661_vm0, %v1655_v54, %v1672_v35  ;;  %v14923_v60 = vmul.u32.u64.low %v1675_v51, %v1670_v18  ;;  %v14924_v61 = vmul.u32.u64.high %v1675_v51, %v1670_v18, %v14923_v60 }
 0x1ed   :  { %vm1515_vm5 = vcmp.lt.s32.totalorder %v14878_v12, 2  ;;  %v3502_v11 = vmul.f32 %v14908_v27, %v14913_v32  ;;  %v1674_v25 = vsel %vm1660_vm1, %v1671_v5, %v1673_v3  ;;  %v1666_v40 = vsel %vm1660_vm1, %v1663_v62, %v1665_v45 }
 0x1ee   :  { %v1592_v17 = vclz %v11813_v21  ;;  %v14933_v57 = vmul.u32.u64.low %v1675_v51, %v1674_v25  ;;  %v14934_v59 = vmul.u32.u64.high %v1675_v51, %v1674_v25, %v14933_v57  ;;  %vm3177_vm6 = vcmp.lt.s32.totalorder %v14876_v52, 2 }
 0x1ef   :  { %vm3178_vm7 = vcmp.eq.s32.totalorder %v14876_v52, 0  ;;  %vm1516_vm8 = vcmp.eq.s32.totalorder %v14878_v12, 0  ;;  %vm1519_vm9 = vcmp.eq.s32.totalorder %v14878_v12, 2  ;;  %vm3181_vm10 = vcmp.eq.s32.totalorder %v14876_v52, 2 }
 0x1f0   :  { %v1580_v37 = vadd.s32 %v14856_v42, %v14853_v1  ;;  %v11814_v55 = vadd.s32 4294967294, %v1592_v17  ;;  %v1685_v10 = vadd.s32 1, %v14924_v61  ;;  %v3454_v56 = vmul.f32 %v14913_v32, %v14913_v32 }
 0x1f1   :  { %v12864_v30 = vpop.eup %12863  ;;  %v3470_v58 = vmul.f32 %v14908_v27, %v14908_v27  ;;  %v1682_v14 = vmul.u32 %v1675_v51, %v1666_v40  ;;  %v14948_v41 = vadd.f32 %v3502_v11, %v3502_v11  ;;  %vm1684_vm12 = vc.u32 %v14934_v59, %v14923_v60 }
 0x1f2   :  { %v12866_v54 = vpop.eup %12865  ;;  %v1520_v36 = vxor.u32 2147483648, %v12864_v30  ;;  %vm11815_vm11 = vcmp.lt.s32.totalorder %v11814_v55, 0  ;;  %v1686_v62 = vsel %vm1684_vm12, %v1685_v10, %v14924_v61  ;;  %vm1526_vm13 = vcmp.lt.s32.totalorder %v14682_v20, 0 }
 0x1f3   :  { %v1517_v48 = vxor.u32 2147483648, %v12866_v54  ;;  %v1595_v5 = vsel %vm11815_vm11, 0, %v11814_v55  ;;  %v1687_v25 = vadd.s32 %v1686_v62, %v1682_v14  ;;  %v3486_v40 = vsub.f32 %v3454_v56, %v3470_v58 }
 0x1f4   :  { %v3183_v1 = vsel %vm3181_vm10, %v1520_v36, %v12866_v54  ;;  %v1521_v42 = vsel %vm1519_vm9, %v1520_v36, %v12866_v54  ;;  %v1596_v18 = vsub.s32 32, %v1595_v5  ;;  %v1597_v35 = vshll.u32 %v14904_v31, %v1595_v5 }
 0x1f5   :  { %v3180_v45 = vsel %vm3178_vm7, %v12864_v30, %v1517_v48  ;;  %v1518_v51 = vsel %vm1516_vm8, %v12864_v30, %v1517_v48  ;;  %v1600_v11 = vsub.s32 4294967266, %v1595_v5  ;;  %v1688_v36 = vadd.s32 536870912, %v1687_v25 }
 0x1f6   :  { %v3184_v21 = vsel %vm3177_vm6, %v3180_v45, %v3183_v1  ;;  %v1522_v3 = vsel %vm1515_vm5, %v1518_v51, %v1521_v42  ;;  %v1598_v57 = vshrl.u32 %v1580_v37, %v1596_v18  ;;  %vm1629_vm2 = vcmp.lt.s32.totalorder %v14800_v44, 0 }
 0x1f7   :  { %v3185_v61 = vsel %vm1513_vm4, nan, %v3184_v21  ;;  %v1523_v17 = vsel %vm1513_vm4, nan, %v1522_v3  ;;  %v1601_v12 = vadd.s32 127, %v1600_v11  ;;  %v1689_v42 = vshrl.u32 %v1688_v36, 30 }
 0x1f8   :  { %v3408_v30 = vpack.c.bf16 %v3185_v61, %v14908_v27  ;;  %v3400_v31 = vpack.c.bf16 %v1523_v17, %v14913_v32  ;;  %v3503_v55 = vmul.f32 %v3185_v61, %v1523_v17  ;;  %v3455_v52 = vmul.f32 %v1523_v17, %v1523_v17 }
 0x1f9   :  { %v3471_v10 = vmul.f32 %v3185_v61, %v3185_v61  ;;  %v1599_v54 = vor.u32 %v1598_v57, %v1597_v35  ;;  %v1602_v1 = vshll.u32 %v1601_v12, 23  ;;  %v1690_v5 = vshll.u32 %v1689_v42, 30 }
 0x1fa   :  { %4095 = vmatprep.mubr.bf16.mxu1 %v3408_v30  ;;  %v3519_v14 = vadd.f32 %v3503_v55, %v3503_v55  ;;  %v19299_v11 = vand.u32 2147483647, %v14682_v20  ;;  %v1683_v55 = vadd.s32 %v14923_v60, %v14934_v59  ;;  %v1610_v36 = vsub.s32 4, %v14893_v34 }
 0x1fb   :  { %4096 = vmatmul.mubr.bf16.gmra.mxu1 %v3400_v31  ;;  %v3487_v48 = vsub.f32 %v3455_v52, %v3471_v10  ;;  %v1603_v37 = vor.u32 4788187, %v1602_v1  ;;  %v1606_v58 = vcvt.s32.f32 %v1599_v54  ;;  %v1691_v45 = vsub.s32 %v1687_v25, %v1690_v5 }
 0x1fc   :  { %v3536_v53 = vpack.c.bf16 %v3519_v14, %v14948_v41  ;;  %vm14974_vm14 = vcmp.le.f32.partialorder %v19299_v11, 0.7853982  ;;  %v4176_v1 = vmul.f32 %v14948_v41, %v14913_v32  ;;  %v4128_v60 = vmul.f32 %v3486_v40, %v14913_v32 }
 0x1fd   :  { %v3528_v56 = vpack.c.bf16 %v3487_v48, %v3486_v40  ;;  %v1604_v62 = vand.u32 2147483647, %v1603_v37  ;;  %v1693_v18 = vsub.s32 0, %v1691_v45  ;;  %v4193_v5 = vmul.f32 %v3487_v48, %v3185_v61 }
 0x1fe   :  { %3822 = vmatprep.mubr.bf16.mxu0 %v3536_v53  ;;  %v4177_v53 = vmul.f32 %v3519_v14, %v1523_v17  ;;  %v4129_v59 = vmul.f32 %v3487_v48, %v1523_v17  ;;  %vm1616_vm8 = vweird.f32 %v14682_v20  ;;  %vm1719_vm9 = vweird.f32 %v14800_v44 }
 0x1ff   :  { %3823 = vmatmul.mubr.bf16.gmra.mxu0 %v3528_v56  ;;  %v1607_v51 = vmul.f32 %v1606_v58, %v1604_v62  ;;  %v11817_v21 = vmin.u32 %v1693_v18, %v1691_v45  ;;  %v4192_v58 = vmul.f32 %v3486_v40, %v14908_v27  ;;  %v4144_v18 = vmul.f32 %v14948_v41, %v14908_v27 }
 0x201   :  { %v1608_v35 = vxor.u32 2147483648, %v1607_v51  ;;  %v1695_v3 = vclz %v11817_v21  ;;  %v14997_v21 = vadd.f32 %v4193_v5, %v4177_v53  ;;  %v4189_v5 = vmul.f32 %v14529_v7, %v14506_v28 }
 0x203   :  { %v1609_v30 = vsel %vm1526_vm13, %v1608_v35, %v1607_v51  ;;  %v11818_v31 = vadd.s32 4294967294, %v1695_v3  ;;  %v1611_v35 = vsel %vm1526_vm13, %v1610_v36, %v14893_v34  ;;  %v4145_v3 = vmul.f32 %v3519_v14, %v3185_v61 }
 0x204   :  { %v1612_v25 = vsel %vm14974_vm14, %v14682_v20, %v1609_v30  ;;  %v1613_v40 = vsel %vm14974_vm14, 0, %v1611_v35  ;;  %v1713_v34 = vsub.s32 4, %v1689_v42  ;;  %v19302_v61 = vand.u32 2147483647, %v14800_v44 }
 0x205   :  { %vm11819_vm15 = vcmp.lt.s32.totalorder %v11818_v31, 0  ;;  %12867 = vcosq.f32 %v1612_v25  ;;  %v4161_v17 = vsub.f32 %v4129_v59, %v4145_v3  ;;  %v3279_v41 = vadd.s32 3, %v1613_v40 }
 0x206   :  { %v1698_v52 = vsel %vm11819_vm15, 0, %v11818_v31  ;;  %12869 = vsinq.f32 %v1612_v25  ;;  %v4160_v31 = vsub.f32 %v4128_v60, %v4144_v18  ;;  %vm1628_vm0 = vcmp.le.f32.partialorder %v19302_v61, 0.7853982 }
 0x207   :  { %v1699_v10 = vsub.s32 32, %v1698_v52  ;;  %v1700_v54 = vshll.u32 %v1691_v45, %v1698_v52  ;;  %v1703_v12 = vsub.s32 4294967266, %v1698_v52  ;;  %v14990_v45 = vadd.f32 %v4192_v58, %v4176_v1 }
 0x208   :  { %v15003_v25 = vpack.c.bf16 %v4161_v17, %v4160_v31  ;;  %v3280_v57 = vand.u32 3, %v3279_v41  ;;  %v1617_v36 = vand.u32 3, %v1613_v40  ;;  %v4173_v58 = vmul.f32 %v14527_v16, %v14510_v29 }
 0x209   :  { %v1701_v56 = vshrl.u32 %v1683_v55, %v1699_v10  ;;  %v1704_v37 = vadd.s32 127, %v1703_v12  ;;  %v4226_v32 = vpack.c.bf16 %v14997_v21, %v14990_v45  ;;  %v15019_v35 = vmul.f32 %v13506_v2, %v13475_v22 }
 0x20a   :  { %vm3282_vm1 = vcmp.eq.s32.totalorder %v3280_v57, 0  ;;  %vm3285_vm3 = vcmp.eq.s32.totalorder %v3280_v57, 2  ;;  %vm1619_vm4 = vcmp.eq.s32.totalorder %v1617_v36, 0  ;;  %vm1622_vm5 = vcmp.eq.s32.totalorder %v1617_v36, 2 }
 0x20b   :  { %v1702_v62 = vor.u32 %v1701_v56, %v1700_v54  ;;  %v1705_v51 = vshll.u32 %v1704_v37, 23  ;;  %v1714_v54 = vsel %vm1629_vm2, %v1713_v34, %v1689_v42  ;;  %v4172_v37 = vmul.f32 %v14483_v15, %v14440_v38 }
 0x20c   :  { %v1716_v56 = vsel %vm1628_vm0, 0, %v1714_v54  ;;  %v4188_v42 = vmul.f32 %v14485_v49, %v14423_v43  ;;  %vm3281_vm6 = vcmp.lt.s32.totalorder %v3280_v57, 2  ;;  %vm1618_vm7 = vcmp.lt.s32.totalorder %v1617_v36, 2 }
 0x20d   :  { %v1706_v11 = vor.u32 4788187, %v1705_v51  ;;  %v1709_v30 = vcvt.s32.f32 %v1702_v62  ;;  %v3383_v60 = vadd.s32 3, %v1716_v56  ;;  %v15023_v3 = vmul.f32 %v14483_v15, %v14423_v43 }
 0x20e   :  { %v15032_v31 = vadd.f32 %v4189_v5, %v4173_v58  ;;  %v15036_v34 = vmul.f32 %v13528_v19, %v13514_v6  ;;  %v15040_v43 = vmul.f32 %v13516_v8, %v13471_v33  ;;  %v4180_v15 = vmul.f32 %v13516_v8, %v13475_v22 }
 0x20f   :  { %v1707_v48 = vand.u32 2147483647, %v1706_v11  ;;  %v15027_v11 = vmul.f32 %v14485_v49, %v14440_v38  ;;  %v3384_v40 = vand.u32 3, %v3383_v60  ;;  %v4164_v38 = vmul.f32 %v13506_v2, %v13471_v33 }
 0x210   :  { %v15048_v49 = vmul.f32 %v13533_v13, %v13510_v4  ;;  %v15052_v41 = vmul.f32 %v14527_v16, %v14506_v28  ;;  %v15056_v61 = vmul.f32 %v14529_v7, %v14510_v29  ;;  %v4165_v2 = vmul.f32 %v13528_v19, %v13510_v4 }
 0x211   :  { %v1710_v27 = vmul.f32 %v1709_v30, %v1707_v48  ;;  %v15030_v30 = vadd.f32 %v4188_v42, %v4172_v37  ;;  %v4181_v8 = vmul.f32 %v13533_v13, %v13514_v6  ;;  %vm3389_vm10 = vcmp.eq.s32.totalorder %v3384_v40, 2  ;;  %v19304_v37 = vld [vmem:[#allocation37_spill] sm:$0xff] }
 0x212   :  { %v12868_v55 = vpop.eup %12867  ;;  %v4156_v16 = vsub.f32 %v15027_v11, %v15023_v3  ;;  %vm3386_vm12 = vcmp.eq.s32.totalorder %v3384_v40, 0  ;;  %v4196_v20 = vadd.f32 %v4180_v15, %v4164_v38  ;;  %vm3385_vm14 = vcmp.lt.s32.totalorder %v3384_v40, 2 }
 0x213   :  { %v1711_v14 = vxor.u32 2147483648, %v1710_v27  ;;  %v12870_v10 = vpop.eup %12869  ;;  %v1623_v53 = vxor.u32 2147483648, %v12868_v55  ;;  %v4224_v29 = vpack.c.bf16 %v15032_v31, %v15030_v30  ;;  %v4197_v13 = vadd.f32 %v4181_v8, %v4165_v2 }
 0x214   :  { %v1620_v1 = vxor.u32 2147483648, %v12870_v10  ;;  %v4157_v40 = vsub.f32 %v15056_v61, %v15052_v41  ;;  %v4149_v15 = vsub.f32 %v15048_v49, %v15036_v34  ;;  %v19308_v41 = vld [vmem:[#allocation14_spill] sm:$0xff]  ;;  %v19312_v34 = vld [vmem:[#allocation17_spill] sm:$0xff] }
 0x215   :  { %v1712_v52 = vsel %vm1629_vm2, %v1711_v14, %v1710_v27  ;;  %v3287_v62 = vsel %vm3285_vm3, %v1623_v53, %v12870_v10  ;;  %v1624_v18 = vsel %vm1622_vm5, %v1623_v53, %v12870_v10  ;;  %v1720_v27 = vand.u32 3, %v1716_v56  ;;  %v19303_v56 = vld [vmem:[#allocation36_spill] sm:$0xff] }
 0x216   :  { %v1715_v12 = vsel %vm1628_vm0, %v14800_v44, %v1712_v52  ;;  %v3284_v59 = vsel %vm3282_vm1, %v12868_v55, %v1620_v1  ;;  %v1621_v51 = vsel %vm1619_vm4, %v12868_v55, %v1620_v1  ;;  %v4174_v52 = vmul.f32 %v14677_v46, %v14649_v23  ;;  %v15107_v44 = vpop.f32.mrf.mxu1 }
 0x217   :  { %12871 = vcosq.f32 %v1715_v12  ;;  %v3288_v17 = vsel %vm3281_vm6, %v3284_v59, %v3287_v62  ;;  %v1625_v48 = vsel %vm1618_vm7, %v1621_v51, %v1624_v18  ;;  %vm1725_vm11 = vcmp.eq.s32.totalorder %v1720_v27, 2  ;;  %v19305_v59 = vld [vmem:[#allocation38_spill] sm:$0xff]  ;;  %v19306_v62 = vld [vmem:[#allocation39_spill] sm:$0xff] }
 0x218   :  { %12873 = vsinq.f32 %v1715_v12  ;;  %v15061_v33 = vsel %vm1616_vm8, nan, %v3288_v17  ;;  %v15065_v22 = vsel %vm1616_vm8, nan, %v1625_v48  ;;  %vm1722_vm13 = vcmp.eq.s32.totalorder %v1720_v27, 0 }
 0x219   :  { %vm1721_vm15 = vcmp.lt.s32.totalorder %v1720_v27, 2  ;;  %v3504_v4 = vmul.f32 %v15061_v33, %v15065_v22  ;;  %v3456_v12 = vmul.f32 %v15065_v22, %v15065_v22  ;;  %v3472_v57 = vmul.f32 %v15061_v33, %v15061_v33 }
 0x21a   :  { %v4175_v53 = vmul.f32 %v14775_v0, %v14761_v24  ;;  %v4190_v58 = vmul.f32 %v19304_v37, %v19303_v56  ;;  %v4191_v51 = vmul.f32 %v19306_v62, %v19305_v59  ;;  %v4148_v48 = vsub.f32 %v15040_v43, %v15019_v35  ;;  %v19309_v43 = vld [vmem:[#allocation16_spill] sm:$0xff] }
 0x21b   :  { %v15095_v60 = vadd.f32 %v3504_v4, %v3504_v4  ;;  %v15111_v17 = vsub.f32 %v3456_v12, %v3472_v57  ;;  %v4220_v38 = vpack.c.bf16 %v4197_v13, %v4196_v20  ;;  %v19310_v20 = vld [vmem:[#allocation18_spill] sm:$0xff]  ;;  %v19311_v4 = vld [vmem:[#allocation12_spill] sm:$0xff]  ;;  %v4143_v12 = vmul.f32 %v14775_v0, %v19305_v59  ;;  %v19315_v59 = vld [vmem:[#allocation21_spill] sm:$0xff] }
 0x21c   :  { %v4206_v2 = vadd.f32 %v4190_v58, %v4174_v52  ;;  %v4182_v49 = vmul.f32 %v19312_v34, %v19311_v4  ;;  %v15135_v52 = vpop.f32.mrf.mxu1  ;;  %v4216_v57 = vpack.c.bf16 %v4157_v40, %v4156_v16  ;;  %v4134_v16 = vmul.f32 %v19308_v41, %v19311_v4  ;;  %v19319_v40 = vld [vmem:[#allocation20_spill] sm:$0xff] }
 0x21d   :  { %v4178_v4 = vmul.f32 %v15095_v60, %v15065_v22  ;;  %v4146_v21 = vmul.f32 %v15095_v60, %v15061_v33 }
 0x224   :  { %v12872_v28 = vpop.eup %12871 }
 0x225   :  { %v12874_v7 = vpop.eup %12873  ;;  %v1726_v14 = vxor.u32 2147483648, %v12872_v28 }
 0x226   :  { %v1723_v55 = vxor.u32 2147483648, %v12874_v7 }
 0x227   :  { %v3391_v6 = vsel %vm3389_vm10, %v1726_v14, %v12874_v7  ;;  %v1727_v19 = vsel %vm1725_vm11, %v1726_v14, %v12874_v7  ;;  %v4126_v7 = vmul.f32 %v19304_v37, %v14649_v23  ;;  %v19307_v14 = vld [vmem:[#allocation13_spill] sm:$0xff]  ;;  %v15147_v37 = vpop.f32.mrf.mxu1 }
 0x228   :  { %v3388_v10 = vsel %vm3386_vm12, %v12872_v28, %v1723_v55  ;;  %v1724_v54 = vsel %vm1722_vm13, %v12872_v28, %v1723_v55  ;;  %v4207_v28 = vadd.f32 %v4191_v51, %v4175_v53  ;;  %v4166_v61 = vmul.f32 %v19308_v41, %v19307_v14 }
 0x229   :  { %v3392_v36 = vsel %vm3385_vm14, %v3388_v10, %v3391_v6  ;;  %v1728_v1 = vsel %vm1721_vm15, %v1724_v54, %v1727_v19  ;;  %v4167_v55 = vmul.f32 %v19310_v20, %v19309_v43  ;;  %v19313_v6 = vld [vmem:[#allocation15_spill] sm:$0xff]  ;;  %v15137_v10 = vpop.f32.mrf.mxu0  ;;  %v4127_v54 = vmul.f32 %v19306_v62, %v14761_v24  ;;  %v19316_v62 = vld [vmem:[#allocation22_spill] sm:$0xff] }
 0x22a   :  { %v15089_v42 = vsel %vm1719_vm9, nan, %v3392_v36  ;;  %v15093_v5 = vsel %vm1719_vm9, nan, %v1728_v1  ;;  %v19314_v19 = vld [vmem:[#allocation19_spill] sm:$0xff]  ;;  %v4225_v36 = vpack.c.bf16 %v4207_v28, %v4206_v2  ;;  %v4198_v1 = vadd.f32 %v4182_v49, %v4166_v61 }
 0x22b   :  { %v3409_v18 = vpack.c.bf16 %v15089_v42, %v15061_v33  ;;  %v3401_v3 = vpack.c.bf16 %v15093_v5, %v15065_v22  ;;  %v3505_v11 = vmul.f32 %v15089_v42, %v15093_v5  ;;  %v3457_v30 = vmul.f32 %v15093_v5, %v15093_v5  ;;  %v15149_v58 = vpop.f32.mrf.mxu0  ;;  %v19322_v2 = vld [vmem:[#allocation27_spill] sm:$0xff] }
 0x22c   :  { %v3473_v31 = vmul.f32 %v15089_v42, %v15089_v42  ;;  %v4183_v13 = vmul.f32 %v19314_v19, %v19313_v6  ;;  %v4212_v51 = vpack.c.bf16 %v4149_v15, %v4148_v48  ;;  %v4159_v24 = vsub.f32 %v4127_v54, %v4143_v12  ;;  %v19320_v48 = vld [vmem:[#allocation23_spill] sm:$0xff]  ;;  %v19321_v15 = vld [vmem:[#allocation24_spill] sm:$0xff] }
 0x22d   :  { %4105 = vmatprep.mubr.bf16.mxu1 %v3409_v18  ;;  %v15117_v27 = vadd.f32 %v3505_v11, %v3505_v11  ;;  %v4119_v0 = vmul.f32 %v19314_v19, %v19309_v43  ;;  %v19317_v11 = vld [vmem:[#allocation25_spill] sm:$0xff]  ;;  %v4185_v28 = vmul.f32 %v19322_v2, %v19321_v15  ;;  %v15169_v41 = vpop.f32.mrf.mxu0  ;;  %v4194_v49 = vmul.f32 %v15111_v17, %v15061_v33 }
 0x22e   :  { %4106 = vmatmul.mubr.bf16.gmra.mxu1 %v3401_v3  ;;  %v15121_v8 = vsub.f32 %v3457_v30, %v3473_v31  ;;  %v4199_v53 = vadd.f32 %v4183_v13, %v4167_v55  ;;  %v4168_v3 = vmul.f32 %v19316_v62, %v19315_v59  ;;  %v19318_v30 = vld [vmem:[#allocation26_spill] sm:$0xff]  ;;  %v4121_v54 = vmul.f32 %v19322_v2, %v19317_v11 }
 0x22f   :  { %v3537_v35 = vpack.c.bf16 %v15117_v27, %v15095_v60  ;;  %4492 = vmatprep.mubr.bf16.mxu1 %v4224_v29  ;;  %v4142_v29 = vmul.f32 %v14677_v46, %v19303_v56  ;;  %v4118_v46 = vmul.f32 %v19312_v34, %v19307_v14  ;;  %v4135_v56 = vmul.f32 %v19310_v20, %v19313_v6  ;;  %v15167_v14 = vpop.f32.mrf.mxu1  ;;  %v15181_v13 = vpop.f32.mrf.mxu0 }
 0x230   :  { %v3529_v23 = vpack.c.bf16 %v15121_v8, %v15111_v17  ;;  %v4169_v31 = vmul.f32 %v19318_v30, %v19317_v11  ;;  %v4179_v34 = vmul.f32 %v15117_v27, %v15093_v5  ;;  %v4195_v6 = vmul.f32 %v15121_v8, %v15089_v42  ;;  %v19330_v11 = vld [vmem:[#allocation35_spill] sm:$0xff] }
 0x231   :  { %3832 = vmatprep.mubr.bf16.mxu0 %v3537_v35  ;;  %v4158_v18 = vsub.f32 %v4126_v7, %v4142_v29  ;;  %v4221_v7 = vpack.c.bf16 %v4199_v53, %v4198_v1  ;;  %v4150_v35 = vsub.f32 %v4118_v46, %v4134_v16  ;;  %v4151_v43 = vsub.f32 %v4119_v0, %v4135_v56  ;;  %v15179_v19 = vpop.f32.mrf.mxu1  ;;  %v19323_v1 = vld [vmem:[#allocation29_spill] sm:$0xff]  ;;  %v19324_v53 = vld [vmem:[#allocation30_spill] sm:$0xff]  ;;  %v19327_v56 = vld [vmem:[#allocation28_spill] sm:$0xff] }
 0x232   :  { %3833 = vmatmul.mubr.bf16.gmra.mxu0 %v3529_v23  ;;  %v4201_v55 = vadd.f32 %v4185_v28, %v4169_v31  ;;  %v4120_v23 = vmul.f32 %v19320_v48, %v19315_v59  ;;  %v4136_v29 = vmul.f32 %v19316_v62, %v19319_v40  ;;  %v4137_v12 = vmul.f32 %v19318_v30, %v19321_v15  ;;  %v19328_v59 = vld [vmem:[#allocation31_spill] sm:$0xff] }
 0x233   :  { %4452 = vmatprep.mubr.bf16.mxu0 %v4220_v38  ;;  %v4184_v38 = vmul.f32 %v19320_v48, %v19319_v40  ;;  %v4217_v61 = vpack.c.bf16 %v4159_v24, %v4158_v18  ;;  %v19325_v18 = vld [vmem:[#allocation33_spill] sm:$0xff]  ;;  %v19326_v24 = vld [vmem:[#allocation34_spill] sm:$0xff]  ;;  %v4210_v0 = vadd.f32 %v4194_v49, %v4178_v4  ;;  %v4211_v16 = vadd.f32 %v4195_v6, %v4179_v34  ;;  %v15202_v31 = vpop.f32.mrf.mxu1  ;;  %v15204_v40 = vpop.f32.mrf.mxu0 }
 0x234   :  { %v4171_v46 = vmul.f32 %v19326_v24, %v19325_v18  ;;  %v4186_v62 = vmul.f32 %v19328_v59, %v19327_v56  ;;  %v4152_v48 = vsub.f32 %v4120_v23, %v4136_v29  ;;  %v4130_v15 = vmul.f32 %v15111_v17, %v15065_v22 }
 0x235   :  { %v4200_v20 = vadd.f32 %v4184_v38, %v4168_v3  ;;  %v19329_v3 = vld [vmem:[#allocation32_spill] sm:$0xff]  ;;  %v4153_v38 = vsub.f32 %v4121_v54, %v4137_v12  ;;  %v4131_v45 = vmul.f32 %v15121_v8, %v15093_v5  ;;  %v4227_v2 = vpack.c.bf16 %v4211_v16, %v4210_v0 }
 0x236   :  { %4493 = vmatmul.mubr.bf16.vlgmr.msra.gmra.mxu1 %v4216_v57  ;;  %v4213_v57 = vpack.c.bf16 %v4151_v43, %v4150_v35  ;;  %v4187_v30 = vmul.f32 %v19330_v11, %v19329_v3  ;;  %v15216_v35 = vpop.f32.mrf.mxu0  ;;  %v4122_v22 = vmul.f32 %v19328_v59, %v19323_v1  ;;  %v4123_v5 = vmul.f32 %v19330_v11, %v19325_v18 }
 0x237   :  { %4502 = vmatprep.mubr.bf16.mxu1 %v4225_v36  ;;  %v4222_v36 = vpack.c.bf16 %v4201_v55, %v4200_v20  ;;  %v4214_v43 = vpack.c.bf16 %v4153_v38, %v4152_v48  ;;  %v4162_v33 = vsub.f32 %v4130_v15, %v4146_v21  ;;  %v4139_v17 = vmul.f32 %v19326_v24, %v19329_v3 }
 0x238   :  { %v15229_v20 = vpop.f32.mrf.mxu0 }
 0x239   :  { %v4155_v34 = vsub.f32 %v4123_v5, %v4139_v17 }
 0x23a   :  { %4453 = vmatmul.mubr.bf16.vlgmr.msra.gmra.mxu0 %v4212_v51  ;;  %v4170_v51 = vmul.f32 %v19324_v53, %v19323_v1  ;;  %v15233_v49 = vpop.f32.mrf.mxu0 }
 0x23b   :  { %4462 = vmatprep.mubr.bf16.mxu0 %v4221_v7  ;;  %v4203_v7 = vadd.f32 %v4187_v30, %v4171_v46 }
 0x23c   :  { %v4202_v28 = vadd.f32 %v4186_v62, %v4170_v51  ;;  %v15237_v54 = vpop.f32.mrf.mxu0 }
 0x23e   :  { %4503 = vmatmul.mubr.bf16.gmra.mxu1 %v4217_v61  ;;  %v15214_v61 = vpop.f32.mrf.mxu1  ;;  %v15241_v12 = vpop.f32.mrf.mxu0 }
 0x23f   :  { %4512 = vmatprep.mubr.bf16.mxu1 %v4226_v32  ;;  %v4147_v32 = vmul.f32 %v15117_v27, %v15089_v42  ;;  %v4138_v42 = vmul.f32 %v19324_v53, %v19327_v56  ;;  %v4223_v27 = vpack.c.bf16 %v4203_v7, %v4202_v28 }
 0x240   :  { %v15227_v8 = vpop.f32.mrf.mxu1 }
 0x241   :  { %v4163_v60 = vsub.f32 %v4131_v45, %v4147_v32  ;;  %v4154_v4 = vsub.f32 %v4122_v22, %v4138_v42 }
 0x242   :  { %4463 = vmatmul.mubr.bf16.gmra.mxu0 %v4213_v57 }
 0x243   :  { %4472 = vmatprep.mubr.bf16.mxu0 %v4222_v36  ;;  %v4219_v55 = vpack.c.bf16 %v4163_v60, %v4162_v33  ;;  %v4215_v6 = vpack.c.bf16 %v4155_v34, %v4154_v4  ;;  %v15245_v36 = vpop.f32.mrf.mxu0 }
 0x245   :  { %v15249_v53 = vpop.f32.mrf.mxu0 }
 0x246   :  { %4513 = vmatmul.mubr.bf16.gmra.mxu1 %v15003_v25  ;;  %v15231_v25 = vpop.f32.mrf.mxu1 }
 0x247   :  { %4522 = vmatprep.mubr.bf16.mxu1 %v4227_v2  ;;  %v15253_v18 = vpop.f32.mrf.mxu0 }
 0x248   :  { %v15235_v23 = vpop.f32.mrf.mxu1  ;;  %19334 = vst [vmem:[#allocation39_spill] sm:$0xff] %v15253_v18 }
 0x249   :  { %v15257_v46 = vpop.f32.mrf.mxu0 }
 0x24a   :  { %4473 = vmatmul.mubr.bf16.gmra.mxu0 %v4214_v43  ;;  %v15239_v29 = vpop.f32.mrf.mxu1  ;;  %19336 = vst [vmem:[#allocation14_spill] sm:$0xff] %v15257_v46 }
 0x24b   :  { %4482 = vmatprep.mubr.bf16.mxu0 %v4223_v27  ;;  %v15261_v16 = vpop.f32.mrf.mxu0 }
 0x24c   :  { %v15243_v57 = vpop.f32.mrf.mxu1  ;;  %19338 = vst [vmem:[#allocation18_spill] sm:$0xff] %v15261_v16 }
 0x24d   :  { %19331 = vst [vmem:[#allocation36_spill] sm:$0xff] %v15243_v57  ;;  %v15263_v59 = vpop.f32.mrf.mxu0 }
 0x24e   :  { %4523 = vmatmul.mubr.bf16.gmra.mxu1 %v4219_v55  ;;  %v15247_v1 = vpop.f32.mrf.mxu1  ;;  %19339 = vst [vmem:[#allocation12_spill] sm:$0xff] %v15263_v59 }
 0x24f   :  { %19332 = vst [vmem:[#allocation37_spill] sm:$0xff] %v15247_v1 }
 0x250   :  { %v15251_v51 = vpop.f32.mrf.mxu1  ;;  %v3804_v3 = vpop.f32.mrf.mxu0 }
 0x251   :  { %19333 = vst [vmem:[#allocation38_spill] sm:$0xff] %v15251_v51 }
 0x252   :  { %4483 = vmatmul.mubr.bf16.gmra.mxu0 %v4215_v6  ;;  %v15255_v24 = vpop.f32.mrf.mxu1  ;;  %v3806_v30 = vpop.f32.mrf.mxu0 }
 0x253   :  { %19335 = vst [vmem:[#allocation13_spill] sm:$0xff] %v15255_v24 }
 0x254   :  { %v15259_v0 = vpop.f32.mrf.mxu1  ;;  %v15269_v38 = vpop.f32.mrf.mxu0 }
 0x255   :  { %19337 = vst [vmem:[#allocation16_spill] sm:$0xff] %v15259_v0 }
 0x256   :  { %v4077_v56 = vpop.f32.mrf.mxu1  ;;  %v15271_v45 = vpop.f32.mrf.mxu0 }
 0x258   :  { %v4079_v62 = vpop.f32.mrf.mxu1 }
 0x25a   :  { %v15265_v11 = vpop.f32.mrf.mxu1 }
 0x25c   :  { %v15267_v48 = vpop.f32.mrf.mxu1 }
 0x27f   :  { %v4087_v15 = vpop.f32.mrf.mxu1 }
 0x281   :  { %v15273_v21 = vpop.f32.mrf.mxu1 }
 0x282   :  { %19340 = vst [vmem:[#allocation17_spill] sm:$0xff] %v15273_v21 }
 0x283   :  { %v3814_v32 = vpop.f32.mrf.mxu0  ;;  %v4091_v7 = vpop.f32.mrf.mxu1 }
 0x284   :  { %v15275_v2 = vadd.f32 %v4087_v15, %v3814_v32 }
 0x285   :  { %v15277_v28 = vpop.f32.mrf.mxu0  ;;  %v15281_v5 = vpop.f32.mrf.mxu1 }
 0x286   :  { %19341 = vst [vmem:[#allocation15_spill] sm:$0xff] %v15275_v2  ;;  %19342 = vst [vmem:[#allocation19_spill] sm:$0xff] %v15277_v28 }
 0x287   :  { %v3818_v43 = vpop.f32.mrf.mxu0  ;;  %19344 = vst [vmem:[#allocation22_spill] sm:$0xff] %v15281_v5 }
 0x288   :  { %v15279_v22 = vadd.f32 %v4091_v7, %v3818_v43  ;;  %v4567_v43 = vlaneseq }
 0x289   :  { %v15283_v60 = vpop.f32.mrf.mxu0 }
 0x28a   :  { %19343 = vst [vmem:[#allocation21_spill] sm:$0xff] %v15279_v22  ;;  %19345 = vst [vmem:[#allocation25_spill] sm:$0xff] %v15283_v60  ;;  %v4568_v22 = vshrl.u32 %v4567_v43, 7 }
 0x28c   :  { %v4569_v60 = vsub.s32 0, %v4568_v22 }
 0x2bb   :  { %v4097_v33 = vpop.f32.mrf.mxu1 }
 0x2bd   :  { %v4099_v42 = vpop.f32.mrf.mxu1 }
 0x2bf   :  { %v3824_v17 = vpop.f32.mrf.mxu0  ;;  %v4101_v55 = vpop.f32.mrf.mxu1 }
 0x2c0   :  { %v15285_v27 = vadd.f32 %v4097_v33, %v3824_v17  ;;  %v4565_v33 = vld [vmem:[%s18991_s3] sm:$0x3]  ;;  %v4573_v17 = vsub.s32 1, %v4568_v22 }
 0x2c1   :  { %v3826_v4 = vpop.f32.mrf.mxu0  ;;  %v4103_v32 = vpop.f32.mrf.mxu1 }
 0x2c2   :  { %19346 = vst [vmem:[#allocation26_spill] sm:$0xff] %v15285_v27  ;;  %v15287_v34 = vadd.f32 %v4099_v42, %v3826_v4  ;;  %v15304_v59 = vrot.slane %v4565_v33, %v4573_v17 }
 0x2c3   :  { %v3828_v6 = vpop.f32.mrf.mxu0 }
 0x2c4   :  { %19347 = vst [vmem:[#allocation20_spill] sm:$0xff] %v15287_v34  ;;  %v15289_v15 = vadd.f32 %v4101_v55, %v3828_v6  ;;  %v4078_v6 = vadd.f32 %v4077_v56, %v3804_v3  ;;  %v4038_v3 = vadd.f32 %v15107_v44, %v15137_v10 }
 0x2c5   :  { %v3830_v2 = vpop.f32.mrf.mxu0 }
 0x2c6   :  { %19348 = vst [vmem:[#allocation23_spill] sm:$0xff] %v15289_v15  ;;  %v15291_v7 = vadd.f32 %v4103_v32, %v3830_v2  ;;  %v15300_v2 = vrot.slane %v4565_v33, %v4569_v60 }
 0x2c8   :  { %19349 = vst [vmem:[#allocation24_spill] sm:$0xff] %v15291_v7  ;;  %19352 = vst [vmem:[#allocation30_spill] sm:$0xff] %v15300_v2  ;;  %v4080_v7 = vadd.f32 %v4079_v62, %v3806_v30 }
 0x2ee   :  { %v4107_v5 = vpop.f32.mrf.mxu1 }
 0x2f0   :  { %v4109_v21 = vpop.f32.mrf.mxu1 }
 0x2f2   :  { %v3834_v28 = vpop.f32.mrf.mxu0  ;;  %v4111_v0 = vpop.f32.mrf.mxu1 }
 0x2f3   :  { %v15296_v42 = vadd.f32 %v4107_v5, %v3834_v28 }
 0x2f4   :  { %v3836_v55 = vpop.f32.mrf.mxu0  ;;  %v4113_v4 = vpop.f32.mrf.mxu1 }
 0x2f5   :  { %19350 = vst [vmem:[#allocation27_spill] sm:$0xff] %v15296_v42  ;;  %v15298_v15 = vadd.f32 %v4109_v21, %v3836_v55 }
 0x2f6   :  { %v3838_v32 = vpop.f32.mrf.mxu0  ;;  %v4494_v43 = vpop.f32.mrf.mxu1 }
 0x2f7   :  { %19351 = vst [vmem:[#allocation29_spill] sm:$0xff] %v15298_v15  ;;  %v15302_v34 = vadd.f32 %v4111_v0, %v3838_v32  ;;  %v4549_v27 = vadd.f32 %v4494_v43, %v4078_v6  ;;  %v4082_v32 = vadd.f32 %v15265_v11, %v15269_v38 }
 0x2f8   :  { %v3840_v24 = vpop.f32.mrf.mxu0  ;;  %v4496_v16 = vpop.f32.mrf.mxu1 }
 0x2f9   :  { %19353 = vst [vmem:[#allocation33_spill] sm:$0xff] %v15302_v34  ;;  %v15307_v28 = vadd.f32 %v15300_v2, %v4549_v27  ;;  %v15309_v22 = vadd.f32 %v4113_v4, %v3840_v24  ;;  %v4550_v56 = vadd.f32 %v4496_v16, %v4080_v7 }
 0x2fa   :  { %v4454_v21 = vpop.f32.mrf.mxu0  ;;  %v4498_v6 = vpop.f32.mrf.mxu1 }
 0x2fb   :  { %19354 = vst [vmem:[#allocation34_spill] sm:$0xff] %v15307_v28  ;;  %19355 = vst [vmem:[#allocation28_spill] sm:$0xff] %v15309_v22  ;;  %v19068_v5 = vand.u32 2147483647, %v15307_v28  ;;  %v6260_v0 = vand.u32 2139095040, %v15307_v28  ;;  %v15316_v62 = vadd.f32 %v15304_v59, %v4550_v56  ;;  %v4533_v30 = vadd.f32 %v4454_v21, %v4038_v3 }
 0x2fd   :  { %19356 = vst [vmem:[#allocation31_spill] sm:$0xff] %v15316_v62  ;;  %v6261_v60 = vshrl.u32 %v6260_v0, 23  ;;  %v6363_v33 = vand.u32 2139095040, %v15316_v62  ;;  %v15320_v27 = vadd.f32 %v15300_v2, %v4533_v30  ;;  %v6264_v16 = vand.u32 8388607, %v19068_v5 }
 0x2fe   :  { %v15328_v30 = vadd.f32 %v4498_v6, %v4082_v32 }
 0x2ff   :  { %19357 = vst [vmem:[#allocation32_spill] sm:$0xff] %v15320_v27  ;;  %v12044_v24 = vadd.s32 4294967169, %v6261_v60  ;;  %v6364_v44 = vshrl.u32 %v6363_v33, 23  ;;  %v4612_v10 = vand.u32 2139095040, %v15320_v27  ;;  %v6265_v55 = vor.u32 8388608, %v6264_v16 }
 0x301   :  { %v6267_v7 = vadd.s32 1, %v12044_v24  ;;  %v12048_v17 = vadd.s32 4294967169, %v6364_v44  ;;  %v4613_v4 = vshrl.u32 %v4612_v10, 23  ;;  %v15330_v33 = vshll.u32 %v6265_v55, 8 }
 0x303   :  { %vm6268_vm2 = vcmp.gt.s32.totalorder %v6267_v7, 0  ;;  %v6370_v56 = vadd.s32 1, %v12048_v17  ;;  %v11980_v24 = vadd.s32 4294967169, %v4613_v4 }
 0x304   :  { %v6269_v43 = vsel %vm6268_vm2, %v6267_v7, 0 }
 0x305   :  { %v6271_v3 = vand.u32 31, %v6269_v43  ;;  %v6270_v21 = vshrl.u32 %v6269_v43, 5  ;;  %vm6371_vm0 = vcmp.gt.s32.totalorder %v6370_v56, 0 }
 0x306   :  { %v6372_v0 = vsel %vm6371_vm0, %v6370_v56, 0 }
 0x307   :  { %v6272_v60 = vsub.s32 32, %v6271_v3  ;;  %v6274_v16 = vshll.u32 %v19273_v50, %v6271_v3  ;;  %v6277_v44 = vshll.u32 %v19274_v63, %v6271_v3  ;;  %v6280_v10 = vshll.u32 %v19266_v39, %v6271_v3 }
 0x308   :  { %v6283_v11 = vshll.u32 %v19267_v26, %v6271_v3  ;;  %v6286_v6 = vshll.u32 %v19288_v9, %v6271_v3  ;;  %vm6289_vm1 = vcmp.lt.s32.totalorder %v6270_v21, 1  ;;  %vm6290_vm3 = vcmp.lt.s32.totalorder %v6270_v21, 2 }
 0x309   :  { %v6275_v38 = vshrl.u32 %v19274_v63, %v6272_v60  ;;  %v6278_v7 = vshrl.u32 %v19266_v39, %v6272_v60  ;;  %v6281_v17 = vshrl.u32 %v19267_v26, %v6272_v60  ;;  %v6284_v55 = vshrl.u32 %v19288_v9, %v6272_v60 }
 0x30a   :  { %v6287_v4 = vshrl.u32 %v19275_v47, %v6272_v60  ;;  %vm6292_vm4 = vcmp.lt.s32.totalorder %v6270_v21, 4  ;;  %v6374_v15 = vand.u32 31, %v6372_v0  ;;  %v6273_v42 = vshrl.u32 %v19273_v50, %v6272_v60 }
 0x30b   :  { %v6276_v32 = vor.u32 %v6275_v38, %v6274_v16  ;;  %v6279_v43 = vor.u32 %v6278_v7, %v6277_v44  ;;  %v6282_v5 = vor.u32 %v6281_v17, %v6280_v10  ;;  %v6285_v22 = vor.u32 %v6284_v55, %v6283_v11 }
 0x30c   :  { %v6288_v34 = vor.u32 %v6287_v4, %v6286_v6  ;;  %vm6291_vm5 = vcmp.lt.s32.totalorder %v6270_v21, 3  ;;  %v6375_v18 = vsub.s32 32, %v6374_v15  ;;  %v19358_v60 = vand.u32 2147483647, %v15316_v62 }
 0x30d   :  { %v6294_v28 = vsel %vm6292_vm4, %v6282_v5, 2102212464  ;;  %v6297_v3 = vsel %vm6289_vm1, %v6276_v32, %v6279_v43  ;;  %v6301_v51 = vsel %vm6289_vm1, %v6279_v43, %v6282_v5  ;;  %v6298_v46 = vsel %vm6292_vm4, %v6285_v22, 920167782 }
 0x30e   :  { %v6302_v1 = vsel %vm6292_vm4, %v6288_v34, 1326507024  ;;  %v6293_v16 = vsel %vm6289_vm1, %v6273_v42, %v6276_v32  ;;  %v6295_v44 = vsel %vm6291_vm5, %v6279_v43, %v6294_v28  ;;  %v6299_v10 = vsel %vm6291_vm5, %v6282_v5, %v6298_v46 }
 0x30f   :  { %v6303_v56 = vsel %vm6291_vm5, %v6285_v22, %v6302_v1  ;;  %v6300_v11 = vsel %vm6290_vm3, %v6297_v3, %v6299_v10  ;;  %v6367_v7 = vand.u32 8388607, %v19358_v60  ;;  %v4619_v17 = vadd.s32 1, %v11980_v24 }
 0x310   :  { %v6304_v38 = vsel %vm6290_vm3, %v6301_v51, %v6303_v56  ;;  %v15356_v34 = vmul.u32.u64.low %v15330_v33, %v6300_v11  ;;  %v15357_v4 = vmul.u32.u64.high %v15330_v33, %v6300_v11, %v15356_v34  ;;  %v6296_v46 = vsel %vm6290_vm3, %v6293_v16, %v6295_v44 }
 0x311   :  { %v15352_v6 = vmul.u32.u64.low %v15330_v33, %v6304_v38  ;;  %v15353_v55 = vmul.u32.u64.high %v15330_v33, %v6304_v38, %v15352_v6  ;;  %v15361_v1 = vshrl.u32 %v6372_v0, 5  ;;  %v6378_v42 = vshrl.u32 %v19274_v63, %v6375_v18 }
 0x312   :  { %19360 = vst [vmem:[#allocation40_spill] sm:$0xff] %v15356_v34  ;;  %v6381_v51 = vshrl.u32 %v19266_v39, %v6375_v18  ;;  %v6377_v28 = vshll.u32 %v19273_v50, %v6374_v15  ;;  %v6380_v22 = vshll.u32 %v19274_v63, %v6374_v15  ;;  %v6384_v5 = vshrl.u32 %v19267_v26, %v6375_v18 }
 0x313   :  { %19359 = vst [vmem:[#allocation35_spill] sm:$0xff] %v15353_v55  ;;  %v6387_v24 = vshrl.u32 %v19288_v9, %v6375_v18  ;;  %v6383_v32 = vshll.u32 %v19266_v39, %v6374_v15  ;;  %v6386_v43 = vshll.u32 %v19267_v26, %v6374_v15  ;;  %v6389_v21 = vshll.u32 %v19288_v9, %v6374_v15 }
 0x314   :  { %v6390_v0 = vshrl.u32 %v19275_v47, %v6375_v18  ;;  %vm6314_vm6 = vc.u32 %v15353_v55, %v15356_v34  ;;  %v6315_v3 = vadd.s32 1, %v15357_v4  ;;  %v6379_v16 = vor.u32 %v6378_v42, %v6377_v28 }
 0x315   :  { %v6382_v44 = vor.u32 %v6381_v51, %v6380_v22  ;;  %v6385_v10 = vor.u32 %v6384_v5, %v6383_v32  ;;  %v6388_v56 = vor.u32 %v6387_v24, %v6386_v43  ;;  %vm6395_vm7 = vcmp.lt.s32.totalorder %v15361_v1, 4 }
 0x316   :  { %v6391_v11 = vor.u32 %v6390_v0, %v6389_v21  ;;  %v6316_v38 = vsel %vm6314_vm6, %v6315_v3, %v15357_v4  ;;  %v19073_v60 = vand.u32 2147483647, %v15320_v27  ;;  %v15381_v15 = vadd.f32 %v15300_v2, %v15328_v30 }
 0x317   :  { %v6312_v6 = vmul.u32 %v15330_v33, %v6296_v46  ;;  %v6368_v62 = vor.u32 8388608, %v6367_v7  ;;  %vm6392_vm8 = vcmp.lt.s32.totalorder %v15361_v1, 1  ;;  %v6401_v42 = vsel %vm6395_vm7, %v6388_v56, 920167782 }
 0x318   :  { %19361 = vst [vmem:[#allocation41_spill] sm:$0xff] %v15381_v15  ;;  %vm6394_vm9 = vcmp.lt.s32.totalorder %v15361_v1, 3  ;;  %v6400_v4 = vsel %vm6392_vm8, %v6379_v16, %v6382_v44  ;;  %v6405_v51 = vsel %vm6395_vm7, %v6391_v11, 1326507024  ;;  %vm4620_vm10 = vcmp.gt.s32.totalorder %v4619_v17, 0 }
 0x319   :  { %v6317_v28 = vadd.s32 %v6316_v38, %v6312_v6  ;;  %v6402_v30 = vsel %vm6394_vm9, %v6385_v10, %v6401_v42  ;;  %v6404_v33 = vsel %vm6392_vm8, %v6382_v44, %v6385_v10  ;;  %v6406_v7 = vsel %vm6394_vm9, %v6388_v56, %v6405_v51 }
 0x31a   :  { %v4616_v46 = vand.u32 8388607, %v19073_v60  ;;  %v6466_v22 = vand.u32 2139095040, %v15381_v15  ;;  %vm6393_vm11 = vcmp.lt.s32.totalorder %v15361_v1, 2  ;;  %v4621_v5 = vsel %vm4620_vm10, %v4619_v17, 0 }
 0x31b   :  { %v6403_v24 = vsel %vm6393_vm11, %v6400_v4, %v6402_v30  ;;  %v6407_v32 = vsel %vm6393_vm11, %v6404_v33, %v6406_v7  ;;  %v4623_v43 = vand.u32 31, %v4621_v5  ;;  %v6318_v21 = vadd.s32 536870912, %v6317_v28 }
 0x31c   :  { %v6408_v0 = vshll.u32 %v6368_v62, 8  ;;  %v6376_v3 = vshrl.u32 %v19273_v50, %v6375_v18  ;;  %v4617_v56 = vor.u32 8388608, %v4616_v46  ;;  %v6467_v38 = vshrl.u32 %v6466_v22, 23 }
 0x31d   :  { %v4624_v11 = vsub.s32 32, %v4623_v43  ;;  %v4626_v17 = vshll.u32 %v19273_v50, %v4623_v43  ;;  %v4629_v30 = vshll.u32 %v19274_v63, %v4623_v43  ;;  %v15418_v33 = vshrl.u32 %v6318_v21, 30 }
 0x31e   :  { %v15407_v6 = vmul.u32.u64.low %v6408_v0, %v6407_v32  ;;  %v15408_v42 = vmul.u32.u64.high %v6408_v0, %v6407_v32, %v15407_v6  ;;  %v15410_v51 = vmul.u32.u64.low %v6408_v0, %v6403_v24  ;;  %v15411_v60 = vmul.u32.u64.high %v6408_v0, %v6403_v24, %v15410_v51 }
 0x31f   :  { %v4627_v4 = vshrl.u32 %v19274_v63, %v4624_v11  ;;  %v4630_v62 = vshrl.u32 %v19266_v39, %v4624_v11  ;;  %19362 = vst [vmem:[#allocation42_spill] sm:$0xff] %v15418_v33  ;;  %v4622_v18 = vshrl.u32 %v4621_v5, 5  ;;  %v4632_v7 = vshll.u32 %v19266_v39, %v4623_v43 }
 0x320   :  { %v4633_v46 = vshrl.u32 %v19267_v26, %v4624_v11  ;;  %v4635_v24 = vshll.u32 %v19267_v26, %v4623_v43  ;;  %v4636_v6 = vshrl.u32 %v19288_v9, %v4624_v11  ;;  %v6397_v27 = vsel %vm6395_vm7, %v6385_v10, 2102212464 }
 0x321   :  { %v4628_v22 = vor.u32 %v4627_v4, %v4626_v17  ;;  %v4631_v32 = vor.u32 %v4630_v62, %v4629_v30  ;;  %v4638_v34 = vshll.u32 %v19288_v9, %v4623_v43  ;;  %v4639_v21 = vshrl.u32 %v19275_v47, %v4624_v11 }
 0x322   :  { %v4634_v2 = vor.u32 %v4633_v46, %v4632_v7  ;;  %v6396_v5 = vsel %vm6392_vm8, %v6376_v3, %v6379_v16  ;;  %v4637_v55 = vor.u32 %v4636_v6, %v4635_v24  ;;  %v4657_v57 = vshll.u32 %v4617_v56, 8 }
 0x323   :  { %v6320_v17 = vshll.u32 %v15418_v33, 30  ;;  %v4640_v4 = vor.u32 %v4639_v21, %v4638_v34  ;;  %vm4641_vm12 = vcmp.lt.s32.totalorder %v4622_v18, 1  ;;  %vm4644_vm13 = vcmp.lt.s32.totalorder %v4622_v18, 4 }
 0x324   :  { %v6398_v30 = vsel %vm6394_vm9, %v6382_v44, %v6397_v27  ;;  %vm4643_vm14 = vcmp.lt.s32.totalorder %v4622_v18, 3  ;;  %v4649_v10 = vsel %vm4641_vm12, %v4628_v22, %v4631_v32  ;;  %v4650_v43 = vsel %vm4644_vm13, %v4637_v55, 920167782 }
 0x325   :  { %v6418_v62 = vadd.s32 1, %v15411_v60  ;;  %vm4642_vm15 = vcmp.lt.s32.totalorder %v4622_v18, 2  ;;  %v4651_v16 = vsel %vm4643_vm14, %v4634_v2, %v4650_v43  ;;  %v12052_v3 = vadd.s32 4294967169, %v6467_v38 }
 0x326   :  { %vm6417_vm2 = vc.u32 %v15408_v42, %v15410_v51  ;;  %v4652_v34 = vsel %vm4642_vm15, %v4649_v10, %v4651_v16  ;;  %v4653_v56 = vsel %vm4641_vm12, %v4631_v32, %v4634_v2  ;;  %v4654_v27 = vsel %vm4644_vm13, %v4640_v4, 1326507024 }
 0x327   :  { %v15442_v44 = vsub.s32 %v6317_v28, %v6320_v17  ;;  %v6399_v7 = vsel %vm6393_vm11, %v6396_v5, %v6398_v30  ;;  %v4655_v46 = vsel %vm4643_vm14, %v4637_v55, %v4654_v27  ;;  %v6419_v21 = vsel %vm6417_vm2, %v6418_v62, %v15411_v60  ;;  %v4456_v5 = vpop.f32.mrf.mxu0 }
 0x328   :  { %v4656_v24 = vsel %vm4642_vm15, %v4653_v56, %v4655_v46  ;;  %v15448_v6 = vmul.u32.u64.low %v4657_v57, %v4652_v34  ;;  %v15449_v38 = vmul.u32.u64.high %v4657_v57, %v4652_v34, %v15448_v6  ;;  %v6415_v10 = vmul.u32 %v6408_v0, %v6399_v7 }
 0x329   :  { %v15453_v43 = vmul.u32.u64.low %v4657_v57, %v4656_v24  ;;  %v15454_v16 = vmul.u32.u64.high %v4657_v57, %v4656_v24, %v15453_v43  ;;  %v6473_v4 = vadd.s32 1, %v12052_v3  ;;  %v6323_v28 = vsub.s32 0, %v15442_v44 }
 0x32a   :  { %v4646_v1 = vsel %vm4644_vm13, %v4634_v2, 2102212464  ;;  %v4040_v55 = vadd.f32 %v15135_v52, %v15149_v58  ;;  %v6420_v17 = vadd.s32 %v6419_v21, %v6415_v10  ;;  %v4625_v30 = vshrl.u32 %v19273_v50, %v4624_v11 }
 0x32b   :  { %vm6474_vm0 = vcmp.gt.s32.totalorder %v6473_v4, 0  ;;  %v4647_v0 = vsel %vm4643_vm14, %v4631_v32, %v4646_v1  ;;  %v12045_v3 = vmin.u32 %v6323_v28, %v15442_v44  ;;  %v4667_v27 = vadd.s32 1, %v15449_v38 }
 0x32c   :  { %v6475_v34 = vsel %vm6474_vm0, %v6473_v4, 0  ;;  %v4645_v60 = vsel %vm4641_vm12, %v4625_v30, %v4628_v22  ;;  %v4534_v56 = vadd.f32 %v4456_v5, %v4040_v55  ;;  %v6421_v2 = vadd.s32 536870912, %v6420_v17 }
 0x32d   :  { %v6477_v62 = vand.u32 31, %v6475_v34  ;;  %vm4666_vm1 = vc.u32 %v15454_v16, %v15448_v6  ;;  %v4648_v52 = vsel %vm4642_vm15, %v4645_v60, %v4647_v0  ;;  %v19080_v11 = vand.u32 2147483647, %v15381_v15 }
 0x32e   :  { %v15472_v22 = vadd.f32 %v15304_v59, %v4534_v56  ;;  %v6325_v32 = vclz %v12045_v3  ;;  %v4668_v7 = vsel %vm4666_vm1, %v4667_v27, %v15449_v38  ;;  %v15475_v46 = vshrl.u32 %v6421_v2, 30 }
 0x32f   :  { %v15468_v58 = vsub.s32 32, %v6477_v62  ;;  %v4664_v24 = vmul.u32 %v4657_v57, %v4648_v52  ;;  %v6470_v4 = vand.u32 8388607, %v19080_v11  ;;  %v6480_v1 = vshll.u32 %v19273_v50, %v6477_v62 }
 0x330   :  { %19363 = vst [vmem:[#allocation43_spill] sm:$0xff] %v15475_v46  ;;  %v4715_v28 = vand.u32 2139095040, %v15472_v22  ;;  %v12046_v57 = vadd.s32 4294967294, %v6325_v32  ;;  %v6483_v5 = vshll.u32 %v19274_v63, %v6477_v62  ;;  %v6489_v55 = vshll.u32 %v19267_v26, %v6477_v62 }
 0x331   :  { %v6481_v21 = vshrl.u32 %v19274_v63, %v15468_v58  ;;  %v6484_v18 = vshrl.u32 %v19266_v39, %v15468_v58  ;;  %v6490_v10 = vshrl.u32 %v19288_v9, %v15468_v58  ;;  %v15483_v43 = vadd.s32 %v4668_v7, %v4664_v24 }
 0x332   :  { %v6487_v38 = vshrl.u32 %v19267_v26, %v15468_v58  ;;  %v6423_v30 = vshll.u32 %v15475_v46, 30  ;;  %v15494_v60 = vshrl.u32 %v6475_v34, 5  ;;  %v6486_v0 = vshll.u32 %v19266_v39, %v6477_v62 }
 0x333   :  { %v6493_v56 = vshrl.u32 %v19275_v47, %v15468_v58  ;;  %v6482_v3 = vor.u32 %v6481_v21, %v6480_v1  ;;  %v6485_v27 = vor.u32 %v6484_v18, %v6483_v5  ;;  %v6491_v2 = vor.u32 %v6490_v10, %v6489_v55 }
 0x334   :  { %v6492_v52 = vshll.u32 %v19288_v9, %v6477_v62  ;;  %v15502_v32 = vadd.f32 %v15147_v37, %v15169_v41  ;;  %v4670_v7 = vadd.s32 536870912, %v15483_v43  ;;  %v6488_v24 = vor.u32 %v6487_v38, %v6486_v0 }
 0x335   :  { %v15507_v34 = vadd.f32 %v15167_v14, %v15181_v13  ;;  %v15511_v11 = vadd.f32 %v15179_v19, %v15204_v40  ;;  %vm12047_vm3 = vcmp.lt.s32.totalorder %v12046_v57, 0  ;;  %v15513_v18 = vsub.s32 %v6420_v17, %v6423_v30 }
 0x336   :  { %v6494_v21 = vor.u32 %v6493_v56, %v6492_v52  ;;  %v6471_v62 = vor.u32 8388608, %v6470_v4  ;;  %vm6495_vm4 = vcmp.lt.s32.totalorder %v15494_v60, 1  ;;  %vm6498_vm5 = vcmp.lt.s32.totalorder %v15494_v60, 4 }
 0x337   :  { %vm6497_vm6 = vcmp.lt.s32.totalorder %v15494_v60, 3  ;;  %v6503_v37 = vsel %vm6495_vm4, %v6482_v3, %v6485_v27  ;;  %v6504_v14 = vsel %vm6498_vm5, %v6491_v2, 920167782  ;;  %v4716_v41 = vshrl.u32 %v4715_v28, 23  ;;  %v4500_v28 = vpop.f32.mrf.mxu1 }
 0x338   :  { %v15522_v19 = vsel %vm12047_vm3, 0, %v12046_v57  ;;  %v15524_v13 = vshrl.u32 %v4670_v7, 30  ;;  %v6505_v40 = vsel %vm6497_vm6, %v6488_v24, %v6504_v14  ;;  %v6507_v17 = vsel %vm6495_vm4, %v6485_v27, %v6488_v24 }
 0x339   :  { %v15532_v10 = vadd.f32 %v15202_v31, %v15216_v35  ;;  %v15536_v4 = vadd.f32 %v15214_v61, %v15229_v20  ;;  %vm6496_vm7 = vcmp.lt.s32.totalorder %v15494_v60, 2  ;;  %v6508_v38 = vsel %vm6498_vm5, %v6494_v21, 1326507024 }
 0x33a   :  { %v15543_v57 = vadd.f32 %v15227_v8, %v15233_v49  ;;  %v4084_v1 = vadd.f32 %v15267_v48, %v15271_v45  ;;  %v6506_v31 = vsel %vm6496_vm7, %v6503_v37, %v6505_v40  ;;  %v6509_v61 = vsel %vm6497_vm6, %v6491_v2, %v6508_v38  ;;  %v19371_v40 = vld [vmem:[#allocation35_spill] sm:$0xff] }
 0x33b   :  { %v6333_v35 = vsub.s32 4294967266, %v15522_v19  ;;  %v6510_v20 = vsel %vm6496_vm7, %v6507_v17, %v6509_v61  ;;  %v15554_v5 = vshll.u32 %v6471_v62, 8  ;;  %v11984_v55 = vadd.s32 4294967169, %v4716_v41  ;;  %v19372_v17 = vld [vmem:[#allocation40_spill] sm:$0xff]  ;;  %v19376_v61 = vld [vmem:[#allocation14_spill] sm:$0xff] }
 0x33c   :  { %19364 = vst [vmem:[#allocation44_spill] sm:$0xff] %v15543_v57  ;;  %v15558_v8 = vadd.f32 %v15231_v25, %v15237_v54  ;;  %v6426_v49 = vsub.s32 0, %v15513_v18  ;;  %v4672_v48 = vshll.u32 %v15524_v13, 30  ;;  %v4552_v45 = vadd.f32 %v4500_v28, %v4084_v1  ;;  %v19373_v1 = vld [vmem:[#allocation39_spill] sm:$0xff] }
 0x33d   :  { %v15563_v30 = vmul.u32.u64.low %v15554_v5, %v6506_v31  ;;  %v15564_v0 = vmul.u32.u64.high %v15554_v5, %v6506_v31, %v15563_v30  ;;  %v19081_v56 = vand.u32 2147483647, %v15472_v22  ;;  %v4722_v2 = vadd.s32 1, %v11984_v55  ;;  %v19379_v55 = vld [vmem:[#allocation18_spill] sm:$0xff] }
 0x33e   :  { %19365 = vst [vmem:[#allocation45_spill] sm:$0xff] %v15558_v8  ;;  %v15570_v52 = vadd.f32 %v15235_v23, %v15241_v12  ;;  %v15574_v25 = vadd.f32 %v15239_v29, %v15245_v36  ;;  %v15577_v54 = vmul.u32.u64.low %v15554_v5, %v6510_v20  ;;  %v15578_v7 = vmul.u32.u64.high %v15554_v5, %v6510_v20, %v15577_v54  ;;  %v19369_v36 = vld [vmem:[#allocation36_spill] sm:$0xff] }
 0x33f   :  { %v6329_v21 = vsub.s32 32, %v15522_v19  ;;  %v6334_v62 = vadd.s32 127, %v6333_v35  ;;  %v6500_v37 = vsel %vm6498_vm5, %v6488_v24, 2102212464  ;;  %vm4723_vm8 = vcmp.gt.s32.totalorder %v4722_v2, 0 }
 0x340   :  { %19366 = vst [vmem:[#allocation46_spill] sm:$0xff] %v15570_v52  ;;  %19367 = vst [vmem:[#allocation47_spill] sm:$0xff] %v15574_v25  ;;  %v12049_v14 = vmin.u32 %v6426_v49, %v15513_v18  ;;  %v15585_v23 = vsub.s32 %v15483_v43, %v4672_v48  ;;  %v6479_v29 = vshrl.u32 %v19273_v50, %v15468_v58  ;;  %v4719_v24 = vand.u32 8388607, %v19081_v56  ;;  %v19374_v43 = vld [vmem:[#allocation37_spill] sm:$0xff]  ;;  %v19377_v58 = vld [vmem:[#allocation38_spill] sm:$0xff] }
 0x341   :  { %v15590_v12 = vadd.f32 %v15304_v59, %v4552_v45  ;;  %v15594_v41 = vadd.f32 %v19369_v36, %v15249_v53  ;;  %v6313_v38 = vadd.s32 %v19372_v17, %v19371_v40  ;;  %v4724_v28 = vsel %vm4723_vm8, %v4722_v2, 0  ;;  %v19380_v49 = vld [vmem:[#allocation13_spill] sm:$0xff] }
 0x342   :  { %v15602_v31 = vadd.f32 %v19374_v43, %v19373_v1  ;;  %v15606_v35 = vadd.f32 %v19377_v58, %v19376_v61  ;;  %v6499_v20 = vsel %vm6495_vm4, %v6479_v29, %v6482_v3  ;;  %v6501_v53 = vsel %vm6497_vm6, %v6485_v27, %v6500_v37 }
 0x343   :  { %19368 = vst [vmem:[#allocation48_spill] sm:$0xff] %v15590_v12  ;;  %19370 = vst [vmem:[#allocation36_spill] sm:$0xff] %v15594_v41  ;;  %v15614_v48 = vadd.f32 %v19380_v49, %v19379_v55  ;;  %v6330_v45 = vshll.u32 %v15442_v44, %v15522_v19  ;;  %v6331_v2 = vshrl.u32 %v6313_v38, %v6329_v21  ;;  %v4726_v54 = vand.u32 31, %v4724_v28 }
 0x344   :  { %19375 = vst [vmem:[#allocation35_spill] sm:$0xff] %v15602_v31  ;;  %19378 = vst [vmem:[#allocation40_spill] sm:$0xff] %v15606_v35  ;;  %v6335_v36 = vshll.u32 %v6334_v62, 23  ;;  %v6428_v40 = vclz %v12049_v14  ;;  %v4675_v17 = vsub.s32 0, %v15585_v23  ;;  %v6569_v1 = vand.u32 2139095040, %v15590_v12  ;;  %v4504_v31 = vpop.f32.mrf.mxu1 }
 0x345   :  { %19381 = vst [vmem:[#allocation39_spill] sm:$0xff] %v15614_v48  ;;  %v6502_v3 = vsel %vm6496_vm7, %v6499_v20, %v6501_v53  ;;  %v6521_v27 = vadd.s32 1, %v15564_v0  ;;  %v4720_v37 = vor.u32 8388608, %v4719_v24  ;;  %v4727_v29 = vsub.s32 32, %v4726_v54 }
 0x346   :  { %vm6520_vm9 = vc.u32 %v15578_v7, %v15563_v30  ;;  %v15625_v43 = vshrl.u32 %v4724_v28, 5  ;;  %v4729_v44 = vshll.u32 %v19273_v50, %v4726_v54  ;;  %v4732_v19 = vshll.u32 %v19274_v63, %v4726_v54 }
 0x347   :  { %v4730_v21 = vshrl.u32 %v19274_v63, %v4727_v29  ;;  %v4733_v62 = vshrl.u32 %v19266_v39, %v4727_v29  ;;  %v4735_v60 = vshll.u32 %v19266_v39, %v4726_v54  ;;  %v4736_v14 = vshrl.u32 %v19267_v26, %v4727_v29 }
 0x348   :  { %v4738_v38 = vshll.u32 %v19267_v26, %v4726_v54  ;;  %v4739_v24 = vshrl.u32 %v19288_v9, %v4727_v29  ;;  %v4742_v61 = vshrl.u32 %v19275_v47, %v4727_v29  ;;  %v6570_v28 = vshrl.u32 %v6569_v1, 23 }
 0x349   :  { %v4731_v58 = vor.u32 %v4730_v21, %v4729_v44  ;;  %v4734_v20 = vor.u32 %v4733_v62, %v4732_v19  ;;  %v4737_v53 = vor.u32 %v4736_v14, %v4735_v60  ;;  %v4741_v55 = vshll.u32 %v19288_v9, %v4726_v54 }
 0x34a   :  { %v11981_v49 = vmin.u32 %v4675_v17, %v15585_v23  ;;  %v6522_v56 = vsel %vm6520_vm9, %v6521_v27, %v15564_v0  ;;  %v4740_v33 = vor.u32 %v4739_v24, %v4738_v38  ;;  %vm4744_vm10 = vcmp.lt.s32.totalorder %v15625_v43, 1 }
 0x34b   :  { %v6518_v46 = vmul.u32 %v15554_v5, %v6502_v3  ;;  %v4743_v48 = vor.u32 %v4742_v61, %v4741_v55  ;;  %vm4747_vm11 = vcmp.lt.s32.totalorder %v15625_v43, 4  ;;  %v4752_v1 = vsel %vm4744_vm10, %v4731_v58, %v4734_v20  ;;  %v4458_v3 = vpop.f32.mrf.mxu0 }
 0x34c   :  { %v6336_v44 = vor.u32 4788187, %v6335_v36  ;;  %vm4746_vm12 = vcmp.lt.s32.totalorder %v15625_v43, 3  ;;  %v4753_v54 = vsel %vm4747_vm11, %v4740_v33, 920167782  ;;  %v12056_v17 = vadd.s32 4294967169, %v6570_v28 }
 0x34d   :  { %v15650_v19 = vadd.s32 %v6522_v56, %v6518_v46  ;;  %vm4745_vm13 = vcmp.lt.s32.totalorder %v15625_v43, 2  ;;  %v4754_v5 = vsel %vm4746_vm12, %v4737_v53, %v4753_v54  ;;  %v4760_v0 = vshll.u32 %v4720_v37, 8  ;;  %v19382_v54 = vld [vmem:[#allocation30_spill] sm:$0xff] }
 0x34e   :  { %v6332_v27 = vor.u32 %v6331_v2, %v6330_v45  ;;  %v12050_v21 = vadd.s32 4294967294, %v6428_v40  ;;  %v4755_v36 = vsel %vm4745_vm13, %v4752_v1, %v4754_v5  ;;  %v4756_v62 = vsel %vm4744_vm10, %v4734_v20, %v4737_v53  ;;  %v19384_v5 = vld [vmem:[#allocation12_spill] sm:$0xff] }
 0x34f   :  { %v4677_v60 = vclz %v11981_v49  ;;  %v4757_v46 = vsel %vm4747_vm11, %v4743_v48, 1326507024  ;;  %v15661_v56 = vmul.u32.u64.low %v4760_v0, %v4755_v36  ;;  %v15662_v14 = vmul.u32.u64.high %v4760_v0, %v4755_v36, %v15661_v56 }
 0x350   :  { %v4749_v37 = vsel %vm4747_vm11, %v4737_v53, 2102212464  ;;  %v4758_v45 = vsel %vm4746_vm12, %v4740_v33, %v4757_v46  ;;  %v6576_v2 = vadd.s32 1, %v12056_v17  ;;  %v4535_v40 = vadd.f32 %v4458_v3, %v15502_v32  ;;  %v19385_v3 = vld [vmem:[#allocation16_spill] sm:$0xff] }
 0x351   :  { %v6337_v38 = vand.u32 2147483647, %v6336_v44  ;;  %v6524_v24 = vadd.s32 536870912, %v15650_v19  ;;  %v4728_v61 = vshrl.u32 %v19273_v50, %v4727_v29  ;;  %v4759_v48 = vsel %vm4745_vm13, %v4756_v62, %v4758_v45  ;;  %v19387_v62 = vld [vmem:[#allocation19_spill] sm:$0xff] }
 0x352   :  { %vm12051_vm14 = vcmp.lt.s32.totalorder %v12050_v21, 0  ;;  %v15674_v28 = vmul.u32.u64.low %v4760_v0, %v4759_v48  ;;  %v15675_v55 = vmul.u32.u64.high %v4760_v0, %v4759_v48, %v15674_v28  ;;  %vm6577_vm15 = vcmp.gt.s32.totalorder %v6576_v2, 0 }
 0x353   :  { %v11982_v53 = vadd.s32 4294967294, %v4677_v60  ;;  %v4748_v33 = vsel %vm4744_vm10, %v4728_v61, %v4731_v58  ;;  %v4750_v32 = vsel %vm4746_vm12, %v4734_v20, %v4749_v37  ;;  %v6578_v49 = vsel %vm6577_vm15, %v6576_v2, 0  ;;  %v19388_v60 = vld [vmem:[#allocation17_spill] sm:$0xff]  ;;  %v19391_v37 = vld [vmem:[#allocation22_spill] sm:$0xff] }
 0x354   :  { %v4770_v1 = vadd.s32 1, %v15662_v14  ;;  %v19086_v29 = vand.u32 2147483647, %v15590_v12  ;;  %v6580_v44 = vand.u32 31, %v6578_v49  ;;  %v15684_v17 = vadd.f32 %v19382_v54, %v4535_v40  ;;  %v19390_v20 = vld [vmem:[#allocation25_spill] sm:$0xff] }
 0x355   :  { %v15688_v36 = vadd.f32 %v19385_v3, %v19384_v5  ;;  %v15692_v46 = vadd.f32 %v19388_v60, %v19387_v62  ;;  %v6339_v58 = vcvt.s32.f32 %v6332_v27  ;;  %v15694_v45 = vshrl.u32 %v6524_v24, 30 }
 0x356   :  { %19383 = vst [vmem:[#allocation37_spill] sm:$0xff] %v15684_v17  ;;  %v15698_v2 = vadd.f32 %v19391_v37, %v19390_v20  ;;  %v6416_v61 = vadd.s32 %v15410_v51, %v15408_v42  ;;  %v15704_v40 = vadd.s32 %v15448_v6, %v15454_v16  ;;  %v4751_v48 = vsel %vm4745_vm13, %v4748_v33, %v4750_v32 }
 0x357   :  { %19386 = vst [vmem:[#allocation14_spill] sm:$0xff] %v15688_v36  ;;  %19389 = vst [vmem:[#allocation38_spill] sm:$0xff] %v15694_v45  ;;  %v15708_v28 = vmul.f32 %v6339_v58, %v6337_v38  ;;  %v15711_v27 = vsel %vm12051_vm14, 0, %v12050_v21  ;;  %vm4769_vm2 = vc.u32 %v15675_v55, %v15661_v56  ;;  %v6581_v24 = vsub.s32 32, %v6580_v44 }
 0x358   :  { %vm11983_vm0 = vcmp.lt.s32.totalorder %v11982_v53, 0  ;;  %v4771_v5 = vsel %vm4769_vm2, %v4770_v1, %v15662_v14  ;;  %v6573_v42 = vand.u32 8388607, %v19086_v29  ;;  %v4818_v51 = vand.u32 2139095040, %v15684_v17 }
 0x359   :  { %v6526_v6 = vshll.u32 %v15694_v45, 30  ;;  %v4767_v16 = vmul.u32 %v4760_v0, %v4751_v48  ;;  %v6584_v43 = vshrl.u32 %v19274_v63, %v6581_v24  ;;  %v6587_v21 = vshrl.u32 %v19266_v39, %v6581_v24 }
 0x35a   :  { %v15722_v38 = vshrl.u32 %v6578_v49, 5  ;;  %v6583_v33 = vshll.u32 %v19273_v50, %v6580_v44  ;;  %v6586_v32 = vshll.u32 %v19274_v63, %v6580_v44  ;;  %v6590_v14 = vshrl.u32 %v19267_v26, %v6581_v24 }
 0x35b   :  { %v15727_v1 = vadd.s32 %v4771_v5, %v4767_v16  ;;  %v6589_v3 = vshll.u32 %v19266_v39, %v6580_v44  ;;  %v6592_v62 = vshll.u32 %v19267_v26, %v6580_v44  ;;  %v6593_v0 = vshrl.u32 %v19288_v9, %v6581_v24 }
 0x35c   :  { %v6574_v60 = vor.u32 8388608, %v6573_v42  ;;  %v6585_v58 = vor.u32 %v6584_v43, %v6583_v33  ;;  %v6588_v20 = vor.u32 %v6587_v21, %v6586_v32  ;;  %v4819_v37 = vshrl.u32 %v4818_v51, 23  ;;  %v19392_v43 = vld [vmem:[#allocation32_spill] sm:$0xff] }
 0x35d   :  { %v6591_v49 = vor.u32 %v6590_v14, %v6589_v3  ;;  %v6594_v48 = vor.u32 %v6593_v0, %v6592_v62  ;;  %v6595_v29 = vshll.u32 %v19288_v9, %v6580_v44  ;;  %v6596_v45 = vshrl.u32 %v19275_v47, %v6581_v24 }
 0x35e   :  { %v6432_v36 = vsub.s32 32, %v15711_v27  ;;  %v6433_v5 = vshll.u32 %v15513_v18, %v15711_v27  ;;  %v15738_v16 = vsel %vm11983_vm0, 0, %v11982_v53  ;;  %v15741_v35 = vsub.s32 %v15650_v19, %v6526_v6 }
 0x35f   :  { %v4773_v42 = vadd.s32 536870912, %v15727_v1  ;;  %v6597_v51 = vor.u32 %v6596_v45, %v6595_v29  ;;  %vm6598_vm1 = vcmp.lt.s32.totalorder %v15722_v38, 1  ;;  %vm6601_vm3 = vcmp.lt.s32.totalorder %v15722_v38, 4 }
 0x360   :  { %vm6600_vm4 = vcmp.lt.s32.totalorder %v15722_v38, 3  ;;  %v6606_v44 = vsel %vm6598_vm1, %v6585_v58, %v6588_v20  ;;  %v6607_v18 = vsel %vm6601_vm3, %v6594_v48, 920167782  ;;  %v11988_v53 = vadd.s32 4294967169, %v4819_v37 }
 0x361   :  { %vm4611_vm5 = vcmp.lt.s32.totalorder %v19392_v43, 0  ;;  %vm6599_vm6 = vcmp.lt.s32.totalorder %v15722_v38, 2  ;;  %v6608_v19 = vsel %vm6600_vm4, %v6591_v49, %v6607_v18  ;;  %v6610_v29 = vsel %vm6598_vm1, %v6588_v20, %v6591_v49 }
 0x362   :  { %v15757_v45 = vshll.u32 %v6574_v60, 8  ;;  %v6436_v6 = vsub.s32 4294967266, %v15711_v27  ;;  %v4685_v21 = vsub.s32 4294967266, %v15738_v16  ;;  %v6609_v33 = vsel %vm6599_vm6, %v6606_v44, %v6608_v19 }
 0x363   :  { %v6611_v32 = vsel %vm6601_vm3, %v6597_v51, 1326507024  ;;  %v15765_v14 = vshrl.u32 %v4773_v42, 30  ;;  %v6529_v27 = vsub.s32 0, %v15741_v35  ;;  %v6603_v60 = vsel %vm6601_vm3, %v6591_v49, 2102212464 }
 0x364   :  { %v6612_v3 = vsel %vm6600_vm4, %v6594_v48, %v6611_v32  ;;  %v15770_v62 = vmul.u32.u64.low %v15757_v45, %v6609_v33  ;;  %v15771_v0 = vmul.u32.u64.high %v15757_v45, %v6609_v33, %v15770_v62  ;;  %v4825_v44 = vadd.s32 1, %v11988_v53 }
 0x365   :  { %19393 = vst [vmem:[#allocation18_spill] sm:$0xff] %v15765_v14  ;;  %v6613_v37 = vsel %vm6599_vm6, %v6610_v29, %v6612_v3  ;;  %v6434_v51 = vshrl.u32 %v6416_v61, %v6432_v36  ;;  %v6582_v42 = vshrl.u32 %v19273_v50, %v6581_v24  ;;  %v4681_v19 = vsub.s32 32, %v15738_v16 }
 0x366   :  { %v15781_v18 = vmul.u32.u64.low %v15757_v45, %v6613_v37  ;;  %v15782_v48 = vmul.u32.u64.high %v15757_v45, %v6613_v37, %v15781_v18  ;;  %v4686_v33 = vadd.s32 127, %v4685_v21  ;;  %v4695_v32 = vsub.s32 4, %v15524_v13 }
 0x367   :  { %vm4826_vm7 = vcmp.gt.s32.totalorder %v4825_v44, 0  ;;  %v4775_v49 = vshll.u32 %v15765_v14, 30  ;;  %v6602_v29 = vsel %vm6598_vm1, %v6582_v42, %v6585_v58  ;;  %v6604_v36 = vsel %vm6600_vm4, %v6588_v20, %v6603_v60  ;;  %v19397_v60 = vld [vmem:[#allocation15_spill] sm:$0xff] }
 0x368   :  { %v4827_v61 = vsel %vm4826_vm7, %v4825_v44, 0  ;;  %v19394_v53 = vand.u32 2147483647, %v19392_v43  ;;  %v12053_v21 = vmin.u32 %v6529_v27, %v15741_v35  ;;  %v19091_v37 = vand.u32 2147483647, %v15684_v17 }
 0x369   :  { %v4829_v18 = vand.u32 31, %v4827_v61  ;;  %v15800_v14 = vor.u32 %v6434_v51, %v6433_v5  ;;  %v15802_v58 = vadd.s32 127, %v6436_v6  ;;  %v6624_v20 = vadd.s32 1, %v15771_v0 }
 0x36a   :  { %vm15794_vm8 = vcmp.le.f32.partialorder %v19394_v53, 0.7853982  ;;  %v4553_v44 = vadd.f32 %v4504_v31, %v19397_v60  ;;  %v4696_v42 = vsel %vm4611_vm5, %v4695_v32, %v15524_v13  ;;  %v6605_v53 = vsel %vm6599_vm6, %v6602_v29, %v6604_v36 }
 0x36b   :  { %vm6623_vm9 = vc.u32 %v15782_v48, %v15770_v62  ;;  %v4830_v27 = vsub.s32 32, %v4829_v18  ;;  %v4682_v5 = vshll.u32 %v15585_v23, %v15738_v16  ;;  %v4683_v6 = vshrl.u32 %v15704_v40, %v4681_v19 }
 0x36c   :  { %v4687_v51 = vshll.u32 %v4686_v33, 23  ;;  %v15817_v24 = vsub.s32 %v15727_v1, %v4775_v49  ;;  %v6531_v31 = vclz %v12053_v21  ;;  %v4822_v13 = vand.u32 8388607, %v19091_v37  ;;  %v19399_v37 = vld [vmem:[#allocation34_spill] sm:$0xff] }
 0x36d   :  { %v4833_v38 = vshrl.u32 %v19274_v63, %v4830_v27  ;;  %v4836_v32 = vshrl.u32 %v19266_v39, %v4830_v27  ;;  %v6621_v29 = vmul.u32 %v15757_v45, %v6605_v53  ;;  %v6625_v36 = vsel %vm6623_vm9, %v6624_v20, %v15771_v0 }
 0x36e   :  { %v4832_v23 = vshll.u32 %v19273_v50, %v4829_v18  ;;  %v15827_v40 = vadd.f32 %v19382_v54, %v4553_v44  ;;  %v4835_v1 = vshll.u32 %v19274_v63, %v4829_v18  ;;  %v4839_v16 = vshrl.u32 %v19267_v26, %v4830_v27 }
 0x36f   :  { %v4841_v19 = vshll.u32 %v19267_v26, %v4829_v18  ;;  %v4842_v33 = vshrl.u32 %v19288_v9, %v4830_v27  ;;  %v4778_v49 = vsub.s32 0, %v15817_v24  ;;  %v15834_v21 = vshrl.u32 %v4827_v61, 5 }
 0x370   :  { %19398 = vst [vmem:[#allocation13_spill] sm:$0xff] %v15827_v40  ;;  %v4834_v45 = vor.u32 %v4833_v38, %v4832_v23  ;;  %v4838_v0 = vshll.u32 %v19266_v39, %v4829_v18  ;;  %v4837_v20 = vor.u32 %v4836_v32, %v4835_v1  ;;  %v4844_v44 = vshll.u32 %v19288_v9, %v4829_v18 }
 0x371   :  { %v4843_v60 = vor.u32 %v4842_v33, %v4841_v19  ;;  %v4845_v53 = vshrl.u32 %v19275_v47, %v4830_v27  ;;  %vm19209_vm10 = vcmp.lt.s32.totalorder %v19399_v37, 0  ;;  %v6438_v41 = vshll.u32 %v15802_v58, 23 }
 0x372   :  { %v4698_v25 = vsel %vm15794_vm8, 0, %v4696_v42  ;;  %v15843_v52 = vadd.s32 %v6625_v36, %v6621_v29  ;;  %v4840_v61 = vor.u32 %v4839_v16, %v4838_v0  ;;  %v4684_v8 = vor.u32 %v4683_v6, %v4682_v5 }
 0x373   :  { %v4823_v38 = vor.u32 8388608, %v4822_v13  ;;  %v4846_v23 = vor.u32 %v4845_v53, %v4844_v44  ;;  %v6672_v32 = vand.u32 2139095040, %v15827_v40  ;;  %v12054_v1 = vadd.s32 4294967294, %v6531_v31 }
 0x374   :  { %v11985_v18 = vmin.u32 %v4778_v49, %v15817_v24  ;;  %vm4847_vm11 = vcmp.lt.s32.totalorder %v15834_v21, 1  ;;  %vm4850_vm12 = vcmp.lt.s32.totalorder %v15834_v21, 4  ;;  %v4688_v19 = vor.u32 4788187, %v4687_v51 }
 0x375   :  { %vm4849_vm13 = vcmp.lt.s32.totalorder %v15834_v21, 3  ;;  %v4855_v58 = vsel %vm4847_vm11, %v4834_v45, %v4837_v20  ;;  %v4856_v42 = vsel %vm4850_vm12, %v4843_v60, 920167782  ;;  %v6627_v5 = vadd.s32 536870912, %v15843_v52 }
 0x376   :  { %vm4848_vm14 = vcmp.lt.s32.totalorder %v15834_v21, 2  ;;  %v4857_v6 = vsel %vm4849_vm13, %v4840_v61, %v4856_v42  ;;  %v4859_v31 = vsel %vm4847_vm11, %v4837_v20, %v4840_v61  ;;  %v4860_v51 = vsel %vm4850_vm12, %v4846_v23, 1326507024 }
 0x377   :  { %v4858_v13 = vsel %vm4848_vm14, %v4855_v58, %v4857_v6  ;;  %v4863_v29 = vshll.u32 %v4823_v38, 8  ;;  %v6673_v36 = vshrl.u32 %v6672_v32, 23  ;;  %vm12055_vm15 = vcmp.lt.s32.totalorder %v12054_v1, 0 }
 0x378   :  { %v4780_v16 = vclz %v11985_v18  ;;  %v4852_v33 = vsel %vm4850_vm12, %v4840_v61, 2102212464  ;;  %v4861_v49 = vsel %vm4849_vm13, %v4843_v60, %v4860_v51  ;;  %v15868_v57 = vshrl.u32 %v6627_v5, 30 }
 0x379   :  { %v4862_v0 = vsel %vm4848_vm14, %v4859_v31, %v4861_v49  ;;  %v15864_v44 = vmul.u32.u64.low %v4863_v29, %v4858_v13  ;;  %v15865_v53 = vmul.u32.u64.high %v4863_v29, %v4858_v13, %v15864_v44  ;;  %v12060_v42 = vadd.s32 4294967169, %v6673_v36 }
 0x37a   :  { %19400 = vst [vmem:[#allocation30_spill] sm:$0xff] %v15868_v57  ;;  %v4831_v23 = vshrl.u32 %v19273_v50, %v4830_v27  ;;  %v15871_v38 = vmul.u32.u64.low %v4863_v29, %v4862_v0  ;;  %v15872_v32 = vmul.u32.u64.high %v4863_v29, %v4862_v0, %v15871_v38  ;;  %v19401_v61 = vxor.u32 2147483648, %v15708_v28 }
 0x37b   :  { %v15881_v18 = vor.u32 4788187, %v6438_v41  ;;  %v6679_v6 = vadd.s32 1, %v12060_v42  ;;  %v7998_v31 = vadd.s32 3, %v4698_v25  ;;  %v15885_v5 = vsel %vm12055_vm15, 0, %v12054_v1  ;;  %v4460_v1 = vpop.f32.mrf.mxu0 }
 0x37c   :  { %v15879_v60 = vsel %vm19209_vm10, %v19401_v61, %v15708_v28  ;;  %v4851_v27 = vsel %vm4847_vm11, %v4831_v23, %v4834_v45  ;;  %v4853_v13 = vsel %vm4849_vm13, %v4837_v20, %v4852_v33  ;;  %v4689_v51 = vand.u32 2147483647, %v4688_v19 }
 0x37d   :  { %19402 = vst [vmem:[#allocation12_spill] sm:$0xff] %v15879_v60  ;;  %v4691_v36 = vcvt.s32.f32 %v4684_v8  ;;  %v4873_v28 = vadd.s32 1, %v15865_v53  ;;  %vm6680_vm2 = vcmp.gt.s32.totalorder %v6679_v6, 0  ;;  %v11986_v41 = vadd.s32 4294967294, %v4780_v16  ;;  %v4506_v60 = vpop.f32.mrf.mxu1 }
 0x37e   :  { %v6629_v49 = vshll.u32 %v15868_v57, 30  ;;  %vm4872_vm0 = vc.u32 %v15872_v32, %v15864_v44  ;;  %v6681_v0 = vsel %vm6680_vm2, %v6679_v6, 0  ;;  %v6539_v42 = vsub.s32 4294967266, %v15885_v5 }
 0x37f   :  { %v4854_v45 = vsel %vm4848_vm14, %v4851_v27, %v4853_v13  ;;  %v19092_v20 = vand.u32 2147483647, %v15827_v40  ;;  %v6683_v19 = vand.u32 31, %v6681_v0  ;;  %v15900_v33 = vand.u32 3, %v4698_v25 }
 0x380   :  { %v15902_v16 = vand.u32 3, %v7998_v31  ;;  %v6519_v23 = vadd.s32 %v15563_v30, %v15578_v7  ;;  %v15906_v38 = vmul.f32 %v4691_v36, %v4689_v51  ;;  %v4874_v61 = vsel %vm4872_vm0, %v4873_v28, %v15865_v53 }
 0x381   :  { %19403 = vst [vmem:[#allocation16_spill] sm:$0xff] %v15900_v33  ;;  %v6684_v6 = vsub.s32 32, %v6683_v19  ;;  %v4536_v21 = vadd.f32 %v4460_v1, %v15507_v34  ;;  %v6535_v27 = vsub.s32 32, %v15885_v5  ;;  %vm11987_vm1 = vcmp.lt.s32.totalorder %v11986_v41, 0 }
 0x382   :  { %19404 = vst [vmem:[#allocation19_spill] sm:$0xff] %v15902_v16  ;;  %v15912_v13 = vsub.s32 %v15843_v52, %v6629_v49  ;;  %v4870_v25 = vmul.u32 %v4863_v29, %v4854_v45  ;;  %v15914_v58 = vadd.s32 127, %v6539_v42  ;;  %v6676_v31 = vand.u32 8388607, %v19092_v20 }
 0x383   :  { %v6687_v30 = vshrl.u32 %v19274_v63, %v6684_v6  ;;  %v6690_v7 = vshrl.u32 %v19266_v39, %v6684_v6  ;;  %v6686_v34 = vshll.u32 %v19273_v50, %v6683_v19  ;;  %v6693_v51 = vshrl.u32 %v19267_v26, %v6684_v6 }
 0x384   :  { %v15920_v53 = vadd.s32 %v4874_v61, %v4870_v25  ;;  %v6696_v36 = vshrl.u32 %v19288_v9, %v6684_v6  ;;  %v15925_v52 = vsel %vm11987_vm1, 0, %v11986_v41  ;;  %v6689_v29 = vshll.u32 %v19274_v63, %v6683_v19 }
 0x385   :  { %v6695_v28 = vshll.u32 %v19267_v26, %v6683_v19  ;;  %v15930_v49 = vadd.f32 %v15304_v59, %v4536_v21  ;;  %v6632_v1 = vsub.s32 0, %v15912_v13  ;;  %v15933_v42 = vshrl.u32 %v6681_v0, 5 }
 0x386   :  { %v6688_v45 = vor.u32 %v6687_v30, %v6686_v34  ;;  %v6692_v61 = vshll.u32 %v19266_v39, %v6683_v19  ;;  %v6691_v25 = vor.u32 %v6690_v7, %v6689_v29  ;;  %v6698_v8 = vshll.u32 %v19288_v9, %v6683_v19 }
 0x387   :  { %v6697_v20 = vor.u32 %v6696_v36, %v6695_v28  ;;  %v6699_v41 = vshrl.u32 %v19275_v47, %v6684_v6  ;;  %v4693_v37 = vxor.u32 2147483648, %v15906_v38  ;;  %v4876_v57 = vadd.s32 536870912, %v15920_v53 }
 0x388   :  { %v6677_v21 = vor.u32 8388608, %v6676_v31  ;;  %v6694_v16 = vor.u32 %v6693_v51, %v6692_v61  ;;  %v6537_v33 = vshrl.u32 %v6519_v23, %v6535_v27  ;;  %v6541_v0 = vshll.u32 %v15914_v58, 23 }
 0x389   :  { %v6700_v40 = vor.u32 %v6699_v41, %v6698_v8  ;;  %v4921_v30 = vand.u32 2139095040, %v15930_v49  ;;  %v4788_v7 = vsub.s32 4294967266, %v15925_v52  ;;  %vm6701_vm3 = vcmp.lt.s32.totalorder %v15933_v42, 1 }
 0x38a   :  { %vm6704_vm4 = vcmp.lt.s32.totalorder %v15933_v42, 4  ;;  %v4554_v19 = vadd.f32 %v4506_v60, %v15692_v46  ;;  %v4784_v34 = vsub.s32 32, %v15925_v52  ;;  %v12057_v36 = vmin.u32 %v6632_v1, %v15912_v13 }
 0x38b   :  { %v6709_v23 = vsel %vm6701_vm3, %v6688_v45, %v6691_v25  ;;  %v6710_v58 = vsel %vm6704_vm4, %v6697_v20, 920167782  ;;  %v15952_v8 = vshrl.u32 %v4876_v57, 30  ;;  %vm6703_vm6 = vcmp.lt.s32.totalorder %v15933_v42, 3 }
 0x38c   :  { %v6713_v27 = vsel %vm6701_vm3, %v6691_v25, %v6694_v16  ;;  %v6717_v31 = vshll.u32 %v6677_v21, 8  ;;  %vm6702_vm7 = vcmp.lt.s32.totalorder %v15933_v42, 2  ;;  %v6711_v46 = vsel %vm6703_vm6, %v6694_v16, %v6710_v58 }
 0x38d   :  { %v6714_v60 = vsel %vm6704_vm4, %v6700_v40, 1326507024  ;;  %v4922_v51 = vshrl.u32 %v4921_v30, 23  ;;  %v4789_v29 = vadd.s32 127, %v4788_v7  ;;  %v6712_v57 = vsel %vm6702_vm7, %v6709_v23, %v6711_v46 }
 0x38e   :  { %v6715_v28 = vsel %vm6703_vm6, %v6697_v20, %v6714_v60  ;;  %v15967_v1 = vadd.f32 %v15304_v59, %v4554_v19  ;;  %v6706_v61 = vsel %vm6704_vm4, %v6694_v16, 2102212464  ;;  %v6685_v40 = vshrl.u32 %v19273_v50, %v6684_v6 }
 0x38f   :  { %v6716_v41 = vsel %vm6702_vm7, %v6713_v27, %v6715_v28  ;;  %v15973_v21 = vmul.u32.u64.low %v6717_v31, %v6712_v57  ;;  %v15974_v58 = vmul.u32.u64.high %v6717_v31, %v6712_v57, %v15973_v21  ;;  %v11992_v23 = vadd.s32 4294967169, %v4922_v51 }
 0x390   :  { %19405 = vst [vmem:[#allocation17_spill] sm:$0xff] %v15967_v1  ;;  %v15978_v30 = vmul.u32.u64.low %v6717_v31, %v6716_v41  ;;  %v15979_v7 = vmul.u32.u64.high %v6717_v31, %v6716_v41, %v15978_v30  ;;  %v6536_v20 = vshll.u32 %v15741_v35, %v15885_v5  ;;  %v4768_v19 = vadd.s32 %v15661_v56, %v15675_v55 }
 0x391   :  { %v6634_v16 = vclz %v12057_v36  ;;  %v4878_v46 = vshll.u32 %v15952_v8, 30  ;;  %v6705_v27 = vsel %vm6701_vm3, %v6685_v40, %v6688_v45  ;;  %v6707_v60 = vsel %vm6703_vm6, %v6691_v25, %v6706_v61 }
 0x392   :  { %v4928_v6 = vadd.s32 1, %v11992_v23  ;;  %v6775_v57 = vand.u32 2139095040, %v15967_v1  ;;  %v19406_v51 = vand.u32 2147483647, %v15881_v18  ;;  %v19407_v28 = vcvt.s32.f32 %v15800_v14 }
 0x393   :  { %v4694_v56 = vsel %vm4611_vm5, %v4693_v37, %v15906_v38  ;;  %v6538_v55 = vor.u32 %v6537_v33, %v6536_v20  ;;  %v6727_v5 = vadd.s32 1, %v15974_v58  ;;  %v6542_v45 = vor.u32 4788187, %v6541_v0 }
 0x394   :  { %v15995_v35 = vmul.f32 %v19407_v28, %v19406_v51  ;;  %v4786_v36 = vshrl.u32 %v4768_v19, %v4784_v34  ;;  %v4790_v41 = vshll.u32 %v4789_v29, 23  ;;  %v19101_v25 = vand.u32 2147483647, %v15930_v49 }
 0x395   :  { %v12058_v61 = vadd.s32 4294967294, %v6634_v16  ;;  %v6708_v18 = vsel %vm6702_vm7, %v6705_v27, %v6707_v60  ;;  %vm6726_vm9 = vc.u32 %v15979_v7, %v15973_v21  ;;  %vm4929_vm11 = vcmp.gt.s32.totalorder %v4928_v6, 0 }
 0x396   :  { %v4785_v14 = vshll.u32 %v15817_v24, %v15925_v52  ;;  %v16009_v37 = vsub.s32 %v15920_v53, %v4878_v46  ;;  %v4930_v33 = vsel %vm4929_vm11, %v4928_v6, 0  ;;  %v6776_v38 = vshrl.u32 %v6775_v57, 23 }
 0x397   :  { %v6444_v0 = vxor.u32 2147483648, %v15995_v35  ;;  %v16015_v34 = vsel %vm15794_vm8, %v19392_v43, %v4694_v56  ;;  %v6728_v42 = vsel %vm6726_vm9, %v6727_v5, %v15974_v58  ;;  %v4932_v29 = vand.u32 31, %v4930_v33 }
 0x398   :  { %v6543_v40 = vand.u32 2147483647, %v6542_v45  ;;  %v6545_v30 = vcvt.s32.f32 %v6538_v55  ;;  %v4787_v23 = vor.u32 %v4786_v36, %v4785_v14  ;;  %v6724_v20 = vmul.u32 %v6717_v31, %v6708_v18 }
 0x399   :  { %v4791_v24 = vor.u32 4788187, %v4790_v41  ;;  %vm12059_vm5 = vcmp.lt.s32.totalorder %v12058_v61, 0  ;;  %v4925_v53 = vand.u32 8388607, %v19101_v25  ;;  %v4933_v52 = vsub.s32 32, %v4932_v29 }
 0x39a   :  { %v4881_v19 = vsub.s32 0, %v16009_v37  ;;  %v16021_v16 = vadd.s32 %v6728_v42, %v6724_v20  ;;  %v16023_v3 = vshrl.u32 %v4930_v33, 5  ;;  %v12064_v46 = vadd.s32 4294967169, %v6776_v38  ;;  %v19408_v20 = vld [vmem:[#allocation31_spill] sm:$0xff] }
 0x39b   :  { %v4935_v58 = vshll.u32 %v19273_v50, %v4932_v29  ;;  %v4936_v27 = vshrl.u32 %v19274_v63, %v4933_v52  ;;  %v4938_v60 = vshll.u32 %v19274_v63, %v4932_v29  ;;  %v4939_v31 = vshrl.u32 %v19266_v39, %v4933_v52 }
 0x39c   :  { %v4941_v6 = vshll.u32 %v19266_v39, %v4932_v29  ;;  %v4942_v57 = vshrl.u32 %v19267_v26, %v4933_v52  ;;  %v4944_v51 = vshll.u32 %v19267_v26, %v4932_v29  ;;  %v4945_v28 = vshrl.u32 %v19288_v9, %v4933_v52 }
 0x39d   :  { %v4937_v56 = vor.u32 %v4936_v27, %v4935_v58  ;;  %v4940_v55 = vor.u32 %v4939_v31, %v4938_v60  ;;  %v4947_v5 = vshll.u32 %v19288_v9, %v4932_v29  ;;  %v4948_v45 = vshrl.u32 %v19275_v47, %v4933_v52 }
 0x39e   :  { %v6546_v36 = vmul.f32 %v6545_v30, %v6543_v40  ;;  %v4794_v41 = vcvt.s32.f32 %v4787_v23  ;;  %v4943_v18 = vor.u32 %v4942_v57, %v4941_v6  ;;  %v4946_v14 = vor.u32 %v4945_v28, %v4944_v51 }
 0x39f   :  { %v4792_v33 = vand.u32 2147483647, %v4791_v24  ;;  %v16036_v38 = vsel %vm12059_vm5, 0, %v12058_v61  ;;  %v4949_v42 = vor.u32 %v4948_v45, %v4947_v5  ;;  %vm4950_vm8 = vcmp.lt.s32.totalorder %v16023_v3, 1 }
 0x3a0   :  { %vm19213_vm12 = vcmp.lt.s32.totalorder %v19408_v20, 0  ;;  %v11989_v58 = vmin.u32 %v4881_v19, %v16009_v37  ;;  %v4926_v27 = vor.u32 8388608, %v4925_v53  ;;  %vm4953_vm13 = vcmp.lt.s32.totalorder %v16023_v3, 4  ;;  %v4464_v19 = vpop.f32.mrf.mxu0 }
 0x3a1   :  { %v4958_v29 = vsel %vm4950_vm8, %v4937_v56, %v4940_v55  ;;  %v6730_v40 = vadd.s32 536870912, %v16021_v16  ;;  %vm4952_vm14 = vcmp.lt.s32.totalorder %v16023_v3, 3  ;;  %v4959_v61 = vsel %vm4953_vm13, %v4946_v14, 920167782 }
 0x3a2   :  { %v6782_v30 = vadd.s32 1, %v12064_v46  ;;  %vm19176_vm15 = vcmp.lt.s32.totalorder %v15381_v15, 0  ;;  %vm4951_vm2 = vcmp.lt.s32.totalorder %v16023_v3, 2  ;;  %v4960_v23 = vsel %vm4952_vm14, %v4943_v18, %v4959_v61 }
 0x3a3   :  { %v4962_v24 = vsel %vm4950_vm8, %v4940_v55, %v4943_v18  ;;  %v4963_v53 = vsel %vm4953_vm13, %v4949_v42, 1326507024  ;;  %12875 = vcosq.f32 %v16015_v34  ;;  %v6547_v60 = vxor.u32 2147483648, %v6546_v36 }
 0x3a4   :  { %v16057_v31 = vmul.f32 %v4794_v41, %v4792_v33  ;;  %v4961_v46 = vsel %vm4951_vm2, %v4958_v29, %v4960_v23  ;;  %v6642_v6 = vsub.s32 4294967266, %v16036_v38  ;;  %v4883_v57 = vclz %v11989_v58 }
 0x3a5   :  { %v4964_v51 = vsel %vm4952_vm14, %v4946_v14, %v4963_v53  ;;  %v16064_v28 = vshll.u32 %v4926_v27, 8  ;;  %v16066_v5 = vshrl.u32 %v6730_v40, 30  ;;  %v19100_v42 = vand.u32 2147483647, %v15967_v1 }
 0x3a6   :  { %v4965_v45 = vsel %vm4951_vm2, %v4962_v24, %v4964_v51  ;;  %v4537_v41 = vadd.f32 %v4464_v19, %v15511_v11  ;;  %v6638_v33 = vsub.s32 32, %v16036_v38  ;;  %vm6783_vm0 = vcmp.gt.s32.totalorder %v6782_v30, 0 }
 0x3a7   :  { %19409 = vst [vmem:[#allocation25_spill] sm:$0xff] %v16066_v5  ;;  %v16074_v29 = vmul.u32.u64.low %v16064_v28, %v4961_v46  ;;  %v16075_v61 = vmul.u32.u64.high %v16064_v28, %v4961_v46, %v16074_v29  ;;  %v4955_v14 = vsel %vm4953_vm13, %v4943_v18, 2102212464  ;;  %v6784_v40 = vsel %vm6783_vm0, %v6782_v30, 0 }
 0x3a8   :  { %v16081_v58 = vmul.u32.u64.low %v16064_v28, %v4965_v45  ;;  %v16082_v27 = vmul.u32.u64.high %v16064_v28, %v4965_v45, %v16081_v58  ;;  %v16084_v23 = vadd.s32 127, %v6642_v6  ;;  %v11990_v24 = vadd.s32 4294967294, %v4883_v57 }
 0x3a9   :  { %v4934_v11 = vshrl.u32 %v19273_v50, %v4933_v52  ;;  %v6786_v53 = vand.u32 31, %v6784_v40  ;;  %v16092_v19 = vsel %vm19213_vm12, %v6444_v0, %v15995_v35  ;;  %12877 = vsinq.f32 %v16015_v34 }
 0x3aa   :  { %19410 = vst [vmem:[#allocation22_spill] sm:$0xff] %v16092_v19  ;;  %v6732_v18 = vshll.u32 %v16066_v5, 30  ;;  %v6779_v30 = vand.u32 8388607, %v19100_v42  ;;  %v6622_v46 = vadd.s32 %v15770_v62, %v15782_v48  ;;  %v4956_v6 = vsel %vm4952_vm14, %v4940_v55, %v4955_v14 }
 0x3ab   :  { %v4954_v52 = vsel %vm4950_vm8, %v4934_v11, %v4937_v56  ;;  %v6787_v57 = vsub.s32 32, %v6786_v53  ;;  %v16106_v35 = vsel %vm19176_vm15, %v6547_v60, %v6546_v36  ;;  %v6639_v34 = vshll.u32 %v15912_v13, %v16036_v38 }
 0x3ac   :  { %19411 = vst [vmem:[#allocation15_spill] sm:$0xff] %v16106_v35  ;;  %v16112_v51 = vadd.f32 %v19382_v54, %v4537_v41  ;;  %v6640_v62 = vshrl.u32 %v6622_v46, %v6638_v33  ;;  %vm11991_vm1 = vcmp.lt.s32.totalorder %v11990_v24, 0  ;;  %v16117_v55 = vsub.s32 %v16021_v16, %v6732_v18 }
 0x3ad   :  { %v6790_v56 = vshrl.u32 %v19274_v63, %v6787_v57  ;;  %v4957_v36 = vsel %vm4951_vm2, %v4954_v52, %v4956_v6  ;;  %v6780_v60 = vor.u32 8388608, %v6779_v30  ;;  %v6793_v45 = vshrl.u32 %v19266_v39, %v6787_v57 }
 0x3ae   :  { %19412 = vst [vmem:[#allocation49_spill] sm:$0xff] %v16112_v51  ;;  %v4976_v13 = vadd.s32 1, %v16075_v61  ;;  %v6789_v38 = vshll.u32 %v19273_v50, %v6786_v53  ;;  %v6792_v41 = vshll.u32 %v19274_v63, %v6786_v53  ;;  %v6796_v33 = vshrl.u32 %v19267_v26, %v6787_v57 }
 0x3af   :  { %vm4975_vm3 = vc.u32 %v16082_v27, %v16074_v29  ;;  %v16128_v14 = vshrl.u32 %v6784_v40, 5  ;;  %v6795_v16 = vshll.u32 %v19266_v39, %v6786_v53  ;;  %v5024_v3 = vand.u32 2139095040, %v16112_v51 }
 0x3b0   :  { %v16132_v58 = vpop.eup %12875  ;;  %v6791_v11 = vor.u32 %v6790_v56, %v6789_v38  ;;  %v6794_v18 = vor.u32 %v6793_v45, %v6792_v41  ;;  %v6798_v30 = vshll.u32 %v19267_v26, %v6786_v53  ;;  %v6799_v46 = vshrl.u32 %v19288_v9, %v6787_v57 }
 0x3b1   :  { %19413 = vst [vmem:[#allocation50_spill] sm:$0xff] %v16132_v58  ;;  %v16137_v52 = vsel %vm11991_vm1, 0, %v11990_v24  ;;  %v6797_v6 = vor.u32 %v6796_v33, %v6795_v16  ;;  %v6801_v42 = vshll.u32 %v19288_v9, %v6786_v53  ;;  %v6802_v40 = vshrl.u32 %v19275_v47, %v6787_v57  ;;  %v4508_v24 = vpop.f32.mrf.mxu1 }
 0x3b2   :  { %v6735_v25 = vsub.s32 0, %v16117_v55  ;;  %v4973_v0 = vmul.u32 %v16064_v28, %v4957_v36  ;;  %v4977_v48 = vsel %vm4975_vm3, %v4976_v13, %v16075_v61  ;;  %v6800_v56 = vor.u32 %v6799_v46, %v6798_v30 }
 0x3b3   :  { %v6803_v45 = vor.u32 %v6802_v40, %v6801_v42  ;;  %vm6804_vm4 = vcmp.lt.s32.totalorder %v16128_v14, 1  ;;  %vm6807_vm6 = vcmp.lt.s32.totalorder %v16128_v14, 4  ;;  %v6820_v38 = vshll.u32 %v6780_v60, 8 }
 0x3b4   :  { %vm6806_vm7 = vcmp.lt.s32.totalorder %v16128_v14, 3  ;;  %v6812_v53 = vsel %vm6804_vm4, %v6791_v11, %v6794_v18  ;;  %v6813_v41 = vsel %vm6807_vm6, %v6800_v56, 920167782  ;;  %v5025_v33 = vshrl.u32 %v5024_v3, 23 }
 0x3b5   :  { %vm4714_vm9 = vcmp.lt.s32.totalorder %v15472_v22, 0  ;;  %v16152_v28 = vadd.s32 %v4977_v48, %v4973_v0  ;;  %vm6805_vm11 = vcmp.lt.s32.totalorder %v16128_v14, 2  ;;  %v6814_v42 = vsel %vm6806_vm7, %v6797_v6, %v6813_v41  ;;  %v19415_v48 = vld [vmem:[#allocation21_spill] sm:$0xff] }
 0x3b6   :  { %v6816_v61 = vsel %vm6804_vm4, %v6794_v18, %v6797_v6  ;;  %v16159_v36 = vpop.eup %12877  ;;  %vm4817_vm5 = vcmp.lt.s32.totalorder %v15684_v17, 0  ;;  %v4891_v60 = vsub.s32 4294967266, %v16137_v52  ;;  %v6815_v13 = vsel %vm6805_vm11, %v6812_v53, %v6814_v42 }
 0x3b7   :  { %19414 = vst [vmem:[#allocation51_spill] sm:$0xff] %v16159_v36  ;;  %v6817_v0 = vsel %vm6807_vm6, %v6803_v45, 1326507024  ;;  %v4555_v16 = vadd.f32 %v4508_v24, %v19415_v48  ;;  %v6809_v3 = vsel %vm6807_vm6, %v6797_v6, 2102212464  ;;  %v12061_v41 = vmin.u32 %v6735_v25, %v16117_v55 }
 0x3b8   :  { %v6818_v30 = vsel %vm6806_vm7, %v6800_v56, %v6817_v0  ;;  %v16172_v46 = vmul.u32.u64.low %v6820_v38, %v6815_v13  ;;  %v16173_v40 = vmul.u32.u64.high %v6820_v38, %v6815_v13, %v16172_v46  ;;  %v6788_v5 = vshrl.u32 %v19273_v50, %v6787_v57 }
 0x3b9   :  { %v6819_v53 = vsel %vm6805_vm11, %v6816_v61, %v6818_v30  ;;  %v11996_v45 = vadd.s32 4294967169, %v5025_v33  ;;  %v16180_v42 = vor.u32 %v6640_v62, %v6639_v34  ;;  %v4979_v24 = vadd.s32 536870912, %v16152_v28 }
 0x3ba   :  { %v16183_v6 = vmul.u32.u64.low %v6820_v38, %v6819_v53  ;;  %v16184_v48 = vmul.u32.u64.high %v6820_v38, %v6819_v53, %v16183_v6  ;;  %v6808_v56 = vsel %vm6804_vm4, %v6788_v5, %v6791_v11  ;;  %v6810_v13 = vsel %vm6806_vm7, %v6794_v18, %v6809_v3 }
 0x3bb   :  { %v5031_v25 = vadd.s32 1, %v11996_v45  ;;  %v16191_v57 = vadd.f32 %v19382_v54, %v4555_v16  ;;  %v19417_v61 = vshll.u32 %v16084_v23, 23  ;;  %v4887_v34 = vsub.s32 32, %v16137_v52 }
 0x3bc   :  { %v4901_v62 = vsub.s32 4, %v15952_v8  ;;  %v6830_v0 = vadd.s32 1, %v16173_v40  ;;  %v4892_v30 = vadd.s32 127, %v4891_v60  ;;  %v6737_v53 = vclz %v12061_v41 }
 0x3bd   :  { %19416 = vst [vmem:[#allocation21_spill] sm:$0xff] %v16191_v57  ;;  %v16195_v33 = vor.u32 4788187, %v19417_v61  ;;  %v19104_v5 = vand.u32 2147483647, %v16112_v51  ;;  %vm5032_vm8 = vcmp.gt.s32.totalorder %v5031_v25, 0  ;;  %v6811_v18 = vsel %vm6805_vm11, %v6808_v56, %v6810_v13 }
 0x3be   :  { %v16201_v11 = vshrl.u32 %v4979_v24, 30  ;;  %vm6829_vm13 = vc.u32 %v16184_v48, %v16172_v46  ;;  %v5033_v23 = vsel %vm5032_vm8, %v5031_v25, 0  ;;  %v19419_v16 = vxor.u32 2147483648, %v16057_v31 }
 0x3bf   :  { %v4871_v60 = vadd.s32 %v15864_v44, %v15872_v32  ;;  %v5035_v41 = vand.u32 31, %v5033_v23  ;;  %v6878_v45 = vand.u32 2139095040, %v16191_v57  ;;  %v6646_v14 = vand.u32 2147483647, %v16195_v33 }
 0x3c0   :  { %19418 = vst [vmem:[#allocation52_spill] sm:$0xff] %v16201_v11  ;;  %v16212_v3 = vsel %vm4714_vm9, %v19419_v16, %v16057_v31  ;;  %v6648_v24 = vcvt.s32.f32 %v16180_v42  ;;  %v4902_v6 = vsel %vm4817_vm5, %v4901_v62, %v15952_v8  ;;  %v6831_v56 = vsel %vm6829_vm13, %v6830_v0, %v16173_v40 }
 0x3c1   :  { %19420 = vst [vmem:[#allocation53_spill] sm:$0xff] %v16212_v3  ;;  %v4888_v31 = vshll.u32 %v16009_v37, %v16137_v52  ;;  %v12062_v13 = vadd.s32 4294967294, %v6737_v53  ;;  %v6827_v25 = vmul.u32 %v6820_v38, %v6811_v18  ;;  %v5036_v61 = vsub.s32 32, %v5035_v41 }
 0x3c2   :  { %v4889_v44 = vshrl.u32 %v4871_v60, %v4887_v34  ;;  %v4893_v32 = vshll.u32 %v4892_v30, 23  ;;  %v4981_v16 = vshll.u32 %v16201_v11, 30  ;;  %v5028_v33 = vand.u32 8388607, %v19104_v5 }
 0x3c3   :  { %v16228_v42 = vadd.s32 %v6831_v56, %v6827_v25  ;;  %v5038_v35 = vshll.u32 %v19273_v50, %v5035_v41  ;;  %v5039_v8 = vshrl.u32 %v19274_v63, %v5036_v61  ;;  %v6879_v40 = vshrl.u32 %v6878_v45, 23 }
 0x3c4   :  { %v5041_v62 = vshll.u32 %v19274_v63, %v5035_v41  ;;  %v5042_v37 = vshrl.u32 %v19266_v39, %v5036_v61  ;;  %v5044_v52 = vshll.u32 %v19266_v39, %v5035_v41  ;;  %v5045_v38 = vshrl.u32 %v19267_v26, %v5036_v61 }
 0x3c5   :  { %vm12063_vm14 = vcmp.lt.s32.totalorder %v12062_v13, 0  ;;  %v5034_v34 = vshrl.u32 %v5033_v23, 5  ;;  %v5047_v0 = vshll.u32 %v19267_v26, %v5035_v41  ;;  %v5048_v30 = vshrl.u32 %v19288_v9, %v5036_v61 }
 0x3c6   :  { %v19421_v53 = vand.u32 2147483647, %v15684_v17  ;;  %v4894_v60 = vor.u32 4788187, %v4893_v32  ;;  %v5040_v45 = vor.u32 %v5039_v8, %v5038_v35  ;;  %v5043_v56 = vor.u32 %v5042_v37, %v5041_v62 }
 0x3c7   :  { %v5046_v25 = vor.u32 %v5045_v38, %v5044_v52  ;;  %v5029_v5 = vor.u32 8388608, %v5028_v33  ;;  %v5049_v15 = vor.u32 %v5048_v30, %v5047_v0  ;;  %v5050_v19 = vshll.u32 %v19288_v9, %v5035_v41 }
 0x3c8   :  { %vm16240_vm2 = vcmp.le.f32.partialorder %v19421_v53, 0.7853982  ;;  %v5051_v23 = vshrl.u32 %v19275_v47, %v5036_v61  ;;  %v16246_v20 = vsel %vm12063_vm14, 0, %v12062_v13  ;;  %v16249_v58 = vsub.s32 %v16152_v28, %v4981_v16 }
 0x3c9   :  { %v6833_v53 = vadd.s32 536870912, %v16228_v42  ;;  %v12068_v43 = vadd.s32 4294967169, %v6879_v40  ;;  %v5037_v36 = vshrl.u32 %v19273_v50, %v5036_v61  ;;  %vm5053_vm0 = vcmp.lt.s32.totalorder %v5034_v34, 1 }
 0x3ca   :  { %v5052_v32 = vor.u32 %v5051_v23, %v5050_v19  ;;  %vm5056_vm1 = vcmp.lt.s32.totalorder %v5034_v34, 4  ;;  %vm5055_vm3 = vcmp.lt.s32.totalorder %v5034_v34, 3  ;;  %v5061_v33 = vsel %vm5053_vm0, %v5040_v45, %v5043_v56 }
 0x3cb   :  { %v5058_v35 = vsel %vm5056_vm1, %v5046_v25, 2102212464  ;;  %v5062_v8 = vsel %vm5056_vm1, %v5049_v15, 920167782  ;;  %vm5054_vm4 = vcmp.lt.s32.totalorder %v5034_v34, 2  ;;  %v5065_v62 = vsel %vm5053_vm0, %v5043_v56, %v5046_v25 }
 0x3cc   :  { %v5063_v41 = vsel %vm5055_vm3, %v5046_v25, %v5062_v8  ;;  %v5069_v13 = vshll.u32 %v5029_v5, 8  ;;  %v4984_v37 = vsub.s32 0, %v16249_v58  ;;  %v5057_v28 = vsel %vm5053_vm0, %v5037_v36, %v5040_v45 }
 0x3cd   :  { %v5064_v16 = vsel %vm5054_vm4, %v5061_v33, %v5063_v41  ;;  %v5066_v52 = vsel %vm5056_vm1, %v5052_v32, 1326507024  ;;  %v5059_v40 = vsel %vm5055_vm3, %v5043_v56, %v5058_v35  ;;  %v4890_v0 = vor.u32 %v4889_v44, %v4888_v31 }
 0x3ce   :  { %v5067_v38 = vsel %vm5055_vm3, %v5049_v15, %v5066_v52  ;;  %v16255_v61 = vmul.u32.u64.low %v5069_v13, %v5064_v16  ;;  %v16256_v19 = vmul.u32.u64.high %v5069_v13, %v5064_v16, %v16255_v61  ;;  %v16259_v30 = vshrl.u32 %v6833_v53, 30  ;;  %v4466_v15 = vpop.f32.mrf.mxu0 }
 0x3cf   :  { %v5068_v23 = vsel %vm5054_vm4, %v5065_v62, %v5067_v38  ;;  %v6885_v8 = vadd.s32 1, %v12068_v43  ;;  %v16262_v25 = vmul.f32 %v6648_v24, %v6646_v14  ;;  %v16266_v36 = vsel %vm16240_vm2, 0, %v4902_v6 }
 0x3d0   :  { %19424 = vst [vmem:[#allocation54_spill] sm:$0xff] %v16259_v30  ;;  %v16268_v5 = vmul.u32.u64.low %v5069_v13, %v5068_v23  ;;  %v16269_v45 = vmul.u32.u64.high %v5069_v13, %v5068_v23, %v16268_v5  ;;  %v4895_v56 = vand.u32 2147483647, %v4894_v60  ;;  %v6745_v32 = vsub.s32 4294967266, %v16246_v20 }
 0x3d1   :  { %v5060_v31 = vsel %vm5054_vm4, %v5057_v28, %v5059_v40  ;;  %vm6886_vm6 = vcmp.gt.s32.totalorder %v6885_v8, 0  ;;  %v11993_v44 = vmin.u32 %v4984_v37, %v16249_v58  ;;  %v5079_v43 = vadd.s32 1, %v16256_v19 }
 0x3d2   :  { %v19111_v14 = vand.u32 2147483647, %v16191_v57  ;;  %v6887_v24 = vsel %vm6886_vm6, %v6885_v8, 0  ;;  %v4897_v53 = vcvt.s32.f32 %v4890_v0  ;;  %v6835_v6 = vshll.u32 %v16259_v30, 30 }
 0x3d3   :  { %v6889_v35 = vand.u32 31, %v6887_v24  ;;  %v4538_v33 = vadd.f32 %v4466_v15, %v15532_v10  ;;  %v16279_v60 = vand.u32 3, %v16266_v36  ;;  %v6725_v34 = vadd.s32 %v15973_v21, %v15979_v7 }
 0x3d4   :  { %v5076_v41 = vmul.u32 %v5069_v13, %v5060_v31  ;;  %vm5078_vm7 = vc.u32 %v16269_v45, %v16255_v61  ;;  %v16285_v62 = vmul.f32 %v4897_v53, %v4895_v56  ;;  %v6741_v37 = vsub.s32 32, %v16246_v20 }
 0x3d5   :  { %19425 = vst [vmem:[#allocation55_spill] sm:$0xff] %v16279_v60  ;;  %v16288_v28 = vadd.s32 127, %v6745_v32  ;;  %v5080_v16 = vsel %vm5078_vm7, %v5079_v43, %v16256_v19  ;;  %v4986_v52 = vclz %v11993_v44  ;;  %v6882_v40 = vand.u32 8388607, %v19111_v14 }
 0x3d6   :  { %v5081_v10 = vadd.s32 %v5080_v16, %v5076_v41  ;;  %v6890_v38 = vsub.s32 32, %v6889_v35  ;;  %v16294_v21 = vsub.s32 %v16228_v42, %v6835_v6  ;;  %v16296_v7 = vshrl.u32 %v6887_v24, 5 }
 0x3d7   :  { %v6892_v13 = vshll.u32 %v19273_v50, %v6889_v35  ;;  %v16300_v0 = vadd.f32 %v15304_v59, %v4538_v33  ;;  %v6895_v19 = vshll.u32 %v19274_v63, %v6889_v35  ;;  %v6898_v15 = vshll.u32 %v19266_v39, %v6889_v35 }
 0x3d8   :  { %v5082_v23 = vadd.s32 536870912, %v5081_v10  ;;  %v6893_v8 = vshrl.u32 %v19274_v63, %v6890_v38  ;;  %v6896_v5 = vshrl.u32 %v19266_v39, %v6890_v38  ;;  %v6899_v56 = vshrl.u32 %v19267_v26, %v6890_v38 }
 0x3d9   :  { %v6901_v42 = vshll.u32 %v19267_v26, %v6889_v35  ;;  %v6902_v32 = vshrl.u32 %v19288_v9, %v6890_v38  ;;  %v4899_v31 = vxor.u32 2147483648, %v16285_v62  ;;  %v6883_v44 = vor.u32 8388608, %v6882_v40 }
 0x3da   :  { %v6894_v43 = vor.u32 %v6893_v8, %v6892_v13  ;;  %v6897_v24 = vor.u32 %v6896_v5, %v6895_v19  ;;  %v6742_v53 = vshll.u32 %v16117_v55, %v16246_v20  ;;  %v6900_v6 = vor.u32 %v6899_v56, %v6898_v15 }
 0x3db   :  { %v6903_v33 = vor.u32 %v6902_v32, %v6901_v42  ;;  %v5127_v41 = vand.u32 2139095040, %v16300_v0  ;;  %v6743_v16 = vshrl.u32 %v6725_v34, %v6741_v37  ;;  %v16313_v14 = vshrl.u32 %v5082_v23, 30 }
 0x3dc   :  { %v6904_v30 = vshll.u32 %v19288_v9, %v6889_v35  ;;  %v6905_v60 = vshrl.u32 %v19275_v47, %v6890_v38  ;;  %v6747_v11 = vshll.u32 %v16288_v28, 23  ;;  %v11994_v3 = vadd.s32 4294967294, %v4986_v52  ;;  %v4510_v52 = vpop.f32.mrf.mxu1 }
 0x3dd   :  { %19426 = vst [vmem:[#allocation56_spill] sm:$0xff] %v16313_v14  ;;  %v6838_v40 = vsub.s32 0, %v16294_v21  ;;  %vm6907_vm11 = vcmp.lt.s32.totalorder %v16296_v7, 1  ;;  %vm6910_vm8 = vcmp.lt.s32.totalorder %v16296_v7, 4  ;;  %v6923_v55 = vshll.u32 %v6883_v44, 8 }
 0x3de   :  { %v6906_v13 = vor.u32 %v6905_v60, %v6904_v30  ;;  %v6915_v20 = vsel %vm6907_vm11, %v6894_v43, %v6897_v24  ;;  %vm6909_vm13 = vcmp.lt.s32.totalorder %v16296_v7, 3  ;;  %v6916_v34 = vsel %vm6910_vm8, %v6903_v33, 920167782 }
 0x3df   :  { %v6919_v35 = vsel %vm6907_vm11, %v6897_v24, %v6900_v6  ;;  %v5128_v37 = vshrl.u32 %v5127_v41, 23  ;;  %v5084_v28 = vshll.u32 %v16313_v14, 30  ;;  %vm6908_vm14 = vcmp.lt.s32.totalorder %v16296_v7, 2 }
 0x3e0   :  { %v6917_v30 = vsel %vm6909_vm13, %v6900_v6, %v6916_v34  ;;  %v6920_v60 = vsel %vm6910_vm8, %v6906_v13, 1326507024  ;;  %v12065_v23 = vmin.u32 %v6838_v40, %v16294_v21  ;;  %v6912_v8 = vsel %vm6910_vm8, %v6900_v6, 2102212464 }
 0x3e1   :  { %v6918_v19 = vsel %vm6908_vm14, %v6915_v20, %v6917_v30  ;;  %v6921_v5 = vsel %vm6909_vm13, %v6903_v33, %v6920_v60  ;;  %v6891_v15 = vshrl.u32 %v19273_v50, %v6890_v38  ;;  %v12000_v40 = vadd.s32 4294967169, %v5128_v37 }
 0x3e2   :  { %v6922_v56 = vsel %vm6908_vm14, %v6919_v35, %v6921_v5  ;;  %v16338_v42 = vmul.u32.u64.low %v6923_v55, %v6918_v19  ;;  %v16339_v32 = vmul.u32.u64.high %v6923_v55, %v6918_v19, %v16338_v42  ;;  %v4556_v6 = vadd.f32 %v4510_v52, %v15698_v2 }
 0x3e3   :  { %v16342_v44 = vmul.u32.u64.low %v6923_v55, %v6922_v56  ;;  %v16343_v41 = vmul.u32.u64.high %v6923_v55, %v6922_v56, %v16342_v44  ;;  %v16346_v13 = vsub.s32 %v5081_v10, %v5084_v28  ;;  %v6911_v33 = vsel %vm6907_vm11, %v6891_v15, %v6894_v43 }
 0x3e4   :  { %v6913_v38 = vsel %vm6909_vm13, %v6897_v24, %v6912_v8  ;;  %v19117_v20 = vand.u32 2147483647, %v16300_v0  ;;  %v4900_v34 = vsel %vm4817_vm5, %v4899_v31, %v16285_v62  ;;  %v16357_v35 = vadd.s32 3, %v16266_v36 }
 0x3e5   :  { %vm11995_vm0 = vcmp.lt.s32.totalorder %v11994_v3, 0  ;;  %v5134_v37 = vadd.s32 1, %v12000_v40  ;;  %v16359_v2 = vor.u32 %v6743_v16, %v6742_v53  ;;  %v16361_v10 = vor.u32 4788187, %v6747_v11 }
 0x3e6   :  { %v6840_v28 = vclz %v12065_v23  ;;  %v6933_v43 = vadd.s32 1, %v16339_v32  ;;  %v6914_v24 = vsel %vm6908_vm14, %v6911_v33, %v6913_v38  ;;  %vm6932_vm1 = vc.u32 %v16343_v41, %v16338_v42 }
 0x3e7   :  { %vm5135_vm3 = vcmp.gt.s32.totalorder %v5134_v37, 0  ;;  %v16369_v62 = vadd.f32 %v15304_v59, %v4556_v6  ;;  %v16371_v36 = vsel %vm11995_vm0, 0, %v11994_v3  ;;  %v5087_v31 = vsub.s32 0, %v16346_v13 }
 0x3e8   :  { %v5131_v11 = vand.u32 8388607, %v19117_v20  ;;  %v5136_v53 = vsel %vm5135_vm3, %v5134_v37, 0  ;;  %v16380_v7 = vsel %vm16240_vm2, %v15684_v17, %v4900_v34  ;;  %v6934_v30 = vsel %vm6932_vm1, %v6933_v43, %v16339_v32 }
 0x3e9   :  { %19427 = vst [vmem:[#allocation57_spill] sm:$0xff] %v16369_v62  ;;  %v5138_v60 = vand.u32 31, %v5136_v53  ;;  %v6749_v52 = vand.u32 2147483647, %v16361_v10  ;;  %v6751_v3 = vcvt.s32.f32 %v16359_v2  ;;  %v4974_v23 = vadd.s32 %v16074_v29, %v16082_v27 }
 0x3ea   :  { %v6930_v8 = vmul.u32 %v6923_v55, %v6914_v24  ;;  %v4990_v19 = vsub.s32 32, %v16371_v36  ;;  %v12066_v5 = vadd.s32 4294967294, %v6840_v28  ;;  %v6981_v56 = vand.u32 2139095040, %v16369_v62 }
 0x3eb   :  { %v5139_v15 = vsub.s32 32, %v5138_v60  ;;  %v11997_v18 = vmin.u32 %v5087_v31, %v16346_v13  ;;  %v5132_v32 = vor.u32 8388608, %v5131_v11  ;;  %v5137_v40 = vshrl.u32 %v5136_v53, 5 }
 0x3ec   :  { %v16390_v44 = vadd.s32 %v6934_v30, %v6930_v8  ;;  %v5141_v6 = vshll.u32 %v19273_v50, %v5138_v60  ;;  %v5144_v38 = vshll.u32 %v19274_v63, %v5138_v60  ;;  %v5147_v27 = vshll.u32 %v19266_v39, %v5138_v60 }
 0x3ed   :  { %v5142_v33 = vshrl.u32 %v19274_v63, %v5139_v15  ;;  %v5145_v29 = vshrl.u32 %v19266_v39, %v5139_v15  ;;  %v5148_v55 = vshrl.u32 %v19267_v26, %v5139_v15  ;;  %v5150_v34 = vshll.u32 %v19267_v26, %v5138_v60 }
 0x3ee   :  { %v5151_v37 = vshrl.u32 %v19288_v9, %v5139_v15  ;;  %v4991_v2 = vshll.u32 %v16249_v58, %v16371_v36  ;;  %v6982_v43 = vshrl.u32 %v6981_v56, 23  ;;  %v4992_v24 = vshrl.u32 %v4974_v23, %v4990_v19 }
 0x3ef   :  { %v5143_v10 = vor.u32 %v5142_v33, %v5141_v6  ;;  %v5146_v28 = vor.u32 %v5145_v29, %v5144_v38  ;;  %v4994_v31 = vsub.s32 4294967266, %v16371_v36  ;;  %v5149_v11 = vor.u32 %v5148_v55, %v5147_v27 }
 0x3f0   :  { %v5152_v53 = vor.u32 %v5151_v37, %v5150_v34  ;;  %vm12067_vm5 = vcmp.lt.s32.totalorder %v12066_v5, 0  ;;  %v6936_v30 = vadd.s32 536870912, %v16390_v44  ;;  %v5153_v8 = vshll.u32 %v19288_v9, %v5138_v60 }
 0x3f1   :  { %v5154_v20 = vshrl.u32 %v19275_v47, %v5139_v15  ;;  %v5089_v16 = vclz %v11997_v18  ;;  %vm5156_vm2 = vcmp.lt.s32.totalorder %v5137_v40, 1  ;;  %vm5159_vm4 = vcmp.lt.s32.totalorder %v5137_v40, 4 }
 0x3f2   :  { %v5172_v14 = vshll.u32 %v5132_v32, 8  ;;  %vm19210_vm6 = vcmp.lt.s32.totalorder %v15590_v12, 0  ;;  %v5161_v56 = vsel %vm5159_vm4, %v5149_v11, 2102212464  ;;  %v5164_v23 = vsel %vm5156_vm2, %v5143_v10, %v5146_v28 }
 0x3f3   :  { %v5155_v58 = vor.u32 %v5154_v20, %v5153_v8  ;;  %v12072_v36 = vadd.s32 4294967169, %v6982_v43  ;;  %v5140_v19 = vshrl.u32 %v19273_v50, %v5139_v15  ;;  %vm5158_vm7 = vcmp.lt.s32.totalorder %v5137_v40, 3 }
 0x3f4   :  { %v5165_v6 = vsel %vm5159_vm4, %v5152_v53, 920167782  ;;  %v5168_v33 = vsel %vm5156_vm2, %v5146_v28, %v5149_v11  ;;  %v16410_v60 = vshrl.u32 %v6936_v30, 30  ;;  %vm5157_vm11 = vcmp.lt.s32.totalorder %v5137_v40, 2 }
 0x3f5   :  { %v5166_v18 = vsel %vm5158_vm7, %v5149_v11, %v5165_v6  ;;  %v5169_v38 = vsel %vm5159_vm4, %v5155_v58, 1326507024  ;;  %v5160_v32 = vsel %vm5156_vm2, %v5140_v19, %v5143_v10  ;;  %v5162_v29 = vsel %vm5158_vm7, %v5146_v28, %v5161_v56  ;;  %v4468_v19 = vpop.f32.mrf.mxu0  ;;  %v4514_v6 = vpop.f32.mrf.mxu1 }
 0x3f6   :  { %19428 = vst [vmem:[#allocation58_spill] sm:$0xff] %v16410_v60  ;;  %v5167_v27 = vsel %vm5157_vm11, %v5164_v23, %v5166_v18  ;;  %v5170_v20 = vsel %vm5158_vm7, %v5152_v53, %v5169_v38  ;;  %v4995_v55 = vadd.s32 127, %v4994_v31  ;;  %v16418_v15 = vsel %vm12067_vm5, 0, %v12066_v5 }
 0x3f7   :  { %v5171_v34 = vsel %vm5157_vm11, %v5168_v33, %v5170_v20  ;;  %v16413_v37 = vmul.u32.u64.low %v5172_v14, %v5167_v27  ;;  %v16414_v43 = vmul.u32.u64.high %v5172_v14, %v5167_v27, %v16413_v37  ;;  %v6988_v17 = vadd.s32 1, %v12072_v36 }
 0x3f8   :  { %v16420_v8 = vmul.u32.u64.low %v5172_v14, %v5171_v34  ;;  %v16421_v30 = vmul.u32.u64.high %v5172_v14, %v5171_v34, %v16420_v8  ;;  %v16423_v11 = vmul.f32 %v6751_v3, %v6749_v52  ;;  %v6938_v40 = vshll.u32 %v16410_v60, 30 }
 0x3f9   :  { %v5163_v10 = vsel %vm5157_vm11, %v5160_v32, %v5162_v29  ;;  %v19122_v28 = vand.u32 2147483647, %v16369_v62  ;;  %v16428_v31 = vand.u32 3, %v16357_v35  ;;  %v16430_v53 = vor.u32 %v4992_v24, %v4991_v2 }
 0x3fa   :  { %v11998_v58 = vadd.s32 4294967294, %v5089_v16  ;;  %vm6989_vm8 = vcmp.gt.s32.totalorder %v6988_v17, 0  ;;  %v4996_v5 = vshll.u32 %v4995_v55, 23  ;;  %v6848_v56 = vsub.s32 4294967266, %v16418_v15  ;;  %v19432_v55 = vld [vmem:[#allocation26_spill] sm:$0xff] }
 0x3fb   :  { %19429 = vst [vmem:[#allocation59_spill] sm:$0xff] %v16428_v31  ;;  %v5182_v23 = vadd.s32 1, %v16414_v43  ;;  %v6990_v36 = vsel %vm6989_vm8, %v6988_v17, 0  ;;  %v19430_v52 = vxor.u32 2147483648, %v16262_v25  ;;  %12879 = vcosq.f32 %v16380_v7 }
 0x3fc   :  { %v5179_v35 = vmul.u32 %v5172_v14, %v5163_v10  ;;  %vm5181_vm13 = vc.u32 %v16421_v30, %v16413_v37  ;;  %v16446_v2 = vsub.s32 %v16390_v44, %v6938_v40  ;;  %v6985_v24 = vand.u32 8388607, %v19122_v28 }
 0x3fd   :  { %v16439_v3 = vsel %vm19210_vm6, %v19430_v52, %v16262_v25  ;;  %v5183_v17 = vsel %vm5181_vm13, %v5182_v23, %v16414_v43  ;;  %v6828_v25 = vadd.s32 %v16172_v46, %v16184_v48  ;;  %vm11999_vm14 = vcmp.lt.s32.totalorder %v11998_v58, 0 }
 0x3fe   :  { %19431 = vst [vmem:[#allocation60_spill] sm:$0xff] %v16439_v3  ;;  %v16453_v14 = vadd.s32 %v5183_v17, %v5179_v35  ;;  %v6992_v33 = vand.u32 31, %v6990_v36  ;;  %v16455_v18 = vor.u32 4788187, %v4996_v5  ;;  %v6844_v44 = vsub.s32 32, %v16418_v15 }
 0x3ff   :  { %v16459_v32 = vadd.s32 127, %v6848_v56  ;;  %v6991_v29 = vshrl.u32 %v6990_v36, 5  ;;  %v4539_v20 = vadd.f32 %v4468_v19, %v15536_v4  ;;  %v4557_v34 = vadd.f32 %v4514_v6, %v19432_v55 }
 0x400   :  { %v6993_v27 = vsub.s32 32, %v6992_v33  ;;  %v16463_v43 = vsel %vm11999_vm14, 0, %v11998_v58  ;;  %v6941_v46 = vsub.s32 0, %v16446_v2  ;;  %v5185_v48 = vadd.s32 536870912, %v16453_v14 }
 0x401   :  { %v6986_v8 = vor.u32 8388608, %v6985_v24  ;;  %v6995_v40 = vshll.u32 %v19273_v50, %v6992_v33  ;;  %v6998_v5 = vshll.u32 %v19274_v63, %v6992_v33  ;;  %v7001_v23 = vshll.u32 %v19266_v39, %v6992_v33 }
 0x402   :  { %v6996_v10 = vshrl.u32 %v19274_v63, %v6993_v27  ;;  %v6999_v56 = vshrl.u32 %v19266_v39, %v6993_v27  ;;  %v7002_v4 = vshrl.u32 %v19267_v26, %v6993_v27  ;;  %v7004_v58 = vshll.u32 %v19267_v26, %v6992_v33 }
 0x403   :  { %v7005_v36 = vshrl.u32 %v19288_v9, %v6993_v27  ;;  %vm7010_vm0 = vcmp.lt.s32.totalorder %v6991_v29, 1  ;;  %v16476_v17 = vadd.f32 %v19382_v54, %v4539_v20  ;;  %v7007_v6 = vshll.u32 %v19288_v9, %v6992_v33 }
 0x404   :  { %v6997_v52 = vor.u32 %v6996_v10, %v6995_v40  ;;  %v7000_v35 = vor.u32 %v6999_v56, %v6998_v5  ;;  %v7003_v24 = vor.u32 %v7002_v4, %v7001_v23  ;;  %v7008_v55 = vshrl.u32 %v19275_v47, %v6993_v27 }
 0x405   :  { %19433 = vst [vmem:[#allocation26_spill] sm:$0xff] %v16476_v17  ;;  %v7006_v19 = vor.u32 %v7005_v36, %v7004_v58  ;;  %v16480_v28 = vshrl.u32 %v5185_v48, 30  ;;  %vm7012_vm1 = vcmp.lt.s32.totalorder %v6991_v29, 3  ;;  %vm7013_vm3 = vcmp.lt.s32.totalorder %v6991_v29, 4 }
 0x406   :  { %v7018_v16 = vsel %vm7010_vm0, %v6997_v52, %v7000_v35  ;;  %v6994_v38 = vshrl.u32 %v19273_v50, %v6993_v27  ;;  %v7009_v40 = vor.u32 %v7008_v55, %v7007_v6  ;;  %v7015_v10 = vsel %vm7013_vm3, %v7003_v24, 2102212464 }
 0x407   :  { %19434 = vst [vmem:[#allocation61_spill] sm:$0xff] %v16480_v28  ;;  %v7019_v5 = vsel %vm7013_vm3, %v7006_v19, 920167782  ;;  %vm7011_vm5 = vcmp.lt.s32.totalorder %v6991_v29, 2  ;;  %v7022_v56 = vsel %vm7010_vm0, %v7000_v35, %v7003_v24  ;;  %v7026_v23 = vshll.u32 %v6986_v8, 8 }
 0x408   :  { %v7020_v20 = vsel %vm7012_vm1, %v7003_v24, %v7019_v5  ;;  %v16486_v33 = vpop.eup %12879  ;;  %v7014_v48 = vsel %vm7010_vm0, %v6994_v38, %v6997_v52  ;;  %v7023_v58 = vsel %vm7013_vm3, %v7009_v40, 1326507024  ;;  %v16491_v36 = vadd.f32 %v19382_v54, %v4557_v34  ;;  %v19437_v52 = vld [vmem:[#allocation13_spill] sm:$0xff] }
 0x409   :  { %19435 = vst [vmem:[#allocation62_spill] sm:$0xff] %v16486_v33  ;;  %v7021_v4 = vsel %vm7011_vm5, %v7018_v16, %v7020_v20  ;;  %v7016_v27 = vsel %vm7012_vm1, %v7000_v35, %v7015_v10  ;;  %v7024_v6 = vsel %vm7012_vm1, %v7006_v19, %v7023_v58  ;;  %v12069_v8 = vmin.u32 %v6941_v46, %v16446_v2 }
 0x40a   :  { %19436 = vst [vmem:[#allocation63_spill] sm:$0xff] %v16491_v36  ;;  %v16495_v55 = vmul.u32.u64.low %v7026_v23, %v7021_v4  ;;  %v16496_v60 = vmul.u32.u64.high %v7026_v23, %v7021_v4, %v16495_v55  ;;  %v5187_v24 = vshll.u32 %v16480_v28, 30  ;;  %v7025_v38 = vsel %vm7011_vm5, %v7022_v56, %v7024_v6 }
 0x40b   :  { %v5230_v16 = vand.u32 2139095040, %v16476_v17  ;;  %vm19156_vm2 = vcmp.lt.s32.totalorder %v19437_v52, 0  ;;  %v4998_v34 = vand.u32 2147483647, %v16455_v18  ;;  %v5077_v35 = vadd.s32 %v16255_v61, %v16269_v45 }
 0x40c   :  { %v16507_v19 = vmul.u32.u64.low %v7026_v23, %v7025_v38  ;;  %v16508_v40 = vmul.u32.u64.high %v7026_v23, %v7025_v38, %v16507_v19  ;;  %v6846_v10 = vshrl.u32 %v6828_v25, %v6844_v44  ;;  %v7017_v5 = vsel %vm7011_vm5, %v7014_v48, %v7016_v27 }
 0x40d   :  { %v5231_v46 = vshrl.u32 %v5230_v16, 23  ;;  %v7084_v20 = vand.u32 2139095040, %v16491_v36  ;;  %v6845_v56 = vshll.u32 %v16294_v21, %v16418_v15  ;;  %v6850_v4 = vshll.u32 %v16459_v32, 23 }
 0x40e   :  { %v5093_v58 = vsub.s32 32, %v16463_v43  ;;  %v7036_v18 = vadd.s32 1, %v16496_v60  ;;  %v5097_v61 = vsub.s32 4294967266, %v16463_v43  ;;  %v6943_v45 = vclz %v12069_v8 }
 0x40f   :  { %v16519_v6 = vsub.s32 %v16453_v14, %v5187_v24  ;;  %v12004_v25 = vadd.s32 4294967169, %v5231_v46  ;;  %v7033_v44 = vmul.u32 %v7026_v23, %v7017_v5  ;;  %vm7035_vm4 = vc.u32 %v16508_v40, %v16495_v55 }
 0x410   :  { %v19125_v29 = vand.u32 2147483647, %v16476_v17  ;;  %v7085_v21 = vshrl.u32 %v7084_v20, 23  ;;  %v19438_v15 = vcvt.s32.f32 %v16430_v53  ;;  %v16528_v48 = vor.u32 %v6846_v10, %v6845_v56 }
 0x411   :  { %v7037_v27 = vsel %vm7035_vm4, %v7036_v18, %v16496_v60  ;;  %v5237_v8 = vadd.s32 1, %v12004_v25  ;;  %v16531_v38 = vor.u32 4788187, %v6850_v4  ;;  %v5094_v14 = vshll.u32 %v16346_v13, %v16463_v43 }
 0x412   :  { %v16526_v32 = vmul.f32 %v19438_v15, %v4998_v34  ;;  %v5095_v23 = vshrl.u32 %v5077_v35, %v5093_v58  ;;  %v7038_v24 = vadd.s32 %v7037_v27, %v7033_v44  ;;  %v5098_v16 = vadd.s32 127, %v5097_v61 }
 0x413   :  { %v12070_v19 = vadd.s32 4294967294, %v6943_v45  ;;  %v5190_v5 = vsub.s32 0, %v16519_v6  ;;  %vm5238_vm7 = vcmp.gt.s32.totalorder %v5237_v8, 0  ;;  %v5234_v34 = vand.u32 8388607, %v19125_v29 }
 0x414   :  { %v7039_v53 = vadd.s32 536870912, %v7038_v24  ;;  %v5239_v10 = vsel %vm5238_vm7, %v5237_v8, 0  ;;  %v12076_v46 = vadd.s32 4294967169, %v7085_v21  ;;  %12881 = vsinq.f32 %v16380_v7 }
 0x415   :  { %v19439_v60 = vxor.u32 2147483648, %v16423_v11  ;;  %v5241_v35 = vand.u32 31, %v5239_v10  ;;  %v16549_v4 = vor.u32 %v5095_v23, %v5094_v14  ;;  %v5099_v18 = vshll.u32 %v5098_v16, 23 }
 0x416   :  { %v16551_v58 = vshrl.u32 %v7039_v53, 30  ;;  %vm12071_vm11 = vcmp.lt.s32.totalorder %v12070_v19, 0  ;;  %v12001_v7 = vmin.u32 %v5190_v5, %v16519_v6  ;;  %v5235_v45 = vor.u32 8388608, %v5234_v34 }
 0x417   :  { %v16544_v13 = vsel %vm19156_vm2, %v19439_v60, %v16423_v11  ;;  %v5242_v61 = vsub.s32 32, %v5241_v35  ;;  %v16554_v25 = vshrl.u32 %v5239_v10, 5  ;;  %v5244_v11 = vshll.u32 %v19273_v50, %v5241_v35 }
 0x418   :  { %19440 = vst [vmem:[#allocation64_spill] sm:$0xff] %v16544_v13  ;;  %19441 = vst [vmem:[#allocation65_spill] sm:$0xff] %v16551_v58  ;;  %v7091_v44 = vadd.s32 1, %v12076_v46  ;;  %v5247_v15 = vshll.u32 %v19274_v63, %v5241_v35  ;;  %v7041_v14 = vshll.u32 %v16551_v58, 30  ;;  %v5250_v23 = vshll.u32 %v19266_v39, %v5241_v35 }
 0x419   :  { %v5245_v21 = vshrl.u32 %v19274_v63, %v5242_v61  ;;  %v5248_v27 = vshrl.u32 %v19266_v39, %v5242_v61  ;;  %v5251_v8 = vshrl.u32 %v19267_v26, %v5242_v61  ;;  %v5253_v16 = vshll.u32 %v19267_v26, %v5241_v35 }
 0x41a   :  { %v5254_v5 = vshrl.u32 %v19288_v9, %v5242_v61  ;;  %v5256_v10 = vshll.u32 %v19288_v9, %v5241_v35  ;;  %v5257_v46 = vshrl.u32 %v19275_v47, %v5242_v61  ;;  %v16567_v60 = vor.u32 4788187, %v5099_v18 }
 0x41b   :  { %v5246_v53 = vor.u32 %v5245_v21, %v5244_v11  ;;  %v5249_v34 = vor.u32 %v5248_v27, %v5247_v15  ;;  %v16571_v29 = vadd.s32 %v16338_v42, %v16343_v41  ;;  %v5252_v43 = vor.u32 %v5251_v8, %v5250_v23  ;;  %v19444_v27 = vld [vmem:[#allocation20_spill] sm:$0xff] }
 0x41c   :  { %v5255_v56 = vor.u32 %v5254_v5, %v5253_v16  ;;  %v16575_v13 = vsel %vm12071_vm11, 0, %v12070_v19  ;;  %v5258_v52 = vor.u32 %v5257_v46, %v5256_v10  ;;  %vm7092_vm8 = vcmp.gt.s32.totalorder %v7091_v44, 0  ;;  %v4470_v10 = vpop.f32.mrf.mxu0 }
 0x41d   :  { %v5192_v11 = vclz %v12001_v7  ;;  %vm5259_vm13 = vcmp.lt.s32.totalorder %v16554_v25, 1  ;;  %vm5262_vm14 = vcmp.lt.s32.totalorder %v16554_v25, 4  ;;  %v5275_v35 = vshll.u32 %v5235_v45, 8 }
 0x41e   :  { %v16579_v18 = vsub.s32 %v7038_v24, %v7041_v14  ;;  %vm5261_vm0 = vcmp.lt.s32.totalorder %v16554_v25, 3  ;;  %v5267_v42 = vsel %vm5259_vm13, %v5246_v53, %v5249_v34  ;;  %v5268_v41 = vsel %vm5262_vm14, %v5255_v56, 920167782 }
 0x41f   :  { %vm5260_vm1 = vcmp.lt.s32.totalorder %v16554_v25, 2  ;;  %v5269_v19 = vsel %vm5261_vm0, %v5252_v43, %v5268_v41  ;;  %v5271_v7 = vsel %vm5259_vm13, %v5249_v34, %v5252_v43  ;;  %v7093_v21 = vsel %vm7092_vm8, %v7091_v44, 0  ;;  %v4516_v44 = vpop.f32.mrf.mxu1 }
 0x420   :  { %v5264_v15 = vsel %vm5262_vm14, %v5252_v43, 2102212464  ;;  %v5270_v24 = vsel %vm5260_vm1, %v5267_v42, %v5269_v19  ;;  %v5272_v45 = vsel %vm5262_vm14, %v5258_v52, 1326507024  ;;  %v5243_v14 = vshrl.u32 %v19273_v50, %v5242_v61 }
 0x421   :  { %v16592_v8 = vpop.eup %12881  ;;  %v5273_v23 = vsel %vm5261_vm0, %v5255_v56, %v5272_v45  ;;  %v16597_v16 = vmul.u32.u64.low %v5275_v35, %v5270_v24  ;;  %v16598_v5 = vmul.u32.u64.high %v5275_v35, %v5270_v24, %v16597_v16  ;;  %v12002_v43 = vadd.s32 4294967294, %v5192_v11  ;;  %v19443_v11 = vld [vmem:[#allocation44_spill] sm:$0xff] }
 0x422   :  { %19442 = vst [vmem:[#allocation66_spill] sm:$0xff] %v16592_v8  ;;  %v7044_v46 = vsub.s32 0, %v16579_v18  ;;  %v5274_v52 = vsel %vm5260_vm1, %v5271_v7, %v5273_v23  ;;  %v7095_v42 = vand.u32 31, %v7093_v21  ;;  %v5263_v41 = vsel %vm5259_vm13, %v5243_v14, %v5246_v53 }
 0x423   :  { %v5265_v61 = vsel %vm5261_vm0, %v5249_v34, %v5264_v15  ;;  %v16608_v56 = vmul.u32.u64.low %v5275_v35, %v5274_v52  ;;  %v16609_v19 = vmul.u32.u64.high %v5275_v35, %v5274_v52, %v16608_v56  ;;  %v5101_v24 = vand.u32 2147483647, %v16567_v60 }
 0x424   :  { %v16612_v45 = vsub.s32 32, %v7095_v42  ;;  %v4540_v20 = vadd.f32 %v4470_v10, %v19443_v11  ;;  %v4558_v58 = vadd.f32 %v4516_v44, %v19444_v27  ;;  %v6947_v7 = vsub.s32 32, %v16575_v13 }
 0x425   :  { %v6951_v23 = vsub.s32 4294967266, %v16575_v13  ;;  %v5285_v53 = vadd.s32 1, %v16598_v5  ;;  %v19445_v14 = vand.u32 2147483647, %v16491_v36  ;;  %vm12003_vm3 = vcmp.lt.s32.totalorder %v12002_v43, 0 }
 0x426   :  { %v5266_v15 = vsel %vm5260_vm1, %v5263_v41, %v5265_v61  ;;  %v7099_v60 = vshrl.u32 %v19274_v63, %v16612_v45  ;;  %v7102_v10 = vshrl.u32 %v19266_v39, %v16612_v45  ;;  %v12073_v27 = vmin.u32 %v7044_v46, %v16579_v18 }
 0x427   :  { %v7088_v34 = vand.u32 8388607, %v19445_v14  ;;  %vm5284_vm5 = vc.u32 %v16609_v19, %v16597_v16  ;;  %v7098_v44 = vshll.u32 %v19273_v50, %v7095_v42  ;;  %v7101_v52 = vshll.u32 %v19274_v63, %v7095_v42 }
 0x428   :  { %v5286_v56 = vsel %vm5284_vm5, %v5285_v53, %v16598_v5  ;;  %v16633_v11 = vshrl.u32 %v7093_v21, 5  ;;  %v7104_v25 = vshll.u32 %v19266_v39, %v7095_v42  ;;  %v7105_v41 = vshrl.u32 %v19267_v26, %v16612_v45 }
 0x429   :  { %v5282_v61 = vmul.u32 %v5275_v35, %v5266_v15  ;;  %v7100_v14 = vor.u32 %v7099_v60, %v7098_v44  ;;  %v7103_v3 = vor.u32 %v7102_v10, %v7101_v52  ;;  %v7107_v46 = vshll.u32 %v19267_v26, %v7095_v42 }
 0x42a   :  { %v7106_v12 = vor.u32 %v7105_v41, %v7104_v25  ;;  %v7108_v28 = vshrl.u32 %v19288_v9, %v16612_v45  ;;  %v7110_v31 = vshll.u32 %v19288_v9, %v7095_v42  ;;  %v7111_v21 = vshrl.u32 %v19275_v47, %v16612_v45 }
 0x42b   :  { %v6949_v5 = vshrl.u32 %v16571_v29, %v6947_v7  ;;  %v6952_v53 = vadd.s32 127, %v6951_v23  ;;  %v16645_v33 = vadd.s32 %v5286_v56, %v5282_v61  ;;  %v16648_v35 = vadd.f32 %v15304_v59, %v4540_v20 }
 0x42c   :  { %vm4920_vm4 = vcmp.lt.s32.totalorder %v15930_v49, 0  ;;  %v7089_v15 = vor.u32 8388608, %v7088_v34  ;;  %v7109_v60 = vor.u32 %v7108_v28, %v7107_v46  ;;  %v7112_v10 = vor.u32 %v7111_v21, %v7110_v31 }
 0x42d   :  { %vm7113_vm7 = vcmp.lt.s32.totalorder %v16633_v11, 1  ;;  %v16653_v42 = vsel %vm12003_vm3, 0, %v12002_v43  ;;  %v7046_v44 = vclz %v12073_v27  ;;  %vm7116_vm11 = vcmp.lt.s32.totalorder %v16633_v11, 4 }
 0x42e   :  { %v7121_v29 = vsel %vm7113_vm7, %v7100_v14, %v7103_v3  ;;  %vm7115_vm8 = vcmp.lt.s32.totalorder %v16633_v11, 3  ;;  %v7122_v20 = vsel %vm7116_vm11, %v7109_v60, 920167782  ;;  %v7125_v28 = vsel %vm7113_vm7, %v7103_v3, %v7106_v12 }
 0x42f   :  { %v7126_v31 = vsel %vm7116_vm11, %v7112_v10, 1326507024  ;;  %v5288_v43 = vadd.s32 536870912, %v16645_v33  ;;  %vm7114_vm13 = vcmp.lt.s32.totalorder %v16633_v11, 2  ;;  %v7123_v7 = vsel %vm7115_vm8, %v7106_v12, %v7122_v20 }
 0x430   :  { %v7127_v23 = vsel %vm7115_vm8, %v7109_v60, %v7126_v31  ;;  %v6953_v34 = vshll.u32 %v6952_v53, 23  ;;  %v7124_v27 = vsel %vm7114_vm13, %v7121_v29, %v7123_v7  ;;  %v16675_v56 = vshll.u32 %v7089_v15, 8 }
 0x431   :  { %v7128_v52 = vsel %vm7114_vm13, %v7125_v28, %v7127_v23  ;;  %v19446_v25 = vand.u32 2147483647, %v16531_v38  ;;  %v19447_v41 = vcvt.s32.f32 %v16528_v48  ;;  %v19448_v46 = vcvt.s32.f32 %v16549_v4 }
 0x432   :  { %v6948_v60 = vshll.u32 %v16446_v2, %v16575_v13  ;;  %v5200_v53 = vsub.s32 4294967266, %v16653_v42  ;;  %v12074_v10 = vadd.s32 4294967294, %v7046_v44  ;;  %v5333_v15 = vand.u32 2139095040, %v16648_v35 }
 0x433   :  { %v6855_v61 = vmul.f32 %v19447_v41, %v19446_v25  ;;  %v5104_v21 = vmul.f32 %v19448_v46, %v5101_v24  ;;  %v16687_v29 = vmul.u32.u64.low %v16675_v56, %v7124_v27  ;;  %v16688_v20 = vmul.u32.u64.high %v16675_v56, %v7124_v27, %v16687_v29 }
 0x434   :  { %vm19175_vm14 = vcmp.lt.s32.totalorder %v15967_v1, 0  ;;  %vm19220_vm0 = vcmp.lt.s32.totalorder %v16112_v51, 0  ;;  %v16694_v48 = vshrl.u32 %v5288_v43, 30  ;;  %v16701_v2 = vadd.f32 %v15304_v59, %v4558_v58  ;;  %v4518_v51 = vpop.f32.mrf.mxu1 }
 0x435   :  { %v16697_v38 = vmul.u32.u64.low %v16675_v56, %v7128_v52  ;;  %v16698_v4 = vmul.u32.u64.high %v16675_v56, %v7128_v52, %v16697_v38  ;;  %v6950_v13 = vor.u32 %v6949_v5, %v6948_v60  ;;  %v6954_v24 = vor.u32 4788187, %v6953_v34 }
 0x436   :  { %19449 = vst [vmem:[#allocation44_spill] sm:$0xff] %v16694_v48  ;;  %19450 = vst [vmem:[#allocation20_spill] sm:$0xff] %v16701_v2  ;;  %v7118_v44 = vsel %vm7116_vm11, %v7106_v12, 2102212464  ;;  %v5334_v28 = vshrl.u32 %v5333_v15, 23  ;;  %v19451_v31 = vxor.u32 2147483648, %v16526_v32  ;;  %v7097_v58 = vshrl.u32 %v19273_v50, %v16612_v45  ;;  %v4474_v38 = vpop.f32.mrf.mxu0 }
 0x437   :  { %v5196_v7 = vsub.s32 32, %v16653_v42  ;;  %v5201_v23 = vadd.s32 127, %v5200_v53  ;;  %v6856_v27 = vxor.u32 2147483648, %v6855_v61  ;;  %v5180_v5 = vadd.s32 %v16413_v37, %v16421_v30 }
 0x438   :  { %v16710_v43 = vsel %vm4920_vm4, %v19451_v31, %v16526_v32  ;;  %vm12075_vm1 = vcmp.lt.s32.totalorder %v12074_v10, 0  ;;  %v12008_v12 = vadd.s32 4294967169, %v5334_v28  ;;  %v5290_v34 = vshll.u32 %v16694_v48, 30 }
 0x439   :  { %19452 = vst [vmem:[#allocation67_spill] sm:$0xff] %v16710_v43  ;;  %v7117_v52 = vsel %vm7113_vm7, %v7097_v58, %v7100_v14  ;;  %v7119_v32 = vsel %vm7115_vm8, %v7103_v3, %v7118_v44  ;;  %v7187_v25 = vand.u32 2139095040, %v16701_v2  ;;  %v5105_v41 = vxor.u32 2147483648, %v5104_v21  ;;  %v19455_v44 = vld [vmem:[#allocation45_spill] sm:$0xff] }
 0x43a   :  { %v6955_v46 = vand.u32 2147483647, %v6954_v24  ;;  %v6957_v60 = vcvt.s32.f32 %v6950_v13  ;;  %v5340_v45 = vadd.s32 1, %v12008_v12  ;;  %v5197_v53 = vshll.u32 %v16519_v6, %v16653_v42 }
 0x43b   :  { %v5198_v37 = vshrl.u32 %v5180_v5, %v5196_v7  ;;  %v5202_v30 = vshll.u32 %v5201_v23, 23  ;;  %v19135_v15 = vand.u32 2147483647, %v16648_v35  ;;  %v16727_v28 = vsel %vm12075_vm1, 0, %v12074_v10 }
 0x43c   :  { %v7120_v3 = vsel %vm7114_vm13, %v7117_v52, %v7119_v32  ;;  %v7139_v14 = vadd.s32 1, %v16688_v20  ;;  %vm5341_vm3 = vcmp.gt.s32.totalorder %v5340_v45, 0  ;;  %v16733_v13 = vsub.s32 %v16645_v33, %v5290_v34 }
 0x43d   :  { %vm7138_vm5 = vc.u32 %v16698_v4, %v16687_v29  ;;  %v5342_v6 = vsel %vm5341_vm3, %v5340_v45, 0  ;;  %v7188_v42 = vshrl.u32 %v7187_v25, 23  ;;  %v16739_v24 = vsel %vm19175_vm14, %v6856_v27, %v6855_v61 }
 0x43e   :  { %19453 = vst [vmem:[#allocation68_spill] sm:$0xff] %v16739_v24  ;;  %v16743_v10 = vsel %vm19220_vm0, %v5105_v41, %v5104_v21  ;;  %v5344_v11 = vand.u32 31, %v5342_v6  ;;  %v4541_v31 = vadd.f32 %v4474_v38, %v19455_v44  ;;  %v16746_v7 = vmul.f32 %v6957_v60, %v6955_v46 }
 0x43f   :  { %19454 = vst [vmem:[#allocation69_spill] sm:$0xff] %v16743_v10  ;;  %v16748_v33 = vor.u32 %v5198_v37, %v5197_v53  ;;  %v16750_v23 = vor.u32 4788187, %v5202_v30  ;;  %v7136_v5 = vmul.u32 %v16675_v56, %v7120_v3  ;;  %v7140_v61 = vsel %vm7138_vm5, %v7139_v14, %v16688_v20 }
 0x440   :  { %v5337_v27 = vand.u32 8388607, %v19135_v15  ;;  %v5345_v21 = vsub.s32 32, %v5344_v11  ;;  %v5293_v12 = vsub.s32 0, %v16733_v13  ;;  %v5347_v34 = vshll.u32 %v19273_v50, %v5344_v11 }
 0x441   :  { %v5350_v52 = vshll.u32 %v19274_v63, %v5344_v11  ;;  %v12080_v32 = vadd.s32 4294967169, %v7188_v42  ;;  %v5353_v46 = vshll.u32 %v19266_v39, %v5344_v11  ;;  %v16764_v20 = vadd.s32 %v7140_v61, %v7136_v5 }
 0x442   :  { %v5348_v25 = vshrl.u32 %v19274_v63, %v5345_v21  ;;  %v5351_v41 = vshrl.u32 %v19266_v39, %v5345_v21  ;;  %v5354_v56 = vshrl.u32 %v19267_v26, %v5345_v21  ;;  %v5343_v60 = vshrl.u32 %v5342_v6, 5 }
 0x443   :  { %v5356_v45 = vshll.u32 %v19267_v26, %v5344_v11  ;;  %v5357_v53 = vshrl.u32 %v19288_v9, %v5345_v21  ;;  %v7054_v37 = vsub.s32 4294967266, %v16727_v28  ;;  %v5338_v14 = vor.u32 8388608, %v5337_v27 }
 0x444   :  { %v5349_v30 = vor.u32 %v5348_v25, %v5347_v34  ;;  %v5352_v38 = vor.u32 %v5351_v41, %v5350_v52  ;;  %v5355_v3 = vor.u32 %v5354_v56, %v5353_v46  ;;  %v7194_v15 = vadd.s32 1, %v12080_v32 }
 0x445   :  { %v5358_v42 = vor.u32 %v5357_v53, %v5356_v45  ;;  %v12005_v58 = vmin.u32 %v5293_v12, %v16733_v13  ;;  %v5359_v5 = vshll.u32 %v19288_v9, %v5344_v11  ;;  %v5360_v6 = vshrl.u32 %v19275_v47, %v5345_v21 }
 0x446   :  { %v16774_v61 = vadd.f32 %v19382_v54, %v4541_v31  ;;  %v7142_v24 = vadd.s32 536870912, %v16764_v20  ;;  %vm5362_vm7 = vcmp.lt.s32.totalorder %v5343_v60, 1  ;;  %vm5364_vm11 = vcmp.lt.s32.totalorder %v5343_v60, 3 }
 0x447   :  { %vm5365_vm8 = vcmp.lt.s32.totalorder %v5343_v60, 4  ;;  %v5361_v34 = vor.u32 %v5360_v6, %v5359_v5  ;;  %v5370_v52 = vsel %vm5362_vm7, %v5349_v30, %v5352_v38  ;;  %v5346_v32 = vshrl.u32 %v19273_v50, %v5345_v21 }
 0x448   :  { %19456 = vst [vmem:[#allocation45_spill] sm:$0xff] %v16774_v61  ;;  %v5367_v27 = vsel %vm5365_vm8, %v5355_v3, 2102212464  ;;  %v5371_v25 = vsel %vm5365_vm8, %v5358_v42, 920167782  ;;  %vm5363_vm13 = vcmp.lt.s32.totalorder %v5343_v60, 2  ;;  %v5374_v31 = vsel %vm5362_vm7, %v5352_v38, %v5355_v3 }
 0x449   :  { %v5372_v11 = vsel %vm5364_vm11, %v5355_v3, %v5371_v25  ;;  %vm7195_vm1 = vcmp.gt.s32.totalorder %v7194_v15, 0  ;;  %v5375_v41 = vsel %vm5365_vm8, %v5361_v34, 1326507024  ;;  %v5378_v46 = vshll.u32 %v5338_v14, 8 }
 0x44a   :  { %v5373_v12 = vsel %vm5363_vm13, %v5370_v52, %v5372_v11  ;;  %v16782_v56 = vshrl.u32 %v7142_v24, 30  ;;  %v5366_v45 = vsel %vm5362_vm7, %v5346_v32, %v5349_v30  ;;  %v5368_v53 = vsel %vm5364_vm11, %v5352_v38, %v5367_v27 }
 0x44b   :  { %v5376_v5 = vsel %vm5364_vm11, %v5358_v42, %v5375_v41  ;;  %v16788_v6 = vmul.u32.u64.low %v5378_v46, %v5373_v12  ;;  %v16789_v44 = vmul.u32.u64.high %v5378_v46, %v5373_v12, %v16788_v6  ;;  %v7196_v25 = vsel %vm7195_vm1, %v7194_v15, 0 }
 0x44c   :  { %19457 = vst [vmem:[#allocation70_spill] sm:$0xff] %v16782_v56  ;;  %v5377_v21 = vsel %vm5363_vm13, %v5374_v31, %v5376_v5  ;;  %v5295_v52 = vclz %v12005_v58  ;;  %v19458_v24 = vand.u32 2147483647, %v16701_v2  ;;  %v7034_v38 = vadd.s32 %v16495_v55, %v16508_v40 }
 0x44d   :  { %v16792_v11 = vmul.u32.u64.low %v5378_v46, %v5377_v21  ;;  %v16793_v3 = vmul.u32.u64.high %v5378_v46, %v5377_v21, %v16792_v11  ;;  %v5369_v42 = vsel %vm5363_vm13, %v5366_v45, %v5368_v53  ;;  %v7198_v34 = vand.u32 31, %v7196_v25 }
 0x44e   :  { %v7191_v14 = vand.u32 8388607, %v19458_v24  ;;  %v7144_v58 = vshll.u32 %v16782_v56, 30  ;;  %v5436_v32 = vand.u32 2139095040, %v16774_v61  ;;  %v19459_v12 = vsub.s32 32, %v16727_v28 }
 0x44f   :  { %v16810_v41 = vadd.s32 127, %v7054_v37  ;;  %v5388_v55 = vadd.s32 1, %v16789_v44  ;;  %v7199_v40 = vsub.s32 32, %v7198_v34  ;;  %v12006_v60 = vadd.s32 4294967294, %v5295_v52 }
 0x450   :  { %v16808_v31 = vshrl.u32 %v7034_v38, %v19459_v12  ;;  %v5385_v45 = vmul.u32 %v5378_v46, %v5369_v42  ;;  %vm5387_vm3 = vc.u32 %v16793_v3, %v16788_v6  ;;  %v7192_v53 = vor.u32 8388608, %v7191_v14 }
 0x451   :  { %v5389_v5 = vsel %vm5387_vm3, %v5388_v55, %v16789_v44  ;;  %v7201_v21 = vshll.u32 %v19273_v50, %v7198_v34  ;;  %v7202_v11 = vshrl.u32 %v19274_v63, %v7199_v40  ;;  %v7205_v24 = vshrl.u32 %v19266_v39, %v7199_v40 }
 0x452   :  { %v16820_v37 = vsub.s32 %v16764_v20, %v7144_v58  ;;  %v5390_v38 = vadd.s32 %v5389_v5, %v5385_v45  ;;  %v7204_v12 = vshll.u32 %v19274_v63, %v7198_v34  ;;  %v5437_v52 = vshrl.u32 %v5436_v32, 23 }
 0x453   :  { %v7197_v46 = vshrl.u32 %v7196_v25, 5  ;;  %v7203_v42 = vor.u32 %v7202_v11, %v7201_v21  ;;  %v7207_v15 = vshll.u32 %v19266_v39, %v7198_v34  ;;  %v7208_v14 = vshrl.u32 %v19267_v26, %v7199_v40 }
 0x454   :  { %v5391_v44 = vadd.s32 536870912, %v5390_v38  ;;  %v7206_v55 = vor.u32 %v7205_v24, %v7204_v12  ;;  %v7210_v30 = vshll.u32 %v19267_v26, %v7198_v34  ;;  %v7211_v27 = vshrl.u32 %v19288_v9, %v7199_v40 }
 0x455   :  { %vm12007_vm5 = vcmp.lt.s32.totalorder %v12006_v60, 0  ;;  %v7209_v56 = vor.u32 %v7208_v14, %v7207_v15  ;;  %v7213_v20 = vshll.u32 %v19288_v9, %v7198_v34  ;;  %v7214_v58 = vshrl.u32 %v19275_v47, %v7199_v40 }
 0x456   :  { %v16829_v45 = vshrl.u32 %v5391_v44, 30  ;;  %v7212_v25 = vor.u32 %v7211_v27, %v7210_v30  ;;  %v7232_v32 = vshll.u32 %v7192_v53, 8  ;;  %v7147_v21 = vsub.s32 0, %v16820_v37 }
 0x457   :  { %v7215_v11 = vor.u32 %v7214_v58, %v7213_v20  ;;  %vm7216_vm7 = vcmp.lt.s32.totalorder %v7197_v46, 1  ;;  %v12012_v24 = vadd.s32 4294967169, %v5437_v52  ;;  %v16833_v12 = vsel %vm12007_vm5, 0, %v12006_v60 }
 0x458   :  { %19460 = vst [vmem:[#allocation71_spill] sm:$0xff] %v16829_v45  ;;  %vm7218_vm11 = vcmp.lt.s32.totalorder %v7197_v46, 3  ;;  %vm7219_vm8 = vcmp.lt.s32.totalorder %v7197_v46, 4  ;;  %v7224_v15 = vsel %vm7216_vm7, %v7203_v42, %v7206_v55  ;;  %v7228_v44 = vsel %vm7216_vm7, %v7206_v55, %v7209_v56 }
 0x459   :  { %v7221_v34 = vsel %vm7219_vm8, %v7209_v56, 2102212464  ;;  %v7225_v14 = vsel %vm7219_vm8, %v7212_v25, 920167782  ;;  %v7229_v1 = vsel %vm7219_vm8, %v7215_v11, 1326507024  ;;  %v7200_v27 = vshrl.u32 %v19273_v50, %v7199_v40 }
 0x45a   :  { %v5393_v30 = vshll.u32 %v16829_v45, 30  ;;  %vm7217_vm13 = vcmp.lt.s32.totalorder %v7197_v46, 2  ;;  %v7226_v53 = vsel %vm7218_vm11, %v7209_v56, %v7225_v14  ;;  %v12077_v52 = vmin.u32 %v7147_v21, %v16820_v37 }
 0x45b   :  { %v7227_v60 = vsel %vm7217_vm13, %v7224_v15, %v7226_v53  ;;  %v7230_v20 = vsel %vm7218_vm11, %v7212_v25, %v7229_v1  ;;  %v5443_v58 = vadd.s32 1, %v12012_v24  ;;  %v5299_v5 = vsub.s32 32, %v16833_v12  ;;  %v19461_v15 = vld [vmem:[#allocation23_spill] sm:$0xff] }
 0x45c   :  { %v7220_v48 = vsel %vm7216_vm7, %v7200_v27, %v7203_v42  ;;  %v7222_v11 = vsel %vm7218_vm11, %v7206_v55, %v7221_v34  ;;  %v7231_v10 = vsel %vm7217_vm13, %v7228_v44, %v7230_v20  ;;  %v5283_v1 = vadd.s32 %v16597_v16, %v16609_v19 }
 0x45d   :  { %v16847_v40 = vmul.u32.u64.low %v7232_v32, %v7231_v10  ;;  %v16848_v45 = vmul.u32.u64.high %v7232_v32, %v7231_v10, %v16847_v40  ;;  %v16850_v56 = vmul.u32.u64.low %v7232_v32, %v7227_v60  ;;  %v16851_v14 = vmul.u32.u64.high %v7232_v32, %v7227_v60, %v16850_v56 }
 0x45e   :  { %v5303_v25 = vsub.s32 4294967266, %v16833_v12  ;;  %v16857_v21 = vsub.s32 %v5390_v38, %v5393_v30  ;;  %vm5444_vm1 = vcmp.gt.s32.totalorder %v5443_v58, 0  ;;  %v7149_v42 = vclz %v12077_v52 }
 0x45f   :  { %v7223_v55 = vsel %vm7217_vm13, %v7220_v48, %v7222_v11  ;;  %v5445_v24 = vsel %vm5444_vm1, %v5443_v58, 0  ;;  %v4559_v34 = vadd.f32 %v4518_v51, %v19461_v15  ;;  %v19462_v10 = vand.u32 2147483647, %v16750_v23 }
 0x460   :  { %v19463_v44 = vcvt.s32.f32 %v16748_v33  ;;  %v19464_v16 = vshll.u32 %v16579_v18, %v16727_v28  ;;  %v7056_v38 = vshll.u32 %v16810_v41, 23  ;;  %v5447_v30 = vand.u32 31, %v5445_v24 }
 0x461   :  { %v5301_v46 = vshrl.u32 %v5283_v1, %v5299_v5  ;;  %vm7241_vm3 = vc.u32 %v16848_v45, %v16850_v56  ;;  %v7242_v51 = vadd.s32 1, %v16851_v14  ;;  %v19465_v48 = vand.u32 2147483647, %v16774_v61 }
 0x462   :  { %v16865_v27 = vmul.f32 %v19463_v44, %v19462_v10  ;;  %v16871_v19 = vor.u32 %v16808_v31, %v19464_v16  ;;  %v5304_v23 = vadd.s32 127, %v5303_v25  ;;  %v5396_v53 = vsub.s32 0, %v16857_v21 }
 0x463   :  { %v5440_v33 = vand.u32 8388607, %v19465_v48  ;;  %v7239_v52 = vmul.u32 %v7232_v32, %v7223_v55  ;;  %v5448_v18 = vsub.s32 32, %v5447_v30  ;;  %v12078_v28 = vadd.s32 4294967294, %v7149_v42 }
 0x464   :  { %v7243_v31 = vsel %vm7241_vm3, %v7242_v51, %v16851_v14  ;;  %v5450_v41 = vshll.u32 %v19273_v50, %v5447_v30  ;;  %v16883_v5 = vadd.f32 %v19382_v54, %v4559_v34  ;;  %v5453_v58 = vshll.u32 %v19274_v63, %v5447_v30 }
 0x465   :  { %v16885_v60 = vadd.s32 %v7243_v31, %v7239_v52  ;;  %v5451_v20 = vshrl.u32 %v19274_v63, %v5448_v18  ;;  %v5456_v11 = vshll.u32 %v19266_v39, %v5447_v30  ;;  %v5454_v40 = vshrl.u32 %v19266_v39, %v5448_v18 }
 0x466   :  { %19466 = vst [vmem:[#allocation23_spill] sm:$0xff] %v16883_v5  ;;  %v5457_v32 = vshrl.u32 %v19267_v26, %v5448_v18  ;;  %v5459_v1 = vshll.u32 %v19267_v26, %v5447_v30  ;;  %v5460_v14 = vshrl.u32 %v19288_v9, %v5448_v18  ;;  %v5300_v25 = vshll.u32 %v16733_v13, %v16833_v12 }
 0x467   :  { %v12009_v42 = vmin.u32 %v5396_v53, %v16857_v21  ;;  %v5441_v55 = vor.u32 8388608, %v5440_v33  ;;  %v5446_v15 = vshrl.u32 %v5445_v24, 5  ;;  %v5452_v34 = vor.u32 %v5451_v20, %v5450_v41 }
 0x468   :  { %v5455_v10 = vor.u32 %v5454_v40, %v5453_v58  ;;  %v5458_v44 = vor.u32 %v5457_v32, %v5456_v11  ;;  %v5461_v16 = vor.u32 %v5460_v14, %v5459_v1  ;;  %v7245_v51 = vadd.s32 536870912, %v16885_v60 }
 0x469   :  { %v5462_v48 = vshll.u32 %v19288_v9, %v5447_v30  ;;  %v5463_v52 = vshrl.u32 %v19275_v47, %v5448_v18  ;;  %v7290_v31 = vand.u32 2139095040, %v16883_v5  ;;  %v7057_v8 = vor.u32 4788187, %v7056_v38 }
 0x46a   :  { %v16901_v43 = vor.u32 %v5301_v46, %v5300_v25  ;;  %v5305_v13 = vshll.u32 %v5304_v23, 23  ;;  %vm12079_vm5 = vcmp.lt.s32.totalorder %v12078_v28, 0  ;;  %vm5465_vm7 = vcmp.lt.s32.totalorder %v5446_v15, 1 }
 0x46b   :  { %v5464_v12 = vor.u32 %v5463_v52, %v5462_v48  ;;  %vm5468_vm11 = vcmp.lt.s32.totalorder %v5446_v15, 4  ;;  %v5481_v24 = vshll.u32 %v5441_v55, 8  ;;  %v5398_v33 = vclz %v12009_v42 }
 0x46c   :  { %v5470_v53 = vsel %vm5468_vm11, %v5458_v44, 2102212464  ;;  %v5473_v41 = vsel %vm5465_vm7, %v5452_v34, %v5455_v10  ;;  %v5474_v20 = vsel %vm5468_vm11, %v5461_v16, 920167782  ;;  %v16904_v58 = vshrl.u32 %v7245_v51, 30 }
 0x46d   :  { %v5449_v30 = vshrl.u32 %v19273_v50, %v5448_v18  ;;  %vm5467_vm8 = vcmp.lt.s32.totalorder %v5446_v15, 3  ;;  %v7291_v11 = vshrl.u32 %v7290_v31, 23  ;;  %vm5466_vm13 = vcmp.lt.s32.totalorder %v5446_v15, 2  ;;  %v19468_v15 = vld [vmem:[#allocation46_spill] sm:$0xff] }
 0x46e   :  { %19467 = vst [vmem:[#allocation72_spill] sm:$0xff] %v16904_v58  ;;  %v5475_v38 = vsel %vm5467_vm8, %v5458_v44, %v5474_v20  ;;  %v5477_v46 = vsel %vm5465_vm7, %v5455_v10, %v5458_v44  ;;  %v5478_v23 = vsel %vm5468_vm11, %v5464_v12, 1326507024  ;;  %vm19154_vm1 = vcmp.lt.s32.totalorder %v16191_v57, 0 }
 0x46f   :  { %vm5126_vm3 = vcmp.lt.s32.totalorder %v16300_v0, 0  ;;  %v5469_v40 = vsel %vm5465_vm7, %v5449_v30, %v5452_v34  ;;  %v5471_v32 = vsel %vm5467_vm8, %v5455_v10, %v5470_v53  ;;  %v5476_v1 = vsel %vm5466_vm13, %v5473_v41, %v5475_v38 }
 0x470   :  { %v5479_v14 = vsel %vm5467_vm8, %v5461_v16, %v5478_v23  ;;  %v5306_v25 = vor.u32 4788187, %v5305_v13  ;;  %v16913_v42 = vmul.u32.u64.low %v5481_v24, %v5476_v1  ;;  %v16914_v55 = vmul.u32.u64.high %v5481_v24, %v5476_v1, %v16913_v42  ;;  %v4476_v13 = vpop.f32.mrf.mxu0 }
 0x471   :  { %v5480_v18 = vsel %vm5466_vm13, %v5477_v46, %v5479_v14  ;;  %v6959_v44 = vxor.u32 2147483648, %v16746_v7  ;;  %v5208_v51 = vxor.u32 2147483648, %v16865_v27  ;;  %v7060_v34 = vcvt.s32.f32 %v16871_v19 }
 0x472   :  { %v16919_v48 = vmul.u32.u64.low %v5481_v24, %v5480_v18  ;;  %v16920_v52 = vmul.u32.u64.high %v5481_v24, %v5480_v18, %v16919_v48  ;;  %v16924_v10 = vsel %vm12079_vm5, 0, %v12078_v28  ;;  %v5472_v16 = vsel %vm5466_vm13, %v5469_v40, %v5471_v32 }
 0x473   :  { %v12084_v31 = vadd.s32 4294967169, %v7291_v11  ;;  %v7058_v12 = vand.u32 2147483647, %v7057_v8  ;;  %v7137_v53 = vadd.s32 %v16687_v29, %v16698_v4  ;;  %v12010_v41 = vadd.s32 4294967294, %v5398_v33 }
 0x474   :  { %v7247_v20 = vshll.u32 %v16904_v58, 30  ;;  %v5307_v30 = vand.u32 2147483647, %v5306_v25  ;;  %v5309_v38 = vcvt.s32.f32 %v16901_v43  ;;  %v5491_v46 = vadd.s32 1, %v16914_v55 }
 0x475   :  { %v7297_v19 = vadd.s32 1, %v12084_v31  ;;  %v7153_v28 = vsub.s32 32, %v16924_v10  ;;  %v5488_v23 = vmul.u32 %v5481_v24, %v5472_v16  ;;  %vm5490_vm5 = vc.u32 %v16920_v52, %v16913_v42 }
 0x476   :  { %v4542_v8 = vadd.f32 %v4476_v13, %v19468_v15  ;;  %v7157_v11 = vsub.s32 4294967266, %v16924_v10  ;;  %v5492_v29 = vsel %vm5490_vm5, %v5491_v46, %v16914_v55  ;;  %v19147_v4 = vand.u32 2147483647, %v16883_v5 }
 0x477   :  { %vm7298_vm7 = vcmp.gt.s32.totalorder %v7297_v19, 0  ;;  %vm12011_vm11 = vcmp.lt.s32.totalorder %v12010_v41, 0  ;;  %v16940_v43 = vsub.s32 %v16885_v60, %v7247_v20  ;;  %v5493_v33 = vadd.s32 %v5492_v29, %v5488_v23  ;;  %v4520_v20 = vpop.f32.mrf.mxu1 }
 0x478   :  { %v7299_v40 = vsel %vm7298_vm7, %v7297_v19, 0  ;;  %v16945_v24 = vsel %vm19154_vm1, %v6959_v44, %v16746_v7  ;;  %v16950_v32 = vsel %vm5126_vm3, %v5208_v51, %v16865_v27  ;;  %v16952_v1 = vmul.f32 %v7060_v34, %v7058_v12 }
 0x479   :  { %19469 = vst [vmem:[#allocation46_spill] sm:$0xff] %v16945_v24  ;;  %19470 = vst [vmem:[#allocation73_spill] sm:$0xff] %v16950_v32  ;;  %v7301_v14 = vand.u32 31, %v7299_v40  ;;  %v16954_v25 = vmul.f32 %v5309_v38, %v5307_v30  ;;  %v16956_v18 = vshrl.u32 %v7137_v53, %v7153_v28  ;;  %v5494_v60 = vadd.s32 536870912, %v5493_v33 }
 0x47a   :  { %v16959_v55 = vadd.f32 %v15304_v59, %v4542_v8  ;;  %v16961_v48 = vadd.s32 127, %v7157_v11  ;;  %v16963_v7 = vsel %vm12011_vm11, 0, %v12010_v41  ;;  %v7294_v44 = vand.u32 8388607, %v19147_v4  ;;  %v19472_v4 = vld [vmem:[#allocation24_spill] sm:$0xff] }
 0x47b   :  { %v7302_v27 = vsub.s32 32, %v7301_v14  ;;  %v7250_v51 = vsub.s32 0, %v16940_v43  ;;  %v7304_v34 = vshll.u32 %v19273_v50, %v7301_v14  ;;  %v7307_v16 = vshll.u32 %v19274_v63, %v7301_v14 }
 0x47c   :  { %v7310_v31 = vshll.u32 %v19266_v39, %v7301_v14  ;;  %v16971_v13 = vshrl.u32 %v5494_v60, 30  ;;  %v7300_v30 = vshrl.u32 %v7299_v40, 5  ;;  %v7313_v38 = vshll.u32 %v19267_v26, %v7301_v14 }
 0x47d   :  { %v7305_v12 = vshrl.u32 %v19274_v63, %v7302_v27  ;;  %v7308_v53 = vshrl.u32 %v19266_v39, %v7302_v27  ;;  %v7311_v41 = vshrl.u32 %v19267_v26, %v7302_v27  ;;  %v7314_v46 = vshrl.u32 %v19288_v9, %v7302_v27 }
 0x47e   :  { %19471 = vst [vmem:[#allocation74_spill] sm:$0xff] %v16971_v13  ;;  %v5539_v19 = vand.u32 2139095040, %v16959_v55  ;;  %v7159_v28 = vshll.u32 %v16961_v48, 23  ;;  %v5406_v11 = vsub.s32 4294967266, %v16963_v7  ;;  %v7295_v29 = vor.u32 8388608, %v7294_v44 }
 0x47f   :  { %v7306_v23 = vor.u32 %v7305_v12, %v7304_v34  ;;  %v7309_v15 = vor.u32 %v7308_v53, %v7307_v16  ;;  %v7312_v8 = vor.u32 %v7311_v41, %v7310_v31  ;;  %v7315_v60 = vor.u32 %v7314_v46, %v7313_v38 }
 0x480   :  { %v4560_v58 = vadd.f32 %v4520_v20, %v19472_v4  ;;  %v12081_v24 = vmin.u32 %v7250_v51, %v16940_v43  ;;  %v5496_v40 = vshll.u32 %v16971_v13, 30  ;;  %v7316_v57 = vshll.u32 %v19288_v9, %v7301_v14 }
 0x481   :  { %v7317_v5 = vshrl.u32 %v19275_v47, %v7302_v27  ;;  %vm7319_vm8 = vcmp.lt.s32.totalorder %v7300_v30, 1  ;;  %vm7321_vm13 = vcmp.lt.s32.totalorder %v7300_v30, 3  ;;  %vm7322_vm5 = vcmp.lt.s32.totalorder %v7300_v30, 4 }
 0x482   :  { %v5540_v48 = vshrl.u32 %v5539_v19, 23  ;;  %v7324_v16 = vsel %vm7322_vm5, %v7312_v8, 2102212464  ;;  %v7327_v31 = vsel %vm7319_vm8, %v7306_v23, %v7309_v15  ;;  %v7328_v44 = vsel %vm7322_vm5, %v7315_v60, 920167782 }
 0x483   :  { %v7318_v34 = vor.u32 %v7317_v5, %v7316_v57  ;;  %v7303_v12 = vshrl.u32 %v19273_v50, %v7302_v27  ;;  %vm7320_vm7 = vcmp.lt.s32.totalorder %v7300_v30, 2  ;;  %v7329_v4 = vsel %vm7321_vm13, %v7312_v8, %v7328_v44 }
 0x484   :  { %v7335_v51 = vshll.u32 %v7295_v29, 8  ;;  %v16989_v53 = vsub.s32 %v5493_v33, %v5496_v40  ;;  %v7330_v14 = vsel %vm7320_vm7, %v7327_v31, %v7329_v4  ;;  %v7331_v41 = vsel %vm7319_vm8, %v7309_v15, %v7312_v8 }
 0x485   :  { %v7332_v20 = vsel %vm7322_vm5, %v7318_v34, 1326507024  ;;  %vm19174_vm11 = vcmp.lt.s32.totalorder %v16369_v62, 0  ;;  %vm19219_vm1 = vcmp.lt.s32.totalorder %v16476_v17, 0  ;;  %v5402_v57 = vsub.s32 32, %v16963_v7 }
 0x486   :  { %v7323_v5 = vsel %vm7319_vm8, %v7303_v12, %v7306_v23  ;;  %v7325_v27 = vsel %vm7321_vm13, %v7309_v15, %v7324_v16  ;;  %v7333_v38 = vsel %vm7321_vm13, %v7315_v60, %v7332_v20  ;;  %v12016_v8 = vadd.s32 4294967169, %v5540_v48 }
 0x487   :  { %v7334_v33 = vsel %vm7320_vm7, %v7331_v41, %v7333_v38  ;;  %v17000_v46 = vmul.u32.u64.low %v7335_v51, %v7330_v14  ;;  %v17001_v19 = vmul.u32.u64.high %v7335_v51, %v7330_v14, %v17000_v46  ;;  %v5407_v29 = vadd.s32 127, %v5406_v11 }
 0x488   :  { %v7252_v40 = vclz %v12081_v24  ;;  %v17004_v34 = vmul.u32.u64.low %v7335_v51, %v7334_v33  ;;  %v17005_v31 = vmul.u32.u64.high %v7335_v51, %v7334_v33, %v17004_v34  ;;  %v7062_v44 = vxor.u32 2147483648, %v16952_v1 }
 0x489   :  { %v7154_v23 = vshll.u32 %v16820_v37, %v16924_v10  ;;  %v5499_v15 = vsub.s32 0, %v16989_v53  ;;  %v5546_v60 = vadd.s32 1, %v12016_v8  ;;  %v5386_v16 = vadd.s32 %v16788_v6, %v16793_v3 }
 0x48a   :  { %v7326_v12 = vsel %vm7320_vm7, %v7323_v5, %v7325_v27  ;;  %v19155_v48 = vand.u32 2147483647, %v16959_v55  ;;  %v17016_v24 = vadd.f32 %v15304_v59, %v4560_v58  ;;  %v5311_v11 = vxor.u32 2147483648, %v16954_v25 }
 0x48b   :  { %v17020_v4 = vor.u32 %v16956_v18, %v7154_v23  ;;  %v7345_v37 = vadd.s32 1, %v17001_v19  ;;  %vm5547_vm8 = vcmp.gt.s32.totalorder %v5546_v60, 0  ;;  %v17023_v10 = vor.u32 4788187, %v7159_v28 }
 0x48c   :  { %19473 = vst [vmem:[#allocation24_spill] sm:$0xff] %v17016_v24  ;;  %v5404_v14 = vshrl.u32 %v5386_v16, %v5402_v57  ;;  %v5408_v41 = vshll.u32 %v5407_v29, 23  ;;  %v12082_v6 = vadd.s32 4294967294, %v7252_v40  ;;  %v17026_v3 = vmin.u32 %v5499_v15, %v16989_v53 }
 0x48d   :  { %v7342_v30 = vmul.u32 %v7335_v51, %v7326_v12  ;;  %vm7344_vm13 = vc.u32 %v17005_v31, %v17000_v46  ;;  %v5548_v58 = vsel %vm5547_vm8, %v5546_v60, 0  ;;  %v5403_v18 = vshll.u32 %v16857_v21, %v16963_v7 }
 0x48e   :  { %v7346_v20 = vsel %vm7344_vm13, %v7345_v37, %v17001_v19  ;;  %v5543_v28 = vand.u32 8388607, %v19155_v48  ;;  %v7393_v57 = vand.u32 2139095040, %v17016_v24  ;;  %v17039_v5 = vsel %vm19174_vm11, %v7062_v44, %v16952_v1 }
 0x48f   :  { %19474 = vst [vmem:[#allocation75_spill] sm:$0xff] %v17039_v5  ;;  %v17044_v51 = vsel %vm19219_vm1, %v5311_v11, %v16954_v25  ;;  %v7347_v27 = vadd.s32 %v7346_v20, %v7342_v30  ;;  %v5550_v38 = vand.u32 31, %v5548_v58  ;;  %v7161_v21 = vand.u32 2147483647, %v17023_v10 }
 0x490   :  { %19475 = vst [vmem:[#allocation76_spill] sm:$0xff] %v17044_v51  ;;  %v7163_v7 = vcvt.s32.f32 %v17020_v4  ;;  %v5405_v33 = vor.u32 %v5404_v14, %v5403_v18  ;;  %v5409_v19 = vor.u32 4788187, %v5408_v41  ;;  %vm12083_vm5 = vcmp.lt.s32.totalorder %v12082_v6, 0 }
 0x491   :  { %v5501_v8 = vclz %v17026_v3  ;;  %v7348_v29 = vadd.s32 536870912, %v7347_v27  ;;  %v5551_v40 = vsub.s32 32, %v5550_v38  ;;  %v5544_v1 = vor.u32 8388608, %v5543_v28 }
 0x492   :  { %v5549_v34 = vshrl.u32 %v5548_v58, 5  ;;  %v5553_v44 = vshll.u32 %v19273_v50, %v5550_v38  ;;  %v7394_v23 = vshrl.u32 %v7393_v57, 23  ;;  %v5556_v15 = vshll.u32 %v19274_v63, %v5550_v38 }
 0x493   :  { %v5554_v25 = vshrl.u32 %v19274_v63, %v5551_v40  ;;  %v5557_v60 = vshrl.u32 %v19266_v39, %v5551_v40  ;;  %v5559_v16 = vshll.u32 %v19266_v39, %v5550_v38  ;;  %v17054_v12 = vshrl.u32 %v7348_v29, 30 }
 0x494   :  { %v5560_v11 = vshrl.u32 %v19267_v26, %v5551_v40  ;;  %v5562_v4 = vshll.u32 %v19267_v26, %v5550_v38  ;;  %v5563_v37 = vshrl.u32 %v19288_v9, %v5551_v40  ;;  %v5565_v41 = vshll.u32 %v19288_v9, %v5550_v38 }
 0x495   :  { %19476 = vst [vmem:[#allocation77_spill] sm:$0xff] %v17054_v12  ;;  %v5555_v10 = vor.u32 %v5554_v25, %v5553_v44  ;;  %v5558_v14 = vor.u32 %v5557_v60, %v5556_v15  ;;  %v5566_v3 = vshrl.u32 %v19275_v47, %v5551_v40  ;;  %v5584_v18 = vshll.u32 %v5544_v1, 8 }
 0x496   :  { %v5561_v30 = vor.u32 %v5560_v11, %v5559_v16  ;;  %v5564_v58 = vor.u32 %v5563_v37, %v5562_v4  ;;  %v12088_v20 = vadd.s32 4294967169, %v7394_v23  ;;  %v5552_v28 = vshrl.u32 %v19273_v50, %v5551_v40  ;;  %v4478_v37 = vpop.f32.mrf.mxu0 }
 0x497   :  { %v5567_v57 = vor.u32 %v5566_v3, %v5565_v41  ;;  %vm5568_vm7 = vcmp.lt.s32.totalorder %v5549_v34, 1  ;;  %vm5571_vm8 = vcmp.lt.s32.totalorder %v5549_v34, 4  ;;  %vm5570_vm13 = vcmp.lt.s32.totalorder %v5549_v34, 3 }
 0x498   :  { %v5573_v29 = vsel %vm5571_vm8, %v5561_v30, 2102212464  ;;  %v5576_v48 = vsel %vm5568_vm7, %v5555_v10, %v5558_v14  ;;  %v5577_v5 = vsel %vm5571_vm8, %v5564_v58, 920167782  ;;  %v7350_v44 = vshll.u32 %v17054_v12, 30 }
 0x499   :  { %vm5569_vm2 = vcmp.lt.s32.totalorder %v5549_v34, 2  ;;  %v5578_v25 = vsel %vm5570_vm13, %v5561_v30, %v5577_v5  ;;  %v5580_v38 = vsel %vm5568_vm7, %v5558_v14, %v5561_v30  ;;  %v5410_v15 = vand.u32 2147483647, %v5409_v19 }
 0x49a   :  { %v5572_v60 = vsel %vm5568_vm7, %v5552_v28, %v5555_v10  ;;  %v5579_v16 = vsel %vm5569_vm2, %v5576_v48, %v5578_v25  ;;  %v5581_v1 = vsel %vm5571_vm8, %v5567_v57, 1326507024  ;;  %v5574_v23 = vsel %vm5570_vm13, %v5558_v14, %v5573_v29  ;;  %v19477_v28 = vld [vmem:[#allocation47_spill] sm:$0xff] }
 0x49b   :  { %v5582_v11 = vsel %vm5570_vm13, %v5564_v58, %v5581_v1  ;;  %v17064_v40 = vmul.u32.u64.low %v5584_v18, %v5579_v16  ;;  %v17065_v4 = vmul.u32.u64.high %v5584_v18, %v5579_v16, %v17064_v40  ;;  %v5412_v41 = vcvt.s32.f32 %v5405_v33 }
 0x49c   :  { %v17069_v3 = vsel %vm12083_vm5, 0, %v12082_v6  ;;  %v5583_v12 = vsel %vm5569_vm2, %v5580_v38, %v5582_v11  ;;  %v7400_v5 = vadd.s32 1, %v12088_v20  ;;  %v12014_v30 = vadd.s32 4294967294, %v5501_v8 }
 0x49d   :  { %v17072_v19 = vsub.s32 %v7347_v27, %v7350_v44  ;;  %v17074_v10 = vmul.u32.u64.low %v5584_v18, %v5583_v12  ;;  %v17075_v48 = vmul.u32.u64.high %v5584_v18, %v5583_v12, %v17074_v10  ;;  %v17077_v14 = vmul.f32 %v7163_v7, %v7161_v21 }
 0x49e   :  { %v5575_v58 = vsel %vm5569_vm2, %v5572_v60, %v5574_v23  ;;  %vm7401_vm7 = vcmp.gt.s32.totalorder %v7400_v5, 0  ;;  %v4543_v57 = vadd.f32 %v4478_v37, %v19477_v28  ;;  %v17081_v33 = vmul.f32 %v5412_v41, %v5410_v15 }
 0x49f   :  { %v7256_v6 = vsub.s32 32, %v17069_v3  ;;  %v5594_v29 = vadd.s32 1, %v17065_v4  ;;  %v7402_v20 = vsel %vm7401_vm7, %v7400_v5, 0  ;;  %v7240_v27 = vadd.s32 %v16850_v56, %v16848_v45 }
 0x4a0   :  { %v7260_v8 = vsub.s32 4294967266, %v17069_v3  ;;  %v19159_v21 = vand.u32 2147483647, %v17016_v24  ;;  %v7404_v7 = vand.u32 31, %v7402_v20  ;;  %vm12015_vm5 = vcmp.lt.s32.totalorder %v12014_v30, 0 }
 0x4a1   :  { %v7353_v34 = vsub.s32 0, %v17072_v19  ;;  %v5591_v12 = vmul.u32 %v5584_v18, %v5575_v58  ;;  %vm5593_vm2 = vc.u32 %v17075_v48, %v17064_v40  ;;  %v17095_v15 = vadd.f32 %v19382_v54, %v4543_v57 }
 0x4a2   :  { %v5595_v25 = vsel %vm5593_vm2, %v5594_v29, %v17065_v4  ;;  %v7405_v38 = vsub.s32 32, %v7404_v7  ;;  %v7257_v56 = vshll.u32 %v16940_v43, %v17069_v3  ;;  %v7258_v60 = vshrl.u32 %v7240_v27, %v7256_v6 }
 0x4a3   :  { %v5596_v16 = vadd.s32 %v5595_v25, %v5591_v12  ;;  %v7261_v1 = vadd.s32 127, %v7260_v8  ;;  %v17100_v18 = vsel %vm12015_vm5, 0, %v12014_v30  ;;  %v12085_v4 = vmin.u32 %v7353_v34, %v17072_v19 }
 0x4a4   :  { %v7408_v23 = vshrl.u32 %v19274_v63, %v7405_v38  ;;  %v7411_v11 = vshrl.u32 %v19266_v39, %v7405_v38  ;;  %v7397_v41 = vand.u32 8388607, %v19159_v21  ;;  %v7407_v5 = vshll.u32 %v19273_v50, %v7404_v7 }
 0x4a5   :  { %v5597_v37 = vadd.s32 536870912, %v5596_v16  ;;  %v7410_v10 = vshll.u32 %v19274_v63, %v7404_v7  ;;  %v7413_v43 = vshll.u32 %v19266_v39, %v7404_v7  ;;  %v7414_v3 = vshrl.u32 %v19267_v26, %v7405_v38 }
 0x4a6   :  { %v5642_v30 = vand.u32 2139095040, %v17095_v15  ;;  %v7403_v58 = vshrl.u32 %v7402_v20, 5  ;;  %v7409_v28 = vor.u32 %v7408_v23, %v7407_v5  ;;  %v7416_v57 = vshll.u32 %v19267_v26, %v7404_v7 }
 0x4a7   :  { %v7417_v6 = vshrl.u32 %v19288_v9, %v7405_v38  ;;  %v7412_v29 = vor.u32 %v7411_v11, %v7410_v10  ;;  %v7415_v27 = vor.u32 %v7414_v3, %v7413_v43  ;;  %v7419_v8 = vshll.u32 %v19288_v9, %v7404_v7 }
 0x4a8   :  { %v7420_v34 = vshrl.u32 %v19275_v47, %v7405_v38  ;;  %v7262_v12 = vshll.u32 %v7261_v1, 23  ;;  %v5505_v25 = vsub.s32 32, %v17100_v18  ;;  %v17117_v21 = vshrl.u32 %v5597_v37, 30 }
 0x4a9   :  { %v7418_v45 = vor.u32 %v7417_v6, %v7416_v57  ;;  %v5509_v44 = vsub.s32 4294967266, %v17100_v18  ;;  %v7398_v20 = vor.u32 8388608, %v7397_v41  ;;  %v5643_v5 = vshrl.u32 %v5642_v30, 23 }
 0x4aa   :  { %19478 = vst [vmem:[#allocation47_spill] sm:$0xff] %v17117_v21  ;;  %v7421_v23 = vor.u32 %v7420_v34, %v7419_v8  ;;  %v7355_v62 = vclz %v12085_v4  ;;  %v7406_v24 = vshrl.u32 %v19273_v50, %v7405_v38  ;;  %vm7422_vm8 = vcmp.lt.s32.totalorder %v7403_v58, 1  ;;  %v4524_v34 = vpop.f32.mrf.mxu1 }
 0x4ab   :  { %vm7425_vm13 = vcmp.lt.s32.totalorder %v7403_v58, 4  ;;  %vm7424_vm7 = vcmp.lt.s32.totalorder %v7403_v58, 3  ;;  %v7430_v11 = vsel %vm7422_vm8, %v7409_v28, %v7412_v29  ;;  %v5599_v1 = vshll.u32 %v17117_v21, 30 }
 0x4ac   :  { %v7427_v7 = vsel %vm7425_vm13, %v7415_v27, 2102212464  ;;  %v7431_v10 = vsel %vm7425_vm13, %v7418_v45, 920167782  ;;  %vm7423_vm5 = vcmp.lt.s32.totalorder %v7403_v58, 2  ;;  %v7434_v43 = vsel %vm7422_vm8, %v7412_v29, %v7415_v27 }
 0x4ad   :  { %v7432_v37 = vsel %vm7424_vm7, %v7415_v27, %v7431_v10  ;;  %v7435_v57 = vsel %vm7425_vm13, %v7421_v23, 1326507024  ;;  %v7438_v41 = vshll.u32 %v7398_v20, 8  ;;  %v12020_v6 = vadd.s32 4294967169, %v5643_v5 }
 0x4ae   :  { %v7433_v3 = vsel %vm7423_vm5, %v7430_v11, %v7432_v37  ;;  %v12086_v30 = vadd.s32 4294967294, %v7355_v62  ;;  %v7426_v4 = vsel %vm7422_vm8, %v7406_v24, %v7409_v28  ;;  %v7428_v8 = vsel %vm7424_vm7, %v7412_v29, %v7427_v7 }
 0x4af   :  { %v7436_v38 = vsel %vm7424_vm7, %v7418_v45, %v7435_v57  ;;  %v17124_v51 = vmul.u32.u64.low %v7438_v41, %v7433_v3  ;;  %v17125_v17 = vmul.u32.u64.high %v7438_v41, %v7433_v3, %v17124_v51  ;;  %v5649_v21 = vadd.s32 1, %v12020_v6  ;;  %v19479_v45 = vld [vmem:[#allocation27_spill] sm:$0xff] }
 0x4b0   :  { %v7437_v13 = vsel %vm7423_vm5, %v7434_v43, %v7436_v38  ;;  %v5489_v27 = vadd.s32 %v16913_v42, %v16920_v52  ;;  %v17130_v10 = vsub.s32 %v5596_v16, %v5599_v1  ;;  %v17135_v62 = vor.u32 %v7258_v60, %v7257_v56 }
 0x4b1   :  { %v17132_v23 = vmul.u32.u64.low %v7438_v41, %v7437_v13  ;;  %v17133_v20 = vmul.u32.u64.high %v7438_v41, %v7437_v13, %v17132_v23  ;;  %v7429_v24 = vsel %vm7423_vm5, %v7426_v4, %v7428_v8  ;;  %vm5650_vm2 = vcmp.gt.s32.totalorder %v5649_v21, 0 }
 0x4b2   :  { %v4561_v28 = vadd.f32 %v4524_v34, %v19479_v45  ;;  %v17139_v29 = vor.u32 4788187, %v7262_v12  ;;  %v5507_v5 = vshrl.u32 %v5489_v27, %v5505_v25  ;;  %vm12087_vm8 = vcmp.lt.s32.totalorder %v12086_v30, 0 }
 0x4b3   :  { %v5651_v7 = vsel %vm5650_vm2, %v5649_v21, 0  ;;  %v5510_v11 = vadd.s32 127, %v5509_v44  ;;  %v7448_v42 = vadd.s32 1, %v17125_v17  ;;  %v19170_v52 = vand.u32 2147483647, %v17095_v15 }
 0x4b4   :  { %v5653_v16 = vand.u32 31, %v5651_v7  ;;  %v5506_v13 = vshll.u32 %v16989_v53, %v17100_v18  ;;  %v5602_v56 = vsub.s32 0, %v17130_v10  ;;  %v7445_v60 = vmul.u32 %v7438_v41, %v7429_v24 }
 0x4b5   :  { %vm7447_vm13 = vc.u32 %v17133_v20, %v17124_v51  ;;  %v17148_v58 = vsel %vm12087_vm8, 0, %v12086_v30  ;;  %v17152_v44 = vadd.f32 %v19382_v54, %v4561_v28  ;;  %v7343_v53 = vadd.s32 %v17000_v46, %v17005_v31 }
 0x4b6   :  { %v7449_v12 = vsel %vm7447_vm13, %v7448_v42, %v17125_v17  ;;  %v5654_v21 = vsub.s32 32, %v5653_v16  ;;  %v17155_v1 = vor.u32 %v5507_v5, %v5506_v13  ;;  %v5511_v37 = vshll.u32 %v5510_v11, 23 }
 0x4b7   :  { %19480 = vst [vmem:[#allocation27_spill] sm:$0xff] %v17152_v44  ;;  %v7450_v18 = vadd.s32 %v7449_v12, %v7445_v60  ;;  %v5646_v43 = vand.u32 8388607, %v19170_v52  ;;  %v7363_v57 = vsub.s32 4294967266, %v17148_v58  ;;  %v12017_v41 = vmin.u32 %v5602_v56, %v17130_v10 }
 0x4b8   :  { %v5657_v3 = vshrl.u32 %v19274_v63, %v5654_v21  ;;  %v5660_v17 = vshrl.u32 %v19266_v39, %v5654_v21  ;;  %v5656_v30 = vshll.u32 %v19273_v50, %v5653_v16  ;;  %v5659_v4 = vshll.u32 %v19274_v63, %v5653_v16 }
 0x4b9   :  { %v7451_v6 = vadd.s32 536870912, %v7450_v18  ;;  %v5662_v46 = vshll.u32 %v19266_v39, %v5653_v16  ;;  %v5663_v31 = vshrl.u32 %v19267_v26, %v5654_v21  ;;  %v7496_v8 = vand.u32 2139095040, %v17152_v44 }
 0x4ba   :  { %v5652_v38 = vshrl.u32 %v5651_v7, 5  ;;  %v5658_v34 = vor.u32 %v5657_v3, %v5656_v30  ;;  %v5665_v27 = vshll.u32 %v19267_v26, %v5653_v16  ;;  %v5666_v23 = vshrl.u32 %v19288_v9, %v5654_v21 }
 0x4bb   :  { %v5661_v24 = vor.u32 %v5660_v17, %v5659_v4  ;;  %v5664_v45 = vor.u32 %v5663_v31, %v5662_v46  ;;  %v5668_v28 = vshll.u32 %v19288_v9, %v5653_v16  ;;  %v5669_v5 = vshrl.u32 %v19275_v47, %v5654_v21 }
 0x4bc   :  { %v5512_v11 = vor.u32 4788187, %v5511_v37  ;;  %v17174_v42 = vshrl.u32 %v7451_v6, 30  ;;  %v5647_v13 = vor.u32 8388608, %v5646_v43  ;;  %v5667_v56 = vor.u32 %v5666_v23, %v5665_v27 }
 0x4bd   :  { %v7359_v60 = vsub.s32 32, %v17148_v58  ;;  %v7364_v12 = vadd.s32 127, %v7363_v57  ;;  %v5670_v7 = vor.u32 %v5669_v5, %v5668_v28  ;;  %v7497_v3 = vshrl.u32 %v7496_v8, 23 }
 0x4be   :  { %19481 = vst [vmem:[#allocation78_spill] sm:$0xff] %v17174_v42  ;;  %v5604_v30 = vclz %v12017_v41  ;;  %v5655_v52 = vshrl.u32 %v19273_v50, %v5654_v21  ;;  %vm5671_vm7 = vcmp.lt.s32.totalorder %v5652_v38, 1  ;;  %vm5674_vm5 = vcmp.lt.s32.totalorder %v5652_v38, 4 }
 0x4bf   :  { %vm5673_vm2 = vcmp.lt.s32.totalorder %v5652_v38, 3  ;;  %v5676_v17 = vsel %vm5674_vm5, %v5664_v45, 2102212464  ;;  %v5679_v16 = vsel %vm5671_vm7, %v5658_v34, %v5661_v24  ;;  %v5680_v4 = vsel %vm5674_vm5, %v5667_v56, 920167782 }
 0x4c0   :  { %v7453_v37 = vshll.u32 %v17174_v42, 30  ;;  %vm5672_vm8 = vcmp.lt.s32.totalorder %v5652_v38, 2  ;;  %v5681_v6 = vsel %vm5673_vm2, %v5664_v45, %v5680_v4  ;;  %v5683_v43 = vsel %vm5671_vm7, %v5661_v24, %v5664_v45 }
 0x4c1   :  { %v5682_v46 = vsel %vm5672_vm8, %v5679_v16, %v5681_v6  ;;  %v5684_v31 = vsel %vm5674_vm5, %v5670_v7, 1326507024  ;;  %v5687_v57 = vshll.u32 %v5647_v13, 8  ;;  %v12092_v27 = vadd.s32 4294967169, %v7497_v3 }
 0x4c2   :  { %v12018_v8 = vadd.s32 4294967294, %v5604_v30  ;;  %v5675_v41 = vsel %vm5671_vm7, %v5655_v52, %v5658_v34  ;;  %v5677_v23 = vsel %vm5673_vm2, %v5661_v24, %v5676_v17  ;;  %v5685_v21 = vsel %vm5673_vm2, %v5667_v56, %v5684_v31 }
 0x4c3   :  { %v5686_v28 = vsel %vm5672_vm8, %v5683_v43, %v5685_v21  ;;  %v17181_v5 = vmul.u32.u64.low %v5687_v57, %v5682_v46  ;;  %v17182_v25 = vmul.u32.u64.high %v5687_v57, %v5682_v46, %v17181_v5  ;;  %v7503_v32 = vadd.s32 1, %v12092_v27 }
 0x4c4   :  { %v17185_v42 = vsub.s32 %v7450_v18, %v7453_v37  ;;  %v17187_v4 = vmul.u32.u64.low %v5687_v57, %v5686_v28  ;;  %v17188_v45 = vmul.u32.u64.high %v5687_v57, %v5686_v28, %v17187_v4  ;;  %v19173_v7 = vand.u32 2147483647, %v17152_v44 }
 0x4c5   :  { %v7264_v13 = vand.u32 2147483647, %v17139_v29  ;;  %v5515_v52 = vcvt.s32.f32 %v17155_v1  ;;  %v5678_v34 = vsel %vm5672_vm8, %v5675_v41, %v5677_v23  ;;  %vm7504_vm13 = vcmp.gt.s32.totalorder %v7503_v32, 0  ;;  %v4480_v1 = vpop.f32.mrf.mxu0 }
 0x4c6   :  { %v5513_v24 = vand.u32 2147483647, %v5512_v11  ;;  %v7361_v56 = vshrl.u32 %v7343_v53, %v7359_v60  ;;  %vm12019_vm7 = vcmp.lt.s32.totalorder %v12018_v8, 0  ;;  %v7505_v3 = vsel %vm7504_vm13, %v7503_v32, 0 }
 0x4c7   :  { %v7360_v18 = vshll.u32 %v17072_v19, %v17148_v58  ;;  %v7365_v30 = vshll.u32 %v7364_v12, 23  ;;  %v5697_v17 = vadd.s32 1, %v17182_v25  ;;  %v7507_v16 = vand.u32 31, %v7505_v3 }
 0x4c8   :  { %v7456_v37 = vsub.s32 0, %v17185_v42  ;;  %v5694_v6 = vmul.u32 %v5687_v57, %v5678_v34  ;;  %vm5696_vm5 = vc.u32 %v17188_v45, %v17181_v5  ;;  %v7500_v29 = vand.u32 8388607, %v19173_v7  ;;  %v19483_v57 = vld [vmem:[#allocation36_spill] sm:$0xff] }
 0x4c9   :  { %v19482_v53 = vcvt.s32.f32 %v17135_v62  ;;  %v17206_v38 = vsel %vm12019_vm7, 0, %v12018_v8  ;;  %v5698_v19 = vsel %vm5696_vm5, %v5697_v17, %v17182_v25  ;;  %v7508_v58 = vsub.s32 32, %v7507_v16 }
 0x4ca   :  { %v17209_v11 = vmul.f32 %v5515_v52, %v5513_v24  ;;  %v17211_v60 = vor.u32 %v7361_v56, %v7360_v18  ;;  %v5592_v12 = vadd.s32 %v17064_v40, %v17075_v48  ;;  %v5699_v43 = vadd.s32 %v5698_v19, %v5694_v6  ;;  %v4526_v24 = vpop.f32.mrf.mxu1 }
 0x4cb   :  { %v17204_v32 = vmul.f32 %v19482_v53, %v7264_v13  ;;  %v17215_v46 = vor.u32 4788187, %v7365_v30  ;;  %v7511_v31 = vshrl.u32 %v19274_v63, %v7508_v58  ;;  %v7514_v62 = vshrl.u32 %v19266_v39, %v7508_v58 }
 0x4cc   :  { %v4544_v27 = vadd.f32 %v4480_v1, %v19483_v57  ;;  %v5612_v8 = vsub.s32 4294967266, %v17206_v38  ;;  %v12089_v25 = vmin.u32 %v7456_v37, %v17185_v42  ;;  %v5700_v41 = vadd.s32 536870912, %v5699_v43  ;;  %v19485_v57 = vld [vmem:[#allocation29_spill] sm:$0xff] }
 0x4cd   :  { %v7501_v23 = vor.u32 8388608, %v7500_v29  ;;  %v17222_v21 = vshrl.u32 %v7505_v3, 5  ;;  %v7510_v28 = vshll.u32 %v19273_v50, %v7507_v16  ;;  %v7513_v40 = vshll.u32 %v19274_v63, %v7507_v16 }
 0x4ce   :  { %v7517_v48 = vshrl.u32 %v19267_v26, %v7508_v58  ;;  %v17227_v4 = vshrl.u32 %v5700_v41, 30  ;;  %v7516_v13 = vshll.u32 %v19266_v39, %v7507_v16  ;;  %v7519_v52 = vshll.u32 %v19267_v26, %v7507_v16 }
 0x4cf   :  { %v7520_v34 = vshrl.u32 %v19288_v9, %v7508_v58  ;;  %v7512_v56 = vor.u32 %v7511_v31, %v7510_v28  ;;  %v7515_v18 = vor.u32 %v7514_v62, %v7513_v40  ;;  %v7522_v3 = vshll.u32 %v19288_v9, %v7507_v16 }
 0x4d0   :  { %19484 = vst [vmem:[#allocation36_spill] sm:$0xff] %v17227_v4  ;;  %v7523_v30 = vshrl.u32 %v19275_v47, %v7508_v58  ;;  %v7369_v17 = vcvt.s32.f32 %v17211_v60  ;;  %v7458_v37 = vclz %v12089_v25  ;;  %v7518_v6 = vor.u32 %v7517_v48, %v7516_v13 }
 0x4d1   :  { %v7521_v29 = vor.u32 %v7520_v34, %v7519_v52  ;;  %v5608_v1 = vsub.s32 32, %v17206_v38  ;;  %v17237_v19 = vadd.f32 %v15304_v59, %v4544_v27  ;;  %v4562_v41 = vadd.f32 %v4526_v24, %v19485_v57 }
 0x4d2   :  { %v7524_v53 = vor.u32 %v7523_v30, %v7522_v3  ;;  %v5613_v7 = vadd.s32 127, %v5612_v8  ;;  %v5702_v31 = vshll.u32 %v17227_v4, 30  ;;  %vm7525_vm2 = vcmp.lt.s32.totalorder %v17222_v21, 1 }
 0x4d3   :  { %vm7528_vm8 = vcmp.lt.s32.totalorder %v17222_v21, 4  ;;  %vm7527_vm13 = vcmp.lt.s32.totalorder %v17222_v21, 3  ;;  %v7533_v16 = vsel %vm7525_vm2, %v7512_v56, %v7515_v18  ;;  %v7541_v62 = vshll.u32 %v7501_v23, 8 }
 0x4d4   :  { %v7534_v60 = vsel %vm7528_vm8, %v7521_v29, 920167782  ;;  %v12090_v25 = vadd.s32 4294967294, %v7458_v37  ;;  %vm7526_vm7 = vcmp.lt.s32.totalorder %v17222_v21, 2  ;;  %v7537_v8 = vsel %vm7525_vm2, %v7515_v18, %v7518_v6 }
 0x4d5   :  { %v7535_v27 = vsel %vm7527_vm13, %v7518_v6, %v7534_v60  ;;  %v7530_v28 = vsel %vm7528_vm8, %v7518_v6, 2102212464  ;;  %v7538_v48 = vsel %vm7528_vm8, %v7524_v53, 1326507024  ;;  %v5745_v13 = vand.u32 2139095040, %v17237_v19 }
 0x4d6   :  { %v7536_v40 = vsel %vm7526_vm7, %v7533_v16, %v7535_v27  ;;  %v17254_v52 = vsub.s32 %v5699_v43, %v5702_v31  ;;  %v7509_v23 = vshrl.u32 %v19273_v50, %v7508_v58  ;;  %v7539_v34 = vsel %vm7527_vm13, %v7521_v29, %v7538_v48 }
 0x4d7   :  { %v17260_v24 = vadd.f32 %v15304_v59, %v4562_v41  ;;  %vm19182_vm5 = vcmp.lt.s32.totalorder %v16491_v36, 0  ;;  %vm5332_vm11 = vcmp.lt.s32.totalorder %v16648_v35, 0  ;;  %vm19183_vm14 = vcmp.lt.s32.totalorder %v16701_v2, 0 }
 0x4d8   :  { %v7540_v3 = vsel %vm7526_vm7, %v7537_v8, %v7539_v34  ;;  %v17267_v30 = vmul.u32.u64.low %v7541_v62, %v7536_v40  ;;  %v17268_v43 = vmul.u32.u64.high %v7541_v62, %v7536_v40, %v17267_v30  ;;  %v5746_v58 = vshrl.u32 %v5745_v13, 23  ;;  %v19488_v34 = vld [vmem:[#allocation35_spill] sm:$0xff] }
 0x4d9   :  { %19486 = vst [vmem:[#allocation29_spill] sm:$0xff] %v17260_v24  ;;  %vm19216_vm8 = vcmp.lt.s32.totalorder %v16774_v61, 0  ;;  %v7529_v37 = vsel %vm7525_vm2, %v7509_v23, %v7512_v56  ;;  %v7531_v6 = vsel %vm7527_vm13, %v7515_v18, %v7530_v28  ;;  %v7367_v57 = vand.u32 2147483647, %v17215_v46  ;;  %v4484_v46 = vpop.f32.mrf.mxu0  ;;  %v12784_v61 = vld [vmem:[#allocation7 + $0x30] sm:$0xff]  }
 0x4da   :  { %v17276_v29 = vmul.u32.u64.low %v7541_v62, %v7540_v3  ;;  %v17277_v53 = vmul.u32.u64.high %v7541_v62, %v7540_v3, %v17276_v29  ;;  %v5610_v41 = vshrl.u32 %v5592_v12, %v5608_v1  ;;  %vm12091_vm15 = vcmp.lt.s32.totalorder %v12090_v25, 0 }
 0x4db   :  { %v12024_v31 = vadd.s32 4294967169, %v5746_v58  ;;  %v5609_v16 = vshll.u32 %v17130_v10, %v17206_v38  ;;  %v5614_v60 = vshll.u32 %v5613_v7, 23  ;;  %v5705_v27 = vsub.s32 0, %v17254_v52 }
 0x4dc   :  { %v19177_v8 = vand.u32 2147483647, %v17237_v19  ;;  %v7532_v56 = vsel %vm7526_vm7, %v7529_v37, %v7531_v6  ;;  %v7551_v18 = vadd.s32 1, %v17268_v43  ;;  %v7599_v40 = vand.u32 2139095040, %v17260_v24 }
 0x4dd   :  { %v5752_v28 = vadd.s32 1, %v12024_v31  ;;  %v7268_v12 = vxor.u32 2147483648, %v17204_v32  ;;  %v5517_v1 = vxor.u32 2147483648, %v17209_v11  ;;  %v17290_v48 = vsel %vm12091_vm15, 0, %v12090_v25 }
 0x4de   :  { %vm7550_vm2 = vc.u32 %v17277_v53, %v17267_v30  ;;  %v17294_v10 = vmul.f32 %v7369_v17, %v7367_v57  ;;  %v17296_v7 = vor.u32 %v5610_v41, %v5609_v16  ;;  %v17299_v21 = vor.u32 4788187, %v5614_v60 }
 0x4df   :  { %v7552_v38 = vsel %vm7550_vm2, %v7551_v18, %v17268_v43  ;;  %vm5753_vm13 = vcmp.gt.s32.totalorder %v5752_v28, 0  ;;  %v12021_v13 = vmin.u32 %v5705_v27, %v17254_v52  ;;  %v7548_v23 = vmul.u32 %v7541_v62, %v7532_v56 }
 0x4e0   :  { %19487 = vst [vmem:[#allocation79_spill] sm:$0xff] %v17294_v10  ;;  %v4545_v3 = vadd.f32 %v4484_v46, %v19488_v34  ;;  %v7466_v25 = vsub.s32 4294967266, %v17290_v48  ;;  %v5749_v58 = vand.u32 8388607, %v19177_v8  ;;  %v5754_v37 = vsel %vm5753_vm13, %v5752_v28, 0  ;;  %v4486_v10 = vpop.f32.mrf.mxu0 }
 0x4e1   :  { %v7600_v17 = vshrl.u32 %v7599_v40, 23  ;;  %v19489_v6 = vxor.u32 2147483648, %v17077_v14  ;;  %v19491_v29 = vxor.u32 2147483648, %v17081_v33  ;;  %v17323_v57 = vsel %vm19183_vm14, %v7268_v12, %v17204_v32 }
 0x4e2   :  { %19493 = vst [vmem:[#allocation81_spill] sm:$0xff] %v17323_v57  ;;  %v7553_v41 = vadd.s32 %v7552_v38, %v7548_v23  ;;  %v17328_v31 = vsel %vm19216_vm8, %v5517_v1, %v17209_v11  ;;  %v5618_v16 = vcvt.s32.f32 %v17296_v7  ;;  %v5756_v60 = vand.u32 31, %v5754_v37 }
 0x4e3   :  { %v17311_v43 = vsel %vm19182_vm5, %v19489_v6, %v17077_v14  ;;  %v17318_v62 = vsel %vm5332_vm11, %v19491_v29, %v17081_v33  ;;  %19494 = vst [vmem:[#allocation82_spill] sm:$0xff] %v17328_v31  ;;  %v5616_v27 = vand.u32 2147483647, %v17299_v21  ;;  %v5707_v56 = vclz %v12021_v13 }
 0x4e4   :  { %19490 = vst [vmem:[#allocation35_spill] sm:$0xff] %v17311_v43  ;;  %19492 = vst [vmem:[#allocation80_spill] sm:$0xff] %v17318_v62  ;;  %v17335_v18 = vadd.f32 %v19382_v54, %v4545_v3  ;;  %v17337_v32 = vadd.s32 127, %v7466_v25  ;;  %v5750_v28 = vor.u32 8388608, %v5749_v58  ;;  %v5757_v40 = vsub.s32 32, %v5756_v60 }
 0x4e5   :  { %v12096_v46 = vadd.s32 4294967169, %v7600_v17  ;;  %v7554_v11 = vadd.s32 536870912, %v7553_v41  ;;  %v5755_v12 = vshrl.u32 %v5754_v37, 5  ;;  %v5759_v1 = vshll.u32 %v19273_v50, %v5756_v60 }
 0x4e6   :  { %v5762_v7 = vshll.u32 %v19274_v63, %v5756_v60  ;;  %v5760_v38 = vshrl.u32 %v19274_v63, %v5757_v40  ;;  %v5763_v21 = vshrl.u32 %v19266_v39, %v5757_v40  ;;  %v5765_v13 = vshll.u32 %v19266_v39, %v5756_v60 }
 0x4e7   :  { %v5766_v23 = vshrl.u32 %v19267_v26, %v5757_v40  ;;  %v12022_v34 = vadd.s32 4294967294, %v5707_v56  ;;  %v5768_v3 = vshll.u32 %v19267_v26, %v5756_v60  ;;  %v5769_v25 = vshrl.u32 %v19288_v9, %v5757_v40 }
 0x4e8   :  { %v5771_v58 = vshll.u32 %v19288_v9, %v5756_v60  ;;  %v5761_v37 = vor.u32 %v5760_v38, %v5759_v1  ;;  %v5764_v17 = vor.u32 %v5763_v21, %v5762_v7  ;;  %v5772_v29 = vshrl.u32 %v19275_v47, %v5757_v40 }
 0x4e9   :  { %v5767_v6 = vor.u32 %v5766_v23, %v5765_v13  ;;  %v17349_v14 = vshrl.u32 %v7554_v11, 30  ;;  %v5770_v8 = vor.u32 %v5769_v25, %v5768_v3  ;;  %v5790_v33 = vshll.u32 %v5750_v28, 8 }
 0x4ea   :  { %v5773_v43 = vor.u32 %v5772_v29, %v5771_v58  ;;  %vm5774_vm15 = vcmp.lt.s32.totalorder %v5755_v12, 1  ;;  %vm5777_vm7 = vcmp.lt.s32.totalorder %v5755_v12, 4  ;;  %v7606_v56 = vadd.s32 1, %v12096_v46  ;;  %v4528_v29 = vpop.f32.mrf.mxu1 }
 0x4eb   :  { %19495 = vst [vmem:[#allocation83_spill] sm:$0xff] %v17349_v14  ;;  %vm12023_vm2 = vcmp.lt.s32.totalorder %v12022_v34, 0  ;;  %v5758_v36 = vshrl.u32 %v19273_v50, %v5757_v40  ;;  %v5779_v57 = vsel %vm5777_vm7, %v5767_v6, 2102212464  ;;  %v5782_v60 = vsel %vm5774_vm15, %v5761_v37, %v5764_v17 }
 0x4ec   :  { %vm5776_vm13 = vcmp.lt.s32.totalorder %v5755_v12, 3  ;;  %v5783_v1 = vsel %vm5777_vm7, %v5770_v8, 920167782  ;;  %v5786_v7 = vsel %vm5774_vm15, %v5764_v17, %v5767_v6  ;;  %v5787_v38 = vsel %vm5777_vm7, %v5773_v43, 1326507024 }
 0x4ed   :  { %v7556_v11 = vshll.u32 %v17349_v14, 30  ;;  %vm5775_vm5 = vcmp.lt.s32.totalorder %v5755_v12, 2  ;;  %v5778_v21 = vsel %vm5774_vm15, %v5758_v36, %v5761_v37  ;;  %v5784_v28 = vsel %vm5776_vm13, %v5767_v6, %v5783_v1 }
 0x4ee   :  { %v5780_v13 = vsel %vm5776_vm13, %v5764_v17, %v5779_v57  ;;  %v5785_v23 = vsel %vm5775_vm5, %v5782_v60, %v5784_v28  ;;  %v5788_v3 = vsel %vm5776_vm13, %v5770_v8, %v5787_v38  ;;  %vm7607_vm14 = vcmp.gt.s32.totalorder %v7606_v56, 0  ;;  %v19497_v28 = vld [vmem:[#allocation33_spill] sm:$0xff] }
 0x4ef   :  { %v5789_v46 = vsel %vm5775_vm5, %v5786_v7, %v5788_v3  ;;  %v17356_v25 = vmul.u32.u64.low %v5790_v33, %v5785_v23  ;;  %v17357_v40 = vmul.u32.u64.high %v5790_v33, %v5785_v23, %v17356_v25  ;;  %v5848_v58 = vand.u32 2139095040, %v17335_v18 }
 0x4f0   :  { %v17361_v43 = vmul.u32.u64.low %v5790_v33, %v5789_v46  ;;  %v17362_v44 = vmul.u32.u64.high %v5790_v33, %v5789_v46, %v17361_v43  ;;  %v19496_v36 = vand.u32 2147483647, %v17260_v24  ;;  %v7608_v57 = vsel %vm7607_vm14, %v7606_v56, 0 }
 0x4f1   :  { %v7446_v8 = vadd.s32 %v17124_v51, %v17133_v20  ;;  %v17368_v17 = vsub.s32 %v7553_v41, %v7556_v11  ;;  %v5781_v6 = vsel %vm5775_vm5, %v5778_v21, %v5780_v13  ;;  %v7610_v60 = vand.u32 31, %v7608_v57 }
 0x4f2   :  { %v7603_v37 = vand.u32 8388607, %v19496_v36  ;;  %v17371_v1 = vmul.f32 %v5618_v16, %v5616_v27  ;;  %v17376_v38 = vsel %vm12023_vm2, 0, %v12022_v34  ;;  %v17379_v23 = vadd.f32 %v4528_v29, %v19497_v28 }
 0x4f3   :  { %v19498_v56 = vsub.s32 32, %v17290_v48  ;;  %v5800_v20 = vadd.s32 1, %v17357_v40  ;;  %v5849_v41 = vshrl.u32 %v5848_v58, 23  ;;  %v5797_v16 = vmul.u32 %v5790_v33, %v5781_v6 }
 0x4f4   :  { %vm5799_vm14 = vc.u32 %v17362_v44, %v17356_v25  ;;  %v7604_v27 = vor.u32 8388608, %v7603_v37  ;;  %v7611_v12 = vsub.s32 32, %v7610_v60  ;;  %v5715_v34 = vsub.s32 4294967266, %v17376_v38 }
 0x4f5   :  { %v17383_v3 = vshrl.u32 %v7446_v8, %v19498_v56  ;;  %v7559_v11 = vsub.s32 0, %v17368_v17  ;;  %v5801_v21 = vsel %vm5799_vm14, %v5800_v20, %v17357_v40  ;;  %v7613_v29 = vshll.u32 %v19273_v50, %v7610_v60 }
 0x4f6   :  { %v5802_v46 = vadd.s32 %v5801_v21, %v5797_v16  ;;  %v7614_v43 = vshrl.u32 %v19274_v63, %v7611_v12  ;;  %v7617_v33 = vshrl.u32 %v19266_v39, %v7611_v12  ;;  %v7616_v58 = vshll.u32 %v19274_v63, %v7610_v60 }
 0x4f7   :  { %v7619_v36 = vshll.u32 %v19266_v39, %v7610_v60  ;;  %v7620_v37 = vshrl.u32 %v19267_v26, %v7611_v12  ;;  %v12028_v8 = vadd.s32 4294967169, %v5849_v41  ;;  %v7609_v28 = vshrl.u32 %v7608_v57, 5 }
 0x4f8   :  { %v5803_v6 = vadd.s32 536870912, %v5802_v46  ;;  %v7615_v56 = vor.u32 %v7614_v43, %v7613_v29  ;;  %v17399_v40 = vshll.u32 %v7604_v27, 8  ;;  %v7618_v20 = vor.u32 %v7617_v33, %v7616_v58 }
 0x4f9   :  { %v7621_v16 = vor.u32 %v7620_v37, %v7619_v36  ;;  %v7622_v21 = vshll.u32 %v19267_v26, %v7610_v60  ;;  %v7623_v13 = vshrl.u32 %v19288_v9, %v7611_v12  ;;  %v5716_v51 = vadd.s32 127, %v5715_v34 }
 0x4fa   :  { %v17403_v7 = vshrl.u32 %v5803_v6, 30  ;;  %v7625_v14 = vshll.u32 %v19288_v9, %v7610_v60  ;;  %v7626_v2 = vshrl.u32 %v19275_v47, %v7611_v12  ;;  %v12093_v41 = vmin.u32 %v7559_v11, %v17368_v17 }
 0x4fb   :  { %v7612_v57 = vshrl.u32 %v19273_v50, %v7611_v12  ;;  %v7624_v29 = vor.u32 %v7623_v13, %v7622_v21  ;;  %v5855_v27 = vadd.s32 1, %v12028_v8  ;;  %vm7628_vm5 = vcmp.lt.s32.totalorder %v7609_v28, 1 }
 0x4fc   :  { %19499 = vst [vmem:[#allocation33_spill] sm:$0xff] %v17403_v7  ;;  %v5805_v43 = vshll.u32 %v17403_v7, 30  ;;  %v7627_v33 = vor.u32 %v7626_v2, %v7625_v14  ;;  %vm7631_vm15 = vcmp.lt.s32.totalorder %v7609_v28, 4  ;;  %vm7630_vm7 = vcmp.lt.s32.totalorder %v7609_v28, 3  ;;  %v12786_v7 = vld [vmem:[#allocation7 + $0xb0] sm:$0xff]  }
 0x4fd   :  { %v7633_v58 = vsel %vm7631_vm15, %v7621_v16, 2102212464  ;;  %v7636_v34 = vsel %vm7628_vm5, %v7615_v56, %v7618_v20  ;;  %v7637_v36 = vsel %vm7631_vm15, %v7624_v29, 920167782  ;;  %vm7629_vm2 = vcmp.lt.s32.totalorder %v7609_v28, 2 }
 0x4fe   :  { %v17410_v37 = vsub.s32 %v5802_v46, %v5805_v43  ;;  %v7638_v60 = vsel %vm7630_vm7, %v7621_v16, %v7637_v36  ;;  %v7640_v6 = vsel %vm7628_vm5, %v7618_v20, %v7621_v16  ;;  %v5711_v11 = vsub.s32 32, %v17376_v38 }
 0x4ff   :  { %v7632_v24 = vsel %vm7628_vm5, %v7612_v57, %v7615_v56  ;;  %v7639_v12 = vsel %vm7629_vm2, %v7636_v34, %v7638_v60  ;;  %v7641_v13 = vsel %vm7631_vm15, %v7627_v33, 1326507024  ;;  %v7634_v8 = vsel %vm7630_vm7, %v7618_v20, %v7633_v58  ;;  %v19500_v34 = vld [vmem:[#allocation40_spill] sm:$0xff] }
 0x500   :  { %v7642_v21 = vsel %vm7630_vm7, %v7624_v29, %v7641_v13  ;;  %v17415_v2 = vmul.u32.u64.low %v17399_v40, %v7639_v12  ;;  %v17416_v14 = vmul.u32.u64.high %v17399_v40, %v7639_v12, %v17415_v2  ;;  %v5717_v4 = vshll.u32 %v5716_v51, 23  ;;  %v12781_v13 = vld [vmem:[#allocation7 + $0xf8] sm:$0xff]  }
 0x501   :  { %v7561_v46 = vclz %v12093_v41  ;;  %v7643_v43 = vsel %vm7629_vm2, %v7640_v6, %v7642_v21  ;;  %vm5856_vm13 = vcmp.gt.s32.totalorder %v5855_v27, 0  ;;  %v5808_v16 = vsub.s32 0, %v17410_v37  ;;  %12333 = vmatprep.subr.bf16.mxu0 %v12781_v13 }
 0x502   :  { %v17422_v56 = vmul.u32.u64.low %v17399_v40, %v7643_v43  ;;  %v17423_v57 = vmul.u32.u64.high %v17399_v40, %v7643_v43, %v17422_v56  ;;  %v5857_v33 = vsel %vm5856_vm13, %v5855_v27, 0  ;;  %v5695_v20 = vadd.s32 %v17181_v5, %v17188_v45  ;;  %v12782_v43 = vld [vmem:[#allocation7 + $0xb8] sm:$0xff]  }
 0x503   :  { %v7635_v29 = vsel %vm7629_vm2, %v7632_v24, %v7634_v8  ;;  %v5859_v58 = vand.u32 31, %v5857_v33  ;;  %v17429_v36 = vadd.f32 %v4486_v10, %v19500_v34  ;;  %v19501_v51 = vshll.u32 %v17185_v42, %v17290_v48  ;;  %12334 = vmatpush3.bf16.msra.mxu0 %v12782_v43 }
 0x504   :  { %v19502_v60 = vshll.u32 %v17337_v32, 23  ;;  %v7654_v27 = vadd.s32 1, %v17416_v14  ;;  %v19503_v5 = vand.u32 2147483647, %v17335_v18  ;;  %v5713_v24 = vshrl.u32 %v5695_v20, %v5711_v11 }
 0x505   :  { %v17435_v41 = vor.u32 %v17383_v3, %v19501_v51  ;;  %v17444_v28 = vor.u32 4788187, %v5717_v4  ;;  %v17446_v10 = vadd.s32 4294967294, %v7561_v46  ;;  %v5860_v12 = vsub.s32 32, %v5859_v58  ;;  %v12779_v3 = vld [vmem:[#allocation7 + $0x78] sm:$0xff]  }
 0x506   :  { %v17439_v6 = vor.u32 4788187, %v19502_v60  ;;  %v5852_v45 = vand.u32 8388607, %v19503_v5  ;;  %v12025_v42 = vmin.u32 %v5808_v16, %v17410_v37  ;;  %v7651_v48 = vmul.u32 %v17399_v40, %v7635_v29  ;;  %v12780_v46 = vld [vmem:[#allocation7 + $0x38] sm:$0xff]   ;;  %12269 = vmatprep.subr.bf16.mxu1 %v12779_v3 }
 0x507   :  { %vm7653_vm14 = vc.u32 %v17423_v57, %v17415_v2  ;;  %v5862_v32 = vshll.u32 %v19273_v50, %v5859_v58  ;;  %v5863_v11 = vshrl.u32 %v19274_v63, %v5860_v12  ;;  %v5865_v4 = vshll.u32 %v19274_v63, %v5859_v58  ;;  %12270 = vmatpush3.bf16.msra.mxu1 %v12780_v46 }
 0x508   :  { %v7655_v8 = vsel %vm7653_vm14, %v7654_v27, %v17416_v14  ;;  %v5866_v21 = vshrl.u32 %v19266_v39, %v5860_v12  ;;  %v5853_v56 = vor.u32 8388608, %v5852_v45  ;;  %v5869_v40 = vshrl.u32 %v19267_v26, %v5860_v12 }
 0x509   :  { %v7656_v16 = vadd.s32 %v7655_v8, %v7651_v48  ;;  %v5872_v20 = vshrl.u32 %v19288_v9, %v5860_v12  ;;  %v17459_v29 = vshrl.u32 %v5857_v33, 5  ;;  %v5868_v14 = vshll.u32 %v19266_v39, %v5859_v58  ;;  %v12783_v48 = vld [vmem:[#allocation7 + $0x70] sm:$0xff]  }
 0x50a   :  { %v5871_v34 = vshll.u32 %v19267_v26, %v5859_v58  ;;  %v17465_v51 = vadd.f32 %v19382_v54, %v17379_v23  ;;  %v5810_v60 = vclz %v12025_v42  ;;  %v5864_v5 = vor.u32 %v5863_v11, %v5862_v32  ;;  %v12785_v8 = vld [vmem:[#allocation7 + $0xf0] sm:$0xff]   ;;  %12271 = vmatprep.subr.bf16.mxu1 %v12783_v48 }
 0x50b   :  { %v7657_v27 = vadd.s32 536870912, %v7656_v16  ;;  %v5867_v45 = vor.u32 %v5866_v21, %v5865_v4  ;;  %v5870_v3 = vor.u32 %v5869_v40, %v5868_v14  ;;  %v5874_v33 = vshll.u32 %v19288_v9, %v5859_v58  ;;  %12335 = vmatprep.subr.bf16.mxu0 %v12785_v8  ;;  %12272 = vmatpush3.bf16.msra.mxu1 %v12784_v61 }
 0x50c   :  { %19504 = vst [vmem:[#allocation40_spill] sm:$0xff] %v17465_v51  ;;  %v5873_v13 = vor.u32 %v5872_v20, %v5871_v34  ;;  %v5875_v31 = vshrl.u32 %v19275_v47, %v5860_v12  ;;  %v7470_v62 = vand.u32 2147483647, %v17439_v6  ;;  %v5712_v23 = vshll.u32 %v17254_v52, %v17376_v38  ;;  %12336 = vmatpush3.bf16.msra.mxu0 %v12786_v7  ;;  %v12787_v52 = vld [vmem:[#allocation7 + $0x68] sm:$0xff]  }
 0x50d   :  { %v5719_v42 = vand.u32 2147483647, %v17444_v28  ;;  %v17473_v46 = vshrl.u32 %v7657_v27, 30  ;;  %vm12095_vm5 = vcmp.lt.s32.totalorder %v17446_v10, 0  ;;  %v17476_v11 = vshll.u32 %v5853_v56, 8  ;;  %v12789_v38 = vld [vmem:[#allocation7 + $0xe8] sm:$0xff]   ;;  %12273 = vmatprep.subr.bf16.mxu1 %v12787_v52 }
 0x50e   :  { %v5876_v32 = vor.u32 %v5875_v31, %v5874_v33  ;;  %v7702_v58 = vand.u32 2139095040, %v17465_v51  ;;  %v17479_v4 = vadd.s32 4294967294, %v5810_v60  ;;  %vm5877_vm15 = vcmp.lt.s32.totalorder %v17459_v29, 1  ;;  %v12788_v7 = vld [vmem:[#allocation7 + $0x28] sm:$0xff]   ;;  %12337 = vmatprep.subr.bf16.mxu0 %v12789_v38  ;;  %v12791_v33 = vld [vmem:[#allocation7 + $0x60] sm:$0xff]   ;;  %v12798_v28 = vld [vmem:[#allocation7 + $0x98] sm:$0xff]  }
 0x50f   :  { %19505 = vst [vmem:[#allocation84_spill] sm:$0xff] %v17473_v46  ;;  %v7659_v6 = vshll.u32 %v17473_v46, 30  ;;  %vm5880_vm7 = vcmp.lt.s32.totalorder %v17459_v29, 4  ;;  %v5714_v21 = vor.u32 %v5713_v24, %v5712_v23  ;;  %v5885_v43 = vsel %vm5877_vm15, %v5864_v5, %v5867_v45  ;;  %v12790_v56 = vld [vmem:[#allocation7 + $0xa8] sm:$0xff]   ;;  %12274 = vmatpush3.bf16.msra.mxu1 %v12788_v7  ;;  %v12794_v52 = vld [vmem:[#allocation7 + $0xa0] sm:$0xff]  }
 0x510   :  { %v5882_v31 = vsel %vm5880_vm7, %v5870_v3, 2102212464  ;;  %v5886_v61 = vsel %vm5880_vm7, %v5873_v13, 920167782  ;;  %v5861_v40 = vshrl.u32 %v19273_v50, %v5860_v12  ;;  %vm5878_vm2 = vcmp.lt.s32.totalorder %v17459_v29, 2  ;;  %12338 = vmatpush3.bf16.msra.mxu0 %v12790_v56  ;;  %12275 = vmatprep.subr.bf16.mxu1 %v12791_v33  ;;  %v12807_v46 = vld [vmem:[#allocation7 + $0x40] sm:$0xff]  }
 0x511   :  { %vm5879_vm13 = vcmp.lt.s32.totalorder %v17459_v29, 3  ;;  %v5889_v24 = vsel %vm5877_vm15, %v5867_v45, %v5870_v3  ;;  %v17495_v20 = vsub.s32 %v7656_v16, %v7659_v6  ;;  %v5890_v34 = vsel %vm5880_vm7, %v5876_v32, 1326507024  ;;  %v12793_v16 = vld [vmem:[#allocation7 + $0xe0] sm:$0xff]  }
 0x512   :  { %v5887_v14 = vsel %vm5879_vm13, %v5870_v3, %v5886_v61  ;;  %v7703_v60 = vshrl.u32 %v7702_v58, 23  ;;  %vm19218_vm14 = vcmp.lt.s32.totalorder %v16959_v55, 0  ;;  %v5881_v12 = vsel %vm5877_vm15, %v5861_v40, %v5864_v5  ;;  %v12792_v6 = vld [vmem:[#allocation7 + $0x20] sm:$0xff]   ;;  %12339 = vmatprep.subr.bf16.mxu0 %v12793_v16  ;;  %v12795_v40 = vld [vmem:[#allocation7 + $0x58] sm:$0xff]  }
 0x513   :  { %v5883_v27 = vsel %vm5879_vm13, %v5867_v45, %v5882_v31  ;;  %v5888_v48 = vsel %vm5878_vm2, %v5885_v43, %v5887_v14  ;;  %v5891_v8 = vsel %vm5879_vm13, %v5873_v13, %v5890_v34  ;;  %v7472_v5 = vcvt.s32.f32 %v17435_v41  ;;  %12276 = vmatpush3.bf16.msra.mxu1 %v12792_v6  ;;  %v12796_v34 = vld [vmem:[#allocation7 + $0x18] sm:$0xff]  }
 0x514   :  { %v5892_v3 = vsel %vm5878_vm2, %v5889_v24, %v5891_v8  ;;  %v17507_v23 = vmul.u32.u64.low %v17476_v11, %v5888_v48  ;;  %v17508_v32 = vmul.u32.u64.high %v17476_v11, %v5888_v48, %v17507_v23  ;;  %v12100_v58 = vadd.s32 4294967169, %v7703_v60  ;;  %12340 = vmatpush3.bf16.msra.mxu0 %v12794_v52  ;;  %12277 = vmatprep.subr.bf16.mxu1 %v12795_v40 }
 0x515   :  { %v17515_v45 = vsel %vm12095_vm5, 0, %v17446_v10  ;;  %v17518_v13 = vmul.u32.u64.low %v17476_v11, %v5892_v3  ;;  %v17519_v38 = vmul.u32.u64.high %v17476_v11, %v5892_v3, %v17518_v13  ;;  %v5721_v31 = vcvt.s32.f32 %v5714_v21  ;;  %v12797_v21 = vld [vmem:[#allocation7 + $0xd8] sm:$0xff]   ;;  %v12799_v3 = vld [vmem:[#allocation7 + $0x50] sm:$0xff]  }
 0x516   :  { %v7662_v43 = vsub.s32 0, %v17495_v20  ;;  %v5884_v61 = vsel %vm5878_vm2, %v5881_v12, %v5883_v27  ;;  %v7709_v7 = vadd.s32 1, %v12100_v58  ;;  %v5620_v41 = vxor.u32 2147483648, %v17371_v1  ;;  %12341 = vmatprep.subr.bf16.mxu0 %v12797_v21  ;;  %v12801_v58 = vld [vmem:[#allocation7 + $0xd0] sm:$0xff]  }
 0x517   :  { %v17525_v56 = vmul.f32 %v7472_v5, %v7470_v62  ;;  %vm12027_vm5 = vcmp.lt.s32.totalorder %v17479_v4, 0  ;;  %v17530_v10 = vadd.f32 %v15304_v59, %v17429_v36  ;;  %v17534_v24 = vmul.f32 %v5721_v31, %v5719_v42  ;;  %12278 = vmatpush3.bf16.msra.mxu1 %v12796_v34 }
 0x518   :  { %v7565_v29 = vsub.s32 32, %v17515_v45  ;;  %v5903_v14 = vadd.s32 1, %v17508_v32  ;;  %vm7710_vm15 = vcmp.gt.s32.totalorder %v7709_v7, 0  ;;  %v7569_v62 = vsub.s32 4294967266, %v17515_v45  ;;  %12342 = vmatpush3.bf16.msra.mxu0 %v12798_v28  ;;  %12279 = vmatprep.subr.bf16.mxu1 %v12799_v3 }
 0x519   :  { %19506 = vst [vmem:[#allocation85_spill] sm:$0xff] %v17525_v56  ;;  %v5900_v60 = vmul.u32 %v17476_v11, %v5884_v61  ;;  %vm5902_vm7 = vc.u32 %v17519_v38, %v17507_v23  ;;  %v19198_v36 = vand.u32 2147483647, %v17465_v51  ;;  %v17546_v42 = vsel %vm12027_vm5, 0, %v17479_v4  ;;  %12343 = vmatprep.subr.bf16.mxu0 %v12801_v58  ;;  %v12809_v56 = vld [vmem:[#allocation7 + $0xc0] sm:$0xff]  }
 0x51a   :  { %v12097_v12 = vmin.u32 %v7662_v43, %v17495_v20  ;;  %v5904_v27 = vsel %vm5902_vm7, %v5903_v14, %v17508_v32  ;;  %v7711_v48 = vsel %vm7710_vm15, %v7709_v7, 0  ;;  %v7549_v11 = vadd.s32 %v17267_v30, %v17277_v53  ;;  %v12800_v30 = vld [vmem:[#allocation7 + $0x10] sm:$0xff]   ;;  %v12805_v14 = vld [vmem:[#allocation7 + $0xc8] sm:$0xff]   ;;  %v12808_v58 = vld [vmem:[#allocation7] sm:$0xff]  }
 0x51b   :  { %v5905_v8 = vadd.s32 %v5904_v27, %v5900_v60  ;;  %v7713_v33 = vand.u32 31, %v7711_v48  ;;  %v5951_v16 = vand.u32 2139095040, %v17530_v10  ;;  %v17556_v4 = vsel %vm19218_vm14, %v5620_v41, %v17371_v1  ;;  %v12802_v53 = vld [vmem:[#allocation7 + $0x90] sm:$0xff]   ;;  %12280 = vmatpush3.bf16.msra.mxu1 %v12800_v30  ;;  %v12806_v27 = vld [vmem:[#allocation7 + $0x88] sm:$0xff]  }
 0x51c   :  { %19507 = vst [vmem:[#allocation86_spill] sm:$0xff] %v17556_v4  ;;  %v5798_v52 = vadd.s32 %v17356_v25, %v17362_v44  ;;  %v17562_v5 = vshrl.u32 %v7549_v11, %v7565_v29  ;;  %v17564_v13 = vadd.s32 127, %v7569_v62  ;;  %v5814_v31 = vsub.s32 32, %v17546_v42  ;;  %12344 = vmatpush3.bf16.msra.mxu0 %v12802_v53  ;;  %v12803_v29 = vld [vmem:[#allocation7 + $0x48] sm:$0xff]  }
 0x51d   :  { %v5906_v43 = vadd.s32 536870912, %v5905_v8  ;;  %v5818_v1 = vsub.s32 4294967266, %v17546_v42  ;;  %v7664_v61 = vclz %v12097_v12  ;;  %v7706_v7 = vand.u32 8388607, %v19198_v36  ;;  %v12804_v12 = vld [vmem:[#allocation7 + $0x8] sm:$0xff]   ;;  %12281 = vmatprep.subr.bf16.mxu1 %v12803_v29  ;;  %12345 = vmatprep.subr.bf16.mxu0 %v12805_v14 }
 0x51e   :  { %v7714_v41 = vsub.s32 32, %v7713_v33  ;;  %v17572_v25 = vshrl.u32 %v7711_v48, 5  ;;  %v7716_v40 = vshll.u32 %v19273_v50, %v7713_v33  ;;  %v5952_v21 = vshrl.u32 %v5951_v16, 23 }
 0x51f   :  { %v17570_v44 = vshrl.u32 %v5906_v43, 30  ;;  %v7719_v62 = vshll.u32 %v19274_v63, %v7713_v33  ;;  %v7722_v48 = vshll.u32 %v19266_v39, %v7713_v33  ;;  %v7725_v3 = vshll.u32 %v19267_v26, %v7713_v33  ;;  %12282 = vmatpush3.bf16.msra.mxu1 %v12804_v12 }
 0x520   :  { %v7717_v34 = vshrl.u32 %v19274_v63, %v7714_v41  ;;  %v7720_v60 = vshrl.u32 %v19266_v39, %v7714_v41  ;;  %v7723_v28 = vshrl.u32 %v19267_v26, %v7714_v41  ;;  %v7726_v16 = vshrl.u32 %v19288_v9, %v7714_v41  ;;  %12346 = vmatpush3.bf16.msra.mxu0 %v12806_v27 }
 0x521   :  { %19508 = vst [vmem:[#allocation87_spill] sm:$0xff] %v17570_v44  ;;  %v5908_v11 = vshll.u32 %v17570_v44, 30  ;;  %v17584_v30 = vshrl.u32 %v5798_v52, %v5814_v31  ;;  %v7707_v6 = vor.u32 8388608, %v7706_v7  ;;  %v5819_v44 = vadd.s32 127, %v5818_v1  ;;  %v12810_v52 = vld [vmem:[#allocation7 + $0x80] sm:$0xff]   ;;  %12283 = vmatprep.subr.bf16.mxu1 %v12807_v46  ;;  %12347 = vmatprep.subr.bf16.mxu0 %v12809_v56 }
 0x522   :  { %v7718_v53 = vor.u32 %v7717_v34, %v7716_v40  ;;  %v7721_v43 = vor.u32 %v7720_v60, %v7719_v62  ;;  %v7724_v32 = vor.u32 %v7723_v28, %v7722_v48  ;;  %v7727_v51 = vor.u32 %v7726_v16, %v7725_v3 }
 0x523   :  { %v17586_v36 = vsub.s32 %v5905_v8, %v5908_v11  ;;  %v12098_v4 = vadd.s32 4294967294, %v7664_v61  ;;  %v7728_v29 = vshll.u32 %v19288_v9, %v7713_v33  ;;  %v7729_v14 = vshrl.u32 %v19275_v47, %v7714_v41  ;;  %12284 = vmatpush3.bf16.msra.mxu1 %v12808_v58 }
 0x524   :  { %vm7731_vm2 = vcmp.lt.s32.totalorder %v17572_v25, 1  ;;  %vm7734_vm13 = vcmp.lt.s32.totalorder %v17572_v25, 4  ;;  %v12032_v8 = vadd.s32 4294967169, %v5952_v21  ;;  %vm7733_vm5 = vcmp.lt.s32.totalorder %v17572_v25, 3  ;;  %12348 = vmatpush3.bf16.msra.mxu0 %v12810_v52 }
 0x525   :  { %v5911_v31 = vsub.s32 0, %v17586_v36  ;;  %v7730_v7 = vor.u32 %v7729_v14, %v7728_v29  ;;  %v7739_v1 = vsel %vm7731_vm2, %v7718_v53, %v7721_v43  ;;  %v7740_v33 = vsel %vm7734_vm13, %v7727_v51, 920167782 }
 0x526   :  { %vm7732_vm15 = vcmp.lt.s32.totalorder %v17572_v25, 2  ;;  %v7741_v61 = vsel %vm7733_vm5, %v7724_v32, %v7740_v33  ;;  %v7747_v40 = vshll.u32 %v7707_v6, 8  ;;  %v19208_v21 = vand.u32 2147483647, %v17530_v10 }
 0x527   :  { %v7736_v46 = vsel %vm7734_vm13, %v7724_v32, 2102212464  ;;  %v7742_v56 = vsel %vm7732_vm15, %v7739_v1, %v7741_v61  ;;  %v7743_v34 = vsel %vm7731_vm2, %v7721_v43, %v7724_v32  ;;  %v7744_v62 = vsel %vm7734_vm13, %v7730_v7, 1326507024  ;;  %v4530_v32 = vpop.f32.mrf.mxu1 }
 0x528   :  { %vm12099_vm7 = vcmp.lt.s32.totalorder %v12098_v4, 0  ;;  %v12029_v60 = vmin.u32 %v5911_v31, %v17586_v36  ;;  %v7715_v6 = vshrl.u32 %v19273_v50, %v7714_v41  ;;  %v7745_v28 = vsel %vm7733_vm5, %v7727_v51, %v7744_v62 }
 0x529   :  { %v7746_v12 = vsel %vm7732_vm15, %v7743_v34, %v7745_v28  ;;  %v17616_v27 = vmul.u32.u64.low %v7747_v40, %v7742_v56  ;;  %v17617_v11 = vmul.u32.u64.high %v7747_v40, %v7742_v56, %v17616_v27  ;;  %v5958_v48 = vadd.s32 1, %v12032_v8  ;;  %v19509_v8 = vld [vmem:[#allocation28_spill] sm:$0xff] }
 0x52a   :  { %v7735_v3 = vsel %vm7731_vm2, %v7715_v6, %v7718_v53  ;;  %v7737_v16 = vsel %vm7733_vm5, %v7721_v43, %v7736_v46  ;;  %v17624_v58 = vmul.u32.u64.low %v7747_v40, %v7746_v12  ;;  %v17625_v41 = vmul.u32.u64.high %v7747_v40, %v7746_v12, %v17624_v58 }
 0x52b   :  { %v7566_v51 = vshll.u32 %v17368_v17, %v17515_v45  ;;  %v5820_v29 = vshll.u32 %v5819_v44, 23  ;;  %v5955_v14 = vand.u32 8388607, %v19208_v21  ;;  %vm5959_vm13 = vcmp.gt.s32.totalorder %v5958_v48, 0 }
 0x52c   :  { %v5815_v52 = vshll.u32 %v17410_v37, %v17546_v42  ;;  %v17634_v31 = vsel %vm12099_vm7, 0, %v12098_v4  ;;  %v5960_v53 = vsel %vm5959_vm13, %v5958_v48, 0  ;;  %v4564_v43 = vadd.f32 %v4530_v32, %v19509_v8 }
 0x52d   :  { %v5913_v7 = vclz %v12029_v60  ;;  %v7738_v1 = vsel %vm7732_vm15, %v7735_v3, %v7737_v16  ;;  %v7757_v17 = vadd.s32 1, %v17617_v11  ;;  %v5962_v45 = vand.u32 31, %v5960_v53  ;;  %v4488_v3 = vpop.f32.mrf.mxu0 }
 0x52e   :  { %v17641_v44 = vor.u32 %v17562_v5, %v7566_v51  ;;  %v19510_v33 = vshll.u32 %v17564_v13, 23  ;;  %v17648_v37 = vor.u32 %v17584_v30, %v5815_v52  ;;  %v17652_v42 = vadd.s32 %v17415_v2, %v17423_v57 }
 0x52f   :  { %v17654_v4 = vor.u32 4788187, %v5820_v29  ;;  %vm7756_vm2 = vc.u32 %v17625_v41, %v17616_v27  ;;  %v5956_v25 = vor.u32 8388608, %v5955_v14  ;;  %v5963_v46 = vsub.s32 32, %v5962_v45 }
 0x530   :  { %v17645_v61 = vor.u32 4788187, %v19510_v33  ;;  %v7672_v5 = vsub.s32 4294967266, %v17634_v31  ;;  %v7754_v56 = vmul.u32 %v7747_v40, %v7738_v1  ;;  %v7758_v13 = vsel %vm7756_vm2, %v7757_v17, %v17617_v11  ;;  %v19512_v1 = vld [vmem:[#allocation39_spill] sm:$0xff] }
 0x531   :  { %v17661_v34 = vadd.f32 %v15304_v59, %v4564_v43  ;;  %v12030_v30 = vadd.s32 4294967294, %v5913_v7  ;;  %v5965_v62 = vshll.u32 %v19273_v50, %v5962_v45  ;;  %v5966_v2 = vshrl.u32 %v19274_v63, %v5963_v46 }
 0x532   :  { %v5969_v57 = vshrl.u32 %v19266_v39, %v5963_v46  ;;  %v17666_v60 = vadd.s32 %v7758_v13, %v7754_v56  ;;  %v5968_v6 = vshll.u32 %v19274_v63, %v5962_v45  ;;  %v5971_v28 = vshll.u32 %v19266_v39, %v5962_v45 }
 0x533   :  { %19511 = vst [vmem:[#allocation28_spill] sm:$0xff] %v17661_v34  ;;  %v5972_v40 = vshrl.u32 %v19267_v26, %v5963_v46  ;;  %v5822_v12 = vand.u32 2147483647, %v17654_v4  ;;  %v5961_v11 = vshrl.u32 %v5960_v53, 5  ;;  %v5974_v48 = vshll.u32 %v19267_v26, %v5962_v45 }
 0x534   :  { %v5975_v32 = vshrl.u32 %v19288_v9, %v5963_v46  ;;  %v7673_v16 = vadd.s32 127, %v7672_v5  ;;  %v5967_v58 = vor.u32 %v5966_v2, %v5965_v62  ;;  %v5970_v51 = vor.u32 %v5969_v57, %v5968_v6 }
 0x535   :  { %v5973_v29 = vor.u32 %v5972_v40, %v5971_v28  ;;  %v5977_v52 = vshll.u32 %v19288_v9, %v5962_v45  ;;  %v5978_v8 = vshrl.u32 %v19275_v47, %v5963_v46  ;;  %v5996_v43 = vshll.u32 %v5956_v25, 8 }
 0x536   :  { %v5976_v14 = vor.u32 %v5975_v32, %v5974_v48  ;;  %vm12031_vm5 = vcmp.lt.s32.totalorder %v12030_v30, 0  ;;  %v7760_v7 = vadd.s32 536870912, %v17666_v60  ;;  %v7805_v53 = vand.u32 2139095040, %v17661_v34 }
 0x537   :  { %v4547_v17 = vadd.f32 %v4488_v3, %v19512_v1  ;;  %v5964_v33 = vshrl.u32 %v19273_v50, %v5963_v46  ;;  %v5979_v4 = vor.u32 %v5978_v8, %v5977_v52  ;;  %vm5980_vm15 = vcmp.lt.s32.totalorder %v5961_v11, 1 }
 0x538   :  { %vm5983_vm7 = vcmp.lt.s32.totalorder %v5961_v11, 4  ;;  %vm5982_vm13 = vcmp.lt.s32.totalorder %v5961_v11, 3  ;;  %v5988_v56 = vsel %vm5980_vm15, %v5967_v58, %v5970_v51  ;;  %v5916_v45 = vsel %vm12031_vm5, 0, %v12030_v30 }
 0x539   :  { %v5985_v5 = vsel %vm5983_vm7, %v5973_v29, 2102212464  ;;  %v5989_v13 = vsel %vm5983_vm7, %v5976_v14, 920167782  ;;  %vm5981_vm2 = vcmp.lt.s32.totalorder %v5961_v11, 2  ;;  %v5992_v25 = vsel %vm5980_vm15, %v5970_v51, %v5973_v29 }
 0x53a   :  { %v5990_v62 = vsel %vm5982_vm13, %v5973_v29, %v5989_v13  ;;  %v17680_v2 = vshrl.u32 %v7760_v7, 30  ;;  %v5984_v57 = vsel %vm5980_vm15, %v5964_v33, %v5967_v58  ;;  %v5993_v28 = vsel %vm5983_vm7, %v5979_v4, 1326507024 }
 0x53b   :  { %v5991_v6 = vsel %vm5981_vm2, %v5988_v56, %v5990_v62  ;;  %v5986_v40 = vsel %vm5982_vm13, %v5970_v51, %v5985_v5  ;;  %v5994_v48 = vsel %vm5982_vm13, %v5976_v14, %v5993_v28  ;;  %v7668_v3 = vsub.s32 32, %v17634_v31 }
 0x53c   :  { %19513 = vst [vmem:[#allocation39_spill] sm:$0xff] %v17680_v2  ;;  %v17683_v46 = vmul.u32.u64.low %v5996_v43, %v5991_v6  ;;  %v17684_v32 = vmul.u32.u64.high %v5996_v43, %v5991_v6, %v17683_v46  ;;  %v7674_v52 = vshll.u32 %v7673_v16, 23  ;;  %v5995_v30 = vsel %vm5981_vm2, %v5992_v25, %v5994_v48 }
 0x53d   :  { %v7806_v8 = vshrl.u32 %v7805_v53, 23  ;;  %v5824_v29 = vcvt.s32.f32 %v17648_v37  ;;  %v5917_v7 = vsub.s32 32, %v5916_v45  ;;  %v5921_v33 = vsub.s32 4294967266, %v5916_v45 }
 0x53e   :  { %v17690_v1 = vmul.u32.u64.low %v5996_v43, %v5995_v30  ;;  %v17691_v58 = vmul.u32.u64.high %v5996_v43, %v5995_v30, %v17690_v1  ;;  %v7762_v51 = vshll.u32 %v17680_v2, 30  ;;  %v5987_v14 = vsel %vm5981_vm2, %v5984_v57, %v5986_v40 }
 0x53f   :  { %v12104_v4 = vadd.s32 4294967169, %v7806_v8  ;;  %v17695_v5 = vmul.f32 %v5824_v29, %v5822_v12  ;;  %v5901_v16 = vadd.s32 %v17507_v23, %v17519_v38  ;;  %v6006_v56 = vadd.s32 1, %v17684_v32 }
 0x540   :  { %v17701_v53 = vadd.f32 %v19382_v54, %v4547_v17  ;;  %v7669_v37 = vshll.u32 %v17495_v20, %v17634_v31  ;;  %v7670_v13 = vshrl.u32 %v17652_v42, %v7668_v3  ;;  %v17706_v62 = vor.u32 4788187, %v7674_v52 }
 0x541   :  { %v7812_v11 = vadd.s32 1, %v12104_v4  ;;  %v5919_v25 = vshrl.u32 %v5901_v16, %v5917_v7  ;;  %v6003_v57 = vmul.u32 %v5996_v43, %v5987_v14  ;;  %vm6005_vm5 = vc.u32 %v17691_v58, %v17683_v46 }
 0x542   :  { %v19207_v23 = vand.u32 2147483647, %v17661_v34  ;;  %v5922_v38 = vadd.s32 127, %v5921_v33  ;;  %v17712_v12 = vsub.s32 %v17666_v60, %v7762_v51  ;;  %v6007_v54 = vsel %vm6005_vm5, %v6006_v56, %v17684_v32 }
 0x543   :  { %vm7813_vm15 = vcmp.gt.s32.totalorder %v7812_v11, 0  ;;  %v5918_v20 = vshll.u32 %v17586_v36, %v5916_v45  ;;  %v6008_v31 = vadd.s32 %v6007_v54, %v6003_v57  ;;  %v6054_v17 = vand.u32 2139095040, %v17701_v53 }
 0x544   :  { %v7814_v42 = vsel %vm7813_vm15, %v7812_v11, 0  ;;  %v7573_v43 = vand.u32 2147483647, %v17645_v61  ;;  %v7575_v6 = vcvt.s32.f32 %v17641_v44  ;;  %v17720_v48 = vor.u32 %v7670_v13, %v7669_v37 }
 0x545   :  { %v7816_v40 = vand.u32 31, %v7814_v42  ;;  %v17723_v3 = vor.u32 %v5919_v25, %v5918_v20  ;;  %v6009_v32 = vadd.s32 536870912, %v6008_v31  ;;  %v5923_v52 = vshll.u32 %v5922_v38, 23 }
 0x546   :  { %v7765_v36 = vsub.s32 0, %v17712_v12  ;;  %v7809_v45 = vand.u32 8388607, %v19207_v23  ;;  %v6055_v1 = vshrl.u32 %v6054_v17, 23  ;;  %v7815_v56 = vshrl.u32 %v7814_v42, 5 }
 0x547   :  { %v7817_v30 = vsub.s32 32, %v7816_v40  ;;  %v17728_v8 = vshrl.u32 %v6009_v32, 30  ;;  %v7819_v29 = vshll.u32 %v19273_v50, %v7816_v40  ;;  %v7822_v7 = vshll.u32 %v19274_v63, %v7816_v40 }
 0x548   :  { %v7825_v14 = vshll.u32 %v19266_v39, %v7816_v40  ;;  %v7828_v37 = vshll.u32 %v19267_v26, %v7816_v40  ;;  %v5924_v11 = vor.u32 4788187, %v5923_v52  ;;  %v12101_v54 = vmin.u32 %v7765_v36, %v17712_v12 }
 0x549   :  { %v7820_v33 = vshrl.u32 %v19274_v63, %v7817_v30  ;;  %v7823_v51 = vshrl.u32 %v19266_v39, %v7817_v30  ;;  %v7826_v4 = vshrl.u32 %v19267_v26, %v7817_v30  ;;  %v6011_v16 = vshll.u32 %v17728_v8, 30 }
 0x54a   :  { %v7829_v13 = vshrl.u32 %v19288_v9, %v7817_v30  ;;  %v7810_v17 = vor.u32 8388608, %v7809_v45  ;;  %v7831_v23 = vshll.u32 %v19288_v9, %v7816_v40  ;;  %v7832_v21 = vshrl.u32 %v19275_v47, %v7817_v30 }
 0x54b   :  { %v7821_v25 = vor.u32 %v7820_v33, %v7819_v29  ;;  %v7824_v57 = vor.u32 %v7823_v51, %v7822_v7  ;;  %v7827_v38 = vor.u32 %v7826_v4, %v7825_v14  ;;  %v17740_v20 = vsub.s32 %v6008_v31, %v6011_v16 }
 0x54c   :  { %v7830_v32 = vor.u32 %v7829_v13, %v7828_v37  ;;  %v19211_v42 = vand.u32 2147483647, %v17701_v53  ;;  %v12036_v60 = vadd.s32 4294967169, %v6055_v1  ;;  %vm19215_vm7 = vcmp.lt.s32.totalorder %v17095_v15, 0  ;;  %v4490_v13 = vpop.f32.mrf.mxu0 }
 0x54d   :  { %v6014_v52 = vsub.s32 0, %v17740_v20  ;;  %vm7834_vm13 = vcmp.lt.s32.totalorder %v7815_v56, 1  ;;  %vm7836_vm2 = vcmp.lt.s32.totalorder %v7815_v56, 3  ;;  %vm7837_vm5 = vcmp.lt.s32.totalorder %v7815_v56, 4 }
 0x54e   :  { %vm19217_vm15 = vcmp.lt.s32.totalorder %v17237_v19, 0  ;;  %v7833_v31 = vor.u32 %v7832_v21, %v7831_v23  ;;  %v7839_v36 = vsel %vm7837_vm5, %v7827_v38, 2102212464  ;;  %v7842_v45 = vsel %vm7834_vm13, %v7821_v25, %v7824_v57 }
 0x54f   :  { %v7843_v29 = vsel %vm7837_vm5, %v7830_v32, 920167782  ;;  %v12033_v40 = vmin.u32 %v6014_v52, %v17740_v20  ;;  %v7818_v7 = vshrl.u32 %v19273_v50, %v7817_v30  ;;  %vm7835_vm10 = vcmp.lt.s32.totalorder %v7815_v56, 2 }
 0x550   :  { %v7844_v1 = vsel %vm7836_vm2, %v7827_v38, %v7843_v29  ;;  %v7846_v51 = vsel %vm7834_vm13, %v7824_v57, %v7827_v38  ;;  %v7847_v14 = vsel %vm7837_vm5, %v7833_v31, 1326507024  ;;  %v7850_v4 = vshll.u32 %v7810_v17, 8 }
 0x551   :  { %v7845_v33 = vsel %vm7835_vm10, %v7842_v45, %v7844_v1  ;;  %v6016_v16 = vclz %v12033_v40  ;;  %v7838_v21 = vsel %vm7834_vm13, %v7818_v7, %v7821_v25  ;;  %v7840_v23 = vsel %vm7836_vm2, %v7824_v57, %v7839_v36  ;;  %v19514_v57 = vld [vmem:[#allocation14_spill] sm:$0xff] }
 0x552   :  { %v7848_v37 = vsel %vm7836_vm2, %v7830_v32, %v7847_v14  ;;  %v17758_v30 = vmul.u32.u64.low %v7850_v4, %v7845_v33  ;;  %v17759_v28 = vmul.u32.u64.high %v7850_v4, %v7845_v33, %v17758_v30  ;;  %v6061_v29 = vadd.s32 1, %v12036_v60 }
 0x553   :  { %v7849_v52 = vsel %vm7835_vm10, %v7846_v51, %v7848_v37  ;;  %v5925_v45 = vand.u32 2147483647, %v5924_v11  ;;  %v12034_v1 = vadd.s32 4294967294, %v6016_v16  ;;  %v7678_v17 = vcvt.s32.f32 %v17720_v48 }
 0x554   :  { %v17762_v38 = vmul.u32.u64.low %v7850_v4, %v7849_v52  ;;  %v17763_v31 = vmul.u32.u64.high %v7850_v4, %v7849_v52, %v17762_v38  ;;  %v5927_v25 = vcvt.s32.f32 %v17723_v3  ;;  %vm6062_vm13 = vcmp.gt.s32.totalorder %v6061_v29, 0 }
 0x555   :  { %v4548_v32 = vadd.f32 %v4490_v13, %v19514_v57  ;;  %v7767_v36 = vclz %v12101_v54  ;;  %v7841_v40 = vsel %vm7835_vm10, %v7838_v21, %v7840_v23  ;;  %v6058_v7 = vand.u32 8388607, %v19211_v42 }
 0x556   :  { %v6063_v33 = vsel %vm6062_vm13, %v6061_v29, 0  ;;  %v19515_v60 = vxor.u32 2147483648, %v17534_v24  ;;  %vm12035_vm2 = vcmp.lt.s32.totalorder %v12034_v1, 0  ;;  %v7860_v48 = vadd.s32 1, %v17759_v28 }
 0x557   :  { %v6065_v3 = vand.u32 31, %v6063_v33  ;;  %v17783_v56 = vmul.f32 %v7575_v6, %v7573_v43  ;;  %v19516_v54 = vxor.u32 2147483648, %v17695_v5  ;;  %v17796_v16 = vmul.f32 %v5927_v25, %v5925_v45 }
 0x558   :  { %v17776_v11 = vsel %vm19215_vm7, %v19515_v60, %v17534_v24  ;;  %v19517_v24 = vand.u32 2147483647, %v17706_v62  ;;  %v7857_v21 = vmul.u32 %v7850_v4, %v7841_v40  ;;  %vm7859_vm10 = vc.u32 %v17763_v31, %v17758_v30 }
 0x559   :  { %v17790_v51 = vsel %vm19217_vm15, %v19516_v54, %v17695_v5  ;;  %v6066_v44 = vsub.s32 32, %v6065_v3  ;;  %v17801_v61 = vadd.f32 %v15304_v59, %v4548_v32  ;;  %v17803_v43 = vadd.s32 4294967294, %v7767_v36 }
 0x55a   :  { %v17794_v14 = vmul.f32 %v7678_v17, %v19517_v24  ;;  %v17805_v6 = vsel %vm12035_vm2, 0, %v12034_v1  ;;  %v7861_v5 = vsel %vm7859_vm10, %v7860_v48, %v17759_v28  ;;  %v6059_v23 = vor.u32 8388608, %v6058_v7 }
 0x55b   :  { %v7862_v62 = vadd.s32 %v7861_v5, %v7857_v21  ;;  %v6064_v37 = vshrl.u32 %v6063_v33, 5  ;;  %v6069_v13 = vshrl.u32 %v19274_v63, %v6066_v44  ;;  %v6072_v4 = vshrl.u32 %v19266_v39, %v6066_v44 }
 0x55c   :  { %19518 = vst [vmem:[#allocation14_spill] sm:$0xff] %v17794_v14  ;;  %v6068_v52 = vshll.u32 %v19273_v50, %v6065_v3  ;;  %v6071_v29 = vshll.u32 %v19274_v63, %v6065_v3  ;;  %v6074_v59 = vshll.u32 %v19266_v39, %v6065_v3  ;;  %v6075_v45 = vshrl.u32 %v19267_v26, %v6066_v44  ;;  %v19540_v14 = vld [vmem:[#allocation19_spill] sm:$0xff] }
 0x55d   :  { %v6004_v1 = vadd.s32 %v17683_v46, %v17691_v58  ;;  %v7863_v38 = vadd.s32 536870912, %v7862_v62  ;;  %v6077_v28 = vshll.u32 %v19267_v26, %v6065_v3  ;;  %v6078_v17 = vshrl.u32 %v19288_v9, %v6066_v44 }
 0x55e   :  { %v6024_v25 = vsub.s32 4294967266, %v17805_v6  ;;  %v6070_v57 = vor.u32 %v6069_v13, %v6068_v52  ;;  %v6073_v32 = vor.u32 %v6072_v4, %v6071_v29  ;;  %v6076_v36 = vor.u32 %v6075_v45, %v6074_v59 }
 0x55f   :  { %v17819_v40 = vshrl.u32 %v7863_v38, 30  ;;  %v6079_v7 = vor.u32 %v6078_v17, %v6077_v28  ;;  %v6080_v33 = vshll.u32 %v19288_v9, %v6065_v3  ;;  %v6081_v60 = vshrl.u32 %v19275_v47, %v6066_v44 }
 0x560   :  { %v6020_v48 = vsub.s32 32, %v17805_v6  ;;  %vm6086_vm5 = vcmp.lt.s32.totalorder %v6064_v37, 4  ;;  %v6099_v46 = vshll.u32 %v6059_v23, 8  ;;  %v6157_v58 = vand.u32 2139095040, %v17801_v61 }
 0x561   :  { %19519 = vst [vmem:[#allocation88_spill] sm:$0xff] %v17819_v40  ;;  %v7865_v54 = vshll.u32 %v17819_v40, 30  ;;  %v6082_v24 = vor.u32 %v6081_v60, %v6080_v33  ;;  %vm6083_vm13 = vcmp.lt.s32.totalorder %v6064_v37, 1  ;;  %v6088_v21 = vsel %vm6086_vm5, %v6076_v36, 2102212464 }
 0x562   :  { %v6067_v5 = vshrl.u32 %v19273_v50, %v6066_v44  ;;  %vm6085_vm2 = vcmp.lt.s32.totalorder %v6064_v37, 3  ;;  %v6091_v13 = vsel %vm6083_vm13, %v6070_v57, %v6073_v32  ;;  %v6092_v3 = vsel %vm6086_vm5, %v6079_v7, 920167782 }
 0x563   :  { %v6025_v4 = vadd.s32 127, %v6024_v25  ;;  %vm6084_vm10 = vcmp.lt.s32.totalorder %v6064_v37, 2  ;;  %v6093_v52 = vsel %vm6085_vm2, %v6076_v36, %v6092_v3  ;;  %v6095_v29 = vsel %vm6083_vm13, %v6073_v32, %v6076_v36 }
 0x564   :  { %v6087_v59 = vsel %vm6083_vm13, %v6067_v5, %v6070_v57  ;;  %v6089_v23 = vsel %vm6085_vm2, %v6073_v32, %v6088_v21  ;;  %v6094_v45 = vsel %vm6084_vm10, %v6091_v13, %v6093_v52  ;;  %v6096_v38 = vsel %vm6086_vm5, %v6082_v24, 1326507024  ;;  %v19523_v13 = vld [vmem:[#allocation18_spill] sm:$0xff] }
 0x565   :  { %vm19214_vm6 = vcmp.lt.s32.totalorder %v17335_v18, 0  ;;  %v17832_v28 = vsub.s32 %v7862_v62, %v7865_v54  ;;  %v6097_v17 = vsel %vm6085_vm2, %v6079_v7, %v6096_v38  ;;  %v19212_v60 = vand.u32 2147483647, %v17801_v61 }
 0x566   :  { %v17834_v44 = vmul.u32.u64.low %v6099_v46, %v6094_v45  ;;  %v17835_v33 = vmul.u32.u64.high %v6099_v46, %v6094_v45, %v17834_v44  ;;  %v6098_v25 = vsel %vm6084_vm10, %v6095_v29, %v6097_v17  ;;  %v6158_v36 = vshrl.u32 %v6157_v58, 23  ;;  %v19524_v45 = vld [vmem:[#allocation53_spill] sm:$0xff] }
 0x567   :  { %v19520_v57 = vand.u32 2147483647, %v15472_v22  ;;  %vm12103_vm5 = vcmp.lt.s32.totalorder %v17803_v43, 0  ;;  %v6022_v62 = vshrl.u32 %v6004_v1, %v6020_v48  ;;  %v6026_v24 = vshll.u32 %v6025_v4, 23 }
 0x568   :  { %v17847_v54 = vmul.u32.u64.low %v6099_v46, %v6098_v25  ;;  %v17848_v7 = vmul.u32.u64.high %v6099_v46, %v6098_v25, %v17847_v54  ;;  %v6090_v21 = vsel %vm6084_vm10, %v6087_v59, %v6089_v23  ;;  %v12040_v5 = vadd.s32 4294967169, %v6158_v36 }
 0x569   :  { %vm17842_vm13 = vcmp.le.f32.partialorder %v19520_v57, 0.7853982  ;;  %v4798_v3 = vsub.s32 4, %v19523_v13  ;;  %v6021_v58 = vshll.u32 %v17740_v20, %v17805_v6  ;;  %v7868_v52 = vsub.s32 0, %v17832_v28 }
 0x56a   :  { %v6109_v29 = vadd.s32 1, %v17835_v33  ;;  %v4800_v1 = vsel %vm17842_vm13, %v15472_v22, %v19524_v45  ;;  %v5929_v37 = vxor.u32 2147483648, %v17796_v16  ;;  %v17863_v4 = vsel %vm12103_vm5, 0, %v17803_v43 }
 0x56b   :  { %v6164_v59 = vadd.s32 1, %v12040_v5  ;;  %v17865_v23 = vor.u32 %v6022_v62, %v6021_v58  ;;  %v6106_v20 = vmul.u32 %v6099_v46, %v6090_v21  ;;  %vm6108_vm2 = vc.u32 %v17848_v7, %v17834_v44 }
 0x56c   :  { %v6161_v6 = vand.u32 8388607, %v19212_v60  ;;  %v17871_v38 = vor.u32 4788187, %v6026_v24  ;;  %v6110_v17 = vsel %vm6108_vm2, %v6109_v29, %v17835_v33  ;;  %12883 = vsinq.f32 %v4800_v1 }
 0x56d   :  { %vm6165_vm10 = vcmp.gt.s32.totalorder %v6164_v59, 0  ;;  %v12105_v25 = vmin.u32 %v7868_v52, %v17832_v28  ;;  %v6111_v43 = vadd.s32 %v6110_v17, %v6106_v20  ;;  %v4799_v46 = vsel %vm4714_vm9, %v4798_v3, %v19523_v13 }
 0x56e   :  { %v6166_v36 = vsel %vm6165_vm10, %v6164_v59, 0  ;;  %v17881_v57 = vsel %vm19214_vm6, %v5929_v37, %v17796_v16  ;;  %v17885_v62 = vadd.s32 %v17616_v27, %v17625_v41  ;;  %12885 = vcosq.f32 %v4800_v1 }
 0x56f   :  { %v6168_v33 = vand.u32 31, %v6166_v36  ;;  %v7775_v24 = vsub.s32 4294967266, %v17863_v4  ;;  %v6112_v5 = vadd.s32 536870912, %v6111_v43  ;;  %v6028_v13 = vand.u32 2147483647, %v17871_v38 }
 0x570   :  { %v6162_v3 = vor.u32 8388608, %v6161_v6  ;;  %v17893_v16 = vsel %vm17842_vm13, 0, %v4799_v46  ;;  %v7870_v52 = vclz %v12105_v25  ;;  %v6167_v32 = vshrl.u32 %v6166_v36, 5 }
 0x571   :  { %v6169_v58 = vsub.s32 32, %v6168_v33  ;;  %v17895_v27 = vshrl.u32 %v6112_v5, 30  ;;  %v6171_v41 = vshll.u32 %v19273_v50, %v6168_v33  ;;  %v6174_v29 = vshll.u32 %v19274_v63, %v6168_v33 }
 0x572   :  { %v6177_v37 = vshll.u32 %v19266_v39, %v6168_v33  ;;  %v6180_v6 = vshll.u32 %v19267_v26, %v6168_v33  ;;  %v17906_v48 = vshll.u32 %v6162_v3, 8  ;;  %v4805_v60 = vand.u32 3, %v17893_v16 }
 0x573   :  { %v6172_v45 = vshrl.u32 %v19274_v63, %v6169_v58  ;;  %v6175_v1 = vshrl.u32 %v19266_v39, %v6169_v58  ;;  %v6178_v59 = vshrl.u32 %v19267_v26, %v6169_v58  ;;  %v6114_v20 = vshll.u32 %v17895_v27, 30 }
 0x574   :  { %v6181_v17 = vshrl.u32 %v19288_v9, %v6169_v58  ;;  %v19525_v39 = vand.u32 2147483647, %v15930_v49  ;;  %v17917_v36 = vadd.s32 4294967294, %v7870_v52  ;;  %v6183_v26 = vshll.u32 %v19288_v9, %v6168_v33 }
 0x575   :  { %v6173_v25 = vor.u32 %v6172_v45, %v6171_v41  ;;  %v6176_v46 = vor.u32 %v6175_v1, %v6174_v29  ;;  %v6179_v5 = vor.u32 %v6178_v59, %v6177_v37  ;;  %v17908_v42 = vsub.s32 %v6111_v43, %v6114_v20  ;;  %v19528_v29 = vld [vmem:[#allocation52_spill] sm:$0xff] }
 0x576   :  { %v6182_v63 = vor.u32 %v6181_v17, %v6180_v6  ;;  %vm17913_vm9 = vcmp.le.f32.partialorder %v19525_v39, 0.7853982  ;;  %v6184_v41 = vshrl.u32 %v19275_v47, %v6169_v58  ;;  %v5004_v3 = vsub.s32 4, %v19528_v29 }
 0x577   :  { %v6117_v43 = vsub.s32 0, %v17908_v42  ;;  %vm6186_vm13 = vcmp.lt.s32.totalorder %v6167_v32, 1  ;;  %vm6188_vm5 = vcmp.lt.s32.totalorder %v6167_v32, 3  ;;  %vm6189_vm2 = vcmp.lt.s32.totalorder %v6167_v32, 4 }
 0x578   :  { %v6185_v45 = vor.u32 %v6184_v41, %v6183_v26  ;;  %v6191_v1 = vsel %vm6189_vm2, %v6179_v5, 2102212464  ;;  %v6194_v37 = vsel %vm6186_vm13, %v6173_v25, %v6176_v46  ;;  %v6195_v59 = vsel %vm6189_vm2, %v6182_v63, 920167782 }
 0x579   :  { %v17924_v20 = vpop.eup %12883  ;;  %v12037_v52 = vmin.u32 %v6117_v43, %v17908_v42  ;;  %v6170_v9 = vshrl.u32 %v19273_v50, %v6169_v58  ;;  %vm6187_vm10 = vcmp.lt.s32.totalorder %v6167_v32, 2  ;;  %v6196_v47 = vsel %vm6188_vm5, %v6179_v5, %v6195_v59 }
 0x57a   :  { %v6197_v33 = vsel %vm6187_vm10, %v6194_v37, %v6196_v47  ;;  %v6198_v6 = vsel %vm6186_vm13, %v6176_v46, %v6179_v5  ;;  %v6199_v17 = vsel %vm6189_vm2, %v6185_v45, 1326507024  ;;  %v5005_v39 = vsel %vm4920_vm4, %v5004_v3, %v19528_v29 }
 0x57b   :  { %v17934_v26 = vpop.eup %12885  ;;  %v6119_v41 = vclz %v12037_v52  ;;  %v6190_v21 = vsel %vm6186_vm13, %v6170_v9, %v6173_v25  ;;  %v6192_v43 = vsel %vm6188_vm5, %v6176_v46, %v6191_v1  ;;  %v6200_v50 = vsel %vm6188_vm5, %v6182_v63, %v6199_v17  ;;  %v19529_v63 = vld [vmem:[#allocation67_spill] sm:$0xff] }
 0x57c   :  { %v6201_v58 = vsel %vm6187_vm10, %v6198_v6, %v6200_v50  ;;  %v17941_v37 = vmul.u32.u64.low %v17906_v48, %v6197_v33  ;;  %v17942_v59 = vmul.u32.u64.high %v17906_v48, %v6197_v33, %v17941_v37  ;;  %v4808_v5 = vxor.u32 2147483648, %v17924_v20 }
 0x57d   :  { %v12038_v45 = vadd.s32 4294967294, %v6119_v41  ;;  %v17946_v29 = vmul.u32.u64.low %v17906_v48, %v6201_v58  ;;  %v17947_v3 = vmul.u32.u64.high %v17906_v48, %v6201_v58, %v17946_v29  ;;  %vm4807_vm4 = vcmp.eq.s32.totalorder %v4805_v60, 0 }
 0x57e   :  { %v6193_v25 = vsel %vm6187_vm10, %v6190_v21, %v6192_v43  ;;  %vm4810_vm13 = vcmp.eq.s32.totalorder %v4805_v60, 2  ;;  %v4811_v46 = vxor.u32 2147483648, %v17934_v26  ;;  %v5006_v1 = vsel %vm17913_vm9, %v15930_v49, %v19529_v63 }
 0x57f   :  { %vm12039_vm5 = vcmp.lt.s32.totalorder %v12038_v45, 0  ;;  %v4809_v52 = vsel %vm4807_vm4, %v17934_v26, %v4808_v5  ;;  %v5007_v9 = vsel %vm17913_vm9, 0, %v5005_v39  ;;  %12887 = vcosq.f32 %v5006_v1 }
 0x580   :  { %v17958_v47 = vsel %vm12039_vm5, 0, %v12038_v45  ;;  %v6212_v32 = vadd.s32 1, %v17942_v59  ;;  %v4812_v21 = vsel %vm4810_vm13, %v4811_v46, %v17924_v20  ;;  %12889 = vsinq.f32 %v5006_v1 }
 0x581   :  { %v17966_v6 = vadd.s32 127, %v7775_v24  ;;  %v19530_v54 = vcvt.s32.f32 %v17865_v23  ;;  %v6127_v39 = vsub.s32 4294967266, %v17958_v47  ;;  %vm12107_vm9 = vcmp.lt.s32.totalorder %v17917_v36, 0 }
 0x582   :  { %v6209_v41 = vmul.u32 %v17906_v48, %v6193_v25  ;;  %vm6211_vm2 = vc.u32 %v17947_v3, %v17941_v37  ;;  %vm4806_vm10 = vcmp.lt.s32.totalorder %v4805_v60, 2  ;;  %v19531_v43 = vsub.s32 32, %v17863_v4 }
 0x583   :  { %v17972_v17 = vmul.f32 %v19530_v54, %v6028_v13  ;;  %v6213_v38 = vsel %vm6211_vm2, %v6212_v32, %v17942_v59  ;;  %v4813_v50 = vsel %vm4806_vm10, %v4809_v52, %v4812_v21  ;;  %v5011_v23 = vand.u32 3, %v5007_v9  ;;  %v19533_v54 = vld [vmem:[#allocation32_spill] sm:$0xff] }
 0x584   :  { %v17981_v24 = vshrl.u32 %v17885_v62, %v19531_v43  ;;  %v17984_v13 = vadd.s32 127, %v6127_v39  ;;  %v6214_v58 = vadd.s32 %v6213_v38, %v6209_v41  ;;  %v8102_v45 = vadd.s32 3, %v17893_v16  ;;  %v19534_v43 = vld [vmem:[#allocation16_spill] sm:$0xff]  ;;  %v19535_v38 = vld [vmem:[#allocation50_spill] sm:$0xff] }
 0x585   :  { %v8310_v29 = vadd.s32 3, %v5007_v9  ;;  %v17990_v60 = vsel %vm12107_vm9, 0, %v17917_v36  ;;  %vm4804_vm4 = vweird.f32 %v15472_v22  ;;  %v17995_v59 = vadd.s32 %v17941_v37, %v17947_v3  ;;  %v19532_v9 = vld [vmem:[#allocation51_spill] sm:$0xff] }
 0x586   :  { %v6215_v63 = vadd.s32 536870912, %v6214_v58  ;;  %v8103_v1 = vand.u32 3, %v8102_v45  ;;  %v4814_v16 = vsel %vm4804_vm4, nan, %v4813_v50  ;;  %vm5013_vm13 = vcmp.eq.s32.totalorder %v5011_v23, 0 }
 0x587   :  { %vm5016_vm5 = vcmp.eq.s32.totalorder %v5011_v23, 2  ;;  %v8311_v52 = vand.u32 3, %v8310_v29  ;;  %v4705_v32 = vxor.u32 2147483648, %v19532_v9  ;;  %vm5012_vm9 = vcmp.lt.s32.totalorder %v5011_v23, 2 }
 0x588   :  { %v18001_v21 = vshrl.u32 %v6215_v63, 30  ;;  %vm8105_vm2 = vcmp.eq.s32.totalorder %v8103_v1, 0  ;;  %vm8108_vm10 = vcmp.eq.s32.totalorder %v8103_v1, 2  ;;  %vm5010_vm12 = vweird.f32 %v15930_v49 }
 0x589   :  { %vm8104_vm6 = vcmp.lt.s32.totalorder %v8103_v1, 2  ;;  %v8107_v37 = vsel %vm8105_vm2, %v17934_v26, %v4808_v5  ;;  %v8110_v3 = vsel %vm8108_vm10, %v4811_v46, %v17924_v20  ;;  %vm4701_vm7 = vweird.f32 %v19533_v54  ;;  %v19536_v1 = vld [vmem:[#allocation37_spill] sm:$0xff] }
 0x58a   :  { %v6217_v39 = vshll.u32 %v18001_v21, 30  ;;  %v8111_v41 = vsel %vm8104_vm6, %v8107_v37, %v8110_v3  ;;  %vm4703_vm8 = vcmp.lt.s32.totalorder %v19534_v43, 2  ;;  %vm4704_vm15 = vcmp.eq.s32.totalorder %v19534_v43, 0  ;;  %v19537_v37 = vld [vmem:[#allocation66_spill] sm:$0xff] }
 0x58b   :  { %vm8312_vm14 = vcmp.lt.s32.totalorder %v8311_v52, 2  ;;  %v4706_v50 = vsel %vm4704_vm15, %v19535_v38, %v4705_v32  ;;  %vm4707_vm1 = vcmp.eq.s32.totalorder %v19534_v43, 2  ;;  %v4708_v45 = vxor.u32 2147483648, %v19535_v38 }
 0x58c   :  { %v12888_v29 = vpop.eup %12887  ;;  %v18013_v26 = vsub.s32 %v6214_v58, %v6217_v39  ;;  %v8112_v20 = vsel %vm4804_vm4, nan, %v8111_v41  ;;  %vm8313_vm2 = vcmp.eq.s32.totalorder %v8311_v52, 0  ;;  %vm8316_vm10 = vcmp.eq.s32.totalorder %v8311_v52, 2  ;;  %v19538_v39 = vld [vmem:[#allocation55_spill] sm:$0xff] }
 0x58d   :  { %v12890_v5 = vpop.eup %12889  ;;  %v5017_v46 = vxor.u32 2147483648, %v12888_v29  ;;  %v4709_v63 = vsel %vm4707_vm1, %v4708_v45, %v19532_v9  ;;  %vm4907_vm6 = vweird.f32 %v19536_v1  ;;  %v4911_v3 = vxor.u32 2147483648, %v19537_v37  ;;  %v19548_v1 = vld [vmem:[#allocation71_spill] sm:$0xff] }
 0x58e   :  { %v6220_v48 = vsub.s32 0, %v18013_v26  ;;  %v5014_v33 = vxor.u32 2147483648, %v12890_v5  ;;  %v4710_v58 = vsel %vm4703_vm8, %v4706_v50, %v4709_v63  ;;  %vm4909_vm15 = vcmp.lt.s32.totalorder %v19538_v39, 2  ;;  %v19539_v63 = vld [vmem:[#allocation62_spill] sm:$0xff] }
 0x58f   :  { %v5018_v22 = vsel %vm5016_vm5, %v5017_v46, %v12890_v5  ;;  %v8318_v41 = vsel %vm8316_vm10, %v5017_v46, %v12890_v5  ;;  %vm4910_vm4 = vcmp.eq.s32.totalorder %v19538_v39, 0  ;;  %vm4913_vm0 = vcmp.eq.s32.totalorder %v19538_v39, 2 }
 0x590   :  { %v12041_v36 = vmin.u32 %v6220_v48, %v18013_v26  ;;  %v5015_v62 = vsel %vm5013_vm13, %v12888_v29, %v5014_v33  ;;  %v8315_v25 = vsel %vm8313_vm2, %v12888_v29, %v5014_v33  ;;  %v4711_v2 = vsel %vm4701_vm7, nan, %v4710_v58 }
 0x591   :  { %v5019_v43 = vsel %vm5012_vm9, %v5015_v62, %v5018_v22  ;;  %v8319_v50 = vsel %vm8312_vm14, %v8315_v25, %v8318_v41  ;;  %v4912_v40 = vsel %vm4910_vm4, %v19539_v63, %v4911_v3  ;;  %v4914_v5 = vxor.u32 2147483648, %v19539_v63  ;;  %v19553_v22 = vld [vmem:[#allocation49_spill] sm:$0xff] }
 0x592   :  { %v6222_v46 = vclz %v12041_v36  ;;  %v5020_v34 = vsel %vm5010_vm12, nan, %v5019_v43  ;;  %v8320_v48 = vsel %vm5010_vm12, nan, %v8319_v50  ;;  %vm8001_vm1 = vcmp.eq.s32.totalorder %v19540_v14, 0  ;;  %v19546_v43 = vld [vmem:[#allocation73_spill] sm:$0xff] }
 0x593   :  { %v11234_v33 = vpack.c.bf16 %v5020_v34, %v4814_v16  ;;  %v11250_v29 = vpack.c.bf16 %v8320_v48, %v8112_v20  ;;  %v4915_v23 = vsel %vm4913_vm0, %v4914_v5, %v19537_v37  ;;  %v8003_v62 = vsel %vm8001_vm1, %v19535_v38, %v4705_v32  ;;  %v19541_v16 = vld [vmem:[#allocation59_spill] sm:$0xff] }
 0x594   :  { %v12042_v25 = vadd.s32 4294967294, %v6222_v46  ;;  %v4916_v52 = vsel %vm4909_vm15, %v4912_v40, %v4915_v23  ;;  %vm8000_vm8 = vcmp.lt.s32.totalorder %v19540_v14, 2  ;;  %vm8004_vm14 = vcmp.eq.s32.totalorder %v19540_v14, 2  ;;  %v19549_v23 = vld [vmem:[#allocation80_spill] sm:$0xff] }
 0x595   :  { %11560 = vmatprep.mubr.bf16.mxu1 %v11234_v33  ;;  %11657 = vmatprep.mubr.bf16.mxu0 %v11250_v29  ;;  %v4917_v49 = vsel %vm4907_vm6, nan, %v4916_v52  ;;  %v8006_v34 = vsel %vm8004_vm14, %v4708_v45, %v19532_v9  ;;  %vm8209_vm12 = vcmp.eq.s32.totalorder %v19541_v16, 0  ;;  %vm8212_vm0 = vcmp.eq.s32.totalorder %v19541_v16, 2 }
 0x596   :  { %vm5950_vm13 = vcmp.lt.s32.totalorder %v17530_v10, 0  ;;  %vm12043_vm5 = vcmp.lt.s32.totalorder %v12042_v25, 0  ;;  %v11233_v32 = vpack.c.bf16 %v4917_v49, %v4711_v2  ;;  %v8007_v40 = vsel %vm8000_vm8, %v8003_v62, %v8006_v34 }
 0x597   :  { %v8211_v36 = vsel %vm8209_vm12, %v19539_v63, %v4911_v3  ;;  %v6225_v38 = vsel %vm12043_vm5, 0, %v12042_v25  ;;  %v8008_v14 = vsel %vm4701_vm7, nan, %v8007_v40  ;;  %vm8208_vm9 = vcmp.lt.s32.totalorder %v19541_v16, 2  ;;  %v19545_v3 = vld [vmem:[#allocation61_spill] sm:$0xff] }
 0x598   :  { %v8214_v20 = vsel %vm8212_vm0, %v4914_v5, %v19537_v37  ;;  %v6226_v9 = vsub.s32 32, %v6225_v38  ;;  %v6230_v45 = vsub.s32 4294967266, %v6225_v38  ;;  %11561 = vmatmul.mubr.bf16.vlgmr.msra.gmra.mxu1 %v11233_v32  ;;  %v19542_v39 = vand.u32 2147483647, %v16300_v0 }
 0x599   :  { %v8215_v58 = vsel %vm8208_vm9, %v8211_v36, %v8214_v20  ;;  %v6227_v2 = vshll.u32 %v18013_v26, %v6225_v38  ;;  %v5210_v41 = vsub.s32 4, %v19545_v3  ;;  %v19547_v26 = vand.u32 2147483647, %v16648_v35 }
 0x59a   :  { %vm18060_vm2 = vcmp.le.f32.partialorder %v19542_v39, 0.7853982  ;;  %v8216_v54 = vsel %vm4907_vm6, nan, %v8215_v58  ;;  %v6228_v50 = vshrl.u32 %v17995_v59, %v6226_v9  ;;  %v6231_v63 = vadd.s32 127, %v6230_v45 }
 0x59b   :  { %v5212_v37 = vsel %vm18060_vm2, %v16300_v0, %v19546_v43  ;;  %v11249_v5 = vpack.c.bf16 %v8216_v54, %v8008_v14  ;;  %v5211_v46 = vsel %vm5126_vm3, %v5210_v41, %v19545_v3  ;;  %vm5331_vm7 = vcmp.le.f32.partialorder %v19547_v26, 0.7853982  ;;  %v19557_v54 = vld [vmem:[#allocation56_spill] sm:$0xff] }
 0x59c   :  { %12891 = vcosq.f32 %v5212_v37  ;;  %v5416_v48 = vsub.s32 4, %v19548_v1  ;;  %v7858_v33 = vadd.s32 %v17758_v30, %v17763_v31  ;;  %v6107_v29 = vadd.s32 %v17834_v44, %v17848_v7 }
 0x59d   :  { %12893 = vsinq.f32 %v5212_v37  ;;  %v6232_v59 = vshll.u32 %v6231_v63, 23  ;;  %11658 = vmatmul.mubr.bf16.vlgmr.msra.gmra.mxu0 %v11249_v5  ;;  %v5418_v62 = vsel %vm5331_vm7, %v16648_v35, %v19549_v23  ;;  %v6229_v25 = vor.u32 %v6228_v50, %v6227_v2  ;;  %v19558_v37 = vld [vmem:[#allocation69_spill] sm:$0xff]  ;;  %v19564_v23 = vld [vmem:[#allocation44_spill] sm:$0xff] }
 0x59e   :  { %v5213_v52 = vsel %vm18060_vm2, 0, %v5211_v46  ;;  %v5417_v49 = vsel %vm5332_vm11, %v5416_v48, %v19548_v1  ;;  %12895 = vcosq.f32 %v5418_v62  ;;  %v7874_v34 = vsub.s32 32, %v17990_v60 }
 0x59f   :  { %v6233_v30 = vor.u32 4788187, %v6232_v59  ;;  %v5419_v31 = vsel %vm5331_vm7, 0, %v5417_v49  ;;  %12897 = vsinq.f32 %v5418_v62  ;;  %v19550_v44 = vxor.u32 2147483648, %v17972_v17  ;;  %v19565_v49 = vld [vmem:[#allocation76_spill] sm:$0xff] }
 0x5a0   :  { %v7878_v16 = vsub.s32 4294967266, %v17990_v60  ;;  %v19551_v32 = vsub.s32 32, %v17958_v47  ;;  %v19552_v36 = vshll.u32 %v17984_v13, 23  ;;  %v5217_v20 = vand.u32 3, %v5213_v52 }
 0x5a1   :  { %v18096_v7 = vsel %vm5950_vm13, %v19550_v44, %v17972_v17  ;;  %v6234_v14 = vand.u32 2147483647, %v6233_v30  ;;  %v8518_v9 = vadd.s32 3, %v5213_v52  ;;  %v8726_v45 = vadd.s32 3, %v5419_v31 }
 0x5a2   :  { %v6125_v40 = vshrl.u32 %v6107_v29, %v19551_v32  ;;  %v18103_v38 = vor.u32 4788187, %v19552_v36  ;;  %v6236_v58 = vcvt.s32.f32 %v6229_v25  ;;  %v18105_v39 = vand.u32 3, %v5419_v31 }
 0x5a3   :  { %v19554_v2 = vand.u32 2147483647, %v19553_v22  ;;  %v5107_v3 = vsub.s32 4, %v19557_v54  ;;  %v7875_v13 = vshll.u32 %v17832_v28, %v17990_v60  ;;  %v18116_v41 = vshrl.u32 %v7858_v33, %v7874_v34  ;;  %v19560_v33 = vld [vmem:[#allocation26_spill] sm:$0xff] }
 0x5a4   :  { %v6124_v43 = vshll.u32 %v17908_v42, %v17958_v47  ;;  %v18124_v63 = vmul.f32 %v6236_v58, %v6234_v14  ;;  %v8519_v5 = vand.u32 3, %v8518_v9  ;;  %vm19559_vm11 = vcmp.lt.s32.totalorder %v19553_v22, 0  ;;  %v19582_v60 = vld [vmem:[#allocation74_spill] sm:$0xff] }
 0x5a5   :  { %vm18109_vm3 = vcmp.le.f32.partialorder %v19554_v2, 0.7853982  ;;  %v5108_v46 = vsel %vm19559_vm11, %v5107_v3, %v19557_v54  ;;  %v18129_v26 = vadd.s32 127, %v7878_v16  ;;  %v6131_v48 = vand.u32 2147483647, %v18103_v38 }
 0x5a6   :  { %v5109_v50 = vsel %vm18109_vm3, %v19553_v22, %v19558_v37  ;;  %v18131_v1 = vor.u32 %v6125_v40, %v6124_v43  ;;  %v8727_v42 = vand.u32 3, %v8726_v45  ;;  %vm5218_vm10 = vcmp.lt.s32.totalorder %v5217_v20, 2 }
 0x5a7   :  { %12899 = vcosq.f32 %v5109_v50  ;;  %vm5219_vm6 = vcmp.eq.s32.totalorder %v5217_v20, 0  ;;  %vm5222_vm15 = vcmp.eq.s32.totalorder %v5217_v20, 2  ;;  %vm5425_vm4 = vcmp.eq.s32.totalorder %v18105_v39, 0 }
 0x5a8   :  { %vm5216_vm1 = vweird.f32 %v16300_v0  ;;  %vm5424_vm8 = vcmp.lt.s32.totalorder %v18105_v39, 2  ;;  %v5110_v47 = vsel %vm18109_vm3, 0, %v5108_v46  ;;  %12901 = vsinq.f32 %v5109_v50 }
 0x5a9   :  { %v19561_v29 = vand.u32 2147483647, %v19560_v33  ;;  %v5313_v62 = vsub.s32 4, %v19564_v23  ;;  %v12892_v25 = vpop.eup %12891  ;;  %v6238_v52 = vxor.u32 2147483648, %v18124_v63  ;;  %vm5422_vm12 = vweird.f32 %v16648_v35 }
 0x5aa   :  { %vm5428_vm0 = vcmp.eq.s32.totalorder %v18105_v39, 2  ;;  %vm8520_vm5 = vcmp.lt.s32.totalorder %v8519_v5, 2  ;;  %v12894_v30 = vpop.eup %12893  ;;  %v5223_v31 = vxor.u32 2147483648, %v12892_v25  ;;  %vm8521_vm9 = vcmp.eq.s32.totalorder %v8519_v5, 0 }
 0x5ab   :  { %vm18141_vm14 = vcmp.le.f32.partialorder %v19561_v29, 0.7853982  ;;  %vm8524_vm2 = vcmp.eq.s32.totalorder %v8519_v5, 2  ;;  %vm8728_vm7 = vcmp.lt.s32.totalorder %v8727_v42, 2  ;;  %v5220_v44 = vxor.u32 2147483648, %v12894_v30  ;;  %v12896_v40 = vpop.eup %12895 }
 0x5ac   :  { %v5315_v34 = vsel %vm18141_vm14, %v19560_v33, %v19565_v49  ;;  %v18153_v16 = vand.u32 3, %v5110_v47  ;;  %vm19566_vm3 = vcmp.lt.s32.totalorder %v19560_v33, 0  ;;  %v5224_v36 = vsel %vm5222_vm15, %v5223_v31, %v12894_v30  ;;  %v12898_v45 = vpop.eup %12897 }
 0x5ad   :  { %v5314_v32 = vsel %vm19566_vm3, %v5313_v62, %v19564_v23  ;;  %12903 = vcosq.f32 %v5315_v34  ;;  %v8526_v14 = vsel %vm8524_vm2, %v5223_v31, %v12894_v30  ;;  %v8414_v9 = vadd.s32 3, %v5110_v47 }
 0x5ae   :  { %12905 = vsinq.f32 %v5315_v34  ;;  %v5221_v58 = vsel %vm5219_vm6, %v12892_v25, %v5220_v44  ;;  %v5429_v2 = vxor.u32 2147483648, %v12896_v40  ;;  %v8523_v17 = vsel %vm8521_vm9, %v12892_v25, %v5220_v44 }
 0x5af   :  { %v5316_v54 = vsel %vm18141_vm14, 0, %v5314_v32  ;;  %v5225_v3 = vsel %vm5218_vm10, %v5221_v58, %v5224_v36  ;;  %v5426_v43 = vxor.u32 2147483648, %v12898_v45  ;;  %vm8729_vm11 = vcmp.eq.s32.totalorder %v8727_v42, 0 }
 0x5b0   :  { %vm8732_vm3 = vcmp.eq.s32.totalorder %v8727_v42, 2  ;;  %v5430_v37 = vsel %vm5428_vm0, %v5429_v2, %v12898_v45  ;;  %v8527_v50 = vsel %vm8520_vm5, %v8523_v17, %v8526_v14  ;;  %v19567_v47 = vand.u32 2147483647, %v16959_v55  ;;  %v19570_v42 = vld [vmem:[#allocation47_spill] sm:$0xff] }
 0x5b1   :  { %v8734_v46 = vsel %vm8732_vm3, %v5429_v2, %v12898_v45  ;;  %v5427_v59 = vsel %vm5425_vm4, %v12896_v40, %v5426_v43  ;;  %v8731_v20 = vsel %vm8729_vm11, %v12896_v40, %v5426_v43  ;;  %v18174_v23 = vand.u32 3, %v5316_v54  ;;  %v19573_v2 = vld [vmem:[#allocation33_spill] sm:$0xff] }
 0x5b2   :  { %vm18168_vm15 = vcmp.le.f32.partialorder %v19567_v47, 0.7853982  ;;  %v8415_v62 = vand.u32 3, %v8414_v9  ;;  %v5226_v25 = vsel %vm5216_vm1, nan, %v5225_v3  ;;  %v5431_v5 = vsel %vm5424_vm8, %v5427_v59, %v5430_v37  ;;  %v19571_v9 = vld [vmem:[#allocation86_spill] sm:$0xff] }
 0x5b3   :  { %v8735_v49 = vsel %vm8728_vm7, %v8731_v20, %v8734_v46  ;;  %vm5115_vm10 = vcmp.lt.s32.totalorder %v18153_v16, 2  ;;  %vm5116_vm6 = vcmp.eq.s32.totalorder %v18153_v16, 0  ;;  %v5432_v30 = vsel %vm5422_vm12, nan, %v5431_v5 }
 0x5b4   :  { %v12900_v34 = vpop.eup %12899  ;;  %v8528_v31 = vsel %vm5216_vm1, nan, %v8527_v50  ;;  %v8736_v44 = vsel %vm5422_vm12, nan, %v8735_v49  ;;  %v8622_v32 = vadd.s32 3, %v5316_v54  ;;  %v11236_v40 = vpack.c.bf16 %v5432_v30, %v5226_v25 }
 0x5b5   :  { %v11252_v39 = vpack.c.bf16 %v8736_v44, %v8528_v31  ;;  %v5120_v36 = vxor.u32 2147483648, %v12900_v34  ;;  %v5622_v14 = vsub.s32 4, %v19570_v42  ;;  %vm5113_vm4 = vweird.f32 %v19553_v22  ;;  %v12902_v35 = vpop.eup %12901  ;;  %v19578_v22 = vld [vmem:[#allocation45_spill] sm:$0xff] }
 0x5b6   :  { %vm5119_vm8 = vcmp.eq.s32.totalorder %v18153_v16, 2  ;;  %vm5321_vm14 = vcmp.lt.s32.totalorder %v18174_v23, 2  ;;  %vm8416_vm0 = vcmp.lt.s32.totalorder %v8415_v62, 2  ;;  %v5624_v0 = vsel %vm18168_vm15, %v16959_v55, %v19571_v9  ;;  %11568 = vmatprep.mubr.bf16.mxu1 %v11236_v40 }
 0x5b7   :  { %11665 = vmatprep.mubr.bf16.mxu0 %v11252_v39  ;;  %vm5319_vm1 = vweird.f32 %v19560_v33  ;;  %v8623_v45 = vand.u32 3, %v8622_v32  ;;  %vm19572_vm12 = vcmp.lt.s32.totalorder %v16959_v55, 0  ;;  %12907 = vcosq.f32 %v5624_v0 }
 0x5b8   :  { %v5623_v58 = vsel %vm19572_vm12, %v5622_v14, %v19570_v42  ;;  %v5828_v17 = vsub.s32 4, %v19573_v2  ;;  %v5117_v54 = vxor.u32 2147483648, %v12902_v35  ;;  %vm5322_vm5 = vcmp.eq.s32.totalorder %v18174_v23, 0 }
 0x5b9   :  { %vm5325_vm9 = vcmp.eq.s32.totalorder %v18174_v23, 2  ;;  %vm8417_vm2 = vcmp.eq.s32.totalorder %v8415_v62, 0  ;;  %v5121_v3 = vsel %vm5119_vm8, %v5120_v36, %v12902_v35  ;;  %vm8420_vm7 = vcmp.eq.s32.totalorder %v8415_v62, 2 }
 0x5ba   :  { %12909 = vsinq.f32 %v5624_v0  ;;  %v19574_v43 = vand.u32 2147483647, %v17237_v19  ;;  %v12904_v50 = vpop.eup %12903  ;;  %vm6156_vm3 = vcmp.lt.s32.totalorder %v17801_v61, 0  ;;  %v5118_v46 = vsel %vm5116_vm6, %v12900_v34, %v5117_v54 }
 0x5bb   :  { %v8419_v47 = vsel %vm8417_vm2, %v12900_v34, %v5117_v54  ;;  %v8422_v59 = vsel %vm8420_vm7, %v5120_v36, %v12902_v35  ;;  %v5625_v20 = vsel %vm18168_vm15, 0, %v5623_v58  ;;  %v12906_v25 = vpop.eup %12905  ;;  %v5326_v5 = vxor.u32 2147483648, %v12904_v50 }
 0x5bc   :  { %vm18208_vm11 = vcmp.le.f32.partialorder %v19574_v43, 0.7853982  ;;  %vm8624_vm8 = vcmp.lt.s32.totalorder %v8623_v45, 2  ;;  %vm19577_vm12 = vcmp.lt.s32.totalorder %v17237_v19, 0  ;;  %v5122_v31 = vsel %vm5115_vm10, %v5118_v46, %v5121_v3 }
 0x5bd   :  { %v5829_v49 = vsel %vm19577_vm12, %v5828_v17, %v19573_v2  ;;  %v5830_v30 = vsel %vm18208_vm11, %v17237_v19, %v17790_v51  ;;  %v5323_v34 = vxor.u32 2147483648, %v12906_v25  ;;  %vm8625_vm6 = vcmp.eq.s32.totalorder %v8623_v45, 0 }
 0x5be   :  { %vm8628_vm2 = vcmp.eq.s32.totalorder %v8623_v45, 2  ;;  %v5327_v29 = vsel %vm5325_vm9, %v5326_v5, %v12906_v25  ;;  %v8423_v44 = vsel %vm8416_vm0, %v8419_v47, %v8422_v59  ;;  %v5629_v40 = vand.u32 3, %v5625_v20 }
 0x5bf   :  { %v8630_v32 = vsel %vm8628_vm2, %v5326_v5, %v12906_v25  ;;  %v5324_v39 = vsel %vm5322_vm5, %v12904_v50, %v5323_v34  ;;  %v8627_v36 = vsel %vm8625_vm6, %v12904_v50, %v5323_v34  ;;  %v5831_v51 = vsel %vm18208_vm11, 0, %v5829_v49 }
 0x5c0   :  { %12911 = vcosq.f32 %v5830_v30  ;;  %v5123_v16 = vsel %vm5113_vm4, nan, %v5122_v31  ;;  %v5328_v42 = vsel %vm5321_vm14, %v5324_v39, %v5327_v29  ;;  %v8631_v14 = vsel %vm8624_vm8, %v8627_v36, %v8630_v32 }
 0x5c1   :  { %12913 = vsinq.f32 %v5830_v30  ;;  %v5329_v62 = vsel %vm5319_vm1, nan, %v5328_v42  ;;  %v8424_v9 = vsel %vm5113_vm4, nan, %v8423_v44  ;;  %v8632_v0 = vsel %vm5319_vm1, nan, %v8631_v14 }
 0x5c2   :  { %v8934_v35 = vadd.s32 3, %v5625_v20  ;;  %v6133_v58 = vcvt.s32.f32 %v18131_v1  ;;  %v11235_v2 = vpack.c.bf16 %v5329_v62, %v5123_v16  ;;  %v11251_v17 = vpack.c.bf16 %v8632_v0, %v8424_v9  ;;  %v19588_v20 = vld [vmem:[#allocation36_spill] sm:$0xff] }
 0x5c3   :  { %v9142_v54 = vadd.s32 3, %v5831_v51  ;;  %v18249_v23 = vor.u32 %v18116_v41, %v7875_v13  ;;  %v7880_v45 = vshll.u32 %v18129_v26, 23  ;;  %v19579_v43 = vand.u32 2147483647, %v19578_v22  ;;  %v19583_v41 = vld [vmem:[#allocation82_spill] sm:$0xff] }
 0x5c4   :  { %v8935_v3 = vand.u32 3, %v8934_v35  ;;  %v18260_v1 = vmul.f32 %v6133_v58, %v6131_v48  ;;  %v18267_v28 = vsel %vm6156_vm3, %v6238_v52, %v18124_v63  ;;  %11569 = vmatmul.mubr.bf16.gmra.mxu1 %v11235_v2  ;;  %11666 = vmatmul.mubr.bf16.gmra.mxu0 %v11251_v17  ;;  %v5519_v13 = vsub.s32 4, %v19582_v60  ;;  %v12908_v50 = vpop.eup %12907 }
 0x5c5   :  { %vm18254_vm15 = vcmp.le.f32.partialorder %v19579_v43, 0.7853982  ;;  %vm5628_vm10 = vweird.f32 %v16959_v55  ;;  %vm5630_vm4 = vcmp.lt.s32.totalorder %v5629_v40, 2  ;;  %vm5631_vm14 = vcmp.eq.s32.totalorder %v5629_v40, 0 }
 0x5c6   :  { %v5521_v37 = vsel %vm18254_vm15, %v19578_v22, %v19583_v41  ;;  %vm5634_vm0 = vcmp.eq.s32.totalorder %v5629_v40, 2  ;;  %v5835_v38 = vand.u32 3, %v5831_v51  ;;  %v5635_v48 = vxor.u32 2147483648, %v12908_v50 }
 0x5c7   :  { %v9143_v46 = vand.u32 3, %v9142_v54  ;;  %vm19584_vm1 = vcmp.lt.s32.totalorder %v19578_v22, 0  ;;  %v19585_v52 = vand.u32 2147483647, %v17095_v15  ;;  %v12910_v59 = vpop.eup %12909  ;;  %vm8940_vm9 = vcmp.eq.s32.totalorder %v8935_v3, 2 }
 0x5c8   :  { %v5520_v63 = vsel %vm19584_vm1, %v5519_v13, %v19582_v60  ;;  %12915 = vcosq.f32 %v5521_v37  ;;  %v5725_v25 = vsub.s32 4, %v19588_v20  ;;  %v5632_v49 = vxor.u32 2147483648, %v12910_v59  ;;  %v19613_v60 = vld [vmem:[#allocation22_spill] sm:$0xff] }
 0x5c9   :  { %vm18280_vm5 = vcmp.le.f32.partialorder %v19585_v52, 0.7853982  ;;  %v5636_v30 = vsel %vm5634_vm0, %v5635_v48, %v12910_v59  ;;  %v5522_v31 = vsel %vm18254_vm15, 0, %v5520_v63  ;;  %12917 = vsinq.f32 %v5521_v37 }
 0x5ca   :  { %v5727_v5 = vsel %vm18280_vm5, %v17095_v15, %v17776_v11  ;;  %vm5834_vm7 = vweird.f32 %v17237_v19  ;;  %vm8937_vm11 = vcmp.eq.s32.totalorder %v8935_v3, 0  ;;  %v8942_v34 = vsel %vm8940_vm9, %v5635_v48, %v12910_v59 }
 0x5cb   :  { %vm19589_vm8 = vcmp.lt.s32.totalorder %v17095_v15, 0  ;;  %12919 = vcosq.f32 %v5727_v5  ;;  %v5633_v44 = vsel %vm5631_vm14, %v12908_v50, %v5632_v49  ;;  %v8939_v32 = vsel %vm8937_vm11, %v12908_v50, %v5632_v49 }
 0x5cc   :  { %v5726_v29 = vsel %vm19589_vm8, %v5725_v25, %v19588_v20  ;;  %12921 = vsinq.f32 %v5727_v5  ;;  %v5637_v39 = vsel %vm5630_vm4, %v5633_v44, %v5636_v30  ;;  %vm5836_vm12 = vcmp.lt.s32.totalorder %v5835_v38, 2 }
 0x5cd   :  { %v5728_v11 = vsel %vm18280_vm5, 0, %v5726_v29  ;;  %vm8936_vm6 = vcmp.lt.s32.totalorder %v8935_v3, 2  ;;  %v18299_v36 = vand.u32 3, %v5522_v31  ;;  %v12912_v51 = vpop.eup %12911  ;;  %vm5837_vm2 = vcmp.eq.s32.totalorder %v5835_v38, 0 }
 0x5ce   :  { %vm5840_vm15 = vcmp.eq.s32.totalorder %v5835_v38, 2  ;;  %v8943_v16 = vsel %vm8936_vm6, %v8939_v32, %v8942_v34  ;;  %vm9144_vm0 = vcmp.lt.s32.totalorder %v9143_v46, 2  ;;  %v12914_v42 = vpop.eup %12913  ;;  %v5841_v14 = vxor.u32 2147483648, %v12912_v51 }
 0x5cf   :  { %vm9145_vm1 = vcmp.eq.s32.totalorder %v9143_v46, 0  ;;  %v8830_v62 = vadd.s32 3, %v5522_v31  ;;  %v9038_v9 = vadd.s32 3, %v5728_v11  ;;  %v5638_v0 = vsel %vm5628_vm10, nan, %v5637_v39 }
 0x5d0   :  { %v5838_v35 = vxor.u32 2147483648, %v12914_v42  ;;  %vm9148_vm14 = vcmp.eq.s32.totalorder %v9143_v46, 2  ;;  %v5732_v40 = vand.u32 3, %v5728_v11  ;;  %v5842_v58 = vsel %vm5840_vm15, %v5841_v14, %v12914_v42 }
 0x5d1   :  { %v8944_v2 = vsel %vm5628_vm10, nan, %v8943_v16  ;;  %v9150_v17 = vsel %vm9148_vm14, %v5841_v14, %v12914_v42  ;;  %vm5528_vm4 = vcmp.eq.s32.totalorder %v18299_v36, 0  ;;  %vm5531_vm5 = vcmp.eq.s32.totalorder %v18299_v36, 2 }
 0x5d2   :  { %v5839_v54 = vsel %vm5837_vm2, %v12912_v51, %v5838_v35  ;;  %v9147_v3 = vsel %vm9145_vm1, %v12912_v51, %v5838_v35  ;;  %vm5527_vm9 = vcmp.lt.s32.totalorder %v18299_v36, 2  ;;  %v8831_v43 = vand.u32 3, %v8830_v62 }
 0x5d3   :  { %v19590_v33 = vand.u32 2147483647, %v17530_v10  ;;  %v5843_v55 = vsel %vm5836_vm12, %v5839_v54, %v5842_v58  ;;  %v9151_v13 = vsel %vm9144_vm0, %v9147_v3, %v9150_v17  ;;  %v9039_v41 = vand.u32 3, %v9038_v9 }
 0x5d4   :  { %v5844_v50 = vsel %vm5834_vm7, nan, %v5843_v55  ;;  %v9152_v48 = vsel %vm5834_vm7, nan, %v9151_v13  ;;  %vm5525_vm10 = vweird.f32 %v19578_v22  ;;  %vm5733_vm8 = vcmp.lt.s32.totalorder %v5732_v40, 2  ;;  %v19601_v55 = vld [vmem:[#allocation87_spill] sm:$0xff] }
 0x5d5   :  { %vm18311_vm11 = vcmp.le.f32.partialorder %v19590_v33, 0.7853982  ;;  %v6034_v38 = vsub.s32 4, %v17728_v8  ;;  %v11238_v63 = vpack.c.bf16 %v5844_v50, %v5638_v0  ;;  %v11254_v46 = vpack.c.bf16 %v9152_v48, %v8944_v2  ;;  %v12916_v52 = vpop.eup %12915 }
 0x5d6   :  { %v6036_v37 = vsel %vm18311_vm11, %v17530_v10, %v18096_v7  ;;  %vm5734_vm6 = vcmp.eq.s32.totalorder %v5732_v40, 0  ;;  %vm5737_vm2 = vcmp.eq.s32.totalorder %v5732_v40, 2  ;;  %vm8832_vm15 = vcmp.lt.s32.totalorder %v8831_v43, 2  ;;  %v12918_v7 = vpop.eup %12917 }
 0x5d7   :  { %vm8833_vm0 = vcmp.eq.s32.totalorder %v8831_v43, 0  ;;  %vm8836_vm1 = vcmp.eq.s32.totalorder %v8831_v43, 2  ;;  %12923 = vcosq.f32 %v6036_v37  ;;  %11576 = vmatprep.mubr.bf16.mxu1 %v11238_v63  ;;  %11673 = vmatprep.mubr.bf16.mxu0 %v11254_v46  ;;  %v5532_v19 = vxor.u32 2147483648, %v12916_v52 }
 0x5d8   :  { %vm9041_vm7 = vcmp.eq.s32.totalorder %v9039_v41, 0  ;;  %12925 = vsinq.f32 %v6036_v37  ;;  %v6240_v47 = vsub.s32 4, %v18001_v21  ;;  %v12920_v59 = vpop.eup %12919  ;;  %v5529_v20 = vxor.u32 2147483648, %v12918_v7 }
 0x5d9   :  { %vm9044_vm14 = vcmp.eq.s32.totalorder %v9039_v41, 2  ;;  %v6035_v25 = vsel %vm5950_vm13, %v6034_v38, %v17728_v8  ;;  %v19593_v5 = vand.u32 2147483647, %v17801_v61  ;;  %v12922_v30 = vpop.eup %12921  ;;  %v5533_v31 = vsel %vm5531_vm5, %v5532_v19, %v12918_v7 }
 0x5da   :  { %v5738_v34 = vxor.u32 2147483648, %v12920_v59  ;;  %v8838_v29 = vsel %vm8836_vm1, %v5532_v19, %v12918_v7  ;;  %v5530_v8 = vsel %vm5528_vm4, %v12916_v52, %v5529_v20  ;;  %v5735_v32 = vxor.u32 2147483648, %v12922_v30 }
 0x5db   :  { %vm18334_vm12 = vcmp.le.f32.partialorder %v19593_v5, 0.7853982  ;;  %v8835_v11 = vsel %vm8833_vm0, %v12916_v52, %v5529_v20  ;;  %v6241_v39 = vsel %vm6156_vm3, %v6240_v47, %v18001_v21  ;;  %v5534_v51 = vsel %vm5527_vm9, %v5530_v8, %v5533_v31 }
 0x5dc   :  { %v6242_v44 = vsel %vm18334_vm12, %v17801_v61, %v18267_v28  ;;  %v5739_v16 = vsel %vm5737_vm2, %v5738_v34, %v12922_v30  ;;  %v8839_v42 = vsel %vm8832_vm15, %v8835_v11, %v8838_v29  ;;  %v9046_v14 = vsel %vm9044_vm14, %v5738_v34, %v12922_v30 }
 0x5dd   :  { %v5736_v28 = vsel %vm5734_vm6, %v12920_v59, %v5735_v32  ;;  %vm9040_vm13 = vcmp.lt.s32.totalorder %v9039_v41, 2  ;;  %v9043_v62 = vsel %vm9041_vm7, %v12920_v59, %v5735_v32  ;;  %v6037_v9 = vsel %vm18311_vm11, 0, %v6035_v25 }
 0x5de   :  { %v5535_v0 = vsel %vm5525_vm10, nan, %v5534_v51  ;;  %v5740_v21 = vsel %vm5733_vm8, %v5736_v28, %v5739_v16  ;;  %v8840_v36 = vsel %vm5525_vm10, nan, %v8839_v42  ;;  %v9047_v35 = vsel %vm9040_vm13, %v9043_v62, %v9046_v14  ;;  %v19608_v28 = vld [vmem:[#allocation43_spill] sm:$0xff] }
 0x5df   :  { %vm19596_vm3 = vweird.f32 %v17095_v15  ;;  %v6243_v17 = vsel %vm18334_vm12, 0, %v6241_v39  ;;  %12927 = vcosq.f32 %v6242_v44  ;;  %v6135_v54 = vxor.u32 2147483648, %v18260_v1 }
 0x5e0   :  { %v5741_v58 = vsel %vm19596_vm3, nan, %v5740_v21  ;;  %vm19597_vm4 = vmmov %vm19596_vm3  ;;  %12929 = vsinq.f32 %v6242_v44  ;;  %v6041_v40 = vand.u32 3, %v6037_v9  ;;  %v9350_v33 = vadd.s32 3, %v6037_v9 }
 0x5e1   :  { %v9048_v2 = vsel %vm19597_vm4, nan, %v9047_v35  ;;  %v11237_v3 = vpack.c.bf16 %v5741_v58, %v5535_v0  ;;  %v19598_v22 = vand.u32 2147483647, %v17335_v18  ;;  %v5931_v15 = vsub.s32 4, %v19601_v55 }
 0x5e2   :  { %v11253_v43 = vpack.c.bf16 %v9048_v2, %v8840_v36  ;;  %v19602_v13 = vshll.u32 %v17712_v12, %v17863_v4  ;;  %vm6053_vm9 = vcmp.lt.s32.totalorder %v17701_v53, 0  ;;  %v9558_v37 = vadd.s32 3, %v6243_v17  ;;  %v19609_v36 = vld [vmem:[#allocation31_spill] sm:$0xff] }
 0x5e3   :  { %vm18373_vm5 = vcmp.le.f32.partialorder %v19598_v22, 0.7853982  ;;  %11577 = vmatmul.mubr.bf16.gmra.mxu1 %v11237_v3  ;;  %v19603_v48 = vshll.u32 %v17966_v6, 23  ;;  %v9351_v63 = vand.u32 3, %v9350_v33  ;;  %vm19604_vm11 = vcmp.lt.s32.totalorder %v17335_v18, 0 }
 0x5e4   :  { %v18382_v41 = vor.u32 %v17981_v24, %v19602_v13  ;;  %11674 = vmatmul.mubr.bf16.gmra.mxu0 %v11253_v43  ;;  %v5933_v50 = vsel %vm18373_vm5, %v17335_v18, %v17881_v57  ;;  %v5932_v12 = vsel %vm19604_vm11, %v5931_v15, %v19601_v55  ;;  %v12924_v4 = vpop.eup %12923  ;;  %v18398_v24 = vor.u32 4788187, %v7880_v45 }
 0x5e5   :  { %v18391_v38 = vor.u32 4788187, %v19603_v48  ;;  %12931 = vcosq.f32 %v5933_v50  ;;  %v7884_v46 = vcvt.s32.f32 %v18249_v23  ;;  %v6136_v57 = vsel %vm6053_vm9, %v6135_v54, %v18260_v1  ;;  %v12926_v6 = vpop.eup %12925 }
 0x5e6   :  { %12933 = vsinq.f32 %v5933_v50  ;;  %vm6043_vm10 = vcmp.eq.s32.totalorder %v6041_v40, 0  ;;  %vm6046_vm8 = vcmp.eq.s32.totalorder %v6041_v40, 2  ;;  %v6047_v52 = vxor.u32 2147483648, %v12924_v4 }
 0x5e7   :  { %v6247_v7 = vand.u32 3, %v6243_v17  ;;  %v6044_v19 = vxor.u32 2147483648, %v12926_v6  ;;  %v9559_v47 = vand.u32 3, %v9558_v37  ;;  %v5934_v59 = vsel %vm18373_vm5, 0, %v5932_v12 }
 0x5e8   :  { %v19605_v26 = vand.u32 2147483647, %v17701_v53  ;;  %v6048_v20 = vsel %vm6046_vm8, %v6047_v52, %v12926_v6  ;;  %vm9353_vm6 = vcmp.eq.s32.totalorder %v9351_v63, 0  ;;  %vm9356_vm2 = vcmp.eq.s32.totalorder %v9351_v63, 2 }
 0x5e9   :  { %v6137_v1 = vsub.s32 4, %v17895_v27  ;;  %v6045_v25 = vsel %vm6043_vm10, %v12924_v4, %v6044_v19  ;;  %v9355_v5 = vsel %vm9353_vm6, %v12924_v4, %v6044_v19  ;;  %v9358_v49 = vsel %vm9356_vm2, %v6047_v52, %v12926_v6 }
 0x5ea   :  { %vm18408_vm12 = vcmp.le.f32.partialorder %v19605_v26, 0.7853982  ;;  %v7882_v31 = vand.u32 2147483647, %v18398_v24  ;;  %vm6040_vm15 = vweird.f32 %v17530_v10  ;;  %vm6042_vm0 = vcmp.lt.s32.totalorder %v6041_v40, 2 }
 0x5eb   :  { %v6139_v30 = vsel %vm18408_vm12, %v17701_v53, %v6136_v57  ;;  %vm6246_vm1 = vweird.f32 %v17801_v61  ;;  %vm6248_vm7 = vcmp.lt.s32.totalorder %v6247_v7, 2  ;;  %vm9352_vm14 = vcmp.lt.s32.totalorder %v9351_v63, 2 }
 0x5ec   :  { %v18419_v34 = vand.u32 3, %v5934_v59  ;;  %v6138_v29 = vsel %vm6053_vm9, %v6137_v1, %v17895_v27  ;;  %v6049_v44 = vsel %vm6042_vm0, %v6045_v25, %v6048_v20  ;;  %v9359_v8 = vsel %vm9352_vm14, %v9355_v5, %v9358_v49  ;;  %v12928_v11 = vpop.eup %12927  ;;  %v19620_v5 = vld [vmem:[#allocation60_spill] sm:$0xff] }
 0x5ed   :  { %12935 = vcosq.f32 %v6139_v30  ;;  %v9246_v32 = vadd.s32 3, %v5934_v59  ;;  %vm6249_vm13 = vcmp.eq.s32.totalorder %v6247_v7, 0  ;;  %vm6252_vm3 = vcmp.eq.s32.totalorder %v6247_v7, 2  ;;  %v12930_v39 = vpop.eup %12929  ;;  %v19615_v7 = vld [vmem:[#allocation48_spill] sm:$0xff]  ;;  %v19619_v59 = vld [vmem:[#allocation30_spill] sm:$0xff] }
 0x5ee   :  { %vm9560_vm4 = vcmp.lt.s32.totalorder %v9559_v47, 2  ;;  %12937 = vsinq.f32 %v6139_v30  ;;  %v6253_v51 = vxor.u32 2147483648, %v12928_v11  ;;  %vm9561_vm5 = vcmp.eq.s32.totalorder %v9559_v47, 0 }
 0x5ef   :  { %vm9564_vm11 = vcmp.eq.s32.totalorder %v9559_v47, 2  ;;  %v6140_v16 = vsel %vm18408_vm12, 0, %v6138_v29  ;;  %v6050_v42 = vsel %vm6040_vm15, nan, %v6049_v44  ;;  %v6250_v27 = vxor.u32 2147483648, %v12930_v39 }
 0x5f0   :  { %v9360_v14 = vsel %vm6040_vm15, nan, %v9359_v8  ;;  %v6446_v62 = vsub.s32 4, %v19608_v28  ;;  %v6254_v9 = vsel %vm6252_vm3, %v6253_v51, %v12930_v39  ;;  %v9566_v0 = vsel %vm9564_vm11, %v6253_v51, %v12930_v39 }
 0x5f1   :  { %vm5939_vm9 = vcmp.lt.s32.totalorder %v18419_v34, 2  ;;  %v9247_v21 = vand.u32 3, %v9246_v32  ;;  %v19610_v35 = vand.u32 2147483647, %v19609_v36  ;;  %v6251_v17 = vsel %vm6249_vm13, %v12928_v11, %v6250_v27 }
 0x5f2   :  { %v12932_v2 = vpop.eup %12931  ;;  %v9563_v54 = vsel %vm9561_vm5, %v12928_v11, %v6250_v27  ;;  %v6144_v3 = vand.u32 3, %v6140_v16  ;;  %v9454_v10 = vadd.s32 3, %v6140_v16  ;;  %v6255_v40 = vsel %vm6248_vm7, %v6251_v17, %v6254_v9 }
 0x5f3   :  { %vm18434_vm10 = vcmp.le.f32.partialorder %v19610_v35, 0.7853982  ;;  %v12934_v43 = vpop.eup %12933  ;;  %v9567_v33 = vsel %vm9560_vm4, %v9563_v54, %v9566_v0  ;;  %v5944_v22 = vxor.u32 2147483648, %v12932_v2  ;;  %v6256_v15 = vsel %vm6246_vm1, nan, %v6255_v40  ;;  %v19622_v35 = vld [vmem:[#allocation34_spill] sm:$0xff]  ;;  %v19628_v40 = vld [vmem:[#allocation41_spill] sm:$0xff] }
 0x5f4   :  { %v6448_v55 = vsel %vm18434_vm10, %v19609_v36, %v19613_v60  ;;  %v9568_v13 = vsel %vm6246_vm1, nan, %v9567_v33  ;;  %v5941_v37 = vxor.u32 2147483648, %v12934_v43  ;;  %vm19614_vm8 = vcmp.lt.s32.totalorder %v19609_v36, 0  ;;  %v19626_v54 = vld [vmem:[#allocation42_spill] sm:$0xff] }
 0x5f5   :  { %v6447_v50 = vsel %vm19614_vm8, %v6446_v62, %v19608_v28  ;;  %v11240_v48 = vpack.c.bf16 %v6256_v15, %v6050_v42  ;;  %v11256_v63 = vpack.c.bf16 %v9568_v13, %v9360_v14  ;;  %vm5937_vm12 = vweird.f32 %v17335_v18  ;;  %v19634_v13 = vld [vmem:[#allocation15_spill] sm:$0xff] }
 0x5f6   :  { %vm5943_vm6 = vcmp.eq.s32.totalorder %v18419_v34, 2  ;;  %vm9252_vm2 = vcmp.eq.s32.totalorder %v9247_v21, 2  ;;  %vm5940_vm15 = vcmp.eq.s32.totalorder %v18419_v34, 0  ;;  %vm9249_vm0 = vcmp.eq.s32.totalorder %v9247_v21, 0 }
 0x5f7   :  { %v5945_v12 = vsel %vm5943_vm6, %v5944_v22, %v12934_v43  ;;  %v9254_v4 = vsel %vm9252_vm2, %v5944_v22, %v12934_v43  ;;  %11584 = vmatprep.mubr.bf16.mxu1 %v11240_v48  ;;  %11681 = vmatprep.mubr.bf16.mxu0 %v11256_v63  ;;  %v5942_v61 = vsel %vm5940_vm15, %v12932_v2, %v5941_v37  ;;  %vm6143_vm1 = vweird.f32 %v17701_v53 }
 0x5f8   :  { %v9251_v57 = vsel %vm9249_vm0, %v12932_v2, %v5941_v37  ;;  %v6449_v6 = vsel %vm18434_vm10, 0, %v6447_v50  ;;  %12939 = vcosq.f32 %v6448_v55  ;;  %vm6145_vm7 = vcmp.lt.s32.totalorder %v6144_v3, 2 }
 0x5f9   :  { %vm6146_vm14 = vcmp.eq.s32.totalorder %v6144_v3, 0  ;;  %v9455_v52 = vand.u32 3, %v9454_v10  ;;  %12941 = vsinq.f32 %v6448_v55  ;;  %vm6149_vm13 = vcmp.eq.s32.totalorder %v6144_v3, 2  ;;  %v19627_v10 = vld [vmem:[#allocation12_spill] sm:$0xff]  ;;  %v19633_v55 = vld [vmem:[#allocation38_spill] sm:$0xff] }
 0x5fa   :  { %vm9248_vm3 = vcmp.lt.s32.totalorder %v9247_v21, 2  ;;  %v19616_v19 = vand.u32 2147483647, %v19615_v7  ;;  %v6652_v26 = vsub.s32 4, %v19619_v59  ;;  %v12936_v45 = vpop.eup %12935  ;;  %v5946_v20 = vsel %vm5939_vm9, %v5942_v61, %v5945_v12 }
 0x5fb   :  { %v9255_v1 = vsel %vm9248_vm3, %v9251_v57, %v9254_v4  ;;  %v18467_v25 = vand.u32 3, %v6449_v6  ;;  %v12938_v30 = vpop.eup %12937  ;;  %v6150_v29 = vxor.u32 2147483648, %v12936_v45  ;;  %vm19621_vm5 = vcmp.lt.s32.totalorder %v19615_v7, 0 }
 0x5fc   :  { %vm18460_vm4 = vcmp.le.f32.partialorder %v19616_v19, 0.7853982  ;;  %v6653_v44 = vsel %vm19621_vm5, %v6652_v26, %v19619_v59  ;;  %v9766_v8 = vadd.s32 3, %v6449_v6  ;;  %v6147_v32 = vxor.u32 2147483648, %v12938_v30 }
 0x5fd   :  { %v6654_v49 = vsel %vm18460_vm4, %v19615_v7, %v19620_v5  ;;  %vm9456_vm11 = vcmp.lt.s32.totalorder %v9455_v52, 2  ;;  %vm9460_vm10 = vcmp.eq.s32.totalorder %v9455_v52, 2  ;;  %v6151_v34 = vsel %vm6149_vm13, %v6150_v29, %v12938_v30 }
 0x5fe   :  { %12943 = vcosq.f32 %v6654_v49  ;;  %vm9457_vm9 = vcmp.eq.s32.totalorder %v9455_v52, 0  ;;  %v9462_v11 = vsel %vm9460_vm10, %v6150_v29, %v12938_v30  ;;  %v6655_v39 = vsel %vm18460_vm4, 0, %v6653_v44 }
 0x5ff   :  { %12945 = vsinq.f32 %v6654_v49  ;;  %v5947_v51 = vsel %vm5937_vm12, nan, %v5946_v20  ;;  %v6148_v16 = vsel %vm6146_vm14, %v12936_v45, %v6147_v32  ;;  %v9256_v42 = vsel %vm5937_vm12, nan, %v9255_v1 }
 0x600   :  { %v9459_v27 = vsel %vm9457_vm9, %v12936_v45, %v6147_v32  ;;  %v6152_v14 = vsel %vm6145_vm7, %v6148_v16, %v6151_v34  ;;  %vm6455_vm8 = vcmp.eq.s32.totalorder %v18467_v25, 0  ;;  %v9767_v62 = vand.u32 3, %v9766_v8 }
 0x601   :  { %v9463_v28 = vsel %vm9456_vm11, %v9459_v27, %v9462_v11  ;;  %v6153_v9 = vsel %vm6143_vm1, nan, %v6152_v14  ;;  %vm6454_vm6 = vcmp.lt.s32.totalorder %v18467_v25, 2  ;;  %v9974_v21 = vadd.s32 3, %v6655_v39 }
 0x602   :  { %v9464_v0 = vsel %vm6143_vm1, nan, %v9463_v28  ;;  %v19623_v58 = vand.u32 2147483647, %v19622_v35  ;;  %v11239_v2 = vpack.c.bf16 %v6153_v9, %v5947_v51  ;;  %v6343_v3 = vsub.s32 4, %v19626_v54 }
 0x603   :  { %v11255_v17 = vpack.c.bf16 %v9464_v0, %v9256_v42  ;;  %vm6458_vm12 = vcmp.eq.s32.totalorder %v18467_v25, 2  ;;  %v6659_v53 = vand.u32 3, %v6655_v39  ;;  %v19629_v33 = vand.u32 2147483647, %v19628_v40 }
 0x604   :  { %vm18493_vm2 = vcmp.le.f32.partialorder %v19623_v58, 0.7853982  ;;  %11585 = vmatmul.mubr.bf16.gmra.mxu1 %v11239_v2  ;;  %vm6452_vm0 = vweird.f32 %v19609_v36  ;;  %vm19632_vm1 = vcmp.lt.s32.totalorder %v19622_v35, 0  ;;  %v6549_v15 = vsub.s32 4, %v19633_v55  ;;  %v19637_v36 = vld [vmem:[#allocation17_spill] sm:$0xff]  ;;  %v19663_v2 = vld [vmem:[#allocation14_spill] sm:$0xff] }
 0x605   :  { %v6345_v43 = vsel %vm18493_vm2, %v19622_v35, %v19627_v10  ;;  %vm18505_vm15 = vcmp.le.f32.partialorder %v19629_v33, 0.7853982  ;;  %11682 = vmatmul.mubr.bf16.gmra.mxu0 %v11255_v17  ;;  %v6344_v60 = vsel %vm19632_vm1, %v6343_v3, %v19626_v54  ;;  %v12940_v50 = vpop.eup %12939  ;;  %vm9768_vm7 = vcmp.lt.s32.totalorder %v9767_v62, 2  ;;  %v19641_v3 = vld [vmem:[#allocation68_spill] sm:$0xff] }
 0x606   :  { %12947 = vcosq.f32 %v6345_v43  ;;  %v6551_v37 = vsel %vm18505_vm15, %v19628_v40, %v19634_v13  ;;  %vm9769_vm14 = vcmp.eq.s32.totalorder %v9767_v62, 0  ;;  %v9975_v48 = vand.u32 3, %v9974_v21  ;;  %v12942_v12 = vpop.eup %12941  ;;  %v19644_v13 = vld [vmem:[#allocation24_spill] sm:$0xff] }
 0x607   :  { %12949 = vsinq.f32 %v6345_v43  ;;  %v6346_v63 = vsel %vm18493_vm2, 0, %v6344_v60  ;;  %v6459_v4 = vxor.u32 2147483648, %v12940_v50  ;;  %vm6658_vm13 = vweird.f32 %v19615_v7 }
 0x608   :  { %vm9772_vm3 = vcmp.eq.s32.totalorder %v9767_v62, 2  ;;  %vm19635_vm4 = vcmp.lt.s32.totalorder %v19628_v40, 0  ;;  %12951 = vcosq.f32 %v6551_v37  ;;  %v6456_v57 = vxor.u32 2147483648, %v12942_v12  ;;  %v19636_v62 = vld [vmem:[#allocation54_spill] sm:$0xff] }
 0x609   :  { %v6550_v61 = vsel %vm19635_vm4, %v6549_v15, %v19633_v55  ;;  %vm6660_vm5 = vcmp.lt.s32.totalorder %v6659_v53, 2  ;;  %vm6661_vm11 = vcmp.eq.s32.totalorder %v6659_v53, 0  ;;  %12953 = vsinq.f32 %v6551_v37  ;;  %v19643_v15 = vld [vmem:[#allocation23_spill] sm:$0xff] }
 0x60a   :  { %v6460_v6 = vsel %vm6458_vm12, %v6459_v4, %v12942_v12  ;;  %v9774_v52 = vsel %vm9772_vm3, %v6459_v4, %v12942_v12  ;;  %v18526_v19 = vand.u32 3, %v6346_v63  ;;  %v6552_v47 = vsel %vm18505_vm15, 0, %v6550_v61 }
 0x60b   :  { %v12944_v59 = vpop.eup %12943  ;;  %v6457_v26 = vsel %vm6455_vm8, %v12940_v50, %v6456_v57  ;;  %vm6664_vm10 = vcmp.eq.s32.totalorder %v6659_v53, 2  ;;  %v9771_v45 = vsel %vm9769_vm14, %v12940_v50, %v6456_v57  ;;  %vm9976_vm9 = vcmp.lt.s32.totalorder %v9975_v48, 2 }
 0x60c   :  { %v12946_v20 = vpop.eup %12945  ;;  %v6461_v1 = vsel %vm6454_vm6, %v6457_v26, %v6460_v6  ;;  %v6665_v5 = vxor.u32 2147483648, %v12944_v59  ;;  %vm9977_vm2 = vcmp.eq.s32.totalorder %v9975_v48, 0  ;;  %v9662_v49 = vadd.s32 3, %v6346_v63 }
 0x60d   :  { %v6662_v30 = vxor.u32 2147483648, %v12946_v20  ;;  %v9775_v29 = vsel %vm9768_vm7, %v9771_v45, %v9774_v52  ;;  %vm9980_vm12 = vcmp.eq.s32.totalorder %v9975_v48, 2  ;;  %v6556_v44 = vand.u32 3, %v6552_v47 }
 0x60e   :  { %v6666_v8 = vsel %vm6664_vm10, %v6665_v5, %v12946_v20  ;;  %v9982_v32 = vsel %vm9980_vm12, %v6665_v5, %v12946_v20  ;;  %vm6351_vm8 = vcmp.lt.s32.totalorder %v18526_v19, 2  ;;  %vm6352_vm15 = vcmp.eq.s32.totalorder %v18526_v19, 0  ;;  %v19645_v20 = vld [vmem:[#allocation57_spill] sm:$0xff] }
 0x60f   :  { %vm6355_vm1 = vcmp.eq.s32.totalorder %v18526_v19, 2  ;;  %v6462_v25 = vsel %vm6452_vm0, nan, %v6461_v1  ;;  %v6663_v34 = vsel %vm6661_vm11, %v12944_v59, %v6662_v30  ;;  %v9979_v11 = vsel %vm9977_vm2, %v12944_v59, %v6662_v30 }
 0x610   :  { %v9870_v39 = vadd.s32 3, %v6552_v47  ;;  %v6667_v51 = vsel %vm6660_vm5, %v6663_v34, %v6666_v8  ;;  %v9776_v16 = vsel %vm6452_vm0, nan, %v9775_v29  ;;  %v9983_v42 = vsel %vm9976_vm9, %v9979_v11, %v9982_v32  ;;  %v19649_v29 = vld [vmem:[#allocation65_spill] sm:$0xff] }
 0x611   :  { %vm6349_vm6 = vweird.f32 %v19622_v35  ;;  %v9663_v27 = vand.u32 3, %v9662_v49  ;;  %v6668_v14 = vsel %vm6658_vm13, nan, %v6667_v51  ;;  %v9984_v28 = vsel %vm6658_vm13, nan, %v9983_v42  ;;  %v19657_v42 = vld [vmem:[#allocation64_spill] sm:$0xff] }
 0x612   :  { %vm6557_vm7 = vcmp.lt.s32.totalorder %v6556_v44, 2  ;;  %v6858_v9 = vsub.s32 4, %v19636_v62  ;;  %v11242_v21 = vpack.c.bf16 %v6668_v14, %v6462_v25  ;;  %v11258_v58 = vpack.c.bf16 %v9984_v28, %v9776_v16  ;;  %v19658_v14 = vld [vmem:[#allocation79_spill] sm:$0xff] }
 0x613   :  { %v12948_v0 = vpop.eup %12947  ;;  %vm6555_vm14 = vweird.f32 %v19628_v40  ;;  %vm6558_vm0 = vcmp.eq.s32.totalorder %v6556_v44, 0  ;;  %v19638_v18 = vand.u32 2147483647, %v19637_v36  ;;  %vm6561_vm4 = vcmp.eq.s32.totalorder %v6556_v44, 2  ;;  %v19650_v44 = vld [vmem:[#allocation75_spill] sm:$0xff] }
 0x614   :  { %v12950_v17 = vpop.eup %12949  ;;  %v6356_v54 = vxor.u32 2147483648, %v12948_v0  ;;  %v9871_v7 = vand.u32 3, %v9870_v39  ;;  %11592 = vmatprep.mubr.bf16.mxu1 %v11242_v21  ;;  %11689 = vmatprep.mubr.bf16.mxu0 %v11258_v58  ;;  %vm9664_vm13 = vcmp.lt.s32.totalorder %v9663_v27, 2  ;;  %vm9665_vm5 = vcmp.eq.s32.totalorder %v9663_v27, 0  ;;  %v19652_v39 = vld [vmem:[#allocation13_spill] sm:$0xff] }
 0x615   :  { %vm18555_vm3 = vcmp.le.f32.partialorder %v19638_v18, 0.7853982  ;;  %v6353_v43 = vxor.u32 2147483648, %v12950_v17  ;;  %vm9668_vm11 = vcmp.eq.s32.totalorder %v9663_v27, 2  ;;  %v12952_v53 = vpop.eup %12951  ;;  %vm19642_vm10 = vcmp.lt.s32.totalorder %v19637_v36, 0  ;;  %v19662_v58 = vld [vmem:[#allocation29_spill] sm:$0xff] }
 0x616   :  { %v6860_v10 = vsel %vm18555_vm3, %v19637_v36, %v19641_v3  ;;  %v6357_v33 = vsel %vm6355_vm1, %v6356_v54, %v12950_v17  ;;  %v9670_v22 = vsel %vm9668_vm11, %v6356_v54, %v12950_v17  ;;  %v6859_v60 = vsel %vm19642_vm10, %v6858_v9, %v19636_v62  ;;  %v12954_v55 = vpop.eup %12953  ;;  %v19660_v9 = vld [vmem:[#allocation85_spill] sm:$0xff] }
 0x617   :  { %12955 = vcosq.f32 %v6860_v10  ;;  %vm7289_vm9 = vcmp.lt.s32.totalorder %v19643_v15, 0  ;;  %vm7392_vm2 = vcmp.lt.s32.totalorder %v19644_v13, 0  ;;  %v6354_v37 = vsel %vm6352_vm15, %v12948_v0, %v6353_v43 }
 0x618   :  { %v6562_v50 = vxor.u32 2147483648, %v12952_v53  ;;  %v9667_v48 = vsel %vm9665_vm5, %v12948_v0, %v6353_v43  ;;  %12957 = vsinq.f32 %v6860_v10  ;;  %v6358_v63 = vsel %vm6351_vm8, %v6354_v37, %v6357_v33 }
 0x619   :  { %v6559_v12 = vxor.u32 2147483648, %v12954_v55  ;;  %v9671_v4 = vsel %vm9664_vm13, %v9667_v48, %v9670_v22  ;;  %vm9876_vm12 = vcmp.eq.s32.totalorder %v9871_v7, 2  ;;  %vm9872_vm1 = vcmp.lt.s32.totalorder %v9871_v7, 2 }
 0x61a   :  { %v6563_v61 = vsel %vm6561_vm4, %v6562_v50, %v12954_v55  ;;  %vm9873_vm11 = vcmp.eq.s32.totalorder %v9871_v7, 0  ;;  %v9878_v57 = vsel %vm9876_vm12, %v6562_v50, %v12954_v55  ;;  %v6359_v6 = vsel %vm6349_vm6, nan, %v6358_v63  ;;  %v19667_v63 = vld [vmem:[#allocation21_spill] sm:$0xff] }
 0x61b   :  { %v6560_v52 = vsel %vm6558_vm0, %v12952_v53, %v6559_v12  ;;  %v9875_v47 = vsel %vm9873_vm11, %v12952_v53, %v6559_v12  ;;  %v6861_v59 = vsel %vm18555_vm3, 0, %v6859_v60  ;;  %v9672_v26 = vsel %vm6349_vm6, nan, %v9671_v4  ;;  %v19666_v60 = vld [vmem:[#allocation58_spill] sm:$0xff] }
 0x61c   :  { %v6564_v19 = vsel %vm6557_vm7, %v6560_v52, %v6563_v61  ;;  %v9879_v45 = vsel %vm9872_vm1, %v9875_v47, %v9878_v57  ;;  %v19646_v1 = vand.u32 2147483647, %v19645_v20  ;;  %v7064_v8 = vsub.s32 4, %v19649_v29 }
 0x61d   :  { %v6565_v49 = vsel %vm6555_vm14, nan, %v6564_v19  ;;  %v9880_v30 = vsel %vm6555_vm14, nan, %v9879_v45  ;;  %v18603_v32 = vmul.f32 %v7884_v46, %v7882_v31  ;;  %vm19651_vm15 = vcmp.lt.s32.totalorder %v19645_v20, 0  ;;  %v19656_v46 = vld [vmem:[#allocation25_spill] sm:$0xff] }
 0x61e   :  { %vm18586_vm8 = vcmp.le.f32.partialorder %v19646_v1, 0.7853982  ;;  %v11241_v25 = vpack.c.bf16 %v6565_v49, %v6359_v6  ;;  %v11257_v34 = vpack.c.bf16 %v9880_v30, %v9672_v26  ;;  %v7065_v40 = vsel %vm19651_vm15, %v7064_v8, %v19649_v29  ;;  %v19671_v6 = vld [vmem:[#allocation46_spill] sm:$0xff] }
 0x61f   :  { %v7066_v35 = vsel %vm18586_vm8, %v19645_v20, %v19650_v44  ;;  %v10182_v11 = vadd.s32 3, %v6861_v59  ;;  %v19653_v51 = vand.u32 2147483647, %v19652_v39  ;;  %v6865_v23 = vand.u32 3, %v6861_v59 }
 0x620   :  { %12959 = vcosq.f32 %v7066_v35  ;;  %11593 = vmatmul.mubr.bf16.gmra.mxu1 %v11241_v25  ;;  %11690 = vmatmul.mubr.bf16.gmra.mxu0 %v11257_v34  ;;  %v7067_v24 = vsel %vm18586_vm8, 0, %v7065_v40  ;;  %v6755_v31 = vsub.s32 4, %v19656_v46  ;;  %v19659_v28 = vxor.u32 2147483648, %v19658_v14 }
 0x621   :  { %12961 = vsinq.f32 %v7066_v35  ;;  %vm18610_vm6 = vcmp.le.f32.partialorder %v19653_v51, 0.7853982  ;;  %v19661_v0 = vxor.u32 2147483648, %v19660_v9  ;;  %vm19229_vm7 = vcmp.lt.s32.totalorder %v19662_v58, 0  ;;  %v19673_v51 = vld [vmem:[#allocation72_spill] sm:$0xff] }
 0x622   :  { %v6757_v27 = vsel %vm18610_vm6, %v19652_v39, %v19657_v42  ;;  %v18626_v62 = vsel %vm7289_vm9, %v19659_v28, %v19658_v14  ;;  %v7577_v18 = vxor.u32 2147483648, %v17783_v56  ;;  %v19664_v17 = vxor.u32 2147483648, %v19663_v2 }
 0x623   :  { %v18633_v21 = vsel %vm7392_vm2, %v19661_v0, %v19660_v9  ;;  %12963 = vcosq.f32 %v6757_v27  ;;  %v10183_v7 = vand.u32 3, %v10182_v11  ;;  %v7779_v3 = vand.u32 2147483647, %v18391_v38  ;;  %v19674_v0 = vld [vmem:[#allocation20_spill] sm:$0xff] }
 0x624   :  { %v18642_v54 = vsel %vm19229_vm7, %v19664_v17, %v19663_v2  ;;  %12965 = vsinq.f32 %v6757_v27  ;;  %v7781_v10 = vcvt.s32.f32 %v18382_v41  ;;  %v10390_v43 = vadd.s32 3, %v7067_v24  ;;  %v12956_v33 = vpop.eup %12955 }
 0x625   :  { %vm19665_vm14 = vcmp.lt.s32.totalorder %v19652_v39, 0  ;;  %v7886_v22 = vxor.u32 2147483648, %v18603_v32  ;;  %vm6864_vm0 = vweird.f32 %v19637_v36  ;;  %vm6867_vm3 = vcmp.eq.s32.totalorder %v6865_v23, 0  ;;  %v12958_v37 = vpop.eup %12957 }
 0x626   :  { %v6756_v53 = vsel %vm19665_vm14, %v6755_v31, %v19656_v46  ;;  %v6961_v55 = vsub.s32 4, %v19666_v60  ;;  %vm6870_vm4 = vcmp.eq.s32.totalorder %v6865_v23, 2  ;;  %v6871_v50 = vxor.u32 2147483648, %v12956_v33 }
 0x627   :  { %v7071_v48 = vand.u32 3, %v7067_v24  ;;  %v19668_v12 = vand.u32 2147483647, %v19667_v63  ;;  %v6868_v61 = vxor.u32 2147483648, %v12958_v37  ;;  %vm10188_vm5 = vcmp.eq.s32.totalorder %v10183_v7, 2 }
 0x628   :  { %v6758_v57 = vsel %vm18610_vm6, 0, %v6756_v53  ;;  %v6872_v47 = vsel %vm6870_vm4, %v6871_v50, %v12958_v37  ;;  %vm10185_vm10 = vcmp.eq.s32.totalorder %v10183_v7, 0  ;;  %v10190_v59 = vsel %vm10188_vm5, %v6871_v50, %v12958_v37  ;;  %v19679_v37 = vld [vmem:[#allocation81_spill] sm:$0xff] }
 0x629   :  { %vm18654_vm13 = vcmp.le.f32.partialorder %v19668_v12, 0.7853982  ;;  %v10391_v19 = vand.u32 3, %v10390_v43  ;;  %vm6866_vm12 = vcmp.lt.s32.totalorder %v6865_v23, 2  ;;  %v6869_v26 = vsel %vm6867_vm3, %v12956_v33, %v6868_v61 }
 0x62a   :  { %v6963_v52 = vsel %vm18654_vm13, %v19667_v63, %v19671_v6  ;;  %v10187_v45 = vsel %vm10185_vm10, %v12956_v33, %v6868_v61  ;;  %vm19672_vm1 = vcmp.lt.s32.totalorder %v19667_v63, 0  ;;  %vm7070_vm11 = vweird.f32 %v19645_v20 }
 0x62b   :  { %v6962_v1 = vsel %vm19672_vm1, %v6961_v55, %v19666_v60  ;;  %vm10184_vm8 = vcmp.lt.s32.totalorder %v10183_v7, 2  ;;  %v18669_v5 = vand.u32 3, %v6758_v57  ;;  %12967 = vcosq.f32 %v6963_v52 }
 0x62c   :  { %v6873_v49 = vsel %vm6866_vm12, %v6869_v26, %v6872_v47  ;;  %vm7072_vm15 = vcmp.lt.s32.totalorder %v7071_v48, 2  ;;  %v10191_v30 = vsel %vm10184_vm8, %v10187_v45, %v10190_v59  ;;  %12969 = vsinq.f32 %v6963_v52  ;;  %v19681_v26 = vld [vmem:[#allocation78_spill] sm:$0xff] }
 0x62d   :  { %v12960_v29 = vpop.eup %12959  ;;  %vm7073_vm6 = vcmp.eq.s32.totalorder %v7071_v48, 0  ;;  %vm7076_vm14 = vcmp.eq.s32.totalorder %v7071_v48, 2  ;;  %vm10392_vm4 = vcmp.lt.s32.totalorder %v10391_v19, 2  ;;  %v6964_v8 = vsel %vm18654_vm13, 0, %v6962_v1 }
 0x62e   :  { %v12962_v44 = vpop.eup %12961  ;;  %v7077_v35 = vxor.u32 2147483648, %v12960_v29  ;;  %vm10393_vm3 = vcmp.eq.s32.totalorder %v10391_v19, 0  ;;  %vm10396_vm5 = vcmp.eq.s32.totalorder %v10391_v19, 2  ;;  %v10078_v25 = vadd.s32 3, %v6758_v57  ;;  %v19680_v57 = vld [vmem:[#allocation28_spill] sm:$0xff] }
 0x62f   :  { %v6874_v34 = vsel %vm6864_vm0, nan, %v6873_v49  ;;  %v7074_v40 = vxor.u32 2147483648, %v12962_v44  ;;  %v10192_v11 = vsel %vm6864_vm0, nan, %v10191_v30  ;;  %vm6763_vm10 = vcmp.lt.s32.totalorder %v18669_v5, 2 }
 0x630   :  { %v7270_v16 = vsub.s32 4, %v19673_v51  ;;  %v12964_v23 = vpop.eup %12963  ;;  %v7078_v24 = vsel %vm7076_vm14, %v7077_v35, %v12962_v44  ;;  %v10398_v46 = vsel %vm10396_vm5, %v7077_v35, %v12962_v44  ;;  %v6968_v31 = vand.u32 3, %v6964_v8 }
 0x631   :  { %v10286_v42 = vadd.s32 3, %v6964_v8  ;;  %v12966_v27 = vpop.eup %12965  ;;  %v7075_v14 = vsel %vm7073_vm6, %v12960_v29, %v7074_v40  ;;  %v10395_v28 = vsel %vm10393_vm3, %v12960_v29, %v7074_v40  ;;  %v6768_v9 = vxor.u32 2147483648, %v12964_v23 }
 0x632   :  { %v19675_v2 = vand.u32 2147483647, %v19674_v0  ;;  %v7079_v36 = vsel %vm7072_vm15, %v7075_v14, %v7078_v24  ;;  %v10399_v7 = vsel %vm10392_vm4, %v10395_v28, %v10398_v46  ;;  %v6765_v43 = vxor.u32 2147483648, %v12966_v27 }
 0x633   :  { %v10079_v53 = vand.u32 3, %v10078_v25  ;;  %v7080_v33 = vsel %vm7070_vm11, nan, %v7079_v36  ;;  %v10400_v60 = vsel %vm7070_vm11, nan, %v10399_v7  ;;  %vm19678_vm0 = vcmp.lt.s32.totalorder %v19674_v0, 0  ;;  %v19687_v7 = vld [vmem:[#allocation70_spill] sm:$0xff] }
 0x634   :  { %vm18682_vm13 = vcmp.le.f32.partialorder %v19675_v2, 0.7853982  ;;  %v7271_v55 = vsel %vm19678_vm0, %v7270_v16, %v19673_v51  ;;  %v11244_v48 = vpack.c.bf16 %v7080_v33, %v6874_v34  ;;  %v11260_v12 = vpack.c.bf16 %v10400_v60, %v10192_v11 }
 0x635   :  { %v7272_v50 = vsel %vm18682_vm13, %v19674_v0, %v19679_v37  ;;  %vm6761_vm12 = vweird.f32 %v19652_v39  ;;  %vm6764_vm1 = vcmp.eq.s32.totalorder %v18669_v5, 0  ;;  %vm6767_vm8 = vcmp.eq.s32.totalorder %v18669_v5, 2 }
 0x636   :  { %v6766_v4 = vsel %vm6764_vm1, %v12964_v23, %v6765_v43  ;;  %v6769_v20 = vsel %vm6767_vm8, %v6768_v9, %v12966_v27  ;;  %vm6967_vm11 = vweird.f32 %v19667_v63  ;;  %vm6969_vm15 = vcmp.lt.s32.totalorder %v6968_v31, 2  ;;  %11600 = vmatprep.mubr.bf16.mxu1 %v11244_v48  ;;  %11697 = vmatprep.mubr.bf16.mxu0 %v11260_v12  ;;  %v19685_v63 = vld [vmem:[#allocation63_spill] sm:$0xff] }
 0x637   :  { %v10287_v61 = vand.u32 3, %v10286_v42  ;;  %vm7804_vm6 = vcmp.lt.s32.totalorder %v19680_v57, 0  ;;  %vm6970_vm14 = vcmp.eq.s32.totalorder %v6968_v31, 0  ;;  %vm6973_vm4 = vcmp.eq.s32.totalorder %v6968_v31, 2 }
 0x638   :  { %v7273_v6 = vsel %vm18682_vm13, 0, %v7271_v55  ;;  %12971 = vcosq.f32 %v7272_v50  ;;  %vm10080_vm3 = vcmp.lt.s32.totalorder %v10079_v53, 2  ;;  %vm10081_vm5 = vcmp.eq.s32.totalorder %v10079_v53, 0  ;;  %v12968_v52 = vpop.eup %12967 }
 0x639   :  { %vm10084_vm0 = vcmp.eq.s32.totalorder %v10079_v53, 2  ;;  %12973 = vsinq.f32 %v7272_v50  ;;  %v6770_v47 = vsel %vm6763_vm10, %v6766_v4, %v6769_v20  ;;  %v10083_v59 = vsel %vm10081_vm5, %v12964_v23, %v6765_v43  ;;  %v12970_v1 = vpop.eup %12969 }
 0x63a   :  { %v10086_v19 = vsel %vm10084_vm0, %v6768_v9, %v12966_v27  ;;  %v7476_v45 = vsub.s32 4, %v19681_v26  ;;  %v6974_v49 = vxor.u32 2147483648, %v12968_v52  ;;  %vm10288_vm1 = vcmp.lt.s32.totalorder %v10287_v61, 2 }
 0x63b   :  { %vm10289_vm8 = vcmp.eq.s32.totalorder %v10287_v61, 0  ;;  %v19682_v30 = vand.u32 2147483647, %v19644_v13  ;;  %v6971_v8 = vxor.u32 2147483648, %v12970_v1  ;;  %vm10292_vm7 = vcmp.eq.s32.totalorder %v10287_v61, 2 }
 0x63c   :  { %v7477_v5 = vsel %vm7392_vm2, %v7476_v45, %v19681_v26  ;;  %v6975_v35 = vsel %vm6973_vm4, %v6974_v49, %v12970_v1  ;;  %v10087_v25 = vsel %vm10080_vm3, %v10083_v59, %v10086_v19  ;;  %v10294_v34 = vsel %vm10292_vm7, %v6974_v49, %v12970_v1 }
 0x63d   :  { %vm18711_vm13 = vcmp.le.f32.partialorder %v19682_v30, 0.7853982  ;;  %v6972_v40 = vsel %vm6970_vm14, %v12968_v52, %v6971_v8  ;;  %v10291_v11 = vsel %vm10289_vm8, %v12968_v52, %v6971_v8  ;;  %v10598_v51 = vadd.s32 3, %v7273_v6 }
 0x63e   :  { %v7478_v44 = vsel %vm18711_vm13, %v19644_v13, %v18633_v21  ;;  %v6771_v16 = vsel %vm6761_vm12, nan, %v6770_v47  ;;  %v6976_v23 = vsel %vm6969_vm15, %v6972_v40, %v6975_v35  ;;  %v10295_v24 = vsel %vm10288_vm1, %v10291_v11, %v10294_v34 }
 0x63f   :  { %12975 = vcosq.f32 %v7478_v44  ;;  %v7479_v21 = vsel %vm18711_vm13, 0, %v7477_v5  ;;  %v6977_v46 = vsel %vm6967_vm11, nan, %v6976_v23  ;;  %v10088_v42 = vsel %vm6761_vm12, nan, %v10087_v25 }
 0x640   :  { %12977 = vsinq.f32 %v7478_v44  ;;  %v10296_v27 = vsel %vm6967_vm11, nan, %v10295_v24  ;;  %v7277_v14 = vand.u32 3, %v7273_v6  ;;  %v18741_v31 = vmul.f32 %v7781_v10, %v7779_v3  ;;  %v19688_v3 = vld [vmem:[#allocation35_spill] sm:$0xff] }
 0x641   :  { %v18748_v28 = vsel %vm7804_vm6, %v7886_v22, %v18603_v32  ;;  %v11243_v9 = vpack.c.bf16 %v6977_v46, %v6771_v16  ;;  %v11259_v39 = vpack.c.bf16 %v10296_v27, %v10088_v42  ;;  %v10599_v2 = vand.u32 3, %v10598_v51  ;;  %v19692_v22 = vld [vmem:[#allocation77_spill] sm:$0xff]  ;;  %v19697_v51 = vld [vmem:[#allocation84_spill] sm:$0xff] }
 0x642   :  { %v10806_v17 = vadd.s32 3, %v7479_v21  ;;  %v19686_v36 = vand.u32 2147483647, %v19685_v63  ;;  %v7167_v38 = vsub.s32 4, %v19687_v7  ;;  %v7483_v41 = vand.u32 3, %v7479_v21 }
 0x643   :  { %11601 = vmatmul.mubr.bf16.gmra.mxu1 %v11243_v9  ;;  %11698 = vmatmul.mubr.bf16.gmra.mxu0 %v11259_v39  ;;  %v19689_v43 = vand.u32 2147483647, %v19643_v15  ;;  %v7373_v53 = vsub.s32 4, %v19692_v22  ;;  %vm7278_vm10 = vcmp.lt.s32.totalorder %v7277_v14, 2  ;;  %vm19693_vm12 = vcmp.lt.s32.totalorder %v19685_v63, 0 }
 0x644   :  { %vm7082_vm2 = vcmp.le.f32.partialorder %v19686_v36, 0.7853982  ;;  %v7168_v33 = vsel %vm19693_vm12, %v7167_v38, %v19687_v7  ;;  %vm7279_vm11 = vcmp.eq.s32.totalorder %v7277_v14, 0  ;;  %vm7276_vm15 = vweird.f32 %v19674_v0  ;;  %v19698_v7 = vld [vmem:[#allocation27_spill] sm:$0xff] }
 0x645   :  { %v7169_v10 = vsel %vm7082_vm2, %v19685_v63, %v19688_v3  ;;  %vm18757_vm7 = vcmp.le.f32.partialorder %v19689_v43, 0.7853982  ;;  %v12972_v55 = vpop.eup %12971  ;;  %v7170_v37 = vsel %vm7082_vm2, 0, %v7168_v33  ;;  %v7374_v50 = vsel %vm7289_vm9, %v7373_v53, %v19692_v22 }
 0x646   :  { %12979 = vcosq.f32 %v7169_v10  ;;  %v7375_v60 = vsel %vm18757_vm7, %v19643_v15, %v18626_v62  ;;  %v12974_v48 = vpop.eup %12973  ;;  %vm7282_vm14 = vcmp.eq.s32.totalorder %v7277_v14, 2  ;;  %v7283_v12 = vxor.u32 2147483648, %v12972_v55 }
 0x647   :  { %12981 = vsinq.f32 %v7169_v10  ;;  %vm10600_vm4 = vcmp.lt.s32.totalorder %v10599_v2, 2  ;;  %v10807_v4 = vand.u32 3, %v10806_v17  ;;  %v7280_v20 = vxor.u32 2147483648, %v12974_v48 }
 0x648   :  { %vm7482_vm3 = vweird.f32 %v19644_v13  ;;  %vm7484_vm5 = vcmp.lt.s32.totalorder %v7483_v41, 2  ;;  %vm10601_vm0 = vcmp.eq.s32.totalorder %v10599_v2, 0  ;;  %12983 = vcosq.f32 %v7375_v60 }
 0x649   :  { %vm7485_vm1 = vcmp.eq.s32.totalorder %v7483_v41, 0  ;;  %v18774_v62 = vand.u32 3, %v7170_v37  ;;  %v7376_v61 = vsel %vm18757_vm7, 0, %v7374_v50  ;;  %12985 = vsinq.f32 %v7375_v60 }
 0x64a   :  { %v7281_v6 = vsel %vm7279_vm11, %v12972_v55, %v7280_v20  ;;  %v7284_v52 = vsel %vm7282_vm14, %v7283_v12, %v12974_v48  ;;  %vm7488_vm9 = vcmp.eq.s32.totalorder %v7483_v41, 2  ;;  %vm10604_vm8 = vcmp.eq.s32.totalorder %v10599_v2, 2 }
 0x64b   :  { %v10603_v59 = vsel %vm10601_vm0, %v12972_v55, %v7280_v20  ;;  %v10606_v19 = vsel %vm10604_vm8, %v7283_v12, %v12974_v48  ;;  %vm10808_vm13 = vcmp.lt.s32.totalorder %v10807_v4, 2  ;;  %v19694_v26 = vand.u32 2147483647, %v19662_v58 }
 0x64c   :  { %v12976_v47 = vpop.eup %12975  ;;  %vm10809_vm12 = vcmp.eq.s32.totalorder %v10807_v4, 0  ;;  %vm10812_vm7 = vcmp.eq.s32.totalorder %v10807_v4, 2  ;;  %v18785_v30 = vand.u32 3, %v7376_v61  ;;  %v7285_v29 = vsel %vm7278_vm10, %v7281_v6, %v7284_v52 }
 0x64d   :  { %vm18781_vm2 = vcmp.le.f32.partialorder %v19694_v26, 0.7853982  ;;  %v12978_v1 = vpop.eup %12977  ;;  %v7489_v49 = vxor.u32 2147483648, %v12976_v47  ;;  %vm7176_vm11 = vcmp.eq.s32.totalorder %v18774_v62, 0  ;;  %v10494_v5 = vadd.s32 3, %v7170_v37  ;;  %v19700_v37 = vld [vmem:[#allocation88_spill] sm:$0xff] }
 0x64e   :  { %v7486_v8 = vxor.u32 2147483648, %v12978_v1  ;;  %v10702_v44 = vadd.s32 3, %v7376_v61  ;;  %v10607_v25 = vsel %vm10600_vm4, %v10603_v59, %v10606_v19  ;;  %vm7175_vm14 = vcmp.lt.s32.totalorder %v18774_v62, 2 }
 0x64f   :  { %v7490_v35 = vsel %vm7488_vm9, %v7489_v49, %v12978_v1  ;;  %v10814_v34 = vsel %vm10812_vm7, %v7489_v49, %v12978_v1  ;;  %vm7179_vm0 = vcmp.eq.s32.totalorder %v18774_v62, 2  ;;  %v7682_v16 = vsub.s32 4, %v19697_v51 }
 0x650   :  { %v7487_v40 = vsel %vm7485_vm1, %v12976_v47, %v7486_v8  ;;  %v10811_v11 = vsel %vm10809_vm12, %v12976_v47, %v7486_v8  ;;  %v7684_v23 = vsel %vm18781_vm2, %v19662_v58, %v18642_v54  ;;  %v7286_v24 = vsel %vm7276_vm15, nan, %v7285_v29 }
 0x651   :  { %v7491_v21 = vsel %vm7484_vm5, %v7487_v40, %v7490_v35  ;;  %v10815_v46 = vsel %vm10808_vm13, %v10811_v11, %v10814_v34  ;;  %vm7173_vm10 = vweird.f32 %v19685_v63  ;;  %v10495_v42 = vand.u32 3, %v10494_v5 }
 0x652   :  { %v7492_v27 = vsel %vm7482_vm3, nan, %v7491_v21  ;;  %v10608_v14 = vsel %vm7276_vm15, nan, %v10607_v25  ;;  %v10816_v9 = vsel %vm7482_vm3, nan, %v10815_v46  ;;  %v10703_v54 = vand.u32 3, %v10702_v44 }
 0x653   :  { %v12980_v39 = vpop.eup %12979  ;;  %v11246_v2 = vpack.c.bf16 %v7492_v27, %v7286_v24  ;;  %v11262_v17 = vpack.c.bf16 %v10816_v9, %v10608_v14  ;;  %vm7379_vm4 = vweird.f32 %v19643_v15  ;;  %vm7381_vm5 = vcmp.lt.s32.totalorder %v18785_v30, 2  ;;  %v19712_v14 = vld [vmem:[#allocation39_spill] sm:$0xff] }
 0x654   :  { %12987 = vcosq.f32 %v7684_v23  ;;  %v12982_v36 = vpop.eup %12981  ;;  %vm7495_vm1 = vcmp.lt.s32.totalorder %v19698_v7, 0  ;;  %v7180_v38 = vxor.u32 2147483648, %v12980_v39  ;;  %vm7382_vm9 = vcmp.eq.s32.totalorder %v18785_v30, 0 }
 0x655   :  { %vm7385_vm15 = vcmp.eq.s32.totalorder %v18785_v30, 2  ;;  %vm19699_vm3 = vcmp.lt.s32.totalorder %v19662_v58, 0  ;;  %11608 = vmatprep.mubr.bf16.mxu1 %v11246_v2  ;;  %11705 = vmatprep.mubr.bf16.mxu0 %v11262_v17  ;;  %v7177_v0 = vxor.u32 2147483648, %v12982_v36  ;;  %vm10496_vm8 = vcmp.lt.s32.totalorder %v10495_v42, 2  ;;  %v12984_v41 = vpop.eup %12983 }
 0x656   :  { %v7683_v13 = vsel %vm19699_vm3, %v7682_v16, %v19697_v51  ;;  %vm10500_vm13 = vcmp.eq.s32.totalorder %v10495_v42, 2  ;;  %12989 = vsinq.f32 %v7684_v23  ;;  %v7181_v3 = vsel %vm7179_vm0, %v7180_v38, %v12982_v36  ;;  %v12986_v43 = vpop.eup %12985  ;;  %v19708_v51 = vld [vmem:[#allocation83_spill] sm:$0xff] }
 0x657   :  { %vm10497_vm12 = vcmp.eq.s32.totalorder %v10495_v42, 0  ;;  %v10502_v10 = vsel %vm10500_vm13, %v7180_v38, %v12982_v36  ;;  %vm10704_vm7 = vcmp.lt.s32.totalorder %v10703_v54, 2  ;;  %v7178_v32 = vsel %vm7176_vm11, %v12980_v39, %v7177_v0 }
 0x658   :  { %v7386_v22 = vxor.u32 2147483648, %v12984_v41  ;;  %v10499_v53 = vsel %vm10497_vm12, %v12980_v39, %v7177_v0  ;;  %vm10708_vm3 = vcmp.eq.s32.totalorder %v10703_v54, 2  ;;  %v7182_v33 = vsel %vm7175_vm14, %v7178_v32, %v7181_v3 }
 0x659   :  { %v7383_v60 = vxor.u32 2147483648, %v12986_v43  ;;  %v10503_v55 = vsel %vm10496_vm8, %v10499_v53, %v10502_v10  ;;  %v7888_v50 = vsub.s32 4, %v19700_v37  ;;  %vm10705_vm0 = vcmp.eq.s32.totalorder %v10703_v54, 0 }
 0x65a   :  { %v7387_v48 = vsel %vm7385_vm15, %v7386_v22, %v12986_v43  ;;  %v10710_v12 = vsel %vm10708_vm3, %v7386_v22, %v12986_v43  ;;  %v7685_v4 = vsel %vm18781_vm2, 0, %v7683_v13  ;;  %v7183_v20 = vsel %vm7173_vm10, nan, %v7182_v33 }
 0x65b   :  { %v7384_v61 = vsel %vm7382_vm9, %v12984_v41, %v7383_v60  ;;  %v10707_v62 = vsel %vm10705_vm0, %v12984_v41, %v7383_v60  ;;  %v19701_v6 = vand.u32 2147483647, %v19680_v57  ;;  %v10504_v59 = vsel %vm7173_vm10, nan, %v10503_v55 }
 0x65c   :  { %v7388_v47 = vsel %vm7381_vm5, %v7384_v61, %v7387_v48  ;;  %v10711_v19 = vsel %vm10704_vm7, %v10707_v62, %v10710_v12  ;;  %v7889_v49 = vsel %vm7804_vm6, %v7888_v50, %v19700_v37  ;;  %v7578_v63 = vsel %vm7495_vm1, %v7577_v18, %v17783_v56  ;;  %v19707_v18 = vld [vmem:[#allocation40_spill] sm:$0xff] }
 0x65d   :  { %vm18835_vm11 = vcmp.le.f32.partialorder %v19701_v6, 0.7853982  ;;  %v7389_v45 = vsel %vm7379_vm4, nan, %v7388_v47  ;;  %v10712_v1 = vsel %vm7379_vm4, nan, %v10711_v19  ;;  %v11014_v8 = vadd.s32 3, %v7685_v4 }
 0x65e   :  { %v7890_v26 = vsel %vm18835_vm11, %v19680_v57, %v18748_v28  ;;  %v11245_v30 = vpack.c.bf16 %v7389_v45, %v7183_v20  ;;  %v11261_v29 = vpack.c.bf16 %v10712_v1, %v10504_v59  ;;  %v7783_v28 = vxor.u32 2147483648, %v18741_v31 }
 0x65f   :  { %12991 = vcosq.f32 %v7890_v26  ;;  %v7891_v15 = vsel %vm18835_vm11, 0, %v7889_v49  ;;  %v19704_v5 = vand.u32 2147483647, %v19698_v7  ;;  %vm7701_vm2 = vcmp.lt.s32.totalorder %v19707_v18, 0 }
 0x660   :  { %12993 = vsinq.f32 %v7890_v26  ;;  %11609 = vmatmul.mubr.bf16.gmra.mxu1 %v11245_v30  ;;  %11706 = vmatmul.mubr.bf16.gmra.mxu0 %v11261_v29  ;;  %v7784_v34 = vsel %vm7701_vm2, %v7783_v28, %v18741_v31  ;;  %v7689_v40 = vand.u32 3, %v7685_v4  ;;  %v11222_v11 = vadd.s32 3, %v7891_v15 }
 0x661   :  { %vm18865_vm6 = vcmp.le.f32.partialorder %v19704_v5, 0.7853982  ;;  %v12988_v35 = vpop.eup %12987  ;;  %v7579_v16 = vsub.s32 4, %v19708_v51  ;;  %v11015_v24 = vand.u32 3, %v11014_v8  ;;  %v19709_v46 = vand.u32 2147483647, %v19707_v18 }
 0x662   :  { %v7581_v56 = vsel %vm18865_vm6, %v19698_v7, %v7578_v63  ;;  %v7695_v23 = vxor.u32 2147483648, %v12988_v35  ;;  %vm7688_vm10 = vweird.f32 %v19662_v58  ;;  %v7895_v27 = vand.u32 3, %v7891_v15 }
 0x663   :  { %12995 = vcosq.f32 %v7581_v56  ;;  %v12990_v25 = vpop.eup %12989  ;;  %vm18879_vm14 = vcmp.le.f32.partialorder %v19709_v46, 0.7853982  ;;  %v7785_v9 = vsub.s32 4, %v19712_v14  ;;  %vm7690_vm4 = vcmp.lt.s32.totalorder %v7689_v40, 2 }
 0x664   :  { %v7692_v21 = vxor.u32 2147483648, %v12990_v25  ;;  %12997 = vsinq.f32 %v7581_v56  ;;  %v7787_v31 = vsel %vm18879_vm14, %v19707_v18, %v7784_v34  ;;  %vm7694_vm5 = vcmp.eq.s32.totalorder %v7689_v40, 2 }
 0x665   :  { %v11223_v54 = vand.u32 3, %v11222_v11  ;;  %v7580_v39 = vsel %vm7495_vm1, %v7579_v16, %v19708_v51  ;;  %vm7691_vm9 = vcmp.eq.s32.totalorder %v7689_v40, 0  ;;  %v7696_v2 = vsel %vm7694_vm5, %v7695_v23, %v12990_v25 }
 0x666   :  { %vm11017_vm15 = vcmp.eq.s32.totalorder %v11015_v24, 0  ;;  %vm11020_vm8 = vcmp.eq.s32.totalorder %v11015_v24, 2  ;;  %v7693_v17 = vsel %vm7691_vm9, %v12988_v35, %v7692_v21  ;;  %12999 = vcosq.f32 %v7787_v31 }
 0x667   :  { %v11019_v36 = vsel %vm11017_vm15, %v12988_v35, %v7692_v21  ;;  %v11022_v38 = vsel %vm11020_vm8, %v7695_v23, %v12990_v25  ;;  %vm7897_vm13 = vcmp.eq.s32.totalorder %v7895_v27, 0  ;;  %v7582_v0 = vsel %vm18865_vm6, 0, %v7580_v39 }
 0x668   :  { %v7786_v41 = vsel %vm7701_vm2, %v7785_v9, %v19712_v14  ;;  %13001 = vsinq.f32 %v7787_v31  ;;  %vm7900_vm1 = vcmp.eq.s32.totalorder %v7895_v27, 2  ;;  %vm11016_vm12 = vcmp.lt.s32.totalorder %v11015_v24, 2  ;;  %v12285_v14 = vpop.f32.mrf.mxu1  ;;  %v18907_v9 = vpop.f32.mrf.mxu0 }
 0x669   :  { %vm11225_vm7 = vcmp.eq.s32.totalorder %v11223_v54, 0  ;;  %v7697_v43 = vsel %vm7690_vm4, %v7693_v17, %v7696_v2  ;;  %v11023_v22 = vsel %vm11016_vm12, %v11019_v36, %v11022_v38  ;;  %vm11228_vm3 = vcmp.eq.s32.totalorder %v11223_v54, 2 }
 0x66a   :  { %v7788_v60 = vsel %vm18879_vm14, 0, %v7786_v41  ;;  %v10910_v55 = vadd.s32 3, %v7582_v0  ;;  %vm7896_vm0 = vcmp.lt.s32.totalorder %v7895_v27, 2  ;;  %vm11224_vm11 = vcmp.lt.s32.totalorder %v11223_v54, 2  ;;  %v12286_v31 = vpop.f32.mrf.mxu1  ;;  %v18909_v54 = vpop.f32.mrf.mxu0 }
 0x66b   :  { %v7698_v12 = vsel %vm7688_vm10, nan, %v7697_v43  ;;  %vm7894_vm6 = vweird.f32 %v19680_v57  ;;  %v11024_v62 = vsel %vm7688_vm10, nan, %v11023_v22  ;;  %v11118_v52 = vadd.s32 3, %v7788_v60 }
 0x66c   :  { %v12992_v13 = vpop.eup %12991  ;;  %v7586_v19 = vand.u32 3, %v7582_v0  ;;  %v10911_v26 = vand.u32 3, %v10910_v55  ;;  %v7792_v63 = vand.u32 3, %v7788_v60  ;;  %v12288_v39 = vpop.f32.mrf.mxu1 }
 0x66d   :  { %v12994_v3 = vpop.eup %12993  ;;  %v7901_v10 = vxor.u32 2147483648, %v12992_v13  ;;  %v11119_v30 = vand.u32 3, %v11118_v52 }
 0x66e   :  { %v7898_v32 = vxor.u32 2147483648, %v12994_v3  ;;  %vm7588_vm2 = vcmp.eq.s32.totalorder %v7586_v19, 0  ;;  %vm7591_vm14 = vcmp.eq.s32.totalorder %v7586_v19, 2  ;;  %vm10913_vm4 = vcmp.eq.s32.totalorder %v10911_v26, 0 }
 0x66f   :  { %v7902_v53 = vsel %vm7900_vm1, %v7901_v10, %v12994_v3  ;;  %v11230_v33 = vsel %vm11228_vm3, %v7901_v10, %v12994_v3  ;;  %vm10916_vm5 = vcmp.eq.s32.totalorder %v10911_v26, 2  ;;  %vm7587_vm10 = vcmp.lt.s32.totalorder %v7586_v19, 2  ;;  %v18918_v3 = vld [vmem:[%s18993_s5] ss:$0 sm:$0xff]  ;;  %s13105_s5 = smov [#allocation8]  }
 0x670   :  { %v7899_v37 = vsel %vm7897_vm13, %v12992_v13, %v7898_v32  ;;  %v11227_v50 = vsel %vm11225_vm7, %v12992_v13, %v7898_v32  ;;  %v12996_v48 = vpop.eup %12995  ;;  %vm7794_vm9 = vcmp.eq.s32.totalorder %v7792_v63, 0  ;;  %vm7797_vm15 = vcmp.eq.s32.totalorder %v7792_v63, 2  ;;  %s11743_s15 = sshll.u32 %s13105_s5, 4  ;;  %s11744_s15 = int_to_ptr.vmem [resolvable:$true] %s11743_s15 }
 0x671   :  { %v7903_v4 = vsel %vm7896_vm0, %v7899_v37, %v7902_v53  ;;  %v11231_v20 = vsel %vm11224_vm11, %v11227_v50, %v11230_v33  ;;  %v12998_v45 = vpop.eup %12997  ;;  %v7592_v1 = vxor.u32 2147483648, %v12996_v48  ;;  %vm10912_vm8 = vcmp.lt.s32.totalorder %v10911_v26, 2  ;;  %s13066_s16 = scalar_lea.vmem %s11744_s15, 512  ;;  %p13071_p2 = scmp.lt.s32.totalorder %s11744_s15, %s11744_s15 }
 0x672   :  { %v7904_v61 = vsel %vm7894_vm6, nan, %v7903_v4  ;;  %v11232_v6 = vsel %vm7894_vm6, nan, %v11231_v20  ;;  %v7589_v49 = vxor.u32 2147483648, %v12998_v45  ;;  %vm11121_vm13 = vcmp.eq.s32.totalorder %v11119_v30, 0  ;;  %p13067_p1 = scmp.ne.s32.totalorder %s11744_s15, %s13066_s16  ;;  %p13072_p3 = scmp.lt.s32.totalorder %s13066_s16, %s13066_s16 }
 0x673   :  { %v11248_v47 = vpack.c.bf16 %v7904_v61, %v7698_v12  ;;  %v11264_v59 = vpack.c.bf16 %v11232_v6, %v11024_v62  ;;  %v13000_v57 = vpop.eup %12999  ;;  %v7593_v29 = vsel %vm7591_vm14, %v7592_v1, %v12998_v45  ;;  %v10918_v15 = vsel %vm10916_vm5, %v7592_v1, %v12998_v45 }
 0x674   :  { %v7590_v58 = vsel %vm7588_vm2, %v12996_v48, %v7589_v49  ;;  %v10915_v28 = vsel %vm10913_vm4, %v12996_v48, %v7589_v49  ;;  %v7798_v5 = vxor.u32 2147483648, %v13000_v57  ;;  %vm11124_vm1 = vcmp.eq.s32.totalorder %v11119_v30, 2  ;;  %p13073_p4 = por %p13072_p3, %p13071_p2 }
 0x675   :  { %11616 = vmatprep.mubr.bf16.mxu1 %v11248_v47  ;;  %11713 = vmatprep.mubr.bf16.mxu0 %v11264_v59  ;;  %v13002_v8 = vpop.eup %13001  ;;  %v7594_v35 = vsel %vm7587_vm10, %v7590_v58, %v7593_v29  ;;  %v10919_v25 = vsel %vm10912_vm8, %v10915_v28, %v10918_v15  ;;  %vm7793_vm12 = vcmp.lt.s32.totalorder %v7792_v63, 2  ;;  %vm11120_vm7 = vcmp.lt.s32.totalorder %v11119_v30, 2 }
 0x676   :  { %v7795_v44 = vxor.u32 2147483648, %v13002_v8  ;;  %v7799_v56 = vsel %vm7797_vm15, %v7798_v5, %v13002_v8  ;;  %v11126_v34 = vsel %vm11124_vm1, %v7798_v5, %v13002_v8  ;;  %vm7585_vm3 = vweird.f32 %v19698_v7  ;;  %v18911_v7 = vpop.f32.mrf.mxu0  ;;  %p13074_p5 = pnand %p13073_p4, %p13067_p1 }
 0x677   :  { %vm7791_vm0 = vweird.f32 %v19707_v18  ;;  %v7595_v23 = vsel %vm7585_vm3, nan, %v7594_v35  ;;  %v10920_v21 = vsel %vm7585_vm3, nan, %v10919_v25  ;;  %v12289_v18 = vpop.f32.mrf.mxu1 }
 0x678   :  { %v7796_v40 = vsel %vm7794_vm9, %v13000_v57, %v7795_v44  ;;  %v11123_v11 = vsel %vm11121_vm13, %v13000_v57, %v7795_v44  ;;  %v18913_v2 = vpop.f32.mrf.mxu0 }
 0x679   :  { %v7800_v51 = vsel %vm7793_vm12, %v7796_v40, %v7799_v56  ;;  %v11127_v16 = vsel %vm11120_vm7, %v11123_v11, %v11126_v34 }
 0x67a   :  { %v7801_v24 = vsel %vm7791_vm0, nan, %v7800_v51  ;;  %v11128_v46 = vsel %vm7791_vm0, nan, %v11127_v16  ;;  %v12287_v51 = vadd.f32 %v12286_v31, %v12285_v14 }
 0x67b   :  { %v11247_v42 = vpack.c.bf16 %v7801_v24, %v7595_v23  ;;  %v11263_v27 = vpack.c.bf16 %v11128_v46, %v10920_v21 }
 0x67d   :  { %11617 = vmatmul.mubr.bf16.gmra.mxu1 %v11247_v42  ;;  %11714 = vmatmul.mubr.bf16.gmra.mxu0 %v11263_v27  ;;  %v11563_v42 = vadd.f32 %v12287_v51, %v18918_v3  ;;  %v12290_v27 = vadd.f32 %v12289_v18, %v12288_v39 }
 0x684   :  { %v12291_v17 = vpop.f32.mrf.mxu1  ;;  %v12355_v36 = vpop.f32.mrf.mxu0 }
 0x686   :  { %v12292_v38 = vpop.f32.mrf.mxu1  ;;  %v12356_v13 = vpop.f32.mrf.mxu0 }
 0x687   :  { %v12293_v0 = vadd.f32 %v12292_v38, %v12291_v17  ;;  %v12357_v41 = vadd.f32 %v12356_v13, %v12355_v36  ;;  %v12351_v13 = vadd.f32 %v18909_v54, %v18907_v9 }
 0x688   :  { %v12294_v10 = vpop.f32.mrf.mxu1  ;;  %v12358_v43 = vpop.f32.mrf.mxu0 }
 0x689   :  { %v11571_v32 = vadd.f32 %v12293_v0, %v18918_v3 }
 0x68a   :  { %v12295_v22 = vpop.f32.mrf.mxu1  ;;  %v12359_v53 = vpop.f32.mrf.mxu0 }
 0x68b   :  { %v18921_v33 = vadd.f32 %v12357_v41, %v11571_v32  ;;  %v12296_v60 = vadd.f32 %v12295_v22, %v12294_v10  ;;  %v12360_v55 = vadd.f32 %v12359_v53, %v12358_v43  ;;  %v11660_v43 = vadd.f32 %v12351_v13, %v11563_v42 }
 0x68c   :  { %v11566_v32 = vadd.f32 %v12290_v27, %v18918_v3 }
 0x68d   :  { %v11574_v37 = vadd.f32 %v12296_v60, %v18918_v3 }
 0x68f   :  { %v18924_v50 = vadd.f32 %v12360_v55, %v11574_v37  ;;  %v12354_v37 = vadd.f32 %v18913_v2, %v18911_v7 }
 0x6a3   :  { %v12297_v48 = vpop.f32.mrf.mxu1 }
 0x6a4   :  { %v12361_v12 = vpop.f32.mrf.mxu0 }
 0x6a5   :  { %v12298_v4 = vpop.f32.mrf.mxu1 }
 0x6a6   :  { %v12362_v20 = vpop.f32.mrf.mxu0  ;;  %v12299_v34 = vadd.f32 %v12298_v4, %v12297_v48 }
 0x6a7   :  { %v12300_v61 = vpop.f32.mrf.mxu1  ;;  %v12363_v17 = vadd.f32 %v12362_v20, %v12361_v12 }
 0x6a8   :  { %v12364_v62 = vpop.f32.mrf.mxu0  ;;  %v11579_v23 = vadd.f32 %v12299_v34, %v18918_v3 }
 0x6a9   :  { %v12301_v6 = vpop.f32.mrf.mxu1 }
 0x6aa   :  { %v12365_v52 = vpop.f32.mrf.mxu0  ;;  %v12302_v46 = vadd.f32 %v12301_v6, %v12300_v61  ;;  %v11676_v0 = vadd.f32 %v12363_v17, %v11579_v23  ;;  %v11663_v6 = vadd.f32 %v12354_v37, %v11566_v32 }
 0x6ab   :  { %v12366_v60 = vadd.f32 %v12365_v52, %v12364_v62 }
 0x6ac   :  { %v11582_v31 = vadd.f32 %v12302_v46, %v18918_v3  ;;  %v11722_v9 = vmax.f32 %v11660_v43, %v11676_v0 }
 0x6ae   :  { %v11679_v12 = vadd.f32 %v12366_v60, %v11582_v31 }
 0x6c4   :  { %v18926_v47 = vpop.f32.mrf.mxu1 }
 0x6c5   :  { %v18928_v59 = vpop.f32.mrf.mxu0 }
 0x6c6   :  { %v18930_v19 = vpop.f32.mrf.mxu1 }
 0x6c7   :  { %v18932_v26 = vpop.f32.mrf.mxu0 }
 0x6c8   :  { %v18934_v45 = vpop.f32.mrf.mxu1  ;;  %v12369_v42 = vadd.f32 %v18932_v26, %v18928_v59 }
 0x6c9   :  { %v18936_v1 = vpop.f32.mrf.mxu0 }
 0x6ca   :  { %v18938_v49 = vpop.f32.mrf.mxu1 }
 0x6cb   :  { %v18940_v63 = vpop.f32.mrf.mxu0  ;;  %v12308_v46 = vadd.f32 %v18938_v49, %v18934_v45 }
 0x6cd   :  { %v11590_v0 = vadd.f32 %v12308_v46, %v18918_v3 }
 0x6e0   :  { %v12309_v30 = vpop.f32.mrf.mxu1  ;;  %v12373_v57 = vpop.f32.mrf.mxu0 }
 0x6e2   :  { %v12310_v58 = vpop.f32.mrf.mxu1  ;;  %v12374_v29 = vpop.f32.mrf.mxu0 }
 0x6e3   :  { %v12311_v16 = vadd.f32 %v12310_v58, %v12309_v30  ;;  %v12375_v10 = vadd.f32 %v12374_v29, %v12373_v57 }
 0x6e4   :  { %v12312_v28 = vpop.f32.mrf.mxu1  ;;  %v12376_v15 = vpop.f32.mrf.mxu0 }
 0x6e5   :  { %v11595_v36 = vadd.f32 %v12311_v16, %v18918_v3 }
 0x6e6   :  { %v12313_v8 = vpop.f32.mrf.mxu1  ;;  %v12377_v5 = vpop.f32.mrf.mxu0 }
 0x6e7   :  { %v12314_v38 = vadd.f32 %v12313_v8, %v12312_v28  ;;  %v11692_v39 = vadd.f32 %v12375_v10, %v11595_v36  ;;  %v12378_v4 = vadd.f32 %v12377_v5, %v12376_v15  ;;  %v11723_v28 = vmax.f32 %v11663_v6, %v11679_v12 }
 0x6e8   :  { %v12305_v15 = vadd.f32 %v18930_v19, %v18926_v47 }
 0x6e9   :  { %v11598_v18 = vadd.f32 %v12314_v38, %v18918_v3  ;;  %v11726_v58 = vmax.f32 %v11722_v9, %v11692_v39 }
 0x6ea   :  { %v11587_v23 = vadd.f32 %v12305_v15, %v18918_v3 }
 0x6eb   :  { %v11695_v62 = vadd.f32 %v12378_v4, %v11598_v18 }
 0x6ec   :  { %v11684_v36 = vadd.f32 %v12369_v42, %v11587_v23 }
 0x6ed   :  { %v11727_v2 = vmax.f32 %v11723_v28, %v11695_v62 }
 0x6ee   :  { %v11724_v26 = vmax.f32 %v18921_v33, %v11684_v36 }
 0x703   :  { %v12315_v44 = vpop.f32.mrf.mxu1  ;;  %v18942_v35 = vpop.f32.mrf.mxu0 }
 0x705   :  { %v12316_v56 = vpop.f32.mrf.mxu1  ;;  %v18944_v25 = vpop.f32.mrf.mxu0 }
 0x706   :  { %v12317_v5 = vadd.f32 %v12316_v56, %v12315_v44  ;;  %v12381_v47 = vadd.f32 %v18944_v25, %v18942_v35  ;;  %v12372_v56 = vadd.f32 %v18940_v63, %v18936_v1 }
 0x707   :  { %v12318_v40 = vpop.f32.mrf.mxu1  ;;  %v18946_v11 = vpop.f32.mrf.mxu0 }
 0x708   :  { %v11603_v27 = vadd.f32 %v12317_v5, %v18918_v3 }
 0x709   :  { %v12319_v24 = vpop.f32.mrf.mxu1  ;;  %v18949_v21 = vpop.f32.mrf.mxu0 }
 0x70a   :  { %v12320_v17 = vadd.f32 %v12319_v24, %v12318_v40  ;;  %v11700_v45 = vadd.f32 %v12381_v47, %v11603_v27 }
 0x70c   :  { %v11606_v49 = vadd.f32 %v12320_v17, %v18918_v3  ;;  %v11728_v43 = vmax.f32 %v11724_v26, %v11700_v45 }
 0x720   :  { %v12321_v41 = vpop.f32.mrf.mxu1  ;;  %v12385_v14 = vpop.f32.mrf.mxu0 }
 0x722   :  { %v12322_v22 = vpop.f32.mrf.mxu1  ;;  %v12386_v53 = vpop.f32.mrf.mxu0 }
 0x723   :  { %v12323_v55 = vadd.f32 %v12322_v22, %v12321_v41  ;;  %v12387_v61 = vadd.f32 %v12386_v53, %v12385_v14  ;;  %v11687_v41 = vadd.f32 %v12372_v56, %v11590_v0  ;;  %v12384_v14 = vadd.f32 %v18949_v21, %v18946_v11 }
 0x724   :  { %v12324_v54 = vpop.f32.mrf.mxu1  ;;  %v12388_v48 = vpop.f32.mrf.mxu0 }
 0x725   :  { %v11611_v20 = vadd.f32 %v12323_v55, %v18918_v3  ;;  %v11703_v32 = vadd.f32 %v12384_v14, %v11606_v49  ;;  %v11725_v22 = vmax.f32 %v18924_v50, %v11687_v41 }
 0x726   :  { %v12325_v30 = vpop.f32.mrf.mxu1  ;;  %v12389_v57 = vpop.f32.mrf.mxu0 }
 0x727   :  { %v11708_v52 = vadd.f32 %v12387_v61, %v11611_v20  ;;  %v12326_v29 = vadd.f32 %v12325_v30, %v12324_v54  ;;  %v12390_v7 = vadd.f32 %v12389_v57, %v12388_v48  ;;  %v11729_v39 = vmax.f32 %v11725_v22, %v11703_v32 }
 0x729   :  { %v11730_v8 = vmax.f32 %v11726_v58, %v11708_v52  ;;  %v11614_v34 = vadd.f32 %v12326_v29, %v18918_v3 }
 0x72b   :  { %11734 = vst [vmem:[#allocation8] sm:$0xff] %v11730_v8  ;;  %v11711_v51 = vadd.f32 %v12390_v7, %v11614_v34 }
 0x72d   :  { %v11731_v16 = vmax.f32 %v11727_v2, %v11711_v51 }
 0x72f   :  { %11735 = vst [vmem:[#allocation8 + $0x8] sm:$0xff] %v11731_v16 }
 0x73d   :  { %v12327_v38 = vpop.f32.mrf.mxu1  ;;  %v12391_v13 = vpop.f32.mrf.mxu0 }
 0x73f   :  { %v12328_v19 = vpop.f32.mrf.mxu1  ;;  %v12392_v44 = vpop.f32.mrf.mxu0 }
 0x740   :  { %v12329_v59 = vadd.f32 %v12328_v19, %v12327_v38  ;;  %v12393_v35 = vadd.f32 %v12392_v44, %v12391_v13 }
 0x741   :  { %v12330_v40 = vpop.f32.mrf.mxu1  ;;  %v12394_v24 = vpop.f32.mrf.mxu0 }
 0x742   :  { %v11619_v31 = vadd.f32 %v12329_v59, %v18918_v3 }
 0x743   :  { %v12331_v25 = vpop.f32.mrf.mxu1  ;;  %v12395_v10 = vpop.f32.mrf.mxu0 }
 0x744   :  { %v11716_v1 = vadd.f32 %v12393_v35, %v11619_v31  ;;  %v12332_v63 = vadd.f32 %v12331_v25, %v12330_v40  ;;  %v12396_v60 = vadd.f32 %v12395_v10, %v12394_v24 }
 0x746   :  { %v11732_v53 = vmax.f32 %v11728_v43, %v11716_v1  ;;  %v11622_v33 = vadd.f32 %v12332_v63, %v18918_v3 }
 0x748   :  { %11736 = vst [vmem:[#allocation8 + $0x10] sm:$0xff] %v11732_v53  ;;  %v11719_v11 = vadd.f32 %v12396_v60, %v11622_v33 }
 0x74a   :  { %v11733_v21 = vmax.f32 %v11729_v39, %v11719_v11 }
 0x74c   :  { %11737 = vst [vmem:[#allocation8 + $0x18] sm:$0xff] %v11733_v21 }
 0x74d   :  { %13077 = shalt.err (!%p13074_p5)
}
 0x74e   :  { %11749 = dma.vmem_to_hbm [thread:$0]  %s11744_s15, 512, %s18994_s6, [#allocation4], %s13094_s25, %s13094_s25, %s13095_s26  }
 0x74f   :  { %13090 = dma.done.wait [#allocation4], 512  }
 0x750   :  { %13091 = vsyncadd [#allocation4], 4294966784 }
 0x751   :  { %11753 = vsyncpa [#allocation3], 1 }
 0x752   :  { %11754 = vsyncpa [#allocation6], 1 }
 0x753   :  { %11755 = vsyncpa [#allocation4], 1 }

</bundles_post_ra>
